<compile_context>
chip_gen: v5e
topology: v5e:2x2
jax: 0.10.0
libtpu: 0.0.40
codegen_flags: <defaults>
</compile_context>

<pallas_src>
import functools

import jax
import jax.numpy as jnp
from jax import lax
from jax.experimental import pallas as pl
from jax.experimental.pallas import tpu as pltpu

BN_EPS = 1e-5
MXU_DTYPE = jnp.bfloat16     # matmul operand / intermediate-activation dtype (accum stays f32)


# --------------------------------------------------------------------------------------------
# conv3x3 (stride 1, zero-pad 1) + optional fused input affine/ReLU + partial BN statistics
# --------------------------------------------------------------------------------------------
def _conv3x3_bn_stats_kernel(scale_ref, shift_ref, x_ref, w_ref,
                             y_ref, stats_ref, xpad_ref,
                             *, H, W, Cin, Cout, apply_input_affine, apply_relu):
    """One batch element.

    x_ref    : (H, W, Cin)      f32 or bf16   conv input tile
    scale_ref: (1, Cin)         f32           folded scale of the *previous* BN (if affine)
    shift_ref: (1, Cin)         f32           folded shift of the *previous* BN
    w_ref    : (9*Cin, Cout)    bf16          conv weights, K ordered (kh, kw, cin)
    y_ref    : (H, W, Cout)     bf16          raw conv output (pre-BN)
    stats_ref: (2, Cout)        f32           [sum, sum-of-squares] over this tile (from f32 acc)
    xpad_ref : (H+2, W+2, Cin)  bf16          VMEM scratch: zero-padded conv input
    """
    x = x_ref[...]
    if apply_input_affine:
        x = (x.astype(jnp.float32) * scale_ref[...].reshape(1, 1, Cin)
             + shift_ref[...].reshape(1, 1, Cin))
    if apply_relu:
        x = jnp.maximum(x, 0.0)

    # Zero only the 1-pixel halo border (4 thin bf16 slabs), write the interior once in bf16.
    # (Kept per-step: the scratch persists, but guarding on program_id==0 is unsafe when the
    #  batch axis is sharded across TensorCores; the border stores are tiny.)
    xpad_ref[0:1, :, :] = jnp.zeros((1, W + 2, Cin), MXU_DTYPE)
    xpad_ref[H + 1:H + 2, :, :] = jnp.zeros((1, W + 2, Cin), MXU_DTYPE)
    xpad_ref[1:H + 1, 0:1, :] = jnp.zeros((H, 1, Cin), MXU_DTYPE)
    xpad_ref[1:H + 1, W + 1:W + 2, :] = jnp.zeros((H, 1, Cin), MXU_DTYPE)
    xpad_ref[1:H + 1, 1:W + 1, :] = x.astype(MXU_DTYPE)

    # 9 accumulated MXU dots (one per kernel tap), f32 accumulation.  No im2col slab.
    xp = xpad_ref[...]                                   # (H+2, W+2, Cin) bf16
    acc = jnp.zeros((H * W, Cout), jnp.float32)
    for kh in range(3):
        for kw in range(3):
            patch = xp[kh:kh + H, kw:kw + W, :].reshape(H * W, Cin)          # bf16
            wk = w_ref[(3 * kh + kw) * Cin:(3 * kh + kw + 1) * Cin, :]       # (Cin, Cout) bf16
            acc = acc + jnp.dot(patch, wk, preferred_element_type=jnp.float32)

    y_ref[...] = acc.reshape(H, W, Cout).astype(y_ref.dtype)                 # bf16 store
    # Partial BatchNorm statistics from the f32 accumulator (reduced over batch outside).
    stats_ref[0:1, :] = jnp.sum(acc, axis=0, keepdims=True)
    stats_ref[1:2, :] = jnp.sum(acc * acc, axis=0, keepdims=True)


def _conv3x3_bn_stats(x, w, scale_in, shift_in, *, apply_input_affine, apply_relu):
    """grid=(B,): per-batch raw conv output (bf16) + per-batch partial BN statistics (f32)."""
    B, H, W, Cin = x.shape
    Cout = w.shape[-1]
    kernel = functools.partial(
        _conv3x3_bn_stats_kernel, H=H, W=W, Cin=Cin, Cout=Cout,
        apply_input_affine=apply_input_affine, apply_relu=apply_relu)

    flops = 2 * B * H * W * 9 * Cin * Cout
    bytes_accessed = int(x.size * x.dtype.itemsize + w.size * w.dtype.itemsize
                         + B * H * W * Cout * 2 + B * 2 * Cout * 4)

    # Per-step working set: double-buffered in/out blocks + bf16 xpad + resident weights + acc.
    ws = (2 * H * W * Cin * x.dtype.itemsize
          + 2 * H * W * Cout * 2
          + (H + 2) * (W + 2) * Cin * 2
          + 9 * Cin * Cout * 2
          + H * W * Cout * 4
          + 2 * 2 * Cout * 4)
    vmem_limit = int(min(max(6 * ws, 32 * 2**20), 48 * 2**20))

    return pl.pallas_call(
        kernel,
        grid=(B,),
        out_shape=(jax.ShapeDtypeStruct((B, H, W, Cout), MXU_DTYPE),
                   jax.ShapeDtypeStruct((B, 2, Cout), jnp.float32)),
        in_specs=[
            pl.BlockSpec((1, Cin), lambda b: (0, 0)),                 # scale (resident)
            pl.BlockSpec((1, Cin), lambda b: (0, 0)),                 # shift (resident)
            pl.BlockSpec((None, H, W, Cin), lambda b: (b, 0, 0, 0)),  # per-batch input tile
            pl.BlockSpec(w.shape, lambda b: (0, 0)),                  # weights (resident)
        ],
        out_specs=(
            pl.BlockSpec((None, H, W, Cout), lambda b: (b, 0, 0, 0)),
            pl.BlockSpec((None, 2, Cout), lambda b: (b, 0, 0)),
        ),
        scratch_shapes=[pltpu.VMEM((H + 2, W + 2, Cin), MXU_DTYPE)],
        compiler_params=pltpu.CompilerParams(
            dimension_semantics=("parallel",), vmem_limit_bytes=vmem_limit),
        cost_estimate=pl.CostEstimate(flops=flops, transcendentals=0,
                                      bytes_accessed=bytes_accessed),
    )(scale_in, shift_in, x, w)


def _fold_bn(stats, gamma, beta, count):
    """Fold training-mode BatchNorm into per-channel scale/shift from partial sums."""
    total = jnp.sum(stats[:, 0, :], axis=0)        # (Cout,)
    total_sq = jnp.sum(stats[:, 1, :], axis=0)     # (Cout,)
    mean = total / count
    var = jnp.maximum(total_sq / count - mean * mean, 0.0)   # biased var, clamped (f32 cancel)
    scale = gamma * lax.rsqrt(var + BN_EPS)
    shift = beta - mean * scale
    return (scale.reshape(1, -1).astype(jnp.float32),
            shift.reshape(1, -1).astype(jnp.float32))


# --------------------------------------------------------------------------------------------
# bn2 (folded affine) + identity residual add — lane-dense (B, H, W*C) layout
# --------------------------------------------------------------------------------------------
def _bn_residual_kernel(scale_ref, shift_ref, y_ref, x_ref, out_ref):
    out_ref[...] = (y_ref[...].astype(jnp.float32) * scale_ref[...]
                    + shift_ref[...] + x_ref[...])


def _bn_residual(y_raw, x, scale, shift):
    B, H, W, C = y_raw.shape
    y2 = y_raw.reshape(B, H, W * C)                      # bf16, lane-dense last dim
    x2 = x.reshape(B, H, W * C)                          # f32 residual
    scale_t = jnp.tile(scale.reshape(1, C), (1, W))      # (1, W*C): index w*C + c -> scale[c]
    shift_t = jnp.tile(shift.reshape(1, C), (1, W))

    out = pl.pallas_call(
        _bn_residual_kernel,
        grid=(B,),
        out_shape=jax.ShapeDtypeStruct((B, H, W * C), jnp.float32),
        in_specs=[
            pl.BlockSpec((1, W * C), lambda b: (0, 0)),
            pl.BlockSpec((1, W * C), lambda b: (0, 0)),
            pl.BlockSpec((None, H, W * C), lambda b: (b, 0, 0)),
            pl.BlockSpec((None, H, W * C), lambda b: (b, 0, 0)),
        ],
        out_specs=pl.BlockSpec((None, H, W * C), lambda b: (b, 0, 0)),
        compiler_params=pltpu.CompilerParams(dimension_semantics=("parallel",)),
    )(scale_t, shift_t, y2, x2)
    return out.reshape(B, H, W, C)


# --------------------------------------------------------------------------------------------
# Forward
# --------------------------------------------------------------------------------------------
def prepare_block_params(params):
    """One-time parameter prep (hoisted out of the forward): OIHW -> (9*Cin, Cout) bf16."""
    w1 = params["w1_oihw"]
    w2 = params["w2_oihw"]
    co1, ci1 = w1.shape[0], w1.shape[1]
    co2, ci2 = w2.shape[0], w2.shape[1]
    return {
        "w1": jnp.transpose(w1, (2, 3, 1, 0)).reshape(9 * ci1, co1).astype(MXU_DTYPE),
        "w2": jnp.transpose(w2, (2, 3, 1, 0)).reshape(9 * ci2, co2).astype(MXU_DTYPE),
        "g1": params["g1"], "b1": params["b1"],
        "g2": params["g2"], "b2": params["b2"],
    }


def basic_block_forward_nhwc(x_nhwc, prepped):
    """BasicBlock forward, NHWC in / NHWC out (TPU-native layout)."""
    B, H, W, C = x_nhwc.shape
    Cout = prepped["w1"].shape[-1]
    assert Cout == C, "identity residual requires inplanes == planes"

    x = x_nhwc.astype(jnp.float32)
    count = float(B * H * W)
    ident = jnp.ones((1, C), jnp.float32)
    zero = jnp.zeros((1, C), jnp.float32)

    # conv1 (raw, bf16) + partial BN1 statistics (f32)
    y1_raw, st1 = _conv3x3_bn_stats(x, prepped["w1"], ident, zero,
                                    apply_input_affine=False, apply_relu=False)
    scale1, shift1 = _fold_bn(st1, prepped["g1"], prepped["b1"], count)

    # bn1 + relu fused into conv2's input path; conv2 (raw, bf16) + partial BN2 statistics
    y2_raw, st2 = _conv3x3_bn_stats(y1_raw, prepped["w2"], scale1, shift1,
                                    apply_input_affine=True, apply_relu=True)
    scale2, shift2 = _fold_bn(st2, prepped["g2"], prepped["b2"], count)

    # bn2 (folded affine) + identity residual (no final ReLU in this module)
    return _bn_residual(y2_raw, x, scale2, shift2)


def basic_block_forward(x_nchw, prepped):
    """NCHW wrapper matching the PyTorch module convention."""
    out = basic_block_forward_nhwc(jnp.transpose(x_nchw, (0, 2, 3, 1)), prepped)
    return jnp.transpose(out, (0, 3, 1, 2))


def ref_forward(x_nchw, params):
    """Pure-JAX f32 reference (NCHW, matches PyTorch training-mode semantics)."""
    def conv(x, w):
        return lax.conv_general_dilated(
            x, w, window_strides=(1, 1), padding=((1, 1), (1, 1)),
            dimension_numbers=("NCHW", "OIHW", "NCHW"))

    def bn(y, g, b):
        mean = jnp.mean(y, axis=(0, 2, 3), keepdims=True)
        var = jnp.mean((y - mean) ** 2, axis=(0, 2, 3), keepdims=True)
        return ((y - mean) * lax.rsqrt(var + BN_EPS) * g.reshape(1, -1, 1, 1)
                + b.reshape(1, -1, 1, 1))

    y = jnp.maximum(bn(conv(x_nchw, params["w1_oihw"]), params["g1"], params["b1"]), 0.0)
    y = bn(conv(y, params["w2_oihw"]), params["g2"], params["b2"])
    return y + x_nchw


if __name__ == "__main__":
    key = jax.random.PRNGKey(0)
    ks = jax.random.split(key, 8)

    B, C, H, W = 2, 8, 16, 16          # inplanes = planes = 8, stride=1, pad=1, dilation=1
    planes = C

    x = jax.random.normal(ks[0], (B, C, H, W), jnp.float32)
    params = {
        "w1_oihw": 0.1 * jax.random.normal(ks[1], (planes, C, 3, 3), jnp.float32),
        "w2_oihw": 0.1 * jax.random.normal(ks[2], (planes, planes, 3, 3), jnp.float32),
        "g1": 1.0 + 0.1 * jax.random.normal(ks[3], (planes,), jnp.float32),
        "b1": 0.1 * jax.random.normal(ks[4], (planes,), jnp.float32),
        "g2": 1.0 + 0.1 * jax.random.normal(ks[5], (planes,), jnp.float32),
        "b2": 0.1 * jax.random.normal(ks[6], (planes,), jnp.float32),
    }

    prepped = jax.block_until_ready(prepare_block_params(params))   # one-time weight prep

    fwd = jax.jit(basic_block_forward)
    out = jax.block_until_ready(fwd(x, prepped))
    ref = jax.block_until_ready(ref_forward(x, params))

    assert out.shape == (B, C, H, W)
    # bf16 MXU operands + bf16 intermediate activations (f32 accumulation / f32 BN stats).
    tol = 7e-2
    max_err = float(jnp.max(jnp.abs(out - ref)))
    assert jnp.allclose(out, ref, atol=tol, rtol=tol), max_err
    print("KERNEL_OK")
</pallas_src>

<mosaic_0001>
module attributes {stable_mosaic.version = 11 : i64} {
  func.func @_conv3x3_bn_stats_kernel(%arg0: i32, %arg1: memref<1x8xf32, #tpu.memory_space<vmem>>, %arg2: memref<1x8xf32, #tpu.memory_space<vmem>>, %arg3: memref<1x16x16x8xf32, #tpu.memory_space<vmem>>, %arg4: memref<72x8xbf16, #tpu.memory_space<vmem>>, %arg5: memref<1x16x16x8xbf16, #tpu.memory_space<vmem>>, %arg6: memref<1x2x8xf32, #tpu.memory_space<vmem>>, %arg7: memref<18x18x8xbf16, #tpu.memory_space<vmem>>) attributes {dimension_semantics = [#tpu.dimension_semantics<parallel>], iteration_bounds = array<i64: 2>, scalar_prefetch = 0 : i64, scratch_operands = 1 : i64, tpu.core_type = #tpu.core_type<tc>, window_params = [{pipeline_mode = #tpu.pipeline_mode<synchronous>, transform_indices = @transform_0, window_bounds = array<i64: 1, 8>}, {pipeline_mode = #tpu.pipeline_mode<synchronous>, transform_indices = @transform_1, window_bounds = array<i64: 1, 8>}, {transform_indices = @transform_2, window_bounds = array<i64: 1, 16, 16, 8>}, {pipeline_mode = #tpu.pipeline_mode<synchronous>, transform_indices = @transform_3, window_bounds = array<i64: 72, 8>}, {transform_indices = @transform_4, window_bounds = array<i64: 1, 16, 16, 8>}, {transform_indices = @transform_5, window_bounds = array<i64: 1, 2, 8>}]} {
    %c0 = arith.constant 0 : index
    %c0_0 = arith.constant 0 : index
    %c0_1 = arith.constant 0 : index
    %c0_2 = arith.constant 0 : index
    %0 = vector.load %arg3[%c0, %c0_0, %c0_1, %c0_2] : memref<1x16x16x8xf32, #tpu.memory_space<vmem>>, vector<1x16x16x8xf32>
    %1 = vector.shape_cast %0 : vector<1x16x16x8xf32> to vector<16x16x8xf32>
    %cst = arith.constant 0.000000e+00 : bf16
    %2 = vector.broadcast %cst : bf16 to vector<1x18x8xbf16>
    %c0_3 = arith.constant 0 : index
    %c0_4 = arith.constant 0 : index
    %c0_5 = arith.constant 0 : index
    %3 = vector.load %arg7[%c0_3, %c0_4, %c0_5] : memref<18x18x8xbf16, #tpu.memory_space<vmem>>, vector<1x18x8xbf16>
    tpu.vector_store %arg7[%c0_3, %c0_4, %c0_5], %2 {strides = array<i32>} : memref<18x18x8xbf16, #tpu.memory_space<vmem>>, vector<1x18x8xbf16>,
    %cst_6 = arith.constant 0.000000e+00 : bf16
    %4 = vector.broadcast %cst_6 : bf16 to vector<1x18x8xbf16>
    %c17 = arith.constant 17 : index
    %c0_7 = arith.constant 0 : index
    %c0_8 = arith.constant 0 : index
    %5 = vector.load %arg7[%c17, %c0_7, %c0_8] : memref<18x18x8xbf16, #tpu.memory_space<vmem>>, vector<1x18x8xbf16>
    tpu.vector_store %arg7[%c17, %c0_7, %c0_8], %4 {strides = array<i32>} : memref<18x18x8xbf16, #tpu.memory_space<vmem>>, vector<1x18x8xbf16>,
    %cst_9 = arith.constant 0.000000e+00 : bf16
    %6 = vector.broadcast %cst_9 : bf16 to vector<16x1x8xbf16>
    %c1 = arith.constant 1 : index
    %c0_10 = arith.constant 0 : index
    %c0_11 = arith.constant 0 : index
    %7 = vector.load %arg7[%c1, %c0_10, %c0_11] : memref<18x18x8xbf16, #tpu.memory_space<vmem>>, vector<16x1x8xbf16>
    tpu.vector_store %arg7[%c1, %c0_10, %c0_11], %6 {strides = array<i32>} : memref<18x18x8xbf16, #tpu.memory_space<vmem>>, vector<16x1x8xbf16>,
    %cst_12 = arith.constant 0.000000e+00 : bf16
    %8 = vector.broadcast %cst_12 : bf16 to vector<16x1x8xbf16>
    %c1_13 = arith.constant 1 : index
    %c17_14 = arith.constant 17 : index
    %c0_15 = arith.constant 0 : index
    %9 = vector.load %arg7[%c1_13, %c17_14, %c0_15] : memref<18x18x8xbf16, #tpu.memory_space<vmem>>, vector<16x1x8xbf16>
    tpu.vector_store %arg7[%c1_13, %c17_14, %c0_15], %8 {strides = array<i32>} : memref<18x18x8xbf16, #tpu.memory_space<vmem>>, vector<16x1x8xbf16>,
    %10 = arith.truncf %1 : vector<16x16x8xf32> to vector<16x16x8xbf16>
    %c1_16 = arith.constant 1 : index
    %c1_17 = arith.constant 1 : index
    %c0_18 = arith.constant 0 : index
    %11 = vector.load %arg7[%c1_16, %c1_17, %c0_18] : memref<18x18x8xbf16, #tpu.memory_space<vmem>>, vector<16x16x8xbf16>
    tpu.vector_store %arg7[%c1_16, %c1_17, %c0_18], %10 {strides = array<i32>} : memref<18x18x8xbf16, #tpu.memory_space<vmem>>, vector<16x16x8xbf16>,
    %c0_19 = arith.constant 0 : index
    %c0_20 = arith.constant 0 : index
    %c0_21 = arith.constant 0 : index
    %12 = vector.load %arg7[%c0_19, %c0_20, %c0_21] : memref<18x18x8xbf16, #tpu.memory_space<vmem>>, vector<18x18x8xbf16>
    %cst_22 = arith.constant 0.000000e+00 : f32
    %13 = vector.broadcast %cst_22 : f32 to vector<256x8xf32>
    %14 = vector.extract_strided_slice %12 {offsets = [0, 0, 0], sizes = [16, 16, 8], strides = [1, 1, 1]} : vector<18x18x8xbf16> to vector<16x16x8xbf16>
    %15 = vector.shape_cast %14 : vector<16x16x8xbf16> to vector<256x8xbf16>
    %c0_23 = arith.constant 0 : index
    %c0_24 = arith.constant 0 : index
    %16 = vector.load %arg4[%c0_23, %c0_24] : memref<72x8xbf16, #tpu.memory_space<vmem>>, vector<8x8xbf16>
    %cst_25 = arith.constant dense<0.000000e+00> : vector<256x8xf32>
    %17 = tpu.matmul %15, %16, %cst_25 {dimension_numbers = #tpu.dot_dimension_numbers<[1], [0], [0], [1], [0, 0, 1, 1], [], []>} : vector<256x8xbf16>, vector<8x8xbf16>, vector<256x8xf32> -> vector<256x8xf32>
    %18 = arith.addf %13, %17 : vector<256x8xf32>
    %19 = vector.extract_strided_slice %12 {offsets = [0, 1, 0], sizes = [16, 16, 8], strides = [1, 1, 1]} : vector<18x18x8xbf16> to vector<16x16x8xbf16>
    %20 = vector.shape_cast %19 : vector<16x16x8xbf16> to vector<256x8xbf16>
    %c8 = arith.constant 8 : index
    %c0_26 = arith.constant 0 : index
    %21 = vector.load %arg4[%c8, %c0_26] : memref<72x8xbf16, #tpu.memory_space<vmem>>, vector<8x8xbf16>
    %cst_27 = arith.constant dense<0.000000e+00> : vector<256x8xf32>
    %22 = tpu.matmul %20, %21, %cst_27 {dimension_numbers = #tpu.dot_dimension_numbers<[1], [0], [0], [1], [0, 0, 1, 1], [], []>} : vector<256x8xbf16>, vector<8x8xbf16>, vector<256x8xf32> -> vector<256x8xf32>
    %23 = arith.addf %18, %22 : vector<256x8xf32>
    %24 = vector.extract_strided_slice %12 {offsets = [0, 2, 0], sizes = [16, 16, 8], strides = [1, 1, 1]} : vector<18x18x8xbf16> to vector<16x16x8xbf16>
    %25 = vector.shape_cast %24 : vector<16x16x8xbf16> to vector<256x8xbf16>
    %c16 = arith.constant 16 : index
    %c0_28 = arith.constant 0 : index
    %26 = vector.load %arg4[%c16, %c0_28] : memref<72x8xbf16, #tpu.memory_space<vmem>>, vector<8x8xbf16>
    %cst_29 = arith.constant dense<0.000000e+00> : vector<256x8xf32>
    %27 = tpu.matmul %25, %26, %cst_29 {dimension_numbers = #tpu.dot_dimension_numbers<[1], [0], [0], [1], [0, 0, 1, 1], [], []>} : vector<256x8xbf16>, vector<8x8xbf16>, vector<256x8xf32> -> vector<256x8xf32>
    %28 = arith.addf %23, %27 : vector<256x8xf32>
    %29 = vector.extract_strided_slice %12 {offsets = [1, 0, 0], sizes = [16, 16, 8], strides = [1, 1, 1]} : vector<18x18x8xbf16> to vector<16x16x8xbf16>
    %30 = vector.shape_cast %29 : vector<16x16x8xbf16> to vector<256x8xbf16>
    %c24 = arith.constant 24 : index
    %c0_30 = arith.constant 0 : index
    %31 = vector.load %arg4[%c24, %c0_30] : memref<72x8xbf16, #tpu.memory_space<vmem>>, vector<8x8xbf16>
    %cst_31 = arith.constant dense<0.000000e+00> : vector<256x8xf32>
    %32 = tpu.matmul %30, %31, %cst_31 {dimension_numbers = #tpu.dot_dimension_numbers<[1], [0], [0], [1], [0, 0, 1, 1], [], []>} : vector<256x8xbf16>, vector<8x8xbf16>, vector<256x8xf32> -> vector<256x8xf32>
    %33 = arith.addf %28, %32 : vector<256x8xf32>
    %34 = vector.extract_strided_slice %12 {offsets = [1, 1, 0], sizes = [16, 16, 8], strides = [1, 1, 1]} : vector<18x18x8xbf16> to vector<16x16x8xbf16>
    %35 = vector.shape_cast %34 : vector<16x16x8xbf16> to vector<256x8xbf16>
    %c32 = arith.constant 32 : index
    %c0_32 = arith.constant 0 : index
    %36 = vector.load %arg4[%c32, %c0_32] : memref<72x8xbf16, #tpu.memory_space<vmem>>, vector<8x8xbf16>
    %cst_33 = arith.constant dense<0.000000e+00> : vector<256x8xf32>
    %37 = tpu.matmul %35, %36, %cst_33 {dimension_numbers = #tpu.dot_dimension_numbers<[1], [0], [0], [1], [0, 0, 1, 1], [], []>} : vector<256x8xbf16>, vector<8x8xbf16>, vector<256x8xf32> -> vector<256x8xf32>
    %38 = arith.addf %33, %37 : vector<256x8xf32>
    %39 = vector.extract_strided_slice %12 {offsets = [1, 2, 0], sizes = [16, 16, 8], strides = [1, 1, 1]} : vector<18x18x8xbf16> to vector<16x16x8xbf16>
    %40 = vector.shape_cast %39 : vector<16x16x8xbf16> to vector<256x8xbf16>
    %c40 = arith.constant 40 : index
    %c0_34 = arith.constant 0 : index
    %41 = vector.load %arg4[%c40, %c0_34] : memref<72x8xbf16, #tpu.memory_space<vmem>>, vector<8x8xbf16>
    %cst_35 = arith.constant dense<0.000000e+00> : vector<256x8xf32>
    %42 = tpu.matmul %40, %41, %cst_35 {dimension_numbers = #tpu.dot_dimension_numbers<[1], [0], [0], [1], [0, 0, 1, 1], [], []>} : vector<256x8xbf16>, vector<8x8xbf16>, vector<256x8xf32> -> vector<256x8xf32>
    %43 = arith.addf %38, %42 : vector<256x8xf32>
    %44 = vector.extract_strided_slice %12 {offsets = [2, 0, 0], sizes = [16, 16, 8], strides = [1, 1, 1]} : vector<18x18x8xbf16> to vector<16x16x8xbf16>
    %45 = vector.shape_cast %44 : vector<16x16x8xbf16> to vector<256x8xbf16>
    %c48 = arith.constant 48 : index
    %c0_36 = arith.constant 0 : index
    %46 = vector.load %arg4[%c48, %c0_36] : memref<72x8xbf16, #tpu.memory_space<vmem>>, vector<8x8xbf16>
    %cst_37 = arith.constant dense<0.000000e+00> : vector<256x8xf32>
    %47 = tpu.matmul %45, %46, %cst_37 {dimension_numbers = #tpu.dot_dimension_numbers<[1], [0], [0], [1], [0, 0, 1, 1], [], []>} : vector<256x8xbf16>, vector<8x8xbf16>, vector<256x8xf32> -> vector<256x8xf32>
    %48 = arith.addf %43, %47 : vector<256x8xf32>
    %49 = vector.extract_strided_slice %12 {offsets = [2, 1, 0], sizes = [16, 16, 8], strides = [1, 1, 1]} : vector<18x18x8xbf16> to vector<16x16x8xbf16>
    %50 = vector.shape_cast %49 : vector<16x16x8xbf16> to vector<256x8xbf16>
    %c56 = arith.constant 56 : index
    %c0_38 = arith.constant 0 : index
    %51 = vector.load %arg4[%c56, %c0_38] : memref<72x8xbf16, #tpu.memory_space<vmem>>, vector<8x8xbf16>
    %cst_39 = arith.constant dense<0.000000e+00> : vector<256x8xf32>
    %52 = tpu.matmul %50, %51, %cst_39 {dimension_numbers = #tpu.dot_dimension_numbers<[1], [0], [0], [1], [0, 0, 1, 1], [], []>} : vector<256x8xbf16>, vector<8x8xbf16>, vector<256x8xf32> -> vector<256x8xf32>
    %53 = arith.addf %48, %52 : vector<256x8xf32>
    %54 = vector.extract_strided_slice %12 {offsets = [2, 2, 0], sizes = [16, 16, 8], strides = [1, 1, 1]} : vector<18x18x8xbf16> to vector<16x16x8xbf16>
    %55 = vector.shape_cast %54 : vector<16x16x8xbf16> to vector<256x8xbf16>
    %c64 = arith.constant 64 : index
    %c0_40 = arith.constant 0 : index
    %56 = vector.load %arg4[%c64, %c0_40] : memref<72x8xbf16, #tpu.memory_space<vmem>>, vector<8x8xbf16>
    %cst_41 = arith.constant dense<0.000000e+00> : vector<256x8xf32>
    %57 = tpu.matmul %55, %56, %cst_41 {dimension_numbers = #tpu.dot_dimension_numbers<[1], [0], [0], [1], [0, 0, 1, 1], [], []>} : vector<256x8xbf16>, vector<8x8xbf16>, vector<256x8xf32> -> vector<256x8xf32>
    %58 = arith.addf %53, %57 : vector<256x8xf32>
    %59 = vector.shape_cast %58 : vector<256x8xf32> to vector<16x16x8xf32>
    %60 = arith.truncf %59 : vector<16x16x8xf32> to vector<16x16x8xbf16>
    %c0_42 = arith.constant 0 : index
    %c0_43 = arith.constant 0 : index
    %c0_44 = arith.constant 0 : index
    %c0_45 = arith.constant 0 : index
    %61 = vector.load %arg5[%c0_42, %c0_43, %c0_44, %c0_45] : memref<1x16x16x8xbf16, #tpu.memory_space<vmem>>, vector<1x16x16x8xbf16>
    %62 = vector.shape_cast %61 : vector<1x16x16x8xbf16> to vector<16x16x8xbf16>
    %63 = vector.shape_cast %60 : vector<16x16x8xbf16> to vector<1x16x16x8xbf16>
    tpu.vector_store %arg5[%c0_42, %c0_43, %c0_44, %c0_45], %63 {strides = array<i32>} : memref<1x16x16x8xbf16, #tpu.memory_space<vmem>>, vector<1x16x16x8xbf16>,
    %cst_46 = arith.constant dense<0.000000e+00> : vector<8xf32>
    %64 = vector.multi_reduction <add>, %58, %cst_46 [0] : vector<256x8xf32> to vector<8xf32>
    %65 = vector.shape_cast %64 : vector<8xf32> to vector<1x8xf32>
    %c0_47 = arith.constant 0 : index
    %c0_48 = arith.constant 0 : index
    %c0_49 = arith.constant 0 : index
    %66 = vector.load %arg6[%c0_47, %c0_48, %c0_49] : memref<1x2x8xf32, #tpu.memory_space<vmem>>, vector<1x1x8xf32>
    %67 = vector.shape_cast %66 : vector<1x1x8xf32> to vector<1x8xf32>
    %68 = vector.shape_cast %65 : vector<1x8xf32> to vector<1x1x8xf32>
    tpu.vector_store %arg6[%c0_47, %c0_48, %c0_49], %68 {strides = array<i32>} : memref<1x2x8xf32, #tpu.memory_space<vmem>>, vector<1x1x8xf32>,
    %69 = arith.mulf %58, %58 : vector<256x8xf32>
    %cst_50 = arith.constant dense<0.000000e+00> : vector<8xf32>
    %70 = vector.multi_reduction <add>, %69, %cst_50 [0] : vector<256x8xf32> to vector<8xf32>
    %71 = vector.shape_cast %70 : vector<8xf32> to vector<1x8xf32>
    %c0_51 = arith.constant 0 : index
    %c1_52 = arith.constant 1 : index
    %c0_53 = arith.constant 0 : index
    %72 = vector.load %arg6[%c0_51, %c1_52, %c0_53] : memref<1x2x8xf32, #tpu.memory_space<vmem>>, vector<1x1x8xf32>
    %73 = vector.shape_cast %72 : vector<1x1x8xf32> to vector<1x8xf32>
    %74 = vector.shape_cast %71 : vector<1x8xf32> to vector<1x1x8xf32>
    tpu.vector_store %arg6[%c0_51, %c1_52, %c0_53], %74 {strides = array<i32>} : memref<1x2x8xf32, #tpu.memory_space<vmem>>, vector<1x1x8xf32>,
    return
  }
  func.func @transform_0(%arg0: i32) -> (i32, i32) {
    %c0_i32 = arith.constant 0 : i32
    %c0_i32_0 = arith.constant 0 : i32
    %c0_i32_1 = arith.constant 0 : i32
    return %c0_i32, %c0_i32_0 : i32, i32
  }
  func.func @transform_1(%arg0: i32) -> (i32, i32) {
    %c0_i32 = arith.constant 0 : i32
    %c0_i32_0 = arith.constant 0 : i32
    %c0_i32_1 = arith.constant 0 : i32
    return %c0_i32, %c0_i32_0 : i32, i32
  }
  func.func @transform_2(%arg0: i32) -> (i32, i32, i32, i32) {
    %c0_i32 = arith.constant 0 : i32
    %c0_i32_0 = arith.constant 0 : i32
    %c0_i32_1 = arith.constant 0 : i32
    %c0_i32_2 = arith.constant 0 : i32
    return %arg0, %c0_i32, %c0_i32_0, %c0_i32_1 : i32, i32, i32, i32
  }
  func.func @transform_3(%arg0: i32) -> (i32, i32) {
    %c0_i32 = arith.constant 0 : i32
    %c0_i32_0 = arith.constant 0 : i32
    %c0_i32_1 = arith.constant 0 : i32
    return %c0_i32, %c0_i32_0 : i32, i32
  }
  func.func @transform_4(%arg0: i32) -> (i32, i32, i32, i32) {
    %c0_i32 = arith.constant 0 : i32
    %c0_i32_0 = arith.constant 0 : i32
    %c0_i32_1 = arith.constant 0 : i32
    %c0_i32_2 = arith.constant 0 : i32
    return %arg0, %c0_i32, %c0_i32_0, %c0_i32_1 : i32, i32, i32, i32
  }
  func.func @transform_5(%arg0: i32) -> (i32, i32, i32) {
    %c0_i32 = arith.constant 0 : i32
    %c0_i32_0 = arith.constant 0 : i32
    %c0_i32_1 = arith.constant 0 : i32
    return %arg0, %c0_i32, %c0_i32_0 : i32, i32, i32
  }
}

module attributes {stable_mosaic.version = 11 : i64} {
  func.func @_conv3x3_bn_stats_kernel(%arg0: i32, %arg1: memref<1x8xf32, #tpu.memory_space<vmem>>, %arg2: memref<1x8xf32, #tpu.memory_space<vmem>>, %arg3: memref<1x16x16x8xbf16, #tpu.memory_space<vmem>>, %arg4: memref<72x8xbf16, #tpu.memory_space<vmem>>, %arg5: memref<1x16x16x8xbf16, #tpu.memory_space<vmem>>, %arg6: memref<1x2x8xf32, #tpu.memory_space<vmem>>, %arg7: memref<18x18x8xbf16, #tpu.memory_space<vmem>>) attributes {dimension_semantics = [#tpu.dimension_semantics<parallel>], iteration_bounds = array<i64: 2>, scalar_prefetch = 0 : i64, scratch_operands = 1 : i64, tpu.core_type = #tpu.core_type<tc>, window_params = [{pipeline_mode = #tpu.pipeline_mode<synchronous>, transform_indices = @transform_0, window_bounds = array<i64: 1, 8>}, {pipeline_mode = #tpu.pipeline_mode<synchronous>, transform_indices = @transform_1, window_bounds = array<i64: 1, 8>}, {transform_indices = @transform_2, window_bounds = array<i64: 1, 16, 16, 8>}, {pipeline_mode = #tpu.pipeline_mode<synchronous>, transform_indices = @transform_3, window_bounds = array<i64: 72, 8>}, {transform_indices = @transform_4, window_bounds = array<i64: 1, 16, 16, 8>}, {transform_indices = @transform_5, window_bounds = array<i64: 1, 2, 8>}]} {
    %c0 = arith.constant 0 : index
    %c0_0 = arith.constant 0 : index
    %c0_1 = arith.constant 0 : index
    %c0_2 = arith.constant 0 : index
    %0 = vector.load %arg3[%c0, %c0_0, %c0_1, %c0_2] : memref<1x16x16x8xbf16, #tpu.memory_space<vmem>>, vector<1x16x16x8xbf16>
    %1 = vector.shape_cast %0 : vector<1x16x16x8xbf16> to vector<16x16x8xbf16>
    %2 = arith.extf %1 : vector<16x16x8xbf16> to vector<16x16x8xf32>
    %c0_3 = arith.constant 0 : index
    %c0_4 = arith.constant 0 : index
    %3 = vector.load %arg1[%c0_3, %c0_4] : memref<1x8xf32, #tpu.memory_space<vmem>>, vector<1x8xf32>
    %4 = vector.shape_cast %3 : vector<1x8xf32> to vector<1x1x8xf32>
    %5 = vector.broadcast %4 : vector<1x1x8xf32> to vector<16x16x8xf32>
    %6 = arith.mulf %2, %5 : vector<16x16x8xf32>
    %c0_5 = arith.constant 0 : index
    %c0_6 = arith.constant 0 : index
    %7 = vector.load %arg2[%c0_5, %c0_6] : memref<1x8xf32, #tpu.memory_space<vmem>>, vector<1x8xf32>
    %8 = vector.shape_cast %7 : vector<1x8xf32> to vector<1x1x8xf32>
    %9 = vector.broadcast %8 : vector<1x1x8xf32> to vector<16x16x8xf32>
    %10 = arith.addf %6, %9 : vector<16x16x8xf32>
    %cst = arith.constant 0.000000e+00 : f32
    %11 = vector.broadcast %cst : f32 to vector<16x16x8xf32>
    %12 = arith.maximumf %10, %11 : vector<16x16x8xf32>
    %cst_7 = arith.constant 0.000000e+00 : bf16
    %13 = vector.broadcast %cst_7 : bf16 to vector<1x18x8xbf16>
    %c0_8 = arith.constant 0 : index
    %c0_9 = arith.constant 0 : index
    %c0_10 = arith.constant 0 : index
    %14 = vector.load %arg7[%c0_8, %c0_9, %c0_10] : memref<18x18x8xbf16, #tpu.memory_space<vmem>>, vector<1x18x8xbf16>
    tpu.vector_store %arg7[%c0_8, %c0_9, %c0_10], %13 {strides = array<i32>} : memref<18x18x8xbf16, #tpu.memory_space<vmem>>, vector<1x18x8xbf16>,
    %cst_11 = arith.constant 0.000000e+00 : bf16
    %15 = vector.broadcast %cst_11 : bf16 to vector<1x18x8xbf16>
    %c17 = arith.constant 17 : index
    %c0_12 = arith.constant 0 : index
    %c0_13 = arith.constant 0 : index
    %16 = vector.load %arg7[%c17, %c0_12, %c0_13] : memref<18x18x8xbf16, #tpu.memory_space<vmem>>, vector<1x18x8xbf16>
    tpu.vector_store %arg7[%c17, %c0_12, %c0_13], %15 {strides = array<i32>} : memref<18x18x8xbf16, #tpu.memory_space<vmem>>, vector<1x18x8xbf16>,
    %cst_14 = arith.constant 0.000000e+00 : bf16
    %17 = vector.broadcast %cst_14 : bf16 to vector<16x1x8xbf16>
    %c1 = arith.constant 1 : index
    %c0_15 = arith.constant 0 : index
    %c0_16 = arith.constant 0 : index
    %18 = vector.load %arg7[%c1, %c0_15, %c0_16] : memref<18x18x8xbf16, #tpu.memory_space<vmem>>, vector<16x1x8xbf16>
    tpu.vector_store %arg7[%c1, %c0_15, %c0_16], %17 {strides = array<i32>} : memref<18x18x8xbf16, #tpu.memory_space<vmem>>, vector<16x1x8xbf16>,
    %cst_17 = arith.constant 0.000000e+00 : bf16
    %19 = vector.broadcast %cst_17 : bf16 to vector<16x1x8xbf16>
    %c1_18 = arith.constant 1 : index
    %c17_19 = arith.constant 17 : index
    %c0_20 = arith.constant 0 : index
    %20 = vector.load %arg7[%c1_18, %c17_19, %c0_20] : memref<18x18x8xbf16, #tpu.memory_space<vmem>>, vector<16x1x8xbf16>
    tpu.vector_store %arg7[%c1_18, %c17_19, %c0_20], %19 {strides = array<i32>} : memref<18x18x8xbf16, #tpu.memory_space<vmem>>, vector<16x1x8xbf16>,
    %21 = arith.truncf %12 : vector<16x16x8xf32> to vector<16x16x8xbf16>
    %c1_21 = arith.constant 1 : index
    %c1_22 = arith.constant 1 : index
    %c0_23 = arith.constant 0 : index
    %22 = vector.load %arg7[%c1_21, %c1_22, %c0_23] : memref<18x18x8xbf16, #tpu.memory_space<vmem>>, vector<16x16x8xbf16>
    tpu.vector_store %arg7[%c1_21, %c1_22, %c0_23], %21 {strides = array<i32>} : memref<18x18x8xbf16, #tpu.memory_space<vmem>>, vector<16x16x8xbf16>,
    %c0_24 = arith.constant 0 : index
    %c0_25 = arith.constant 0 : index
    %c0_26 = arith.constant 0 : index
    %23 = vector.load %arg7[%c0_24, %c0_25, %c0_26] : memref<18x18x8xbf16, #tpu.memory_space<vmem>>, vector<18x18x8xbf16>
    %cst_27 = arith.constant 0.000000e+00 : f32
    %24 = vector.broadcast %cst_27 : f32 to vector<256x8xf32>
    %25 = vector.extract_strided_slice %23 {offsets = [0, 0, 0], sizes = [16, 16, 8], strides = [1, 1, 1]} : vector<18x18x8xbf16> to vector<16x16x8xbf16>
    %26 = vector.shape_cast %25 : vector<16x16x8xbf16> to vector<256x8xbf16>
    %c0_28 = arith.constant 0 : index
    %c0_29 = arith.constant 0 : index
    %27 = vector.load %arg4[%c0_28, %c0_29] : memref<72x8xbf16, #tpu.memory_space<vmem>>, vector<8x8xbf16>
    %cst_30 = arith.constant dense<0.000000e+00> : vector<256x8xf32>
    %28 = tpu.matmul %26, %27, %cst_30 {dimension_numbers = #tpu.dot_dimension_numbers<[1], [0], [0], [1], [0, 0, 1, 1], [], []>} : vector<256x8xbf16>, vector<8x8xbf16>, vector<256x8xf32> -> vector<256x8xf32>
    %29 = arith.addf %24, %28 : vector<256x8xf32>
    %30 = vector.extract_strided_slice %23 {offsets = [0, 1, 0], sizes = [16, 16, 8], strides = [1, 1, 1]} : vector<18x18x8xbf16> to vector<16x16x8xbf16>
    %31 = vector.shape_cast %30 : vector<16x16x8xbf16> to vector<256x8xbf16>
    %c8 = arith.constant 8 : index
    %c0_31 = arith.constant 0 : index
    %32 = vector.load %arg4[%c8, %c0_31] : memref<72x8xbf16, #tpu.memory_space<vmem>>, vector<8x8xbf16>
    %cst_32 = arith.constant dense<0.000000e+00> : vector<256x8xf32>
    %33 = tpu.matmul %31, %32, %cst_32 {dimension_numbers = #tpu.dot_dimension_numbers<[1], [0], [0], [1], [0, 0, 1, 1], [], []>} : vector<256x8xbf16>, vector<8x8xbf16>, vector<256x8xf32> -> vector<256x8xf32>
    %34 = arith.addf %29, %33 : vector<256x8xf32>
    %35 = vector.extract_strided_slice %23 {offsets = [0, 2, 0], sizes = [16, 16, 8], strides = [1, 1, 1]} : vector<18x18x8xbf16> to vector<16x16x8xbf16>
    %36 = vector.shape_cast %35 : vector<16x16x8xbf16> to vector<256x8xbf16>
    %c16 = arith.constant 16 : index
    %c0_33 = arith.constant 0 : index
    %37 = vector.load %arg4[%c16, %c0_33] : memref<72x8xbf16, #tpu.memory_space<vmem>>, vector<8x8xbf16>
    %cst_34 = arith.constant dense<0.000000e+00> : vector<256x8xf32>
    %38 = tpu.matmul %36, %37, %cst_34 {dimension_numbers = #tpu.dot_dimension_numbers<[1], [0], [0], [1], [0, 0, 1, 1], [], []>} : vector<256x8xbf16>, vector<8x8xbf16>, vector<256x8xf32> -> vector<256x8xf32>
    %39 = arith.addf %34, %38 : vector<256x8xf32>
    %40 = vector.extract_strided_slice %23 {offsets = [1, 0, 0], sizes = [16, 16, 8], strides = [1, 1, 1]} : vector<18x18x8xbf16> to vector<16x16x8xbf16>
    %41 = vector.shape_cast %40 : vector<16x16x8xbf16> to vector<256x8xbf16>
    %c24 = arith.constant 24 : index
    %c0_35 = arith.constant 0 : index
    %42 = vector.load %arg4[%c24, %c0_35] : memref<72x8xbf16, #tpu.memory_space<vmem>>, vector<8x8xbf16>
    %cst_36 = arith.constant dense<0.000000e+00> : vector<256x8xf32>
    %43 = tpu.matmul %41, %42, %cst_36 {dimension_numbers = #tpu.dot_dimension_numbers<[1], [0], [0], [1], [0, 0, 1, 1], [], []>} : vector<256x8xbf16>, vector<8x8xbf16>, vector<256x8xf32> -> vector<256x8xf32>
    %44 = arith.addf %39, %43 : vector<256x8xf32>
    %45 = vector.extract_strided_slice %23 {offsets = [1, 1, 0], sizes = [16, 16, 8], strides = [1, 1, 1]} : vector<18x18x8xbf16> to vector<16x16x8xbf16>
    %46 = vector.shape_cast %45 : vector<16x16x8xbf16> to vector<256x8xbf16>
    %c32 = arith.constant 32 : index
    %c0_37 = arith.constant 0 : index
    %47 = vector.load %arg4[%c32, %c0_37] : memref<72x8xbf16, #tpu.memory_space<vmem>>, vector<8x8xbf16>
    %cst_38 = arith.constant dense<0.000000e+00> : vector<256x8xf32>
    %48 = tpu.matmul %46, %47, %cst_38 {dimension_numbers = #tpu.dot_dimension_numbers<[1], [0], [0], [1], [0, 0, 1, 1], [], []>} : vector<256x8xbf16>, vector<8x8xbf16>, vector<256x8xf32> -> vector<256x8xf32>
    %49 = arith.addf %44, %48 : vector<256x8xf32>
    %50 = vector.extract_strided_slice %23 {offsets = [1, 2, 0], sizes = [16, 16, 8], strides = [1, 1, 1]} : vector<18x18x8xbf16> to vector<16x16x8xbf16>
    %51 = vector.shape_cast %50 : vector<16x16x8xbf16> to vector<256x8xbf16>
    %c40 = arith.constant 40 : index
    %c0_39 = arith.constant 0 : index
    %52 = vector.load %arg4[%c40, %c0_39] : memref<72x8xbf16, #tpu.memory_space<vmem>>, vector<8x8xbf16>
    %cst_40 = arith.constant dense<0.000000e+00> : vector<256x8xf32>
    %53 = tpu.matmul %51, %52, %cst_40 {dimension_numbers = #tpu.dot_dimension_numbers<[1], [0], [0], [1], [0, 0, 1, 1], [], []>} : vector<256x8xbf16>, vector<8x8xbf16>, vector<256x8xf32> -> vector<256x8xf32>
    %54 = arith.addf %49, %53 : vector<256x8xf32>
    %55 = vector.extract_strided_slice %23 {offsets = [2, 0, 0], sizes = [16, 16, 8], strides = [1, 1, 1]} : vector<18x18x8xbf16> to vector<16x16x8xbf16>
    %56 = vector.shape_cast %55 : vector<16x16x8xbf16> to vector<256x8xbf16>
    %c48 = arith.constant 48 : index
    %c0_41 = arith.constant 0 : index
    %57 = vector.load %arg4[%c48, %c0_41] : memref<72x8xbf16, #tpu.memory_space<vmem>>, vector<8x8xbf16>
    %cst_42 = arith.constant dense<0.000000e+00> : vector<256x8xf32>
    %58 = tpu.matmul %56, %57, %cst_42 {dimension_numbers = #tpu.dot_dimension_numbers<[1], [0], [0], [1], [0, 0, 1, 1], [], []>} : vector<256x8xbf16>, vector<8x8xbf16>, vector<256x8xf32> -> vector<256x8xf32>
    %59 = arith.addf %54, %58 : vector<256x8xf32>
    %60 = vector.extract_strided_slice %23 {offsets = [2, 1, 0], sizes = [16, 16, 8], strides = [1, 1, 1]} : vector<18x18x8xbf16> to vector<16x16x8xbf16>
    %61 = vector.shape_cast %60 : vector<16x16x8xbf16> to vector<256x8xbf16>
    %c56 = arith.constant 56 : index
    %c0_43 = arith.constant 0 : index
    %62 = vector.load %arg4[%c56, %c0_43] : memref<72x8xbf16, #tpu.memory_space<vmem>>, vector<8x8xbf16>
    %cst_44 = arith.constant dense<0.000000e+00> : vector<256x8xf32>
    %63 = tpu.matmul %61, %62, %cst_44 {dimension_numbers = #tpu.dot_dimension_numbers<[1], [0], [0], [1], [0, 0, 1, 1], [], []>} : vector<256x8xbf16>, vector<8x8xbf16>, vector<256x8xf32> -> vector<256x8xf32>
    %64 = arith.addf %59, %63 : vector<256x8xf32>
    %65 = vector.extract_strided_slice %23 {offsets = [2, 2, 0], sizes = [16, 16, 8], strides = [1, 1, 1]} : vector<18x18x8xbf16> to vector<16x16x8xbf16>
    %66 = vector.shape_cast %65 : vector<16x16x8xbf16> to vector<256x8xbf16>
    %c64 = arith.constant 64 : index
    %c0_45 = arith.constant 0 : index
    %67 = vector.load %arg4[%c64, %c0_45] : memref<72x8xbf16, #tpu.memory_space<vmem>>, vector<8x8xbf16>
    %cst_46 = arith.constant dense<0.000000e+00> : vector<256x8xf32>
    %68 = tpu.matmul %66, %67, %cst_46 {dimension_numbers = #tpu.dot_dimension_numbers<[1], [0], [0], [1], [0, 0, 1, 1], [], []>} : vector<256x8xbf16>, vector<8x8xbf16>, vector<256x8xf32> -> vector<256x8xf32>
    %69 = arith.addf %64, %68 : vector<256x8xf32>
    %70 = vector.shape_cast %69 : vector<256x8xf32> to vector<16x16x8xf32>
    %71 = arith.truncf %70 : vector<16x16x8xf32> to vector<16x16x8xbf16>
    %c0_47 = arith.constant 0 : index
    %c0_48 = arith.constant 0 : index
    %c0_49 = arith.constant 0 : index
    %c0_50 = arith.constant 0 : index
    %72 = vector.load %arg5[%c0_47, %c0_48, %c0_49, %c0_50] : memref<1x16x16x8xbf16, #tpu.memory_space<vmem>>, vector<1x16x16x8xbf16>
    %73 = vector.shape_cast %72 : vector<1x16x16x8xbf16> to vector<16x16x8xbf16>
    %74 = vector.shape_cast %71 : vector<16x16x8xbf16> to vector<1x16x16x8xbf16>
    tpu.vector_store %arg5[%c0_47, %c0_48, %c0_49, %c0_50], %74 {strides = array<i32>} : memref<1x16x16x8xbf16, #tpu.memory_space<vmem>>, vector<1x16x16x8xbf16>,
    %cst_51 = arith.constant dense<0.000000e+00> : vector<8xf32>
    %75 = vector.multi_reduction <add>, %69, %cst_51 [0] : vector<256x8xf32> to vector<8xf32>
    %76 = vector.shape_cast %75 : vector<8xf32> to vector<1x8xf32>
    %c0_52 = arith.constant 0 : index
    %c0_53 = arith.constant 0 : index
    %c0_54 = arith.constant 0 : index
    %77 = vector.load %arg6[%c0_52, %c0_53, %c0_54] : memref<1x2x8xf32, #tpu.memory_space<vmem>>, vector<1x1x8xf32>
    %78 = vector.shape_cast %77 : vector<1x1x8xf32> to vector<1x8xf32>
    %79 = vector.shape_cast %76 : vector<1x8xf32> to vector<1x1x8xf32>
    tpu.vector_store %arg6[%c0_52, %c0_53, %c0_54], %79 {strides = array<i32>} : memref<1x2x8xf32, #tpu.memory_space<vmem>>, vector<1x1x8xf32>,
    %80 = arith.mulf %69, %69 : vector<256x8xf32>
    %cst_55 = arith.constant dense<0.000000e+00> : vector<8xf32>
    %81 = vector.multi_reduction <add>, %80, %cst_55 [0] : vector<256x8xf32> to vector<8xf32>
    %82 = vector.shape_cast %81 : vector<8xf32> to vector<1x8xf32>
    %c0_56 = arith.constant 0 : index
    %c1_57 = arith.constant 1 : index
    %c0_58 = arith.constant 0 : index
    %83 = vector.load %arg6[%c0_56, %c1_57, %c0_58] : memref<1x2x8xf32, #tpu.memory_space<vmem>>, vector<1x1x8xf32>
    %84 = vector.shape_cast %83 : vector<1x1x8xf32> to vector<1x8xf32>
    %85 = vector.shape_cast %82 : vector<1x8xf32> to vector<1x1x8xf32>
    tpu.vector_store %arg6[%c0_56, %c1_57, %c0_58], %85 {strides = array<i32>} : memref<1x2x8xf32, #tpu.memory_space<vmem>>, vector<1x1x8xf32>,
    return
  }
  func.func @transform_0(%arg0: i32) -> (i32, i32) {
    %c0_i32 = arith.constant 0 : i32
    %c0_i32_0 = arith.constant 0 : i32
    %c0_i32_1 = arith.constant 0 : i32
    return %c0_i32, %c0_i32_0 : i32, i32
  }
  func.func @transform_1(%arg0: i32) -> (i32, i32) {
    %c0_i32 = arith.constant 0 : i32
    %c0_i32_0 = arith.constant 0 : i32
    %c0_i32_1 = arith.constant 0 : i32
    return %c0_i32, %c0_i32_0 : i32, i32
  }
  func.func @transform_2(%arg0: i32) -> (i32, i32, i32, i32) {
    %c0_i32 = arith.constant 0 : i32
    %c0_i32_0 = arith.constant 0 : i32
    %c0_i32_1 = arith.constant 0 : i32
    %c0_i32_2 = arith.constant 0 : i32
    return %arg0, %c0_i32, %c0_i32_0, %c0_i32_1 : i32, i32, i32, i32
  }
  func.func @transform_3(%arg0: i32) -> (i32, i32) {
    %c0_i32 = arith.constant 0 : i32
    %c0_i32_0 = arith.constant 0 : i32
    %c0_i32_1 = arith.constant 0 : i32
    return %c0_i32, %c0_i32_0 : i32, i32
  }
  func.func @transform_4(%arg0: i32) -> (i32, i32, i32, i32) {
    %c0_i32 = arith.constant 0 : i32
    %c0_i32_0 = arith.constant 0 : i32
    %c0_i32_1 = arith.constant 0 : i32
    %c0_i32_2 = arith.constant 0 : i32
    return %arg0, %c0_i32, %c0_i32_0, %c0_i32_1 : i32, i32, i32, i32
  }
  func.func @transform_5(%arg0: i32) -> (i32, i32, i32) {
    %c0_i32 = arith.constant 0 : i32
    %c0_i32_0 = arith.constant 0 : i32
    %c0_i32_1 = arith.constant 0 : i32
    return %arg0, %c0_i32, %c0_i32_0 : i32, i32, i32
  }
}

module attributes {stable_mosaic.version = 11 : i64} {
  func.func @_bn_residual_kernel(%arg0: i32, %arg1: memref<1x128xf32, #tpu.memory_space<vmem>>, %arg2: memref<1x128xf32, #tpu.memory_space<vmem>>, %arg3: memref<1x16x128xbf16, #tpu.memory_space<vmem>>, %arg4: memref<1x16x128xf32, #tpu.memory_space<vmem>>, %arg5: memref<1x16x128xf32, #tpu.memory_space<vmem>>) attributes {dimension_semantics = [#tpu.dimension_semantics<parallel>], iteration_bounds = array<i64: 2>, scalar_prefetch = 0 : i64, scratch_operands = 0 : i64, tpu.core_type = #tpu.core_type<tc>, window_params = [{pipeline_mode = #tpu.pipeline_mode<synchronous>, transform_indices = @transform_0, window_bounds = array<i64: 1, 128>}, {pipeline_mode = #tpu.pipeline_mode<synchronous>, transform_indices = @transform_1, window_bounds = array<i64: 1, 128>}, {transform_indices = @transform_2, window_bounds = array<i64: 1, 16, 128>}, {transform_indices = @transform_3, window_bounds = array<i64: 1, 16, 128>}, {transform_indices = @transform_4, window_bounds = array<i64: 1, 16, 128>}]} {
    %c0 = arith.constant 0 : index
    %c0_0 = arith.constant 0 : index
    %c0_1 = arith.constant 0 : index
    %0 = vector.load %arg3[%c0, %c0_0, %c0_1] : memref<1x16x128xbf16, #tpu.memory_space<vmem>>, vector<1x16x128xbf16>
    %1 = vector.shape_cast %0 : vector<1x16x128xbf16> to vector<16x128xbf16>
    %2 = arith.extf %1 : vector<16x128xbf16> to vector<16x128xf32>
    %c0_2 = arith.constant 0 : index
    %c0_3 = arith.constant 0 : index
    %3 = vector.load %arg1[%c0_2, %c0_3] : memref<1x128xf32, #tpu.memory_space<vmem>>, vector<1x128xf32>
    %4 = vector.broadcast %3 : vector<1x128xf32> to vector<16x128xf32>
    %5 = arith.mulf %2, %4 : vector<16x128xf32>
    %c0_4 = arith.constant 0 : index
    %c0_5 = arith.constant 0 : index
    %6 = vector.load %arg2[%c0_4, %c0_5] : memref<1x128xf32, #tpu.memory_space<vmem>>, vector<1x128xf32>
    %7 = vector.broadcast %6 : vector<1x128xf32> to vector<16x128xf32>
    %8 = arith.addf %5, %7 : vector<16x128xf32>
    %c0_6 = arith.constant 0 : index
    %c0_7 = arith.constant 0 : index
    %c0_8 = arith.constant 0 : index
    %9 = vector.load %arg4[%c0_6, %c0_7, %c0_8] : memref<1x16x128xf32, #tpu.memory_space<vmem>>, vector<1x16x128xf32>
    %10 = vector.shape_cast %9 : vector<1x16x128xf32> to vector<16x128xf32>
    %11 = arith.addf %8, %10 : vector<16x128xf32>
    %c0_9 = arith.constant 0 : index
    %c0_10 = arith.constant 0 : index
    %c0_11 = arith.constant 0 : index
    %12 = vector.load %arg5[%c0_9, %c0_10, %c0_11] : memref<1x16x128xf32, #tpu.memory_space<vmem>>, vector<1x16x128xf32>
    %13 = vector.shape_cast %12 : vector<1x16x128xf32> to vector<16x128xf32>
    %14 = vector.shape_cast %11 : vector<16x128xf32> to vector<1x16x128xf32>
    tpu.vector_store %arg5[%c0_9, %c0_10, %c0_11], %14 {strides = array<i32>} : memref<1x16x128xf32, #tpu.memory_space<vmem>>, vector<1x16x128xf32>,
    return
  }
  func.func @transform_0(%arg0: i32) -> (i32, i32) {
    %c0_i32 = arith.constant 0 : i32
    %c0_i32_0 = arith.constant 0 : i32
    %c0_i32_1 = arith.constant 0 : i32
    return %c0_i32, %c0_i32_0 : i32, i32
  }
  func.func @transform_1(%arg0: i32) -> (i32, i32) {
    %c0_i32 = arith.constant 0 : i32
    %c0_i32_0 = arith.constant 0 : i32
    %c0_i32_1 = arith.constant 0 : i32
    return %c0_i32, %c0_i32_0 : i32, i32
  }
  func.func @transform_2(%arg0: i32) -> (i32, i32, i32) {
    %c0_i32 = arith.constant 0 : i32
    %c0_i32_0 = arith.constant 0 : i32
    %c0_i32_1 = arith.constant 0 : i32
    return %arg0, %c0_i32, %c0_i32_0 : i32, i32, i32
  }
  func.func @transform_3(%arg0: i32) -> (i32, i32, i32) {
    %c0_i32 = arith.constant 0 : i32
    %c0_i32_0 = arith.constant 0 : i32
    %c0_i32_1 = arith.constant 0 : i32
    return %arg0, %c0_i32, %c0_i32_0 : i32, i32, i32
  }
  func.func @transform_4(%arg0: i32) -> (i32, i32, i32) {
    %c0_i32 = arith.constant 0 : i32
    %c0_i32_0 = arith.constant 0 : i32
    %c0_i32_1 = arith.constant 0 : i32
    return %arg0, %c0_i32, %c0_i32_0 : i32, i32, i32
  }
}

</mosaic_0001>

<bundles_post_ra>
// kernel: basic_block_forward.5
= control target key start
LH: loop header
LB: loop body
LE: loop exit
PB: predicated region body
PF: predicated region fallthrough
CT: control target
= control target key end

     0   :  { %s370_s15 = smov 0   ;;  %s396_s0 = inlined_call_operand.vmem [shape: f32[1,128], index: 0, kind: input, shape index: {}]   ;;  %s397_s1 = inlined_call_operand.vmem [shape: f32[1,128], index: 1, kind: input, shape index: {}]   ;;  %s398_s2 = inlined_call_operand.vmem [shape: bf16[2,16,128], index: 2, kind: input, shape index: {}]   ;;  %s399_s3 = inlined_call_operand.vmem [shape: f32[2,16,128], index: 3, kind: input, shape index: {}]   ;;  %s400_s4 = inlined_call_operand.vmem [shape: f32[2,16,128], index: 4, kind: output, shape index: {}]  }
   0x1 LB: > { %s307_s16 = sadd.s32 4294967295, %s343_s15   ;;  %p311_p0 = scmp.ge.s32.totalorder %s343_s15, 1  ;;  %s343_s15 = sphi %s370_s15, %s14_s15  }
   0x2   : > { %p172_p1 = scmp.lt.s32.totalorder %s343_s15, 3 }
   0x4   : > { %p173_p2 = pnand %p311_p0, %p172_p1 }
   0x5   : > { %p203_p3 = scmp.lt.s32.totalorder (!%p173_p2), %s307_s16, 1 }
   0x6   : > { %176 = sbr.rel (%p173_p2) target bundleno = 25 (0x19), region = 36 }
   0xb   : > { %s402_s16 = smov (!%p203_p3, %s307_s16), 1  ;;  %v335_v0 = vld [vmem:[%s396_s0] ss:$0 sm:$0xff] }
   0xc   : > { %s320_s17 = sshll.u32 %s402_s16, 3  ;;  %s321_s18 = sshll.u32 %s402_s16, 4  ;;  %v336_v4 = vld [vmem:[%s397_s1] ss:$0 sm:$0xff] }
   0xd   : > { %s207_s21 = scalar_lea.vmem %s398_s2, %s320_s17  ;;  %s212_s26 = scalar_lea.vmem %s399_s3, %s321_s18 }
   0xe   : > { %v324_v1 = vld [vmem:[%s207_s21] sm:$0xff]   ;;  %v235_v8 = vld [vmem:[%s212_s26 + $0x8] sm:$0xff]  ;;  %s217_s5 = scalar_lea.vmem %s400_s4, %s321_s18 }
   0xf   : > { %v325_v2 = vunpack.c.l.bf16 %v324_v1  ;;  %v326_v3 = vunpack.c.h.bf16 %v324_v1  ;;  %v234_v7 = vld [vmem:[%s212_s26] sm:$0xff] }
  0x11   : > { %v226_v5 = vmul.f32 %v335_v0, %v325_v2  ;;  %v227_v6 = vmul.f32 %v335_v0, %v326_v3 }
  0x13   : > { %v232_v9 = vadd.f32 %v336_v4, %v226_v5  ;;  %v233_v10 = vadd.f32 %v336_v4, %v227_v6 }
  0x15   : > { %v236_v11 = vadd.f32 %v234_v7, %v232_v9  ;;  %v237_v12 = vadd.f32 %v235_v8, %v233_v10 }
  0x17   : > { %238 = vst [vmem:[%s217_s5] sm:$0xff] %v236_v11 }
  0x18   : > { %239 = vst [vmem:[%s217_s5 + $0x8] sm:$0xff] %v237_v12 }
  0x19 PF: > { %s14_s15 = sadd.s32 1, %s343_s15  }
  0x1a   : > { %p11_p4 = scmp.ge.s32.totalorder %s14_s15, 4  }
  0x1c   :  { %13 = sbr.rel (!%p11_p4) target bundleno = 1 (0x1), region = 69 }

// kernel: basic_block_forward.3
= control target key start
LH: loop header
LB: loop body
LE: loop exit
PB: predicated region body
PF: predicated region fallthrough
CT: control target
= control target key end

     0   :  { %s3570_s18 = smov 0   ;;  %s4931_s0 = inlined_call_operand.vmem [shape: f32[1,8], index: 0, kind: input, shape index: {}]   ;;  %s4932_s1 = inlined_call_operand.vmem [shape: f32[1,8], index: 1, kind: input, shape index: {}]   ;;  %s4933_s2 = inlined_call_operand.vmem [shape: f32[2,16,16,8], index: 2, kind: input, shape index: {}]   ;;  %s4934_s3 = inlined_call_operand.vmem [shape: bf16[72,8], index: 3, kind: input, shape index: {}]   ;;  %s4935_s4 = inlined_call_operand.vmem [shape: bf16[2,16,16,8], index: 4, kind: output, shape index: {0}]   ;;  %s4936_s5 = inlined_call_operand.vmem [shape: f32[2,2,8], index: 5, kind: output, shape index: {1}]  }
   0x1 LB: > { %s3229_s0 = sadd.s32 4294967295, %s3537_s18   ;;  %p3233_p0 = scmp.ge.s32.totalorder %s3537_s18, 1  ;;  %s3537_s18 = sphi %s3570_s18, %s16_s18  }
   0x2   : > { %p190_p1 = scmp.lt.s32.totalorder %s3537_s18, 3 }
   0x4   : > { %p191_p2 = pnand %p3233_p0, %p190_p1 }
   0x6   : > { %194 = sbr.rel (%p191_p2) target bundleno = 842 (0x34a), region = 36 }
   0xb   : > { %v1290_v0 = vld [vmem:[%s4934_s3 + $0x4] sm:$0xf]  ;;  %vm1388_vm0 = vcmask 1043456   ;;  %p222_p3 = scmp.lt.s32.totalorder %s3229_s0, 1  ;;  %vm272_vm1 = vcmask 57344   ;;  %vm269_vm6 = vcmask 60416  }
   0xc   : > { %v1390_v1 = vsel %vm1388_vm0, %v1290_v0, 0  ;;  %vm280_vm2 = vsmask.f32 256  ;;  %v291_v2 = vld [vmem:[#allocation2 + $0x30] sm:$0x1]  ;;  %v3539_v12 = vmov 0  }
   0xd   : > { %3495 = vmatpush.bf16.msra.mxu1 %v1390_v1  ;;  %3496 = vmatpush.bf16.msra.mxu2 %v1390_v1  ;;  %s5060_s0 = smov (!%p222_p3, %s3229_s0), 1  ;;  %vm3586_vm3 = vmand %vm272_vm1, %vm280_vm2  ;;  %vm330_vm4 = vsmask.f32 7938  ;;  %v341_v4 = vld [vmem:[#allocation2 + $0x38] sm:$0x1]  ;;  %vm1339_vm12 = vcmask 64512  }
   0xe   : > { %3497 = vmatpush.bf16.msra.mxu3 %v1390_v1  ;;  %1399 = vmatpush.bf16.msra.mxu0 %v1390_v1  ;;  %v292_v5 = vsel %vm3586_vm3, 0, %v291_v2  ;;  %vm3594_vm5 = vmand %vm272_vm1, %vm330_vm4  ;;  %s3475_s20 = sshll.u32 %s5060_s0, 8  ;;  %vm412_vm7 = vsmask.f32 4368  ;;  %v303_v8 = vld [vmem:[#allocation2 + $0x60] sm:$0x1] }
   0xf   : > { %293 = vst [vmem:[#allocation2 + $0x30] sm:$0x1] %v292_v5  ;;  %v342_v7 = vsel %vm3594_vm5, 0, %v341_v4  ;;  %s3604_s23 = scalar_lea.vmem %s4933_s2, %s3475_s20  ;;  %v304_v11 = vsel %vm3586_vm3, 0, %v303_v8  ;;  %v353_v17 = vld [vmem:[#allocation2 + $0x68] sm:$0x1]  ;;  %vm3620_vm8 = vmor %vm280_vm2, %vm412_vm7 }
  0x10   : > { %343 = vst [vmem:[#allocation2 + $0x38] sm:$0x1] %v342_v7  ;;  %v243_v9 = vld [vmem:[%s3604_s23 + $0x30] sm:$0xff]  ;;  %v244_v10 = vld [vmem:[%s3604_s23 + $0x38] sm:$0xff]  ;;  %v354_v18 = vsel %vm3594_vm5, 0, %v353_v17  ;;  %vm3630_vm9 = vmand %vm269_vm6, %vm330_vm4  ;;  %vm1717_vm14 = vcmask 1042432  }
  0x11   : > { %270 = vst.msk [vmem:[#allocation2] sm:$0xf] %vm269_vm6, %v3539_v12  ;;  %v386_v13 = vpack.c.bf16 %v243_v9, %v243_v9  ;;  %v387_v14 = vpack.c.bf16 %v244_v10, %v244_v10  ;;  %v251_v15 = vld [vmem:[%s3604_s23 + $0x70] sm:$0xff]  ;;  %v252_v16 = vld [vmem:[%s3604_s23 + $0x78] sm:$0xff]  ;;  %v245_v59 = vld [vmem:[%s3604_s23 + $0x40] sm:$0xff]  ;;  %vm1718_vm15 = vcmask 1046532  }
  0x12   : > { %305 = vst [vmem:[#allocation2 + $0x60] sm:$0x1] %v304_v11  ;;  %v394_v19 = vpack.c.bf16 %v251_v15, %v251_v15  ;;  %v395_v20 = vpack.c.bf16 %v252_v16, %v252_v16  ;;  %v259_v21 = vld [vmem:[%s3604_s23 + $0xb0] sm:$0xff]  ;;  %v260_v22 = vld [vmem:[%s3604_s23 + $0xb8] sm:$0xff]  ;;  %v1832_v5 = vld [vmem:[%s4934_s3 + $0x8] sm:$0xf]  ;;  %v3655_v7 = vpack.c.bf16 %v245_v59, %v245_v59 }
  0x13   : > { %v315_v23 = vld [vmem:[#allocation2 + $0x90] sm:$0x1]  ;;  %v466_v24 = vshrl.u32 %v386_v13, 16  ;;  %v469_v25 = vshll.u32 %v386_v13, 16  ;;  %v474_v26 = vshrl.u32 %v387_v14, 16  ;;  %v477_v27 = vshll.u32 %v387_v14, 16  ;;  %vm4093_vm2 = vmor %vm1717_vm14, %vm1718_vm15 }
  0x14   : > { %355 = vst [vmem:[#allocation2 + $0x68] sm:$0x1] %v354_v18  ;;  %v534_v28 = vshrl.u32 %v394_v19, 16  ;;  %v537_v29 = vshll.u32 %v394_v19, 16  ;;  %v542_v30 = vshrl.u32 %v395_v20, 16  ;;  %v545_v31 = vshll.u32 %v395_v20, 16 }
  0x15   : > { %v365_v32 = vld [vmem:[#allocation2 + $0x98] sm:$0x1]  ;;  %v468_v34 = vrot.slane %v466_v24, 7  ;;  %v476_v35 = vrot.slane %v474_v26, 7  ;;  %v316_v37 = vsel %vm3586_vm3, 0, %v315_v23  ;;  %v402_v43 = vpack.c.bf16 %v259_v21, %v259_v21  ;;  %v246_v16 = vld [vmem:[%s3604_s23 + $0x48] sm:$0xff] }
  0x16   : > { %v757_v36 = vld [vmem:[#allocation2 + $0x30] sm:$0xf]  ;;  %v366_v38 = vsel %vm3594_vm5, 0, %v365_v32  ;;  %v536_v41 = vrot.slane %v534_v28, 7  ;;  %v544_v42 = vrot.slane %v542_v30, 7  ;;  %v403_v44 = vpack.c.bf16 %v260_v22, %v260_v22  ;;  %s3476_s15 = sshll.u32 %s5060_s0, 7 }
  0x17   : > { %v761_v40 = vld [vmem:[#allocation2 + $0x38] sm:$0x1]  ;;  %317 = vst [vmem:[#allocation2 + $0x90] sm:$0x1] %v316_v37  ;;  %v471_v45 = vor.u32 %v469_v25, %v468_v34  ;;  %v472_v46 = vrot.slane %v468_v34, 4  ;;  %v479_v47 = vor.u32 %v477_v27, %v476_v35  ;;  %v481_v48 = vrot.slane %v476_v35, 4  ;;  %s4678_s1 = scalar_lea.vmem %s4935_s4, %s3476_s15 }
  0x18   : > { %367 = vst [vmem:[#allocation2 + $0x98] sm:$0x1] %v366_v38  ;;  %v539_v49 = vor.u32 %v537_v29, %v536_v41  ;;  %v540_v50 = vrot.slane %v536_v41, 4  ;;  %v547_v51 = vor.u32 %v545_v31, %v544_v42  ;;  %v549_v52 = vrot.slane %v544_v42, 4  ;;  %v848_v58 = vld [vmem:[#allocation2] sm:$0xf] }
  0x19   : > { %v785_v53 = vld [vmem:[#allocation2 + $0x60] sm:$0xf]  ;;  %271 = vst.msk [vmem:[#allocation2 + $0x4] sm:$0xf] %vm269_vm6, %v3539_v12  ;;  %v480_v54 = vsel %vm3620_vm8, %v472_v46, %v479_v47  ;;  %v758_v55 = vsel %vm3630_vm9, %v471_v45, %v757_v36  ;;  %v762_v56 = vsel %vm3586_vm3, %v481_v48, %v761_v40  ;;  %v602_v57 = vshrl.u32 %v402_v43, 16  ;;  %s3238_s19 = sshll.u32 %s5060_s0, 1 }
  0x1a   : > { %273 = vst.msk [vmem:[#allocation2 + $0x8] sm:$0x1] %vm272_vm1, %v3539_v12  ;;  %v548_v60 = vsel %vm3620_vm8, %v540_v50, %v547_v51  ;;  %v786_v61 = vsel %vm3630_vm9, %v539_v49, %v785_v53  ;;  %v605_v63 = vshll.u32 %v402_v43, 16  ;;  %v610_v0 = vshrl.u32 %v403_v44, 16  ;;  %v253_v25 = vld [vmem:[%s3604_s23 + $0x80] sm:$0xff]  ;;  %s235_s22 = scalar_lea.vmem %s4936_s5, %s3238_s19 }
  0x1b   : > { %759 = vst [vmem:[#allocation2 + $0x30] sm:$0xf] %v758_v55  ;;  %v789_v62 = vld [vmem:[#allocation2 + $0x68] sm:$0x1]  ;;  %v604_v2 = vrot.slane %v602_v57, 7  ;;  %v613_v4 = vshll.u32 %v403_v44, 16  ;;  %v3676_v37 = vpack.c.bf16 %v246_v16, %v246_v16  ;;  %v3678_v38 = vpack.c.bf16 %v253_v25, %v253_v25 }
  0x1c   : > { %760 = vst.msk [vmem:[#allocation2 + $0x34] sm:$0xf] %vm269_vm6, %v480_v54  ;;  %v790_v1 = vsel %vm3586_vm3, %v549_v52, %v789_v62  ;;  %vm903_vm10 = vsmask.f32 3328  ;;  %v612_v8 = vrot.slane %v610_v0, 7  ;;  %v1930_v9 = vsel %vm1388_vm0, %v1832_v5, 0 }
  0x1d   : > { %763 = vst [vmem:[#allocation2 + $0x38] sm:$0x1] %v762_v56  ;;  %v907_v10 = vshrl.u32 %v848_v58, 16  ;;  %v910_v11 = vshll.u32 %v848_v58, 16  ;;  %v607_v13 = vor.u32 %v605_v63, %v604_v2  ;;  %v608_v14 = vrot.slane %v604_v2, 4  ;;  %1939 = vmatpush.bf16.msrb.mxu2 %v1930_v9 }
  0x1e   : > { %787 = vst [vmem:[#allocation2 + $0x60] sm:$0xf] %v786_v61  ;;  %v813_v15 = vld [vmem:[#allocation2 + $0x90] sm:$0xf]  ;;  %v483_v17 = vshrl.u32 %v3655_v7, 16  ;;  %v615_v18 = vor.u32 %v613_v4, %v612_v8  ;;  %v617_v19 = vrot.slane %v612_v8, 4 }
  0x1f   : > { %788 = vst.msk [vmem:[#allocation2 + $0x64] sm:$0xf] %vm269_vm6, %v548_v60  ;;  %v817_v20 = vld [vmem:[#allocation2 + $0x98] sm:$0x1]  ;;  %v909_v21 = vrot.slane %v907_v10, 4  ;;  %v814_v22 = vsel %vm3630_vm9, %v607_v13, %v813_v15  ;;  %v912_v24 = vrot.slane %v910_v11, 5 }
  0x20   : > { %791 = vst [vmem:[#allocation2 + $0x68] sm:$0x1] %v790_v1  ;;  %v3663_v23 = vld [vmem:[#allocation2 + $0x4] sm:$0xf]  ;;  %vm904_vm11 = vsmask.f32 7440  ;;  %v616_v26 = vsel %vm3620_vm8, %v608_v14, %v615_v18  ;;  %v818_v27 = vsel %vm3586_vm3, %v617_v19, %v817_v20 }
  0x21   : > { %815 = vst [vmem:[#allocation2 + $0x90] sm:$0xf] %v814_v22  ;;  %v3670_v28 = vld [vmem:[#allocation2 + $0x8] sm:$0x1]  ;;  %v913_v30 = vor.u32 %v912_v24, %v909_v21  ;;  %v916_v31 = vshll.u32 %v3663_v23, 16  ;;  %v3674_v32 = vrot.slane %v483_v17, 7  ;;  %vm3686_vm13 = vmor %vm903_vm10, %vm904_vm11 }
  0x22   : > { %v860_v29 = vld [vmem:[#allocation2 + $0x30] sm:$0xf]  ;;  %816 = vst.msk [vmem:[#allocation2 + $0x94] sm:$0xf] %vm269_vm6, %v616_v26  ;;  %v920_v43 = vshrl.u32 %v3663_v23, 16  ;;  %v926_v44 = vshll.u32 %v3670_v28, 16 }
  0x23   : > { %v861_v34 = vld [vmem:[#allocation2 + $0x34] sm:$0xf]  ;;  %v1003_v35 = vshrl.u32 %v860_v29, 16  ;;  %v1006_v36 = vshll.u32 %v860_v29, 16  ;;  %819 = vst [vmem:[#allocation2 + $0x98] sm:$0x1] %v818_v27 }
  0x24   : > { %v862_v40 = vld [vmem:[#allocation2 + $0x38] sm:$0x1]  ;;  %v1012_v41 = vshll.u32 %v861_v34, 16  ;;  %v1016_v42 = vshrl.u32 %v861_v34, 16  ;;  %v3682_v49 = vrot.slane %v913_v30, 4  ;;  %v918_v9 = vrot.slane %v916_v31, 5 }
  0x25   : > { %v1005_v45 = vrot.slane %v1003_v35, 4  ;;  %v1008_v46 = vrot.slane %v1006_v36, 5  ;;  %v1022_v47 = vshll.u32 %v862_v40, 16  ;;  %v872_v48 = vld [vmem:[#allocation2 + $0x60] sm:$0xf]  ;;  %v922_v27 = vrot.slane %v920_v43, 4 }
  0x26   : > { %v1014_v50 = vrot.slane %v1012_v41, 5  ;;  %v1018_v51 = vrot.slane %v1016_v42, 4  ;;  %v873_v52 = vld [vmem:[#allocation2 + $0x64] sm:$0xf]  ;;  %v1099_v53 = vshrl.u32 %v872_v48, 16  ;;  %v1102_v54 = vshll.u32 %v872_v48, 16 }
  0x27   : > { %v1009_v55 = vor.u32 %v1008_v46, %v1005_v45  ;;  %v1024_v56 = vrot.slane %v1022_v47, 5  ;;  %v874_v57 = vld [vmem:[#allocation2 + $0x68] sm:$0x1]  ;;  %v1108_v58 = vshll.u32 %v873_v52, 16  ;;  %v1112_v59 = vshrl.u32 %v873_v52, 16 }
  0x28   : > { %v1019_v61 = vor.u32 %v1018_v51, %v1014_v50  ;;  %v1101_v62 = vrot.slane %v1099_v53, 4  ;;  %v1104_v63 = vrot.slane %v1102_v54, 5  ;;  %v1118_v0 = vshll.u32 %v874_v57, 16  ;;  %v884_v1 = vld [vmem:[#allocation2 + $0x90] sm:$0xf] }
  0x29   : > { %v1010_v2 = vrot.slane %v1009_v55, 4  ;;  %v1110_v4 = vrot.slane %v1108_v58, 5  ;;  %v1114_v5 = vrot.slane %v1112_v59, 4  ;;  %v885_v8 = vld [vmem:[#allocation2 + $0x94] sm:$0xf]  ;;  %v1195_v14 = vshrl.u32 %v884_v1, 16 }
  0x2a   : > { %v1020_v10 = vrot.slane %v1019_v61, 4  ;;  %v1105_v11 = vor.u32 %v1104_v63, %v1101_v62  ;;  %v1120_v13 = vrot.slane %v1118_v0, 5  ;;  %v886_v17 = vld [vmem:[#allocation2 + $0x98] sm:$0x1]  ;;  %v1198_v18 = vshll.u32 %v884_v1, 16 }
  0x2b   : > { %v1015_v15 = vsel %vm3686_vm13, %v1010_v2, %v1014_v50  ;;  %v1115_v16 = vor.u32 %v1114_v5, %v1110_v4  ;;  %v1204_v19 = vshll.u32 %v885_v8, 16  ;;  %275 = vst.msk [vmem:[#allocation2 + $0xcc] sm:$0xf] %vm269_vm6, %v3539_v12  ;;  %v1197_v23 = vrot.slane %v1195_v14, 4  ;;  %v2053_v42 = vld [vmem:[%s4934_s3 + $0xc] sm:$0xf] }
  0x2c   : > { %v1025_v20 = vsel %vm3686_vm13, %v1020_v10, %v1024_v56  ;;  %v1299_v21 = vunpack.c.l.b16 %v1015_v15  ;;  %v1106_v22 = vrot.slane %v1105_v11, 4  ;;  %276 = vst.msk [vmem:[#allocation2 + $0xd0] sm:$0xf] %vm269_vm6, %v3539_v12  ;;  %v1200_v26 = vrot.slane %v1198_v18, 5  ;;  %v2210_v48 = vld [vmem:[%s4934_s3 + $0x10] sm:$0xf] }
  0x2d   : > { %v1300_v24 = vunpack.c.l.b16 %v1025_v20  ;;  %v1116_v25 = vrot.slane %v1115_v16, 4  ;;  %277 = vst.msk [vmem:[#allocation2 + $0xd4] sm:$0x1] %vm272_vm1, %v3539_v12  ;;  %v1206_v30 = vrot.slane %v1204_v19, 5  ;;  %v1208_v31 = vshrl.u32 %v885_v8, 16  ;;  %v254_v8 = vld [vmem:[%s3604_s23 + $0x88] sm:$0xff] }
  0x2e   : > { %v1111_v29 = vsel %vm3686_vm13, %v1106_v22, %v1110_v4  ;;  %v1214_v34 = vshll.u32 %v886_v17, 16  ;;  %v1201_v41 = vor.u32 %v1200_v26, %v1197_v23  ;;  %v902_v12 = vld [vmem:[%s4934_s3] sm:$0xf]  ;;  %v919_v47 = vsel %vm3686_vm13, %v3682_v49, %v918_v9  ;;  %v294_v50 = vld [vmem:[#allocation2 + $0x3c] sm:$0x1] }
  0x2f   : > { %v3702_v35 = vpack.c.b16 %v1300_v24, %v1299_v21  ;;  %v1121_v36 = vsel %vm3686_vm13, %v1116_v25, %v1120_v13  ;;  %v1307_v40 = vunpack.c.l.b16 %v1111_v29  ;;  %v1210_v45 = vrot.slane %v1208_v31, 4  ;;  %v344_v55 = vld [vmem:[#allocation2 + $0x44] sm:$0x1]  ;;  %v306_v59 = vld [vmem:[#allocation2 + $0x6c] sm:$0x1] }
  0x30   : > { %v1308_v43 = vunpack.c.l.b16 %v1121_v36  ;;  %v1216_v46 = vrot.slane %v1214_v34, 5  ;;  %v1202_v51 = vrot.slane %v1201_v41, 4  ;;  %v923_v52 = vor.u32 %v922_v27, %v918_v9  ;;  %v356_v61 = vld [vmem:[#allocation2 + $0x74] sm:$0x1]  ;;  %v318_v0 = vld [vmem:[#allocation2 + $0x9c] sm:$0x1] }
  0x31   : > { %4977 = vst [vmem:[#allocation3_spill] sm:$0xff] %v3702_v35  ;;  %3243 = vmatmul.msk.bf16.vlgmr.msra.gmra.mxu1 %vm1339_vm12, %v3702_v35  ;;  %v928_v53 = vrot.slane %v926_v44, 5  ;;  %v1291_v54 = vunpack.c.l.b16 %v919_v47  ;;  %v1211_v57 = vor.u32 %v1210_v45, %v1206_v30  ;;  %v2063_v49 = vsel %vm1388_vm0, %v2053_v42, 0  ;;  %v261_v17 = vld [vmem:[%s3604_s23 + $0xc0] sm:$0xff]  ;;  %v282_v22 = vld [vmem:[#allocation2 + $0xc] sm:$0x1] }
  0x32   : > { %v3722_v56 = vpack.c.b16 %v1308_v43, %v1307_v40  ;;  %v1610_v58 = vsel %vm1388_vm0, %v902_v12, 0  ;;  %v1207_v62 = vsel %vm3686_vm13, %v1202_v51, %v1206_v30  ;;  %v924_v63 = vrot.slane %v923_v52, 4  ;;  %2072 = vmatpush.bf16.msrb.mxu3 %v2063_v49  ;;  %v368_v18 = vld [vmem:[#allocation2 + $0xa4] sm:$0x1]  ;;  %v262_v25 = vld [vmem:[%s3604_s23 + $0xc8] sm:$0xff] }
  0x33   : > { %1619 = vmatpush.bf16.msrb.mxu1 %v1610_v58  ;;  %v2218_v28 = vsel %vm1388_vm0, %v2210_v48, 0  ;;  %v295_v44 = vsel %vm3586_vm3, 0, %v294_v50  ;;  %v1212_v1 = vrot.slane %v1211_v57, 4  ;;  %v1315_v2 = vunpack.c.l.b16 %v1207_v62  ;;  %v237_v34 = vld [vmem:[%s3604_s23] sm:$0xff]  ;;  %v332_v12 = vld [vmem:[#allocation2 + $0x14] sm:$0x1] }
  0x34   : > { %4978 = vst [vmem:[#allocation4_spill] sm:$0xff] %v3722_v56  ;;  %3247 = vmatmul.msk.bf16.vlgmr.msra.gmra.mxu2 %vm1339_vm12, %v3722_v56  ;;  %2227 = vmatpush.bf16.msrb.mxu0 %v2218_v28  ;;  %v345_v4 = vsel %vm3594_vm5, 0, %v344_v55  ;;  %v486_v5 = vshll.u32 %v3655_v7, 16  ;;  %v929_v9 = vsel %vm3686_vm13, %v924_v63, %v928_v53  ;;  %v489_v10 = vrot.slane %v3674_v32, 4 }
  0x35   : > { %296 = vst [vmem:[#allocation2 + $0x3c] sm:$0x1] %v295_v44  ;;  %v491_v11 = vshrl.u32 %v3676_v37, 16  ;;  %v494_v13 = vshll.u32 %v3676_v37, 16  ;;  %v1217_v14 = vsel %vm3686_vm13, %v1212_v1, %v1216_v46  ;;  %v1292_v15 = vunpack.c.l.b16 %v929_v9 }
  0x36   : > { %346 = vst [vmem:[#allocation2 + $0x44] sm:$0x1] %v345_v4  ;;  %v488_v16 = vor.u32 %v486_v5, %v3674_v32  ;;  %v307_v7 = vsel %vm3586_vm3, 0, %v306_v59  ;;  %v1316_v19 = vunpack.c.l.b16 %v1217_v14  ;;  %v357_v21 = vsel %vm3594_vm5, 0, %v356_v61  ;;  %v3773_v59 = vld [vmem:[#allocation2 + $0x48] sm:$0x1] }
  0x37   : > { %v493_v20 = vrot.slane %v491_v11, 7  ;;  %308 = vst [vmem:[#allocation2 + $0x6c] sm:$0x1] %v307_v7  ;;  %v397_v37 = vpack.c.bf16 %v254_v8, %v254_v8  ;;  %v1323_v23 = vpack.c.b16 %v1292_v15, %v1291_v54  ;;  %v551_v24 = vshrl.u32 %v3678_v38, 16  ;;  %v247_v14 = vld [vmem:[%s3604_s23 + $0x50] sm:$0xff] }
  0x38   : > { %358 = vst [vmem:[#allocation2 + $0x74] sm:$0x1] %v357_v21  ;;  %v554_v32 = vshll.u32 %v3678_v38, 16  ;;  %v319_v26 = vsel %vm3586_vm3, 0, %v318_v0  ;;  %v3755_v27 = vpack.c.b16 %v1316_v19, %v1315_v2  ;;  %v369_v41 = vsel %vm3594_vm5, 0, %v368_v18  ;;  %v238_v38 = vld [vmem:[%s3604_s23 + $0x8] sm:$0xff] }
  0x39   : > { %v496_v29 = vor.u32 %v494_v13, %v493_v20  ;;  %v498_v30 = vrot.slane %v493_v20, 4  ;;  %v559_v31 = vshrl.u32 %v397_v37, 16  ;;  %320 = vst [vmem:[#allocation2 + $0x9c] sm:$0x1] %v319_v26  ;;  %3239 = vmatmul.msk.bf16.vlgmr.msra.gmra.mxu0 %vm1339_vm12, %v1323_v23  ;;  %v553_v36 = vrot.slane %v551_v24, 7 }
  0x3a   : > { %4979 = vst [vmem:[#allocation5_spill] sm:$0xff] %v3755_v27  ;;  %v562_v40 = vshll.u32 %v397_v37, 16  ;;  %v404_v42 = vpack.c.bf16 %v261_v17, %v261_v17  ;;  %3251 = vmatmul.msk.bf16.vlgmr.msra.gmra.mxu3 %vm1339_vm12, %v3755_v27  ;;  %v405_v47 = vpack.c.bf16 %v262_v25, %v262_v25  ;;  %v283_v48 = vsel %vm3586_vm3, 0, %v282_v22 }
  0x3b   : > { %v497_v43 = vsel %vm3620_vm8, %v489_v10, %v496_v29  ;;  %v561_v46 = vrot.slane %v559_v31, 7  ;;  %370 = vst [vmem:[#allocation2 + $0xa4] sm:$0x1] %v369_v41  ;;  %v556_v52 = vor.u32 %v554_v32, %v553_v36  ;;  %v557_v53 = vrot.slane %v553_v36, 4 }
  0x3c   : > { %v764_v45 = vld [vmem:[#allocation2 + $0x3c] sm:$0xf]  ;;  %767 = vst.msk [vmem:[#allocation2 + $0x40] sm:$0xf] %vm269_vm6, %v497_v43  ;;  %v619_v54 = vshrl.u32 %v404_v42, 16  ;;  %v622_v58 = vshll.u32 %v404_v42, 16  ;;  %v380_v28 = vpack.c.bf16 %v237_v34, %v237_v34  ;;  %v381_v44 = vpack.c.bf16 %v238_v38, %v238_v38 }
  0x3d   : > { %v765_v50 = vsel %vm3630_vm9, %v488_v16, %v764_v45  ;;  %v768_v51 = vld [vmem:[#allocation2 + $0x44] sm:$0x1]  ;;  %v564_v57 = vor.u32 %v562_v40, %v561_v46  ;;  %v566_v49 = vrot.slane %v561_v46, 4  ;;  %v627_v63 = vshrl.u32 %v405_v47, 16  ;;  %284 = vst [vmem:[#allocation2 + $0xc] sm:$0x1] %v283_v48 }
  0x3e   : > { %766 = vst [vmem:[#allocation2 + $0x3c] sm:$0xf] %v765_v50  ;;  %v769_v55 = vsel %vm3586_vm3, %v498_v30, %v768_v51  ;;  %v792_v61 = vld [vmem:[#allocation2 + $0x6c] sm:$0xf]  ;;  %v621_v62 = vrot.slane %v619_v54, 7  ;;  %v630_v4 = vshll.u32 %v405_v47, 16  ;;  %v3798_v41 = vpack.c.bf16 %v247_v14, %v247_v14 }
  0x3f   : > { %770 = vst [vmem:[#allocation2 + $0x44] sm:$0x1] %v769_v55  ;;  %v565_v0 = vsel %vm3620_vm8, %v557_v53, %v564_v57  ;;  %v793_v1 = vsel %vm3630_vm9, %v556_v52, %v792_v61  ;;  %v796_v2 = vld [vmem:[#allocation2 + $0x74] sm:$0x1]  ;;  %v333_v5 = vsel %vm3594_vm5, 0, %v332_v12  ;;  %v629_v11 = vrot.slane %v627_v63, 7 }
  0x40   : > { %794 = vst [vmem:[#allocation2 + $0x6c] sm:$0xf] %v793_v1  ;;  %v797_v8 = vsel %vm3586_vm3, %v566_v49, %v796_v2  ;;  %v624_v9 = vor.u32 %v622_v58, %v621_v62  ;;  %v625_v10 = vrot.slane %v621_v62, 4  ;;  %v820_v13 = vld [vmem:[#allocation2 + $0x9c] sm:$0xf]  ;;  %v415_v15 = vshrl.u32 %v380_v28, 16 }
  0x41   : > { %795 = vst.msk [vmem:[#allocation2 + $0x70] sm:$0xf] %vm269_vm6, %v565_v0  ;;  %v418_v16 = vshll.u32 %v380_v28, 16  ;;  %v423_v7 = vshrl.u32 %v381_v44, 16  ;;  %v426_v17 = vshll.u32 %v381_v44, 16  ;;  %v632_v18 = vor.u32 %v630_v4, %v629_v11 }
  0x42   : > { %798 = vst [vmem:[#allocation2 + $0x74] sm:$0x1] %v797_v8  ;;  %v634_v19 = vrot.slane %v629_v11, 4  ;;  %v821_v20 = vsel %vm3630_vm9, %v624_v9, %v820_v13  ;;  %v824_v21 = vld [vmem:[#allocation2 + $0xa4] sm:$0x1]  ;;  %v298_v37 = vsel %vm3586_vm3, 0, %v3773_v59 }
  0x43   : > { %v864_v22 = vld [vmem:[#allocation2 + $0x40] sm:$0xf]  ;;  %822 = vst [vmem:[#allocation2 + $0x9c] sm:$0xf] %v821_v20  ;;  %v417_v23 = vrot.slane %v415_v15, 7  ;;  %v3790_v24 = vrot.slane %v423_v7, 7  ;;  %v633_v29 = vsel %vm3620_vm8, %v625_v10, %v632_v18 }
  0x44   : > { %v1036_v25 = vshll.u32 %v864_v22, 16  ;;  %v1040_v26 = vshrl.u32 %v864_v22, 16  ;;  %v825_v30 = vsel %vm3586_vm3, %v634_v19, %v824_v21  ;;  %334 = vst [vmem:[#allocation2 + $0x14] sm:$0x1] %v333_v5  ;;  %v347_v45 = vld [vmem:[#allocation2 + $0x50] sm:$0x1] }
  0x45   : > { %v863_v32 = vld [vmem:[#allocation2 + $0x3c] sm:$0xf]  ;;  %823 = vst.msk [vmem:[#allocation2 + $0xa0] sm:$0xf] %vm269_vm6, %v633_v29  ;;  %v428_v40 = vor.u32 %v426_v17, %v3790_v24  ;;  %v421_v43 = vrot.slane %v417_v23, 4  ;;  %v3800_v50 = vor.u32 %v418_v16, %v417_v23  ;;  %v430_v51 = vrot.slane %v3790_v24, 4 }
  0x46   : > { %v865_v31 = vld [vmem:[#allocation2 + $0x44] sm:$0x1]  ;;  %v1027_v34 = vshrl.u32 %v863_v32, 16  ;;  %v1030_v36 = vshll.u32 %v863_v32, 16  ;;  %v1038_v42 = vrot.slane %v1036_v25, 5  ;;  %v1042_v38 = vrot.slane %v1040_v26, 4 }
  0x47   : > { %v1046_v12 = vshll.u32 %v865_v31, 16  ;;  %826 = vst [vmem:[#allocation2 + $0xa4] sm:$0x1] %v825_v30  ;;  %v875_v48 = vld [vmem:[#allocation2 + $0x6c] sm:$0xf]  ;;  %v429_v62 = vsel %vm3620_vm8, %v421_v43, %v428_v40  ;;  %v348_v8 = vsel %vm3594_vm5, 0, %v347_v45 }
  0x48   : > { %v1029_v46 = vrot.slane %v1027_v34, 4  ;;  %v1032_v47 = vrot.slane %v1030_v36, 5  ;;  %v1043_v52 = vor.u32 %v1042_v38, %v1038_v42  ;;  %v876_v54 = vld [vmem:[#allocation2 + $0x70] sm:$0xf]  ;;  %v1123_v55 = vshrl.u32 %v875_v48, 16  ;;  %v248_v20 = vld [vmem:[%s3604_s23 + $0x58] sm:$0xff] }
  0x49   : > { %v1048_v53 = vrot.slane %v1046_v12, 5  ;;  %v1126_v57 = vshll.u32 %v875_v48, 16  ;;  %v877_v58 = vld [vmem:[#allocation2 + $0x74] sm:$0x1]  ;;  %v1132_v59 = vshll.u32 %v876_v54, 16  ;;  %v1136_v61 = vshrl.u32 %v876_v54, 16 }
  0x4a   : > { %v1033_v49 = vor.u32 %v1032_v47, %v1029_v46  ;;  %v1044_v63 = vrot.slane %v1043_v52, 4  ;;  %v1125_v28 = vrot.slane %v1123_v55, 4  ;;  %v1142_v0 = vshll.u32 %v877_v58, 16  ;;  %v887_v1 = vld [vmem:[#allocation2 + $0x9c] sm:$0xf] }
  0x4b   : > { %v1128_v44 = vrot.slane %v1126_v57, 5  ;;  %v1134_v4 = vrot.slane %v1132_v59, 5  ;;  %v1138_v5 = vrot.slane %v1136_v61, 4  ;;  %739 = vst.msk [vmem:[#allocation2 + $0x10] sm:$0xf] %vm269_vm6, %v429_v62  ;;  %v1219_v14 = vshrl.u32 %v887_v1, 16 }
  0x4c   : > { %v1034_v2 = vrot.slane %v1033_v49, 4  ;;  %v1049_v9 = vsel %vm3686_vm13, %v1044_v63, %v1048_v53  ;;  %v1144_v11 = vrot.slane %v1142_v0, 5  ;;  %v888_v13 = vld [vmem:[#allocation2 + $0xa0] sm:$0xf]  ;;  %v1222_v18 = vshll.u32 %v887_v1, 16 }
  0x4d   : > { %v1129_v10 = vor.u32 %v1128_v44, %v1125_v28  ;;  %v1302_v16 = vunpack.c.l.b16 %v1049_v9  ;;  %v1139_v7 = vor.u32 %v1138_v5, %v1134_v4  ;;  %v736_v19 = vld [vmem:[#allocation2 + $0xc] sm:$0xf]  ;;  %299 = vst [vmem:[#allocation2 + $0x48] sm:$0x1] %v298_v37  ;;  %v1221_v23 = vrot.slane %v1219_v14, 4  ;;  %v256_v5 = vld [vmem:[%s3604_s23 + $0x98] sm:$0xff] }
  0x4e   : > { %v1039_v15 = vsel %vm3686_vm13, %v1034_v2, %v1038_v42  ;;  %v889_v17 = vld [vmem:[#allocation2 + $0xa4] sm:$0x1]  ;;  %v1228_v24 = vshll.u32 %v888_v13, 16  ;;  %349 = vst [vmem:[#allocation2 + $0x50] sm:$0x1] %v348_v8  ;;  %v1224_v25 = vrot.slane %v1222_v18, 5  ;;  %v391_v40 = vpack.c.bf16 %v248_v20, %v248_v20 }
  0x4f   : > { %v1301_v21 = vunpack.c.l.b16 %v1039_v15  ;;  %v1130_v22 = vrot.slane %v1129_v10, 4  ;;  %v1140_v32 = vrot.slane %v1139_v7, 4  ;;  %v1232_v26 = vshrl.u32 %v888_v13, 16  ;;  %v740_v30 = vld [vmem:[#allocation2 + $0x14] sm:$0x1] }
  0x50   : > { %v1238_v29 = vshll.u32 %v889_v17, 16  ;;  %v1230_v36 = vrot.slane %v1228_v24, 5  ;;  %v1225_v38 = vor.u32 %v1224_v25, %v1221_v23  ;;  %v737_v46 = vsel %vm3630_vm9, %v3800_v50, %v736_v19  ;;  %v309_v52 = vld [vmem:[#allocation2 + $0x78] sm:$0x1]  ;;  %v359_v53 = vld [vmem:[#allocation2 + $0x80] sm:$0x1] }
  0x51   : > { %v3813_v31 = vpack.c.b16 %v1302_v16, %v1301_v21  ;;  %v1135_v34 = vsel %vm3686_vm13, %v1130_v22, %v1134_v4  ;;  %v1145_v37 = vsel %vm3686_vm13, %v1140_v32, %v1144_v11  ;;  %v1234_v12 = vrot.slane %v1232_v26, 4  ;;  %738 = vst [vmem:[#allocation2 + $0xc] sm:$0xf] %v737_v46  ;;  %v255_v4 = vld [vmem:[%s3604_s23 + $0x90] sm:$0xff]  ;;  %v321_v13 = vld [vmem:[#allocation2 + $0xa8] sm:$0x1] }
  0x52   : > { %v1309_v42 = vunpack.c.l.b16 %v1135_v34  ;;  %v1310_v43 = vunpack.c.l.b16 %v1145_v37  ;;  %v1240_v45 = vrot.slane %v1238_v29, 5  ;;  %v741_v47 = vsel %vm3586_vm3, %v430_v51, %v740_v30  ;;  %v3826_v48 = vld [vmem:[#allocation2 + $0x10] sm:$0xf]  ;;  %v264_v23 = vld [vmem:[%s3604_s23 + $0xd8] sm:$0xff] }
  0x53   : > { %4980 = vst [vmem:[#allocation6_spill] sm:$0xff] %v3813_v31  ;;  %3244 = vmatmul.msk.bf16.gmra.mxu1 %vm1339_vm12, %v3813_v31  ;;  %v1226_v54 = vrot.slane %v1225_v38, 4  ;;  %v1235_v55 = vor.u32 %v1234_v12, %v1230_v36  ;;  %v940_v57 = vshll.u32 %v3826_v48, 16  ;;  %v944_v49 = vshrl.u32 %v3826_v48, 16  ;;  %v263_v18 = vld [vmem:[%s3604_s23 + $0xd0] sm:$0xff] }
  0x54   : > { %v3830_v58 = vpack.c.b16 %v1310_v43, %v1309_v42  ;;  %742 = vst [vmem:[#allocation2 + $0x14] sm:$0x1] %v741_v47  ;;  %v500_v50 = vshrl.u32 %v3798_v41, 16  ;;  %v503_v51 = vshll.u32 %v3798_v41, 16  ;;  %v508_v59 = vshrl.u32 %v391_v40, 16  ;;  %v239_v34 = vld [vmem:[%s3604_s23 + $0x10] sm:$0xff] }
  0x55   : > { %v1231_v61 = vsel %vm3686_vm13, %v1226_v54, %v1230_v36  ;;  %v1236_v62 = vrot.slane %v1235_v55, 4  ;;  %v3836_v63 = vrot.slane %v940_v57, 5  ;;  %v946_v28 = vrot.slane %v944_v49, 4  ;;  %v771_v9 = vld [vmem:[#allocation2 + $0x48] sm:$0xf] }
  0x56   : > { %3248 = vmatmul.msk.bf16.gmra.mxu2 %vm1339_vm12, %v3830_v58  ;;  %v1317_v44 = vunpack.c.l.b16 %v1231_v61  ;;  %v502_v0 = vrot.slane %v500_v50, 7  ;;  %v510_v1 = vrot.slane %v508_v59, 7  ;;  %v511_v2 = vshll.u32 %v391_v40, 16  ;;  %v775_v17 = vld [vmem:[#allocation2 + $0x50] sm:$0x1] }
  0x57   : > { %v1241_v41 = vsel %vm3686_vm13, %v1236_v62, %v1240_v45  ;;  %v947_v8 = vor.u32 %v946_v28, %v3836_v63  ;;  %v310_v10 = vsel %vm3586_vm3, 0, %v309_v52  ;;  %v360_v11 = vsel %vm3594_vm5, 0, %v359_v53  ;;  %v371_v30 = vld [vmem:[#allocation2 + $0xb0] sm:$0x1] }
  0x58   : > { %v1318_v14 = vunpack.c.l.b16 %v1241_v41  ;;  %v505_v15 = vor.u32 %v503_v51, %v502_v0  ;;  %v506_v16 = vrot.slane %v502_v0, 4  ;;  %v513_v7 = vor.u32 %v511_v2, %v510_v1  ;;  %311 = vst [vmem:[#allocation2 + $0x78] sm:$0x1] %v310_v10  ;;  %v3853_v32 = vld [vmem:[#allocation2 + $0xc] sm:$0xf] }
  0x59   : > { %v948_v19 = vrot.slane %v947_v8, 4  ;;  %v515_v20 = vrot.slane %v510_v1, 4  ;;  %361 = vst [vmem:[#allocation2 + $0x80] sm:$0x1] %v360_v11  ;;  %v398_v21 = vpack.c.bf16 %v255_v4, %v255_v4  ;;  %v399_v22 = vpack.c.bf16 %v256_v5, %v256_v5 }
  0x5a   : > { %v3851_v24 = vpack.c.b16 %v1318_v14, %v1317_v44  ;;  %v514_v25 = vsel %vm3620_vm8, %v506_v16, %v513_v7  ;;  %v772_v26 = vsel %vm3630_vm9, %v505_v15, %v771_v9  ;;  %v322_v29 = vsel %vm3586_vm3, 0, %v321_v13  ;;  %v285_v16 = vld [vmem:[#allocation2 + $0x18] sm:$0x1] }
  0x5b   : > { %v3862_v36 = vld [vmem:[#allocation2 + $0x14] sm:$0x1]  ;;  %v931_v40 = vshrl.u32 %v3853_v32, 16  ;;  %v934_v37 = vshll.u32 %v3853_v32, 16  ;;  %773 = vst [vmem:[#allocation2 + $0x48] sm:$0xf] %v772_v26  ;;  %v776_v42 = vsel %vm3586_vm3, %v515_v20, %v775_v17  ;;  %v406_v38 = vpack.c.bf16 %v263_v18, %v263_v18 }
  0x5c   : > { %3252 = vmatmul.msk.bf16.gmra.mxu3 %vm1339_vm12, %v3851_v24  ;;  %v950_v12 = vshll.u32 %v3862_v36, 16  ;;  %774 = vst.msk [vmem:[#allocation2 + $0x4c] sm:$0xf] %vm269_vm6, %v514_v25  ;;  %v568_v43 = vshrl.u32 %v398_v21, 16  ;;  %v571_v45 = vshll.u32 %v398_v21, 16  ;;  %v576_v46 = vshrl.u32 %v399_v22, 16 }
  0x5d   : > { %v933_v47 = vrot.slane %v931_v40, 4  ;;  %v936_v52 = vrot.slane %v934_v37, 5  ;;  %777 = vst [vmem:[#allocation2 + $0x50] sm:$0x1] %v776_v42  ;;  %v579_v53 = vshll.u32 %v399_v22, 16  ;;  %v372_v54 = vsel %vm3594_vm5, 0, %v371_v30 }
  0x5e   : > { %v952_v55 = vrot.slane %v950_v12, 5  ;;  %v570_v57 = vrot.slane %v568_v43, 7  ;;  %v578_v49 = vrot.slane %v576_v46, 7  ;;  %323 = vst [vmem:[#allocation2 + $0xa8] sm:$0x1] %v322_v29  ;;  %v407_v50 = vpack.c.bf16 %v264_v23, %v264_v23 }
  0x5f   : > { %v937_v51 = vor.u32 %v936_v52, %v933_v47  ;;  %v799_v59 = vld [vmem:[#allocation2 + $0x78] sm:$0xf]  ;;  %373 = vst [vmem:[#allocation2 + $0xb0] sm:$0x1] %v372_v54  ;;  %v636_v61 = vshrl.u32 %v406_v38, 16  ;;  %v639_v62 = vshll.u32 %v406_v38, 16  ;;  %v3874_v28 = vpack.c.bf16 %v239_v34, %v239_v34 }
  0x60   : > { %v953_v44 = vsel %vm3686_vm13, %v948_v19, %v952_v55  ;;  %v573_v0 = vor.u32 %v571_v45, %v570_v57  ;;  %v574_v1 = vrot.slane %v570_v57, 4  ;;  %v581_v2 = vor.u32 %v579_v53, %v578_v49  ;;  %v803_v4 = vld [vmem:[#allocation2 + $0x80] sm:$0x1]  ;;  %v300_v54 = vld [vmem:[#allocation2 + $0x54] sm:$0x1] }
  0x61   : > { %v938_v5 = vrot.slane %v937_v51, 4  ;;  %v1294_v41 = vunpack.c.l.b16 %v953_v44  ;;  %v583_v8 = vrot.slane %v578_v49, 4  ;;  %v638_v9 = vrot.slane %v636_v61, 7  ;;  %v335_v21 = vld [vmem:[#allocation2 + $0x20] sm:$0x1] }
  0x62   : > { %v3878_v10 = vld [vmem:[#allocation2 + $0x48] sm:$0xf]  ;;  %v582_v11 = vsel %vm3620_vm8, %v574_v1, %v581_v2  ;;  %v800_v13 = vsel %vm3630_vm9, %v573_v0, %v799_v59  ;;  %v644_v14 = vshrl.u32 %v407_v50, 16  ;;  %v647_v15 = vshll.u32 %v407_v50, 16  ;;  %v240_v50 = vld [vmem:[%s3604_s23 + $0x18] sm:$0xff]  ;;  %v249_v44 = vld [vmem:[%s3604_s23 + $0x60] sm:$0xff] }
  0x63   : > { %v943_v7 = vsel %vm3686_vm13, %v938_v5, %v3836_v63  ;;  %v3887_v17 = vld [vmem:[#allocation2 + $0x4c] sm:$0xf]  ;;  %v1051_v18 = vshrl.u32 %v3878_v10, 16  ;;  %v1054_v19 = vshll.u32 %v3878_v10, 16  ;;  %801 = vst [vmem:[#allocation2 + $0x78] sm:$0xf] %v800_v13  ;;  %v804_v20 = vsel %vm3586_vm3, %v583_v8, %v803_v4 }
  0x64   : > { %v1293_v22 = vunpack.c.l.b16 %v943_v7  ;;  %v3893_v23 = vld [vmem:[#allocation2 + $0x50] sm:$0x1]  ;;  %v1060_v25 = vshll.u32 %v3887_v17, 16  ;;  %v1064_v26 = vshrl.u32 %v3887_v17, 16  ;;  %802 = vst.msk [vmem:[#allocation2 + $0x7c] sm:$0xf] %vm269_vm6, %v582_v11  ;;  %v641_v63 = vor.u32 %v639_v62, %v638_v9 }
  0x65   : > { %v1053_v29 = vrot.slane %v1051_v18, 4  ;;  %v1056_v30 = vrot.slane %v1054_v19, 5  ;;  %v1070_v34 = vshll.u32 %v3893_v23, 16  ;;  %805 = vst [vmem:[#allocation2 + $0x80] sm:$0x1] %v804_v20  ;;  %v642_v40 = vrot.slane %v638_v9, 4 }
  0x66   : > { %v3899_v37 = vpack.c.b16 %v1294_v41, %v1293_v22  ;;  %v1062_v42 = vrot.slane %v1060_v25, 5  ;;  %v1066_v38 = vrot.slane %v1064_v26, 4  ;;  %v646_v12 = vrot.slane %v644_v14, 7  ;;  %v827_v43 = vld [vmem:[#allocation2 + $0xa8] sm:$0xf] }
  0x67   : > { %v1057_v45 = vor.u32 %v1056_v30, %v1053_v29  ;;  %v1072_v46 = vrot.slane %v1070_v34, 5  ;;  %v828_v47 = vsel %vm3630_vm9, %v641_v63, %v827_v43  ;;  %v831_v52 = vld [vmem:[#allocation2 + $0xb0] sm:$0x1]  ;;  %v286_v53 = vsel %vm3586_vm3, 0, %v285_v16 }
  0x68   : > { %3240 = vmatmul.msk.bf16.gmra.mxu0 %vm1339_vm12, %v3899_v37  ;;  %v1067_v55 = vor.u32 %v1066_v38, %v1062_v42  ;;  %v649_v57 = vor.u32 %v647_v15, %v646_v12  ;;  %v651_v49 = vrot.slane %v646_v12, 4  ;;  %829 = vst [vmem:[#allocation2 + $0xa8] sm:$0xf] %v828_v47  ;;  %v336_v51 = vsel %vm3594_vm5, 0, %v335_v21 }
  0x69   : > { %v1058_v59 = vrot.slane %v1057_v45, 4  ;;  %287 = vst [vmem:[#allocation2 + $0x18] sm:$0x1] %v286_v53  ;;  %v432_v61 = vshrl.u32 %v3874_v28, 16  ;;  %v435_v62 = vshll.u32 %v3874_v28, 16  ;;  %v301_v5 = vsel %vm3586_vm3, 0, %v300_v54 }
  0x6a   : > { %v1068_v0 = vrot.slane %v1067_v55, 4  ;;  %v3913_v1 = vld [vmem:[#allocation2 + $0x78] sm:$0xf]  ;;  %v650_v2 = vsel %vm3620_vm8, %v642_v40, %v649_v57  ;;  %v832_v4 = vsel %vm3586_vm3, %v651_v49, %v831_v52  ;;  %337 = vst [vmem:[#allocation2 + $0x20] sm:$0x1] %v336_v51  ;;  %v383_v11 = vpack.c.bf16 %v240_v50, %v240_v50 }
  0x6b   : > { %v1063_v41 = vsel %vm3686_vm13, %v1058_v59, %v1062_v42  ;;  %v3923_v8 = vld [vmem:[#allocation2 + $0x7c] sm:$0xf]  ;;  %v1147_v28 = vshrl.u32 %v3913_v1, 16  ;;  %v1150_v9 = vshll.u32 %v3913_v1, 16  ;;  %830 = vst.msk [vmem:[#allocation2 + $0xac] sm:$0xf] %vm269_vm6, %v650_v2  ;;  %v3935_v63 = vpack.c.bf16 %v249_v44, %v249_v44 }
  0x6c   : > { %v1073_v13 = vsel %vm3686_vm13, %v1068_v0, %v1072_v46  ;;  %v1303_v14 = vunpack.c.l.b16 %v1063_v41  ;;  %v3930_v15 = vld [vmem:[#allocation2 + $0x80] sm:$0x1]  ;;  %v1156_v16 = vshll.u32 %v3923_v8, 16  ;;  %v1160_v7 = vshrl.u32 %v3923_v8, 16  ;;  %833 = vst [vmem:[#allocation2 + $0xb0] sm:$0x1] %v832_v4 }
  0x6d   : > { %v1304_v18 = vunpack.c.l.b16 %v1073_v13  ;;  %v1149_v19 = vrot.slane %v1147_v28, 4  ;;  %v1152_v20 = vrot.slane %v1150_v9, 5  ;;  %v1166_v21 = vshll.u32 %v3930_v15, 16  ;;  %302 = vst [vmem:[#allocation2 + $0x54] sm:$0x1] %v301_v5  ;;  %v250_v28 = vld [vmem:[%s3604_s23 + $0x68] sm:$0xff] }
  0x6e   : > { %v1158_v22 = vrot.slane %v1156_v16, 5  ;;  %v1162_v25 = vrot.slane %v1160_v7, 4  ;;  %v434_v26 = vrot.slane %v432_v61, 7  ;;  %v440_v42 = vshrl.u32 %v383_v11, 16  ;;  %v350_v9 = vld [vmem:[#allocation2 + $0x5c] sm:$0x1] }
  0x6f   : > { %v3937_v29 = vpack.c.b16 %v1304_v18, %v1303_v14  ;;  %v1153_v30 = vor.u32 %v1152_v20, %v1149_v19  ;;  %v1168_v34 = vrot.slane %v1166_v21, 5  ;;  %v890_v40 = vld [vmem:[#allocation2 + $0xa8] sm:$0xf]  ;;  %v443_v54 = vshll.u32 %v383_v11, 16  ;;  %v312_v21 = vld [vmem:[#allocation2 + $0x84] sm:$0x1] }
  0x70   : > { %v1163_v38 = vor.u32 %v1162_v25, %v1158_v22  ;;  %v1243_v12 = vshrl.u32 %v890_v40, 16  ;;  %v1246_v43 = vshll.u32 %v890_v40, 16  ;;  %v437_v45 = vor.u32 %v435_v62, %v434_v26  ;;  %v743_v46 = vld [vmem:[#allocation2 + $0x18] sm:$0xf]  ;;  %v362_v40 = vld [vmem:[#allocation2 + $0x8c] sm:$0x1] }
  0x71   : > { %4981 = vst [vmem:[#allocation7_spill] sm:$0xff] %v3937_v29  ;;  %3245 = vmatmul.msk.bf16.gmra.mxu1 %vm1339_vm12, %v3937_v29  ;;  %v1154_v47 = vrot.slane %v1153_v30, 4  ;;  %v438_v52 = vrot.slane %v434_v26, 4  ;;  %v442_v53 = vrot.slane %v440_v42, 7  ;;  %v747_v16 = vld [vmem:[#allocation2 + $0x20] sm:$0x1]  ;;  %v393_v30 = vpack.c.bf16 %v250_v28, %v250_v28 }
  0x72   : > { %v1164_v55 = vrot.slane %v1163_v38, 4  ;;  %v891_v57 = vld [vmem:[#allocation2 + $0xac] sm:$0xf]  ;;  %v1245_v49 = vrot.slane %v1243_v12, 4  ;;  %v1248_v50 = vrot.slane %v1246_v43, 5  ;;  %v744_v51 = vsel %vm3630_vm9, %v437_v45, %v743_v46 }
  0x73   : > { %v1159_v59 = vsel %vm3686_vm13, %v1154_v47, %v1158_v22  ;;  %v892_v61 = vld [vmem:[#allocation2 + $0xb0] sm:$0x1]  ;;  %v1252_v62 = vshll.u32 %v891_v57, 16  ;;  %v1256_v44 = vshrl.u32 %v891_v57, 16  ;;  %v445_v0 = vor.u32 %v443_v54, %v442_v53  ;;  %745 = vst [vmem:[#allocation2 + $0x18] sm:$0xf] %v744_v51 }
  0x74   : > { %v1169_v2 = vsel %vm3686_vm13, %v1164_v55, %v1168_v34  ;;  %v1311_v4 = vunpack.c.l.b16 %v1159_v59  ;;  %v1249_v5 = vor.u32 %v1248_v50, %v1245_v49  ;;  %v1262_v41 = vshll.u32 %v892_v61, 16  ;;  %v257_v34 = vld [vmem:[%s3604_s23 + $0xa0] sm:$0xff]  ;;  %v258_v54 = vld [vmem:[%s3604_s23 + $0xa8] sm:$0xff] }
  0x75   : > { %v1312_v11 = vunpack.c.l.b16 %v1169_v2  ;;  %v1254_v13 = vrot.slane %v1252_v62, 5  ;;  %v1258_v14 = vrot.slane %v1256_v44, 4  ;;  %v446_v19 = vsel %vm3620_vm8, %v438_v52, %v445_v0 }
  0x76   : > { %v1250_v7 = vrot.slane %v1249_v5, 4  ;;  %v1264_v18 = vrot.slane %v1262_v41, 5  ;;  %v447_v20 = vrot.slane %v442_v53, 4  ;;  %746 = vst.msk [vmem:[#allocation2 + $0x1c] sm:$0xf] %vm269_vm6, %v446_v19  ;;  %v351_v26 = vsel %vm3594_vm5, 0, %v350_v9 }
  0x77   : > { %v3950_v22 = vpack.c.b16 %v1312_v11, %v1311_v4  ;;  %v1259_v25 = vor.u32 %v1258_v14, %v1254_v13  ;;  %352 = vst [vmem:[#allocation2 + $0x5c] sm:$0x1] %v351_v26  ;;  %v517_v12 = vshrl.u32 %v3935_v63, 16  ;;  %v520_v43 = vshll.u32 %v3935_v63, 16  ;;  %v778_v53 = vld [vmem:[#allocation2 + $0x54] sm:$0xf] }
  0x78   : > { %v1255_v42 = vsel %vm3686_vm13, %v1250_v7, %v1254_v13  ;;  %v748_v38 = vsel %vm3586_vm3, %v447_v20, %v747_v16  ;;  %v525_v47 = vshrl.u32 %v393_v30, 16  ;;  %v528_v52 = vshll.u32 %v393_v30, 16  ;;  %v265_v11 = vld [vmem:[%s3604_s23 + $0xe0] sm:$0xff]  ;;  %v324_v19 = vld [vmem:[#allocation2 + $0xb4] sm:$0x1] }
  0x79   : > { %3249 = vmatmul.msk.bf16.gmra.mxu2 %vm1339_vm12, %v3950_v22  ;;  %v1260_v45 = vrot.slane %v1259_v25, 4  ;;  %v1319_v46 = vunpack.c.l.b16 %v1255_v42  ;;  %749 = vst [vmem:[#allocation2 + $0x20] sm:$0x1] %v748_v38  ;;  %v519_v57 = vrot.slane %v517_v12, 7  ;;  %v313_v49 = vsel %vm3586_vm3, 0, %v312_v21 }
  0x7a   : > { %v3965_v55 = vld [vmem:[#allocation2 + $0x18] sm:$0xf]  ;;  %v363_v50 = vsel %vm3594_vm5, 0, %v362_v40  ;;  %v400_v63 = vpack.c.bf16 %v257_v34, %v257_v34  ;;  %v527_v62 = vrot.slane %v525_v47, 7  ;;  %314 = vst [vmem:[#allocation2 + $0x84] sm:$0x1] %v313_v49  ;;  %v401_v4 = vpack.c.bf16 %v258_v54, %v258_v54 }
  0x7b   : > { %v1265_v51 = vsel %vm3686_vm13, %v1260_v45, %v1264_v18  ;;  %v955_v59 = vshrl.u32 %v3965_v55, 16  ;;  %v958_v61 = vshll.u32 %v3965_v55, 16  ;;  %v522_v0 = vor.u32 %v520_v43, %v519_v57  ;;  %364 = vst [vmem:[#allocation2 + $0x8c] sm:$0x1] %v363_v50  ;;  %v374_v12 = vld [vmem:[#allocation2 + $0xbc] sm:$0x1] }
  0x7c   : > { %v1320_v44 = vunpack.c.l.b16 %v1265_v51  ;;  %v523_v2 = vrot.slane %v519_v57, 4  ;;  %v530_v28 = vor.u32 %v528_v52, %v527_v62  ;;  %v532_v9 = vrot.slane %v527_v62, 4 }
  0x7d   : > { %v957_v5 = vrot.slane %v955_v59, 4  ;;  %v960_v41 = vrot.slane %v958_v61, 5  ;;  %v3978_v14 = vld [vmem:[#allocation2 + $0x1c] sm:$0xf]  ;;  %v779_v16 = vsel %vm3630_vm9, %v522_v0, %v778_v53  ;;  %v585_v7 = vshrl.u32 %v400_v63, 16 }
  0x7e   : > { %v3976_v13 = vpack.c.b16 %v1320_v44, %v1319_v46  ;;  %v588_v18 = vshll.u32 %v400_v63, 16  ;;  %v964_v21 = vshll.u32 %v3978_v14, 16  ;;  %v968_v25 = vshrl.u32 %v3978_v14, 16  ;;  %780 = vst [vmem:[#allocation2 + $0x54] sm:$0xf] %v779_v16  ;;  %v266_v63 = vld [vmem:[%s3604_s23 + $0xe8] sm:$0xff] }
  0x7f   : > { %v961_v20 = vor.u32 %v960_v41, %v957_v5  ;;  %v531_v26 = vsel %vm3620_vm8, %v523_v2, %v530_v28  ;;  %v782_v30 = vld [vmem:[#allocation2 + $0x5c] sm:$0x1]  ;;  %v587_v42 = vrot.slane %v585_v7, 7  ;;  %v593_v38 = vshrl.u32 %v401_v4, 16  ;;  %v288_v0 = vld [vmem:[#allocation2 + $0x24] sm:$0x1] }
  0x80   : > { %4982 = vst [vmem:[#allocation8_spill] sm:$0xff] %v3976_v13  ;;  %3253 = vmatmul.msk.bf16.gmra.mxu3 %vm1339_vm12, %v3976_v13  ;;  %v3988_v34 = vld [vmem:[#allocation2 + $0x20] sm:$0x1]  ;;  %v783_v40 = vsel %vm3586_vm3, %v532_v9, %v782_v30  ;;  %v408_v43 = vpack.c.bf16 %v265_v11, %v265_v11  ;;  %v966_v46 = vrot.slane %v964_v21, 5  ;;  %v970_v47 = vrot.slane %v968_v25, 4 }
  0x81   : > { %781 = vst.msk [vmem:[#allocation2 + $0x58] sm:$0xf] %vm269_vm6, %v531_v26  ;;  %v962_v45 = vrot.slane %v961_v20, 4  ;;  %v974_v52 = vshll.u32 %v3988_v34, 16  ;;  %v590_v53 = vor.u32 %v588_v18, %v587_v42  ;;  %v591_v54 = vrot.slane %v587_v42, 4  ;;  %v241_v7 = vld [vmem:[%s3604_s23 + $0x20] sm:$0xff] }
  0x82   : > { %784 = vst [vmem:[#allocation2 + $0x5c] sm:$0x1] %v783_v40  ;;  %v595_v57 = vrot.slane %v593_v38, 7  ;;  %v596_v49 = vshll.u32 %v401_v4, 16  ;;  %v806_v50 = vld [vmem:[#allocation2 + $0x84] sm:$0xf]  ;;  %v971_v59 = vor.u32 %v970_v47, %v966_v46  ;;  %v409_v11 = vpack.c.bf16 %v266_v63, %v266_v63 }
  0x83   : > { %v967_v51 = vsel %vm3686_vm13, %v962_v45, %v966_v46  ;;  %v976_v61 = vrot.slane %v974_v52, 5  ;;  %v810_v62 = vld [vmem:[#allocation2 + $0x8c] sm:$0x1]  ;;  %v325_v44 = vsel %vm3586_vm3, 0, %v324_v19  ;;  %v807_v28 = vsel %vm3630_vm9, %v590_v53, %v806_v50 }
  0x84   : > { %v1295_v2 = vunpack.c.l.b16 %v967_v51  ;;  %v598_v5 = vor.u32 %v596_v49, %v595_v57  ;;  %v600_v41 = vrot.slane %v595_v57, 4  ;;  %326 = vst [vmem:[#allocation2 + $0xb4] sm:$0x1] %v325_v44  ;;  %v972_v4 = vrot.slane %v971_v59, 4  ;;  %v338_v38 = vld [vmem:[#allocation2 + $0x2c] sm:$0x1] }
  0x85   : > { %808 = vst [vmem:[#allocation2 + $0x84] sm:$0xf] %v807_v28  ;;  %v375_v9 = vsel %vm3594_vm5, 0, %v374_v12  ;;  %v653_v16 = vshrl.u32 %v408_v43, 16  ;;  %v4004_v18 = vld [vmem:[#allocation2 + $0x54] sm:$0xf]  ;;  %v4023_v47 = vpack.c.bf16 %v241_v7, %v241_v7 }
  0x86   : > { %v599_v19 = vsel %vm3620_vm8, %v591_v54, %v598_v5  ;;  %v811_v20 = vsel %vm3586_vm3, %v600_v41, %v810_v62  ;;  %376 = vst [vmem:[#allocation2 + $0xbc] sm:$0x1] %v375_v9  ;;  %v656_v21 = vshll.u32 %v408_v43, 16  ;;  %v289_v25 = vsel %vm3586_vm3, 0, %v288_v0  ;;  %v242_v5 = vld [vmem:[%s3604_s23 + $0x28] sm:$0xff] }
  0x87   : > { %v977_v26 = vsel %vm3686_vm13, %v972_v4, %v976_v61  ;;  %v1075_v40 = vshrl.u32 %v4004_v18, 16  ;;  %v1078_v42 = vshll.u32 %v4004_v18, 16  ;;  %809 = vst.msk [vmem:[#allocation2 + $0x88] sm:$0xf] %vm269_vm6, %v599_v19  ;;  %v655_v57 = vrot.slane %v653_v16, 7 }
  0x88   : > { %v4014_v30 = vld [vmem:[#allocation2 + $0x58] sm:$0xf]  ;;  %v1296_v12 = vunpack.c.l.b16 %v977_v26  ;;  %812 = vst [vmem:[#allocation2 + $0x8c] sm:$0x1] %v811_v20  ;;  %v661_v51 = vshrl.u32 %v409_v11, 16  ;;  %v664_v9 = vshll.u32 %v409_v11, 16 }
  0x89   : > { %v4019_v45 = vld [vmem:[#allocation2 + $0x5c] sm:$0x1]  ;;  %v1084_v43 = vshll.u32 %v4014_v30, 16  ;;  %v1088_v46 = vshrl.u32 %v4014_v30, 16  ;;  %v1077_v52 = vrot.slane %v1075_v40, 4  ;;  %v1080_v53 = vrot.slane %v1078_v42, 5 }
  0x8a   : > { %v1094_v54 = vshll.u32 %v4019_v45, 16  ;;  %290 = vst [vmem:[#allocation2 + $0x24] sm:$0x1] %v289_v25  ;;  %v4026_v49 = vpack.c.b16 %v1296_v12, %v1295_v2  ;;  %v658_v62 = vor.u32 %v656_v21, %v655_v57  ;;  %v659_v44 = vrot.slane %v655_v57, 4 }
  0x8b   : > { %v1086_v50 = vrot.slane %v1084_v43, 5  ;;  %v1090_v63 = vrot.slane %v1088_v46, 4  ;;  %v1081_v59 = vor.u32 %v1080_v53, %v1077_v52  ;;  %v834_v0 = vld [vmem:[#allocation2 + $0xb4] sm:$0xf]  ;;  %v663_v4 = vrot.slane %v661_v51, 7 }
  0x8c   : > { %v1096_v61 = vrot.slane %v1094_v54, 5  ;;  %3241 = vmatmul.msk.bf16.gmra.mxu0 %vm1339_vm12, %v4026_v49  ;;  %v4031_v28 = vld [vmem:[#allocation2 + $0x84] sm:$0xf]  ;;  %v339_v2 = vsel %vm3594_vm5, 0, %v338_v38  ;;  %v835_v20 = vsel %vm3630_vm9, %v658_v62, %v834_v0  ;;  %v385_v12 = vpack.c.bf16 %v242_v5, %v242_v5 }
  0x8d   : > { %v1091_v41 = vor.u32 %v1090_v63, %v1086_v50  ;;  %v1082_v16 = vrot.slane %v1081_v59, 4  ;;  %v1171_v7 = vshrl.u32 %v4031_v28, 16  ;;  %v1174_v19 = vshll.u32 %v4031_v28, 16  ;;  %v838_v21 = vld [vmem:[#allocation2 + $0xbc] sm:$0x1] }
  0x8e   : > { %v4039_v26 = vld [vmem:[#allocation2 + $0x88] sm:$0xf]  ;;  %v666_v40 = vor.u32 %v664_v9, %v663_v4  ;;  %v668_v42 = vrot.slane %v663_v4, 4  ;;  %836 = vst [vmem:[#allocation2 + $0xb4] sm:$0xf] %v835_v20  ;;  %v452_v9 = vshll.u32 %v4023_v47, 16 }
  0x8f   : > { %v1092_v25 = vrot.slane %v1091_v41, 4  ;;  %v1087_v11 = vsel %vm3686_vm13, %v1082_v16, %v1086_v50  ;;  %v4043_v38 = vld [vmem:[#allocation2 + $0x8c] sm:$0x1]  ;;  %v1173_v43 = vrot.slane %v1171_v7, 4  ;;  %v1176_v46 = vrot.slane %v1174_v19, 5 }
  0x90   : > { %v1180_v52 = vshll.u32 %v4039_v26, 16  ;;  %v1305_v54 = vunpack.c.l.b16 %v1087_v11  ;;  %v1184_v57 = vshrl.u32 %v4039_v26, 16  ;;  %v1190_v63 = vshll.u32 %v4043_v38, 16  ;;  %340 = vst [vmem:[#allocation2 + $0x2c] sm:$0x1] %v339_v2 }
  0x91   : > { %v1097_v53 = vsel %vm3686_vm13, %v1092_v25, %v1096_v61  ;;  %v1177_v59 = vor.u32 %v1176_v46, %v1173_v43  ;;  %v667_v50 = vsel %vm3620_vm8, %v659_v44, %v666_v40  ;;  %v839_v5 = vsel %vm3586_vm3, %v668_v42, %v838_v21 }
  0x92   : > { %v1306_v51 = vunpack.c.l.b16 %v1097_v53  ;;  %v1182_v62 = vrot.slane %v1180_v52, 5  ;;  %v1186_v0 = vrot.slane %v1184_v57, 4  ;;  %837 = vst.msk [vmem:[#allocation2 + $0xb8] sm:$0xf] %vm269_vm6, %v667_v50  ;;  %v449_v61 = vshrl.u32 %v4023_v47, 16 }
  0x93   : > { %v1178_v4 = vrot.slane %v1177_v59, 4  ;;  %v1192_v16 = vrot.slane %v1190_v63, 5  ;;  %840 = vst [vmem:[#allocation2 + $0xbc] sm:$0x1] %v839_v5  ;;  %v457_v7 = vshrl.u32 %v385_v12, 16  ;;  %v460_v21 = vshll.u32 %v385_v12, 16 }
  0x94   : > { %v4054_v41 = vpack.c.b16 %v1306_v51, %v1305_v54  ;;  %v1187_v2 = vor.u32 %v1186_v0, %v1182_v62  ;;  %v451_v20 = vrot.slane %v449_v61, 7  ;;  %v750_v47 = vld [vmem:[#allocation2 + $0x24] sm:$0xf]  ;;  %v2480_v12 = vld [vmem:[%s4934_s3 + $0x18] sm:$0xf] }
  0x95   : > { %v1183_v44 = vsel %vm3686_vm13, %v1178_v4, %v1182_v62  ;;  %v4063_v19 = vld [vmem:[#allocation2 + $0xb4] sm:$0xf]  ;;  %v459_v52 = vrot.slane %v457_v7, 7  ;;  %v3507_v4 = vld [vmem:[#allocation2 + $0x4] sm:$0xf] }
  0x96   : > { %4983 = vst [vmem:[#allocation9_spill] sm:$0xff] %v4054_v41  ;;  %3246 = vmatmul.msk.bf16.gmra.mxu1 %vm1339_vm12, %v4054_v41  ;;  %v1188_v25 = vrot.slane %v1187_v2, 4  ;;  %v1267_v40 = vshrl.u32 %v4063_v19, 16  ;;  %v1270_v42 = vshll.u32 %v4063_v19, 16  ;;  %v1313_v11 = vunpack.c.l.b16 %v1183_v44 }
  0x97   : > { %v454_v43 = vor.u32 %v452_v9, %v451_v20  ;;  %v455_v46 = vrot.slane %v451_v20, 4  ;;  %v462_v51 = vor.u32 %v460_v21, %v459_v52  ;;  %v464_v59 = vrot.slane %v459_v52, 4  ;;  %v754_v0 = vld [vmem:[#allocation2 + $0x2c] sm:$0x1]  ;;  %v3509_v52 = vld [vmem:[#allocation2 + $0x8] sm:$0x1] }
  0x98   : > { %v1193_v53 = vsel %vm3686_vm13, %v1188_v25, %v1192_v16  ;;  %v1269_v54 = vrot.slane %v1267_v40, 4  ;;  %v1272_v57 = vrot.slane %v1270_v42, 5  ;;  %v1722_v61 = vrot.slane %v3507_v4, 5  ;;  %v3508_v42 = vld [vmem:[#allocation2] sm:$0xf] }
  0x99   : > { %v1314_v63 = vunpack.c.l.b16 %v1193_v53  ;;  %v751_v62 = vsel %vm3630_vm9, %v454_v43, %v750_v47  ;;  %v4074_v50 = vld [vmem:[#allocation2 + $0xb8] sm:$0xf]  ;;  %v2490_v9 = vsel %vm1388_vm0, %v2480_v12, 0  ;;  %v463_v20 = vsel %vm3620_vm8, %v455_v46, %v462_v51 }
  0x9a   : > { %v1273_v5 = vor.u32 %v1272_v57, %v1269_v54  ;;  %752 = vst [vmem:[#allocation2 + $0x24] sm:$0xf] %v751_v62  ;;  %v4079_v16 = vld [vmem:[#allocation2 + $0xbc] sm:$0x1]  ;;  %v1276_v7 = vshll.u32 %v4074_v50, 16  ;;  %v1280_v44 = vshrl.u32 %v4074_v50, 16  ;;  %2499 = vmatpush.bf16.msra.mxu2 %v2490_v9  ;;  %v755_v40 = vsel %vm3586_vm3, %v464_v59, %v754_v0 }
  0x9b   : > { %v4077_v2 = vpack.c.b16 %v1314_v63, %v1313_v11  ;;  %v1286_v25 = vshll.u32 %v4079_v16, 16  ;;  %753 = vst.msk [vmem:[#allocation2 + $0x28] sm:$0xf] %vm269_vm6, %v463_v20  ;;  %v3335_v47 = vrot.slane %v3508_v42, 9  ;;  %v1725_v53 = vrot.slane %v3509_v52, 5  ;;  %v3477_v0 = vld [vmem:[#allocation2] sm:$0xff] }
  0x9c   : > { %v1274_v21 = vrot.slane %v1273_v5, 4  ;;  %v1278_v11 = vrot.slane %v1276_v7, 5  ;;  %v1282_v43 = vrot.slane %v1280_v44, 4  ;;  %756 = vst [vmem:[#allocation2 + $0x2c] sm:$0x1] %v755_v40  ;;  %v1724_v54 = vrot.slane %v1722_v61, 4 }
  0x9d   : > { %4984 = vst [vmem:[#allocation10_spill] sm:$0xff] %v4077_v2  ;;  %3250 = vmatmul.msk.bf16.gmra.mxu2 %vm1339_vm12, %v4077_v2  ;;  %v1288_v63 = vrot.slane %v1286_v25, 5  ;;  %v1723_v51 = vsel %vm4093_vm2, %v3335_v47, %v1722_v61  ;;  %v2637_v44 = vld [vmem:[%s4934_s3 + $0x1c] sm:$0xf]  ;;  %v2349_v61 = vld [vmem:[%s4934_s3 + $0x14] sm:$0xf] }
  0x9e   : > { %v1279_v57 = vsel %vm3686_vm13, %v1274_v21, %v1278_v11  ;;  %v1283_v12 = vor.u32 %v1282_v43, %v1278_v11  ;;  %v1726_v7 = vsel %vm4093_vm2, %v1724_v54, %v1725_v53  ;;  %v1833_v25 = vunpack.c.l.b16 %v1723_v51  ;;  %v2776_v47 = vld [vmem:[%s4934_s3 + $0x20] sm:$0xf] }
  0x9f   : > { %v1321_v5 = vunpack.c.l.b16 %v1279_v57  ;;  %v2645_v40 = vsel %vm1388_vm0, %v2637_v44, 0  ;;  %v2357_v42 = vsel %vm1388_vm0, %v2349_v61, 0  ;;  %v2784_v51 = vsel %vm1388_vm0, %v2776_v47, 0 }
  0xa0   : > { %v1284_v59 = vrot.slane %v1283_v12, 4  ;;  %2654 = vmatpush.bf16.msra.mxu3 %v2645_v40  ;;  %2366 = vmatpush.bf16.msra.mxu1 %v2357_v42 }
  0xa1   : > { %v4101_v62 = vld [vmem:[#allocation2 + $0x24] sm:$0xf]  ;;  %2793 = vmatpush.bf16.msra.mxu0 %v2784_v51 }
  0xa2   : > { %v979_v4 = vshrl.u32 %v4101_v62, 16  ;;  %v982_v9 = vshll.u32 %v4101_v62, 16  ;;  %v1289_v20 = vsel %vm3686_vm13, %v1284_v59, %v1288_v63  ;;  %v4115_v21 = vld [vmem:[#allocation2 + $0x28] sm:$0xf]  ;;  %v1834_v63 = vunpack.c.l.b16 %v1726_v7 }
  0xa3   : > { %v1322_v11 = vunpack.c.l.b16 %v1289_v20  ;;  %v4122_v43 = vld [vmem:[#allocation2 + $0x2c] sm:$0x1]  ;;  %v988_v54 = vshll.u32 %v4115_v21, 16  ;;  %v992_v57 = vshrl.u32 %v4115_v21, 16 }
  0xa4   : > { %v981_v52 = vrot.slane %v979_v4, 4  ;;  %v984_v53 = vrot.slane %v982_v9, 5  ;;  %v998_v12 = vshll.u32 %v4122_v43, 16  ;;  %v1865_v42 = vpack.c.b16 %v1834_v63, %v1833_v25  ;;  %v3478_v63 = vld [vmem:[#allocation2 + $0xc] sm:$0xff] }
  0xa5   : > { %v4129_v59 = vpack.c.b16 %v1322_v11, %v1321_v5  ;;  %v990_v61 = vrot.slane %v988_v54, 5  ;;  %v994_v4 = vrot.slane %v992_v57, 4  ;;  %v3336_v11 = vrot.slane %v3853_v32, 9 }
  0xa6   : > { %3319 = vmatmul.msk.bf16.vlgmr.msrb.gmra.mxu1 %vm1339_vm12, %v3477_v0  ;;  %v985_v44 = vor.u32 %v984_v53, %v981_v52  ;;  %v1000_v40 = vrot.slane %v998_v12, 5  ;;  %v1729_v0 = vrot.slane %v3826_v48, 5  ;;  %v1732_v54 = vrot.slane %v3862_v36, 5 }
  0xa7   : > { %3254 = vmatmul.msk.bf16.gmra.mxu3 %vm1339_vm12, %v4129_v59  ;;  %v995_v20 = vor.u32 %v994_v4, %v990_v61  ;;  %v1736_v12 = vrot.slane %v3978_v14, 5  ;;  %v1739_v32 = vrot.slane %v3988_v34, 5  ;;  %v4166_v34 = vld [vmem:[#allocation2 + $0x18] sm:$0xff] }
  0xa8   : > { %v986_v9 = vrot.slane %v985_v44, 4  ;;  %v1731_v53 = vrot.slane %v1729_v0, 4  ;;  %v1730_v25 = vsel %vm4093_vm2, %v3336_v11, %v1729_v0 }
  0xa9   : > { %v996_v7 = vrot.slane %v995_v20, 4  ;;  %v1738_v51 = vrot.slane %v1736_v12, 4  ;;  %v1835_v44 = vunpack.c.l.b16 %v1730_v25 }
  0xaa   : > { %v991_v13 = vsel %vm3686_vm13, %v986_v9, %v990_v61  ;;  %v1733_v48 = vsel %vm4093_vm2, %v1731_v53, %v1732_v54  ;;  %v3511_v54 = vld [vmem:[#allocation2 + $0x30] sm:$0xf] }
  0xab   : > { %v1297_v47 = vunpack.c.l.b16 %v991_v13  ;;  %v1001_v5 = vsel %vm3686_vm13, %v996_v7, %v1000_v40  ;;  %v3337_v13 = vrot.slane %v3965_v55, 9  ;;  %v1836_v61 = vunpack.c.l.b16 %v1733_v48 }
  0xac   : > { %v1298_v52 = vunpack.c.l.b16 %v1001_v5  ;;  %v1740_v9 = vsel %vm4093_vm2, %v1738_v51, %v1739_v32  ;;  %v1743_v40 = vrot.slane %v4115_v21, 5  ;;  %v1746_v7 = vrot.slane %v4122_v43, 5  ;;  %v4183_v5 = vld [vmem:[#allocation2 + $0x24] sm:$0xff] }
  0xad   : > { %3351 = vmatmul.msk.bf16.vlgmr.msrb.gmra.mxu2 %vm1339_vm12, %v1865_v42  ;;  %v1737_v36 = vsel %vm4093_vm2, %v3337_v13, %v1736_v12  ;;  %v1838_v20 = vunpack.c.l.b16 %v1740_v9  ;;  %v4158_v55 = vpack.c.b16 %v1836_v61, %v1835_v44  ;;  %v3338_v42 = vrot.slane %v4101_v62, 9  ;;  %v3512_v13 = vld [vmem:[#allocation2 + $0x38] sm:$0x1] }
  0xae   : > { %v4141_v57 = vpack.c.b16 %v1298_v52, %v1297_v47  ;;  %v1837_v4 = vunpack.c.l.b16 %v1737_v36  ;;  %v1745_v0 = vrot.slane %v1743_v40, 4  ;;  %v4191_v43 = vpop.f32.mrf.mxu1  ;;  %v3510_v52 = vld [vmem:[#allocation2 + $0x34] sm:$0xf]  ;;  %v3339_v25 = vrot.slane %v3511_v54, 9 }
  0xaf   : > { %v1750_v53 = vrot.slane %v3510_v52, 5  ;;  %v1753_v12 = vrot.slane %v3512_v13, 5  ;;  %v4201_v36 = vld [vmem:[#allocation2 + $0x30] sm:$0xff] }
  0xb0   : > { %3242 = vmatmul.msk.bf16.gmra.mxu0 %vm1339_vm12, %v4141_v57  ;;  %v4160_v14 = vpack.c.b16 %v1838_v20, %v1837_v4  ;;  %v1747_v47 = vsel %vm4093_vm2, %v1745_v0, %v1746_v7  ;;  %v3513_v20 = vld [vmem:[#allocation2 + $0x40] sm:$0xf]  ;;  %v3514_v7 = vld [vmem:[#allocation2 + $0x3c] sm:$0xf] }
  0xb1   : > { %v1840_v11 = vunpack.c.l.b16 %v1747_v47  ;;  %v1752_v48 = vrot.slane %v1750_v53, 4  ;;  %v1751_v32 = vsel %vm4093_vm2, %v3339_v25, %v1750_v53 }
  0xb2   : > { %v1841_v61 = vunpack.c.l.b16 %v1751_v32 }
  0xb6   : > { %3320 = vmatmul.msk.bf16.gmra.mxu1 %vm1339_vm12, %v3478_v63  ;;  %v4203_v51 = vpop.f32.mrf.mxu1  ;;  %v4227_v25 = vpop.f32.mrf.mxu0 }
  0xb7   : > { %3371 = vmatmul.msk.bf16.vlgmr.msrb.gmra.mxu3 %vm1339_vm12, %v3478_v63  ;;  %v1754_v63 = vsel %vm4093_vm2, %v1752_v48, %v1753_v12  ;;  %v4205_v44 = vpop.f32.mrf.mxu2  ;;  %v4229_v48 = vld [vmem:[#allocation2 + $0x3c] sm:$0xff] }
  0xb8   : > { %v1842_v4 = vunpack.c.l.b16 %v1754_v63  ;;  %4989 = vst [vmem:[#allocation13_spill] sm:$0xff] %v4229_v48 }
  0xba   : > { %v4211_v9 = vpack.c.b16 %v1842_v4, %v1841_v61 }
  0xbc   : > { %4987 = vst [vmem:[#allocation11_spill] sm:$0xff] %v4211_v9 }
  0xbd   : > { %3352 = vmatmul.msk.bf16.gmra.mxu2 %vm1339_vm12, %v4158_v55  ;;  %v4219_v52 = vpop.f32.mrf.mxu3 }
  0xbe   : > { %4988 = vst [vmem:[#allocation12_spill] sm:$0xff] %v4219_v52 }
  0xbf   : > { %v4217_v0 = vpop.f32.mrf.mxu2 }
  0xc0   : > { %3387 = vmatmul.msk.bf16.vlgmr.msrb.gmra.mxu0 %vm1339_vm12, %v3899_v37  ;;  %v1744_v37 = vsel %vm4093_vm2, %v3338_v42, %v1743_v40  ;;  %v1757_v40 = vrot.slane %v3513_v20, 5  ;;  %v1764_v20 = vrot.slane %v3887_v17, 5 }
  0xc1   : > { %v1839_v21 = vunpack.c.l.b16 %v1744_v37  ;;  %v3340_v37 = vrot.slane %v3514_v7, 9 }
  0xc2   : > { %v1759_v47 = vrot.slane %v1757_v40, 4 }
  0xc3   : > { %v4189_v62 = vpack.c.b16 %v1840_v11, %v1839_v21  ;;  %v3515_v21 = vld [vmem:[#allocation2 + $0x44] sm:$0x1]  ;;  %v1758_v53 = vsel %vm4093_vm2, %v3340_v37, %v1757_v40  ;;  %v4244_v40 = vpop.f32.mrf.mxu0  ;;  %v3341_v37 = vrot.slane %v3878_v10, 9 }
  0xc4   : > { %v1760_v11 = vrot.slane %v3515_v21, 5  ;;  %v1843_v12 = vunpack.c.l.b16 %v1758_v53  ;;  %v1767_v21 = vrot.slane %v3893_v23, 5 }
  0xc5   : > { %v4239_v61 = vpop.f32.mrf.mxu3  ;;  %v1765_v17 = vsel %vm4093_vm2, %v3341_v37, %v1764_v20  ;;  %v1771_v37 = vrot.slane %v4014_v30, 5 }
  0xc6   : > { %3321 = vmatmul.msk.bf16.gmra.mxu1 %vm1339_vm12, %v4166_v34  ;;  %v1761_v54 = vsel %vm4093_vm2, %v1759_v47, %v1760_v11  ;;  %4990 = vst [vmem:[#allocation14_spill] sm:$0xff] %v4239_v61  ;;  %v1766_v47 = vrot.slane %v1764_v20, 4  ;;  %v1845_v10 = vunpack.c.l.b16 %v1765_v17  ;;  %v3342_v17 = vrot.slane %v4004_v18, 9 }
  0xc7   : > { %3372 = vmatmul.msk.bf16.gmra.mxu3 %vm1339_vm12, %v4166_v34  ;;  %v1844_v32 = vunpack.c.l.b16 %v1761_v54  ;;  %v4260_v54 = vld [vmem:[#allocation2 + $0x48] sm:$0xff] }
  0xc8   : > { %v1768_v53 = vsel %vm4093_vm2, %v1766_v47, %v1767_v21  ;;  %4992 = vst [vmem:[#allocation16_spill] sm:$0xff] %v4260_v54  ;;  %v1772_v30 = vsel %vm4093_vm2, %v3342_v17, %v1771_v37  ;;  %v3516_v17 = vld [vmem:[#allocation2 + $0x64] sm:$0xf] }
  0xc9   : > { %v4241_v4 = vpack.c.b16 %v1844_v32, %v1843_v12  ;;  %v1846_v23 = vunpack.c.l.b16 %v1768_v53  ;;  %v1773_v53 = vrot.slane %v1771_v37, 4  ;;  %v1847_v18 = vunpack.c.l.b16 %v1772_v30  ;;  %v3517_v30 = vld [vmem:[#allocation2 + $0x68] sm:$0x1] }
  0xcb   : > { %4991 = vst [vmem:[#allocation15_spill] sm:$0xff] %v4241_v4  ;;  %v4272_v20 = vpack.c.b16 %v1846_v23, %v1845_v10 }
  0xcd   : > { %3353 = vmatmul.msk.bf16.gmra.mxu2 %vm1339_vm12, %v4160_v14  ;;  %4994 = vst [vmem:[#allocation18_spill] sm:$0xff] %v4272_v20 }
  0xd0   : > { %3388 = vmatmul.msk.bf16.gmra.mxu0 %vm1339_vm12, %v4026_v49  ;;  %v4213_v42 = vpop.f32.mrf.mxu1 }
  0xd6   : > { %3322 = vmatmul.msk.bf16.gmra.mxu1 %vm1339_vm12, %v4183_v5 }
  0xd7   : > { %3373 = vmatmul.msk.bf16.gmra.mxu3 %vm1339_vm12, %v4183_v5 }
  0xd8   : > { %v4231_v13 = vpop.f32.mrf.mxu1 }
  0xd9   : > { %v4237_v63 = vpop.f32.mrf.mxu2 }
  0xdd   : > { %3354 = vmatmul.msk.bf16.gmra.mxu2 %vm1339_vm12, %v4189_v62 }
  0xdf   : > { %v4262_v12 = vpop.f32.mrf.mxu3 }
  0xe0   : > { %3389 = vmatmul.msk.bf16.gmra.mxu0 %vm1339_vm12, %v4141_v57  ;;  %4993 = vst [vmem:[#allocation17_spill] sm:$0xff] %v4262_v12  ;;  %v1774_v12 = vrot.slane %v4019_v45, 5 }
  0xe1   : > { %v4254_v11 = vpop.f32.mrf.mxu2 }
  0xe2   : > { %v1775_v23 = vsel %vm4093_vm2, %v1773_v53, %v1774_v12  ;;  %v1778_v12 = vrot.slane %v3516_v17, 5 }
  0xe3   : > { %v1848_v45 = vunpack.c.l.b16 %v1775_v23  ;;  %v1781_v23 = vrot.slane %v3517_v30, 5 }
  0xe5   : > { %v4266_v32 = vpop.f32.mrf.mxu0 }
  0xe6   : > { %3323 = vmatmul.msk.bf16.gmra.mxu1 %vm1339_vm12, %v4201_v36 }
  0xe7   : > { %3374 = vmatmul.msk.bf16.gmra.mxu3 %vm1339_vm12, %v4201_v36  ;;  %v4277_v21 = vpop.f32.mrf.mxu3 }
  0xe8   : > { %4996 = vst [vmem:[#allocation20_spill] sm:$0xff] %v4277_v21  ;;  %v4293_v21 = vld [vmem:[#allocation2 + $0x54] sm:$0xff] }
  0xe9   : > { %4997 = vst [vmem:[#allocation21_spill] sm:$0xff] %v4293_v21 }
  0xed   : > { %3355 = vmatmul.msk.bf16.gmra.mxu2 %vm1339_vm12, %v4211_v9  ;;  %v4283_v52 = vpop.f32.mrf.mxu0 }
  0xee   : > { %v4248_v7 = vpop.f32.mrf.mxu1 }
  0xf0   : > { %3390 = vmatmul.msk.bf16.gmra.mxu0 %vm1339_vm12, %v3702_v35 }
  0xf6   : > { %3324 = vmatmul.msk.bf16.gmra.mxu1 %vm1339_vm12, %v4229_v48  ;;  %v4270_v61 = vpop.f32.mrf.mxu1 }
  0xf7   : > { %3375 = vmatmul.msk.bf16.gmra.mxu3 %vm1339_vm12, %v4229_v48  ;;  %v1780_v48 = vrot.slane %v1778_v12, 4 }
  0xf9   : > { %v1782_v17 = vsel %vm4093_vm2, %v1780_v48, %v1781_v23  ;;  %v3519_v48 = vld [vmem:[#allocation2 + $0x70] sm:$0xf] }
  0xfa   : > { %v1785_v23 = vrot.slane %v3519_v48, 5 }
  0xfc   : > { %v4275_v47 = vpop.f32.mrf.mxu2 }
  0xfd   : > { %3356 = vmatmul.msk.bf16.gmra.mxu2 %vm1339_vm12, %v4241_v4  ;;  %4995 = vst [vmem:[#allocation19_spill] sm:$0xff] %v4275_v47 }
 0x100   : > { %3391 = vmatmul.msk.bf16.gmra.mxu0 %vm1339_vm12, %v3813_v31  ;;  %v3518_v31 = vld [vmem:[#allocation2 + $0x60] sm:$0xf] }
 0x101   : > { %v3343_v4 = vrot.slane %v3518_v31, 9 }
 0x106   : > { %3325 = vmatmul.msk.bf16.gmra.mxu1 %vm1339_vm12, %v4260_v54 }
 0x107   : > { %3376 = vmatmul.msk.bf16.gmra.mxu3 %vm1339_vm12, %v4260_v54  ;;  %v4299_v54 = vpop.f32.mrf.mxu3 }
 0x108   : > { %4999 = vst [vmem:[#allocation23_spill] sm:$0xff] %v4299_v54 }
 0x109   : > { %v4307_v53 = vpop.f32.mrf.mxu0 }
 0x10d   : > { %3357 = vmatmul.msk.bf16.gmra.mxu2 %vm1339_vm12, %v4272_v20  ;;  %v4297_v20 = vpop.f32.mrf.mxu2 }
 0x10e   : > { %4998 = vst [vmem:[#allocation22_spill] sm:$0xff] %v4297_v20  ;;  %v3521_v20 = vld [vmem:[#allocation2 + $0x6c] sm:$0xf] }
 0x10f   : > { %v4313_v35 = vpop.f32.mrf.mxu3 }
 0x110   : > { %3392 = vmatmul.msk.bf16.gmra.mxu0 %vm1339_vm12, %v3937_v29  ;;  %v4303_v29 = vpack.c.b16 %v1848_v45, %v1847_v18  ;;  %5002 = vst [vmem:[#allocation26_spill] sm:$0xff] %v4313_v35  ;;  %v1779_v45 = vsel %vm4093_vm2, %v3343_v4, %v1778_v12 }
 0x111   : > { %v4324_v31 = vpop.f32.mrf.mxu0  ;;  %v1849_v35 = vunpack.c.l.b16 %v1779_v45  ;;  %v3344_v45 = vrot.slane %v3521_v20, 9 }
 0x112   : > { %5000 = vst [vmem:[#allocation24_spill] sm:$0xff] %v4303_v29 }
 0x113   : > { %v4287_v10 = vpop.f32.mrf.mxu1 }
 0x116   : > { %3326 = vmatmul.msk.bf16.gmra.mxu1 %vm1339_vm12, %v4293_v21 }
 0x117   : > { %3377 = vmatmul.msk.bf16.gmra.mxu3 %vm1339_vm12, %v4293_v21  ;;  %v1850_v21 = vunpack.c.l.b16 %v1782_v17  ;;  %v1787_v17 = vrot.slane %v1785_v23, 4 }
 0x119   : > { %v4332_v4 = vpack.c.b16 %v1850_v21, %v1849_v35  ;;  %v1786_v21 = vsel %vm4093_vm2, %v3344_v45, %v1785_v23 }
 0x11b   : > { %v4305_v37 = vpop.f32.mrf.mxu1  ;;  %5005 = vst [vmem:[#allocation29_spill] sm:$0xff] %v4332_v4 }
 0x11d   : > { %3358 = vmatmul.msk.bf16.gmra.mxu2 %vm1339_vm12, %v4303_v29  ;;  %v4321_v29 = vld [vmem:[#allocation2 + $0x60] sm:$0xff] }
 0x11e   : > { %5003 = vst [vmem:[#allocation27_spill] sm:$0xff] %v4321_v29 }
 0x120   : > { %v4311_v54 = vpop.f32.mrf.mxu2  ;;  %3393 = vmatmul.msk.bf16.gmra.mxu0 %vm1339_vm12, %v4054_v41 }
 0x121   : > { %5001 = vst [vmem:[#allocation25_spill] sm:$0xff] %v4311_v54 }
 0x123   : > { %v1621_v18 = vpop.f32.mrf.mxu1 }
 0x124   : > { %v1622_v30 = vadd.f32 %v1621_v18, %v4227_v25  ;;  %v3520_v25 = vld [vmem:[#allocation2 + $0x74] sm:$0x1] }
 0x125   : > { %v1788_v18 = vrot.slane %v3520_v25, 5  ;;  %v4348_v25 = vld [vmem:[#allocation2 + $0x6c] sm:$0xff] }
 0x126   : > { %3327 = vmatmul.msk.bf16.gmra.mxu1 %vm1339_vm12, %v4321_v29  ;;  %5008 = vst [vmem:[#allocation32_spill] sm:$0xff] %v4348_v25 }
 0x127   : > { %3378 = vmatmul.msk.bf16.gmra.mxu3 %vm1339_vm12, %v4321_v29  ;;  %v1789_v48 = vsel %vm4093_vm2, %v1787_v17, %v1788_v18 }
 0x128   : > { %v4330_v41 = vpop.f32.mrf.mxu2 }
 0x129   : > { %5004 = vst [vmem:[#allocation28_spill] sm:$0xff] %v4330_v41 }
 0x12a   : > { %v4334_v54 = vpop.f32.mrf.mxu3 }
 0x12b   : > { %v1623_v12 = vpop.f32.mrf.mxu1  ;;  %5006 = vst [vmem:[#allocation30_spill] sm:$0xff] %v4334_v54 }
 0x12d   : > { %3359 = vmatmul.msk.bf16.gmra.mxu2 %vm1339_vm12, %v4332_v4  ;;  %v4338_v9 = vpop.f32.mrf.mxu0 }
 0x130   : > { %v1941_v29 = vpop.f32.mrf.mxu2  ;;  %3394 = vmatmul.msk.bf16.gmra.mxu0 %vm1339_vm12, %v3722_v56  ;;  %v1624_v56 = vadd.f32 %v1623_v12, %v4244_v40 }
 0x131   : > { %v2021_v47 = vadd.f32 %v1941_v29, %v1622_v30  ;;  %v1851_v29 = vunpack.c.l.b16 %v1786_v21  ;;  %v1852_v30 = vunpack.c.l.b16 %v1789_v48  ;;  %v1795_v21 = vrot.slane %v3930_v15, 5  ;;  %v4373_v15 = vld [vmem:[#allocation2 + $0x78] sm:$0xff] }
 0x132   : > { %v4346_v54 = vpop.f32.mrf.mxu3  ;;  %v3345_v48 = vrot.slane %v3913_v1, 9 }
 0x133   : > { %v1626_v35 = vpop.f32.mrf.mxu1  ;;  %5007 = vst [vmem:[#allocation31_spill] sm:$0xff] %v4346_v54  ;;  %v4358_v45 = vpack.c.b16 %v1852_v30, %v1851_v29  ;;  %v1792_v54 = vrot.slane %v3923_v8, 5 }
 0x134   : > { %v1627_v20 = vadd.f32 %v1626_v35, %v4266_v32 }
 0x135   : > { %v4353_v4 = vpop.f32.mrf.mxu0  ;;  %v1794_v40 = vrot.slane %v1792_v54, 4  ;;  %v1793_v8 = vsel %vm4093_vm2, %v3345_v48, %v1792_v54 }
 0x136   : > { %3328 = vmatmul.msk.bf16.gmra.mxu1 %vm1339_vm12, %v4348_v25 }
 0x137   : > { %3379 = vmatmul.msk.bf16.gmra.mxu3 %vm1339_vm12, %v4348_v25 }
 0x138   : > { %v1943_v23 = vpop.f32.mrf.mxu2 }
 0x139   : > { %v2022_v18 = vadd.f32 %v1943_v23, %v1624_v56 }
 0x13a   : > { %v2074_v32 = vpop.f32.mrf.mxu3 }
 0x13b   : > { %v1628_v17 = vpop.f32.mrf.mxu1  ;;  %v2154_v35 = vadd.f32 %v2074_v32, %v2021_v47  ;;  %v1796_v47 = vsel %vm4093_vm2, %v1794_v40, %v1795_v21 }
 0x13d   : > { %3360 = vmatmul.msk.bf16.gmra.mxu2 %vm1339_vm12, %v4358_v45  ;;  %v2229_v12 = vpop.f32.mrf.mxu0 }
 0x13e   : > { %v4365_v25 = vadd.f32 %v2229_v12, %v2154_v35  ;;  %v1629_v35 = vadd.f32 %v1628_v17, %v4283_v52  ;;  %v1802_v52 = vrot.slane %v4043_v38, 5  ;;  %v3346_v17 = vrot.slane %v4031_v28, 9  ;;  %v4399_v38 = vld [vmem:[#allocation2 + $0x84] sm:$0xff] }
 0x140   : > { %v1946_v41 = vpop.f32.mrf.mxu2  ;;  %3395 = vmatmul.msk.bf16.gmra.mxu0 %vm1339_vm12, %v3830_v58 }
 0x141   : > { %v2023_v56 = vadd.f32 %v1946_v41, %v1627_v20  ;;  %v1853_v41 = vunpack.c.l.b16 %v1793_v8  ;;  %v1854_v20 = vunpack.c.l.b16 %v1796_v47 }
 0x142   : > { %v2076_v30 = vpop.f32.mrf.mxu3 }
 0x143   : > { %v1631_v29 = vpop.f32.mrf.mxu1  ;;  %v2155_v23 = vadd.f32 %v2076_v30, %v2022_v18  ;;  %v4383_v40 = vpack.c.b16 %v1854_v20, %v1853_v41 }
 0x144   : > { %v1632_v1 = vadd.f32 %v1631_v29, %v4307_v53  ;;  %v1799_v53 = vrot.slane %v4039_v26, 5 }
 0x145   : > { %v2231_v32 = vpop.f32.mrf.mxu0 }
 0x146   : > { %3329 = vmatmul.msk.bf16.gmra.mxu1 %vm1339_vm12, %v4373_v15  ;;  %v4381_v48 = vadd.f32 %v2231_v32, %v2155_v23  ;;  %v1801_v47 = vrot.slane %v1799_v53, 4 }
 0x147   : > { %3380 = vmatmul.msk.bf16.gmra.mxu3 %vm1339_vm12, %v4373_v15 }
 0x148   : > { %v1948_v54 = vpop.f32.mrf.mxu2  ;;  %5009 = vst [vmem:[#allocation33_spill] sm:$0xff] %v4381_v48 }
 0x149   : > { %v2024_v21 = vadd.f32 %v1948_v54, %v1629_v35 }
 0x14a   : > { %v2079_v18 = vpop.f32.mrf.mxu3 }
 0x14b   : > { %v1633_v12 = vpop.f32.mrf.mxu1  ;;  %v2156_v8 = vadd.f32 %v2079_v18, %v2023_v56  ;;  %v1803_v56 = vsel %vm4093_vm2, %v1801_v47, %v1802_v52  ;;  %v3522_v47 = vld [vmem:[#allocation2 + $0x94] sm:$0xf] }
 0x14c   : > { %v1634_v29 = vadd.f32 %v1633_v12, %v4324_v31  ;;  %v1800_v31 = vsel %vm4093_vm2, %v3346_v17, %v1799_v53  ;;  %v1856_v54 = vunpack.c.l.b16 %v1803_v56  ;;  %v3524_v56 = vld [vmem:[#allocation2 + $0x90] sm:$0xf] }
 0x14d   : > { %3361 = vmatmul.msk.bf16.gmra.mxu2 %vm1339_vm12, %v4383_v40  ;;  %v2234_v30 = vpop.f32.mrf.mxu0 }
 0x14e   : > { %v4391_v32 = vadd.f32 %v2234_v30, %v2156_v8  ;;  %v1806_v30 = vrot.slane %v3522_v47, 5 }
 0x150   : > { %v1951_v23 = vpop.f32.mrf.mxu2  ;;  %5010 = vst [vmem:[#allocation34_spill] sm:$0xff] %v4391_v32  ;;  %3396 = vmatmul.msk.bf16.gmra.mxu0 %vm1339_vm12, %v3950_v22  ;;  %v1808_v32 = vrot.slane %v1806_v30, 4 }
 0x151   : > { %v2025_v41 = vadd.f32 %v1951_v23, %v1632_v1  ;;  %v1855_v1 = vunpack.c.l.b16 %v1800_v31 }
 0x152   : > { %v2081_v20 = vpop.f32.mrf.mxu3 }
 0x153   : > { %v1636_v26 = vpop.f32.mrf.mxu1  ;;  %v2157_v35 = vadd.f32 %v2081_v20, %v2024_v21  ;;  %v4408_v52 = vpack.c.b16 %v1856_v54, %v1855_v1  ;;  %v3347_v20 = vrot.slane %v3524_v56, 9 }
 0x154   : > { %v1637_v28 = vadd.f32 %v1636_v26, %v4338_v9  ;;  %v3523_v26 = vld [vmem:[#allocation2 + $0x98] sm:$0x1] }
 0x155   : > { %v2236_v12 = vpop.f32.mrf.mxu0  ;;  %5012 = vst [vmem:[#allocation36_spill] sm:$0xff] %v4408_v52  ;;  %v1809_v31 = vrot.slane %v3523_v26, 5 }
 0x156   : > { %3330 = vmatmul.msk.bf16.gmra.mxu1 %vm1339_vm12, %v4399_v38  ;;  %v4406_v53 = vadd.f32 %v2236_v12, %v2157_v35 }
 0x157   : > { %3381 = vmatmul.msk.bf16.gmra.mxu3 %vm1339_vm12, %v4399_v38 }
 0x158   : > { %v1953_v18 = vpop.f32.mrf.mxu2  ;;  %5011 = vst [vmem:[#allocation35_spill] sm:$0xff] %v4406_v53 }
 0x159   : > { %v2026_v8 = vadd.f32 %v1953_v18, %v1634_v29 }
 0x15a   : > { %v2084_v9 = vpop.f32.mrf.mxu3 }
 0x15b   : > { %v1638_v17 = vpop.f32.mrf.mxu1  ;;  %v2158_v23 = vadd.f32 %v2084_v9, %v2025_v41  ;;  %v1810_v41 = vsel %vm4093_vm2, %v1808_v32, %v1809_v31  ;;  %v3525_v31 = vld [vmem:[#allocation2 + $0xa0] sm:$0xf] }
 0x15c   : > { %v1639_v21 = vadd.f32 %v1638_v17, %v4353_v4  ;;  %v1807_v4 = vsel %vm4093_vm2, %v3347_v20, %v1806_v30  ;;  %v4421_v17 = vld [vmem:[#allocation2 + $0x90] sm:$0xff] }
 0x15d   : > { %3362 = vmatmul.msk.bf16.gmra.mxu2 %vm1339_vm12, %v4408_v52  ;;  %v2239_v35 = vpop.f32.mrf.mxu0  ;;  %5014 = vst [vmem:[#allocation38_spill] sm:$0xff] %v4421_v17  ;;  %v1857_v9 = vunpack.c.l.b16 %v1807_v4  ;;  %v3526_v4 = vld [vmem:[#allocation2 + $0xa4] sm:$0x1] }
 0x15e   : > { %v4413_v29 = vadd.f32 %v2239_v35, %v2158_v23  ;;  %v1858_v23 = vunpack.c.l.b16 %v1810_v41  ;;  %v1813_v35 = vrot.slane %v3525_v31, 5  ;;  %v1816_v41 = vrot.slane %v3526_v4, 5 }
 0x160   : > { %v1956_v12 = vpop.f32.mrf.mxu2  ;;  %5013 = vst [vmem:[#allocation37_spill] sm:$0xff] %v4413_v29  ;;  %3397 = vmatmul.msk.bf16.gmra.mxu0 %vm1339_vm12, %v4077_v2  ;;  %v4429_v20 = vpack.c.b16 %v1858_v23, %v1857_v9  ;;  %v1815_v53 = vrot.slane %v1813_v35, 4  ;;  %v3528_v2 = vld [vmem:[#allocation2 + $0xac] sm:$0xf] }
 0x161   : > { %v2027_v1 = vadd.f32 %v1956_v12, %v1637_v28 }
 0x162   : > { %v2086_v18 = vpop.f32.mrf.mxu3  ;;  %5016 = vst [vmem:[#allocation40_spill] sm:$0xff] %v4429_v20  ;;  %v1817_v31 = vsel %vm4093_vm2, %v1815_v53, %v1816_v41  ;;  %v377_v41 = vld [vmem:[#allocation2 + $0xc8] sm:$0x1] }
 0x163   : > { %v1641_v54 = vpop.f32.mrf.mxu1  ;;  %v2159_v47 = vadd.f32 %v2086_v18, %v2026_v8  ;;  %v3527_v18 = vld [vmem:[#allocation2 + $0x9c] sm:$0xf] }
 0x164   : > { %v3348_v29 = vrot.slane %v3527_v18, 9  ;;  %v4442_v18 = vld [vmem:[#allocation2 + $0x9c] sm:$0xff] }
 0x165   : > { %v2241_v28 = vpop.f32.mrf.mxu0  ;;  %5018 = vst [vmem:[#allocation42_spill] sm:$0xff] %v4442_v18 }
 0x166   : > { %3331 = vmatmul.msk.bf16.gmra.mxu1 %vm1339_vm12, %v4421_v17  ;;  %v4427_v56 = vadd.f32 %v2241_v28, %v2159_v47 }
 0x167   : > { %3382 = vmatmul.msk.bf16.gmra.mxu3 %vm1339_vm12, %v4421_v17 }
 0x168   : > { %v1958_v26 = vpop.f32.mrf.mxu2  ;;  %5015 = vst [vmem:[#allocation39_spill] sm:$0xff] %v4427_v56  ;;  %v267_v56 = vld [vmem:[%s3604_s23 + $0xf0] sm:$0xff] }
 0x169   : > { %v2028_v30 = vadd.f32 %v1958_v26, %v1639_v21  ;;  %v1642_v21 = vadd.f32 %v1641_v54, %v4191_v43  ;;  %v1814_v26 = vsel %vm4093_vm2, %v3348_v29, %v1813_v35  ;;  %v268_v43 = vld [vmem:[%s3604_s23 + $0xf8] sm:$0xff]  ;;  %v1860_v35 = vunpack.c.l.b16 %v1817_v31 }
 0x16a   : > { %v2089_v12 = vpop.f32.mrf.mxu3  ;;  %v1859_v29 = vunpack.c.l.b16 %v1814_v26 }
 0x16b   : > { %v1643_v32 = vpop.f32.mrf.mxu1  ;;  %v2160_v8 = vadd.f32 %v2089_v12, %v2027_v1  ;;  %v327_v12 = vld [vmem:[#allocation2 + $0xc0] sm:$0x1] }
 0x16c   : > { %v328_v54 = vsel %vm3586_vm3, 0, %v327_v12  ;;  %v4455_v31 = vpack.c.b16 %v1860_v35, %v1859_v29 }
 0x16d   : > { %3363 = vmatmul.msk.bf16.gmra.mxu2 %vm1339_vm12, %v4429_v20  ;;  %v2244_v47 = vpop.f32.mrf.mxu0  ;;  %329 = vst [vmem:[#allocation2 + $0xc0] sm:$0x1] %v328_v54  ;;  %v378_v20 = vsel %vm3594_vm5, 0, %v377_v41 }
 0x16e   : > { %v4434_v23 = vadd.f32 %v2244_v47, %v2160_v8  ;;  %v410_v47 = vpack.c.bf16 %v267_v56, %v267_v56  ;;  %379 = vst [vmem:[#allocation2 + $0xc8] sm:$0x1] %v378_v20  ;;  %v3529_v20 = vld [vmem:[#allocation2 + $0xb0] sm:$0x1] }
 0x170   : > { %v1961_v9 = vpop.f32.mrf.mxu2  ;;  %5017 = vst [vmem:[#allocation41_spill] sm:$0xff] %v4434_v23  ;;  %3398 = vmatmul.msk.bf16.gmra.mxu0 %vm1339_vm12, %v3755_v27  ;;  %v1644_v27 = vadd.f32 %v1643_v32, %v4203_v51  ;;  %v673_v12 = vshll.u32 %v410_v47, 16  ;;  %v1820_v51 = vrot.slane %v3528_v2, 5  ;;  %v3530_v2 = vld [vmem:[#allocation2 + $0xa8] sm:$0xf] }
 0x171   : > { %v2029_v28 = vadd.f32 %v1961_v9, %v1642_v21  ;;  %v411_v21 = vpack.c.bf16 %v268_v43, %v268_v43  ;;  %v670_v9 = vshrl.u32 %v410_v47, 16 }
 0x172   : > { %v2091_v4 = vpop.f32.mrf.mxu3 }
 0x173   : > { %v1646_v1 = vpop.f32.mrf.mxu1  ;;  %v2161_v8 = vadd.f32 %v2091_v4, %v2028_v30  ;;  %v678_v53 = vshrl.u32 %v411_v21, 16  ;;  %v672_v56 = vrot.slane %v670_v9, 7  ;;  %v681_v43 = vshll.u32 %v411_v21, 16 }
 0x174   : > { %v841_v48 = vld [vmem:[#allocation2 + $0xc0] sm:$0xf]  ;;  %v1822_v21 = vrot.slane %v1820_v51, 4 }
 0x175   : > { %v2246_v23 = vpop.f32.mrf.mxu0  ;;  %v680_v4 = vrot.slane %v678_v53, 7  ;;  %v675_v32 = vor.u32 %v673_v12, %v672_v56  ;;  %v676_v6 = vrot.slane %v672_v56, 4  ;;  %v845_v33 = vld [vmem:[#allocation2 + $0xc8] sm:$0x1] }
 0x176   : > { %3332 = vmatmul.msk.bf16.gmra.mxu1 %vm1339_vm12, %v4442_v18  ;;  %v4457_v54 = vadd.f32 %v2246_v23, %v2161_v8  ;;  %v1823_v23 = vrot.slane %v3529_v20, 5  ;;  %v3349_v8 = vrot.slane %v3530_v2, 9 }
 0x177   : > { %3383 = vmatmul.msk.bf16.gmra.mxu3 %vm1339_vm12, %v4442_v18  ;;  %v683_v41 = vor.u32 %v681_v43, %v680_v4  ;;  %v685_v29 = vrot.slane %v680_v4, 4 }
 0x178   : > { %v1963_v30 = vpop.f32.mrf.mxu2  ;;  %v1824_v56 = vsel %vm4093_vm2, %v1822_v21, %v1823_v23  ;;  %v1830_v23 = vrot.slane %v4079_v16, 5 }
 0x179   : > { %v2030_v26 = vadd.f32 %v1963_v30, %v1644_v27  ;;  %v684_v47 = vsel %vm3620_vm8, %v676_v6, %v683_v41  ;;  %v842_v27 = vsel %vm3630_vm9, %v675_v32, %v841_v48  ;;  %v846_v9 = vsel %vm3586_vm3, %v685_v29, %v845_v33 }
 0x17a   : > { %v2094_v52 = vpop.f32.mrf.mxu3  ;;  %844 = vst.msk [vmem:[#allocation2 + $0xc4] sm:$0xf] %vm269_vm6, %v684_v47  ;;  %v1821_v30 = vsel %vm4093_vm2, %v3349_v8, %v1820_v51 }
 0x17b   : > { %v1648_v17 = vpop.f32.mrf.mxu1  ;;  %v2162_v18 = vadd.f32 %v2094_v52, %v2029_v28  ;;  %843 = vst [vmem:[#allocation2 + $0xc0] sm:$0xf] %v842_v27  ;;  %v1647_v52 = vadd.f32 %v1646_v1, %v4213_v42  ;;  %v4477_v1 = vld [vmem:[#allocation2 + $0xa8] sm:$0xff]  ;;  %v1861_v3 = vunpack.c.l.b16 %v1821_v30 }
 0x17c   : > { %847 = vst [vmem:[#allocation2 + $0xc8] sm:$0x1] %v846_v9  ;;  %v1649_v43 = vadd.f32 %v1648_v17, %v4231_v13  ;;  %v3350_v13 = vrot.slane %v4063_v19, 9  ;;  %v4502_v19 = vld [vmem:[#allocation2 + $0xb4] sm:$0xff] }
 0x17d   : > { %3364 = vmatmul.msk.bf16.gmra.mxu2 %vm1339_vm12, %v4455_v31  ;;  %v2249_v35 = vpop.f32.mrf.mxu0 }
 0x17e   : > { %v4469_v53 = vadd.f32 %v2249_v35, %v2162_v18  ;;  %v1862_v18 = vunpack.c.l.b16 %v1824_v56 }
 0x180   : > { %v1966_v28 = vpop.f32.mrf.mxu2  ;;  %3399 = vmatmul.msk.bf16.gmra.mxu0 %vm1339_vm12, %v3851_v24  ;;  %v4486_v41 = vpack.c.b16 %v1862_v18, %v1861_v3 }
 0x181   : > { %v2031_v39 = vadd.f32 %v1966_v28, %v1647_v52  ;;  %v5019_v52 = vld [vmem:[#allocation8_spill] sm:$0xff] }
 0x182   : > { %v2096_v42 = vpop.f32.mrf.mxu3  ;;  %v4504_v9 = vld [vmem:[#allocation2 + $0xc4] sm:$0xf] }
 0x183   : > { %v1651_v48 = vpop.f32.mrf.mxu1  ;;  %v2163_v12 = vadd.f32 %v2096_v42, %v2030_v26  ;;  %v1827_v26 = vrot.slane %v4074_v50, 5  ;;  %v2196_v56 = vshll.u32 %v4504_v9, 16 }
 0x184   : > { %v1652_v8 = vadd.f32 %v1651_v48, %v4248_v7 }
 0x185   : > { %v2251_v4 = vpop.f32.mrf.mxu0  ;;  %v1829_v17 = vrot.slane %v1827_v26, 4  ;;  %v1828_v33 = vsel %vm4093_vm2, %v3350_v13, %v1827_v26 }
 0x186   : > { %3333 = vmatmul.msk.bf16.gmra.mxu1 %vm1339_vm12, %v4477_v1  ;;  %v4484_v51 = vadd.f32 %v2251_v4, %v2163_v12  ;;  %v1863_v48 = vunpack.c.l.b16 %v1828_v33  ;;  %v2200_v4 = vshrl.u32 %v4504_v9, 16 }
 0x187   : > { %3384 = vmatmul.msk.bf16.gmra.mxu3 %vm1339_vm12, %v4477_v1  ;;  %v1831_v16 = vsel %vm4093_vm2, %v1829_v17, %v1830_v23 }
 0x188   : > { %v1968_v32 = vpop.f32.mrf.mxu2  ;;  %v1864_v30 = vunpack.c.l.b16 %v1831_v16 }
 0x189   : > { %v2032_v6 = vadd.f32 %v1968_v32, %v1649_v43 }
 0x18a   : > { %v2099_v27 = vpop.f32.mrf.mxu3  ;;  %v4519_v26 = vpack.c.b16 %v1864_v30, %v1863_v48 }
 0x18b   : > { %v1653_v47 = vpop.f32.mrf.mxu1  ;;  %v2164_v20 = vadd.f32 %v2099_v27, %v2031_v39  ;;  %v4506_v39 = vld [vmem:[#allocation2 + $0xc0] sm:$0xf] }
 0x18c   : > { %v1654_v12 = vadd.f32 %v1653_v47, %v4270_v61  ;;  %v2187_v3 = vshrl.u32 %v4506_v39, 16  ;;  %v2190_v18 = vshll.u32 %v4506_v39, 16  ;;  %v2198_v61 = vrot.slane %v2196_v56, 5 }
 0x18d   : > { %3365 = vmatmul.msk.bf16.gmra.mxu2 %vm1339_vm12, %v4486_v41  ;;  %v2254_v2 = vpop.f32.mrf.mxu0  ;;  %v2202_v47 = vrot.slane %v2200_v4, 4  ;;  %v4531_v4 = vld [vmem:[#allocation2 + $0xc0] sm:$0xff] }
 0x18e   : > { %v4494_v29 = vadd.f32 %v2254_v2, %v2164_v20  ;;  %v2189_v23 = vrot.slane %v2187_v3, 4  ;;  %v2192_v13 = vrot.slane %v2190_v18, 5  ;;  %v4521_v2 = vld [vmem:[#allocation2 + $0xc8] sm:$0x1] }
 0x18f   : > { %v2203_v16 = vor.u32 %v2202_v47, %v2198_v61 }
 0x190   : > { %v1971_v21 = vpop.f32.mrf.mxu2  ;;  %3400 = vmatmul.msk.bf16.gmra.mxu0 %vm1339_vm12, %v5019_v52  ;;  %v2193_v33 = vor.u32 %v2192_v13, %v2189_v23 }
 0x191   : > { %v2033_v35 = vadd.f32 %v1971_v21, %v1652_v8 }
 0x192   : > { %v2101_v28 = vpop.f32.mrf.mxu3 }
 0x193   : > { %v1656_v50 = vpop.f32.mrf.mxu1  ;;  %v2165_v7 = vadd.f32 %v2101_v28, %v2032_v6  ;;  %v2206_v28 = vshll.u32 %v4521_v2, 16 }
 0x194   : > { %v1657_v21 = vadd.f32 %v1656_v50, %v4287_v10 }
 0x195   : > { %v2256_v42 = vpop.f32.mrf.mxu0  ;;  %v2208_v3 = vrot.slane %v2206_v28, 5 }
 0x196   : > { %3334 = vmatmul.msk.bf16.gmra.mxu1 %vm1339_vm12, %v4502_v19  ;;  %v4517_v32 = vadd.f32 %v2256_v42, %v2165_v7  ;;  %v2194_v42 = vrot.slane %v2193_v33, 4 }
 0x197   : > { %3385 = vmatmul.msk.bf16.gmra.mxu3 %vm1339_vm12, %v4502_v19 }
 0x198   : > { %v1973_v43 = vpop.f32.mrf.mxu2  ;;  %v2199_v50 = vsel %vm3686_vm13, %v2194_v42, %v2198_v61 }
 0x199   : > { %v2034_v6 = vadd.f32 %v1973_v43, %v1654_v12  ;;  %v2204_v12 = vrot.slane %v2203_v16, 4  ;;  %v2211_v47 = vunpack.c.l.b16 %v2199_v50 }
 0x19a   : > { %v2104_v20 = vpop.f32.mrf.mxu3 }
 0x19b   : > { %v1658_v27 = vpop.f32.mrf.mxu1  ;;  %v2166_v17 = vadd.f32 %v2104_v20, %v2033_v35  ;;  %v2209_v43 = vsel %vm3686_vm13, %v2204_v12, %v2208_v3 }
 0x19c   : > { %v1659_v20 = vadd.f32 %v1658_v27, %v4305_v37 }
 0x19d   : > { %3366 = vmatmul.msk.bf16.gmra.mxu2 %vm1339_vm12, %v4519_v26  ;;  %v2259_v8 = vpop.f32.mrf.mxu0 }
 0x19e   : > { %v4527_v48 = vadd.f32 %v2259_v8, %v2166_v17  ;;  %v2212_v17 = vunpack.c.l.b16 %v2209_v43 }
 0x1a0   : > { %v1976_v7 = vpop.f32.mrf.mxu2  ;;  %3401 = vmatmul.msk.bf16.gmra.mxu0 %vm1339_vm12, %v4129_v59  ;;  %v4546_v61 = vpack.c.b16 %v2212_v17, %v2211_v47 }
 0x1a1   : > { %v2035_v30 = vadd.f32 %v1976_v7, %v1657_v21 }
 0x1a2   : > { %v2106_v56 = vpop.f32.mrf.mxu3 }
 0x1a3   : > { %v1661_v35 = vpop.f32.mrf.mxu1  ;;  %v2167_v18 = vadd.f32 %v2106_v56, %v2034_v6 }
 0x1a4   : > { %v1662_v37 = vadd.f32 %v1661_v35, %v4205_v44 }
 0x1a5   : > { %v2261_v10 = vpop.f32.mrf.mxu0 }
 0x1a6   : > { %3404 = vmatmul.msk.bf16.vlgmr.msra.gmra.mxu1 %vm1339_vm12, %v4158_v55  ;;  %v4542_v13 = vadd.f32 %v2261_v10, %v2167_v18 }
 0x1a7   : > { %3386 = vmatmul.msk.bf16.gmra.mxu3 %vm1339_vm12, %v4531_v4 }
 0x1a8   : > { %v1978_v23 = vpop.f32.mrf.mxu2 }
 0x1a9   : > { %v2036_v6 = vadd.f32 %v1978_v23, %v1659_v20 }
 0x1aa   : > { %v2109_v55 = vpop.f32.mrf.mxu3 }
 0x1ab   : > { %v1663_v8 = vpop.f32.mrf.mxu1  ;;  %v2168_v21 = vadd.f32 %v2109_v55, %v2035_v30 }
 0x1ad   : > { %3424 = vmatmul.msk.bf16.vlgmr.msra.gmra.mxu2 %vm1339_vm12, %v4166_v34  ;;  %v2264_v33 = vpop.f32.mrf.mxu0  ;;  %v1664_v34 = vadd.f32 %v1663_v8, %v4217_v0 }
 0x1ae   : > { %v4549_v16 = vadd.f32 %v2264_v33, %v2168_v21 }
 0x1b0   : > { %v1981_v27 = vpop.f32.mrf.mxu2  ;;  %3402 = vmatmul.msk.bf16.gmra.mxu0 %vm1339_vm12, %v4546_v61 }
 0x1b1   : > { %v2037_v28 = vadd.f32 %v1981_v27, %v1662_v37  ;;  %v5020_v27 = vld [vmem:[#allocation19_spill] sm:$0xff] }
 0x1b2   : > { %v2111_v56 = vpop.f32.mrf.mxu3 }
 0x1b3   : > { %v1666_v7 = vpop.f32.mrf.mxu1  ;;  %v2169_v42 = vadd.f32 %v2111_v56, %v2036_v6 }
 0x1b4   : > { %v1667_v43 = vadd.f32 %v1666_v7, %v4237_v63 }
 0x1b5   : > { %v2266_v30 = vpop.f32.mrf.mxu0 }
 0x1b6   : > { %3405 = vmatmul.msk.bf16.gmra.mxu1 %vm1339_vm12, %v4160_v14  ;;  %v4558_v35 = vadd.f32 %v2266_v30, %v2169_v42 }
 0x1b7   : > { %3440 = vmatmul.msk.bf16.vlgmr.msra.gmra.mxu3 %vm1339_vm12, %v4026_v49 }
 0x1b8   : > { %v1983_v44 = vpop.f32.mrf.mxu2 }
 0x1b9   : > { %v2038_v12 = vadd.f32 %v1983_v44, %v1664_v34  ;;  %v5021_v34 = vld [vmem:[#allocation11_spill] sm:$0xff] }
 0x1ba   : > { %v2114_v18 = vpop.f32.mrf.mxu3 }
 0x1bb   : > { %v1668_v3 = vpop.f32.mrf.mxu1  ;;  %v2170_v10 = vadd.f32 %v2114_v18, %v2037_v28 }
 0x1bc   : > { %v1669_v8 = vadd.f32 %v1668_v3, %v4254_v11 }
 0x1bd   : > { %3425 = vmatmul.msk.bf16.gmra.mxu2 %vm1339_vm12, %v4183_v5  ;;  %v2269_v50 = vpop.f32.mrf.mxu0 }
 0x1be   : > { %v4563_v23 = vadd.f32 %v2269_v50, %v2170_v10 }
 0x1c0   : > { %v1986_v20 = vpop.f32.mrf.mxu2  ;;  %3457 = vmatmul.msk.bf16.vlgmr.msra.gmra.mxu0 %vm1339_vm12, %v4160_v14 }
 0x1c1   : > { %v2039_v0 = vadd.f32 %v1986_v20, %v1667_v43 }
 0x1c2   : > { %v2116_v6 = vpop.f32.mrf.mxu3 }
 0x1c3   : > { %v1671_v49 = vpop.f32.mrf.mxu1  ;;  %v2171_v47 = vadd.f32 %v2116_v6, %v2038_v12  ;;  %v5022_v12 = vld [vmem:[#allocation22_spill] sm:$0xff]  ;;  %v5025_v6 = vld [vmem:[#allocation25_spill] sm:$0xff] }
 0x1c4   : > { %v1672_v28 = vadd.f32 %v1671_v49, %v5020_v27  ;;  %v5027_v27 = vld [vmem:[#allocation28_spill] sm:$0xff] }
 0x1c5   : > { %v2271_v17 = vpop.f32.mrf.mxu0 }
 0x1c6   : > { %3406 = vmatmul.msk.bf16.gmra.mxu1 %vm1339_vm12, %v4189_v62  ;;  %v4572_v63 = vadd.f32 %v2271_v17, %v2171_v47 }
 0x1c7   : > { %3441 = vmatmul.msk.bf16.gmra.mxu3 %vm1339_vm12, %v4141_v57 }
 0x1c8   : > { %v1988_v5 = vpop.f32.mrf.mxu2 }
 0x1c9   : > { %v2040_v55 = vadd.f32 %v1988_v5, %v1669_v8 }
 0x1ca   : > { %v2119_v33 = vpop.f32.mrf.mxu3 }
 0x1cb   : > { %v1673_v21 = vpop.f32.mrf.mxu1  ;;  %v2172_v37 = vadd.f32 %v2119_v33, %v2039_v0 }
 0x1cc   : > { %v1674_v3 = vadd.f32 %v1673_v21, %v5022_v12 }
 0x1cd   : > { %3426 = vmatmul.msk.bf16.gmra.mxu2 %vm1339_vm12, %v4201_v36  ;;  %v2274_v14 = vpop.f32.mrf.mxu0  ;;  %v5023_v36 = vld [vmem:[#allocation3_spill] sm:$0xff] }
 0x1ce   : > { %v4577_v56 = vadd.f32 %v2274_v14, %v2172_v37  ;;  %v5026_v37 = vld [vmem:[#allocation15_spill] sm:$0xff] }
 0x1d0   : > { %v1991_v7 = vpop.f32.mrf.mxu2  ;;  %3458 = vmatmul.msk.bf16.gmra.mxu0 %vm1339_vm12, %v4189_v62  ;;  %v5024_v62 = vld [vmem:[#allocation13_spill] sm:$0xff] }
 0x1d1   : > { %v2041_v11 = vadd.f32 %v1991_v7, %v1672_v28  ;;  %v5028_v7 = vld [vmem:[#allocation6_spill] sm:$0xff] }
 0x1d2   : > { %v2121_v42 = vpop.f32.mrf.mxu3 }
 0x1d3   : > { %v1676_v57 = vpop.f32.mrf.mxu1  ;;  %v2173_v30 = vadd.f32 %v2121_v42, %v2040_v55 }
 0x1d4   : > { %v1677_v47 = vadd.f32 %v1676_v57, %v5025_v6  ;;  %v5031_v6 = vld [vmem:[#allocation18_spill] sm:$0xff] }
 0x1d5   : > { %v2276_v44 = vpop.f32.mrf.mxu0 }
 0x1d6   : > { %3407 = vmatmul.msk.bf16.gmra.mxu1 %vm1339_vm12, %v5021_v34  ;;  %v4586_v10 = vadd.f32 %v2276_v44, %v2173_v30 }
 0x1d7   : > { %3442 = vmatmul.msk.bf16.gmra.mxu3 %vm1339_vm12, %v5023_v36  ;;  %v5030_v36 = vld [vmem:[#allocation12_spill] sm:$0xff] }
 0x1d8   : > { %v1993_v18 = vpop.f32.mrf.mxu2 }
 0x1d9   : > { %v2042_v50 = vadd.f32 %v1993_v18, %v1674_v3 }
 0x1da   : > { %v2124_v20 = vpop.f32.mrf.mxu3 }
 0x1db   : > { %v1678_v43 = vpop.f32.mrf.mxu1  ;;  %v2174_v0 = vadd.f32 %v2124_v20, %v2041_v11 }
 0x1dc   : > { %v1679_v28 = vadd.f32 %v1678_v43, %v5027_v27 }
 0x1dd   : > { %3427 = vmatmul.msk.bf16.gmra.mxu2 %vm1339_vm12, %v5024_v62  ;;  %v2279_v49 = vpop.f32.mrf.mxu0 }
 0x1de   : > { %v4591_v8 = vadd.f32 %v2279_v49, %v2174_v0 }
 0x1e0   : > { %v1996_v17 = vpop.f32.mrf.mxu2  ;;  %3459 = vmatmul.msk.bf16.gmra.mxu0 %vm1339_vm12, %v5021_v34  ;;  %v5029_v34 = vld [vmem:[#allocation16_spill] sm:$0xff] }
 0x1e1   : > { %v2043_v5 = vadd.f32 %v1996_v17, %v1677_v47  ;;  %v5032_v17 = vld [vmem:[#allocation14_spill] sm:$0xff] }
 0x1e2   : > { %v2126_v21 = vpop.f32.mrf.mxu3 }
 0x1e3   : > { %v1681_v55 = vpop.f32.mrf.mxu1  ;;  %v2175_v33 = vadd.f32 %v2126_v21, %v2042_v50  ;;  %v5033_v21 = vld [vmem:[#allocation7_spill] sm:$0xff] }
 0x1e4   : > { %v1682_v18 = vadd.f32 %v1681_v55, %v5030_v36 }
 0x1e5   : > { %v2281_v14 = vpop.f32.mrf.mxu0 }
 0x1e6   : > { %3408 = vmatmul.msk.bf16.gmra.mxu1 %vm1339_vm12, %v5026_v37  ;;  %v4600_v57 = vadd.f32 %v2281_v14, %v2175_v33 }
 0x1e7   : > { %3443 = vmatmul.msk.bf16.gmra.mxu3 %vm1339_vm12, %v5028_v7 }
 0x1e8   : > { %v1998_v11 = vpop.f32.mrf.mxu2 }
 0x1e9   : > { %v2044_v42 = vadd.f32 %v1998_v11, %v1679_v28 }
 0x1ea   : > { %v2129_v44 = vpop.f32.mrf.mxu3 }
 0x1eb   : > { %v1683_v30 = vpop.f32.mrf.mxu1  ;;  %v2176_v12 = vadd.f32 %v2129_v44, %v2043_v5 }
 0x1ec   : > { %v1684_v5 = vadd.f32 %v1683_v30, %v5032_v17 }
 0x1ed   : > { %3428 = vmatmul.msk.bf16.gmra.mxu2 %vm1339_vm12, %v5029_v34  ;;  %v2284_v3 = vpop.f32.mrf.mxu0 }
 0x1ee   : > { %v4605_v20 = vadd.f32 %v2284_v3, %v2176_v12 }
 0x1f0   : > { %v2001_v50 = vpop.f32.mrf.mxu2  ;;  %3460 = vmatmul.msk.bf16.gmra.mxu0 %vm1339_vm12, %v5026_v37  ;;  %v5034_v37 = vld [vmem:[#allocation21_spill] sm:$0xff] }
 0x1f1   : > { %v2045_v43 = vadd.f32 %v2001_v50, %v1682_v18  ;;  %v5036_v50 = vld [vmem:[#allocation24_spill] sm:$0xff] }
 0x1f2   : > { %v2131_v62 = vpop.f32.mrf.mxu3 }
 0x1f3   : > { %v1686_v0 = vpop.f32.mrf.mxu1  ;;  %v2177_v49 = vadd.f32 %v2131_v62, %v2044_v42  ;;  %v5035_v42 = vld [vmem:[#allocation17_spill] sm:$0xff]  ;;  %v5037_v62 = vld [vmem:[#allocation20_spill] sm:$0xff] }
 0x1f4   : > { %v1687_v44 = vadd.f32 %v1686_v0, %v5035_v42 }
 0x1f5   : > { %v2286_v47 = vpop.f32.mrf.mxu0 }
 0x1f6   : > { %3409 = vmatmul.msk.bf16.gmra.mxu1 %vm1339_vm12, %v5031_v6  ;;  %v4614_v33 = vadd.f32 %v2286_v47, %v2177_v49  ;;  %v5038_v47 = vld [vmem:[#allocation9_spill] sm:$0xff] }
 0x1f7   : > { %3444 = vmatmul.msk.bf16.gmra.mxu3 %vm1339_vm12, %v5033_v21 }
 0x1f8   : > { %v2003_v55 = vpop.f32.mrf.mxu2 }
 0x1f9   : > { %v2046_v14 = vadd.f32 %v2003_v55, %v1684_v5 }
 0x1fa   : > { %v2134_v28 = vpop.f32.mrf.mxu3 }
 0x1fb   : > { %v1688_v27 = vpop.f32.mrf.mxu1  ;;  %v2178_v7 = vadd.f32 %v2134_v28, %v2045_v43 }
 0x1fc   : > { %v1689_v49 = vadd.f32 %v1688_v27, %v5037_v62 }
 0x1fd   : > { %3429 = vmatmul.msk.bf16.gmra.mxu2 %vm1339_vm12, %v5034_v37  ;;  %v2289_v11 = vpop.f32.mrf.mxu0 }
 0x1fe   : > { %v4619_v34 = vadd.f32 %v2289_v11, %v2178_v7  ;;  %v5040_v7 = vld [vmem:[#allocation23_spill] sm:$0xff] }
 0x200   : > { %v2006_v12 = vpop.f32.mrf.mxu2  ;;  %3461 = vmatmul.msk.bf16.gmra.mxu0 %vm1339_vm12, %v5031_v6  ;;  %v5039_v6 = vld [vmem:[#allocation27_spill] sm:$0xff] }
 0x201   : > { %v2047_v30 = vadd.f32 %v2006_v12, %v1687_v44 }
 0x202   : > { %v2136_v36 = vpop.f32.mrf.mxu3 }
 0x203   : > { %v1691_v3 = vpop.f32.mrf.mxu1  ;;  %v2179_v18 = vadd.f32 %v2136_v36, %v2046_v14 }
 0x204   : > { %v1692_v37 = vadd.f32 %v1691_v3, %v5040_v7 }
 0x205   : > { %v2291_v43 = vpop.f32.mrf.mxu0 }
 0x206   : > { %3410 = vmatmul.msk.bf16.gmra.mxu1 %vm1339_vm12, %v5036_v50  ;;  %v4628_v17 = vadd.f32 %v2291_v43, %v2179_v18  ;;  %v5041_v18 = vld [vmem:[#allocation29_spill] sm:$0xff]  ;;  %v5042_v43 = vld [vmem:[#allocation26_spill] sm:$0xff] }
 0x207   : > { %3445 = vmatmul.msk.bf16.gmra.mxu3 %vm1339_vm12, %v5038_v47 }
 0x208   : > { %v2008_v0 = vpop.f32.mrf.mxu2 }
 0x209   : > { %v2048_v5 = vadd.f32 %v2008_v0, %v1689_v49  ;;  %v5043_v49 = vld [vmem:[#allocation4_spill] sm:$0xff] }
 0x20a   : > { %v2139_v55 = vpop.f32.mrf.mxu3 }
 0x20b   : > { %v1693_v21 = vpop.f32.mrf.mxu1  ;;  %v2180_v28 = vadd.f32 %v2139_v55, %v2047_v30 }
 0x20c   : > { %v1694_v62 = vadd.f32 %v1693_v21, %v5042_v43  ;;  %v5046_v43 = vld [vmem:[#allocation31_spill] sm:$0xff] }
 0x20d   : > { %3430 = vmatmul.msk.bf16.gmra.mxu2 %vm1339_vm12, %v5039_v6  ;;  %v2294_v14 = vpop.f32.mrf.mxu0 }
 0x20e   : > { %v4633_v42 = vadd.f32 %v2294_v14, %v2180_v28  ;;  %v5045_v14 = vld [vmem:[#allocation30_spill] sm:$0xff] }
 0x210   : > { %v2011_v11 = vpop.f32.mrf.mxu2  ;;  %3462 = vmatmul.msk.bf16.gmra.mxu0 %vm1339_vm12, %v5036_v50  ;;  %v5044_v50 = vld [vmem:[#allocation32_spill] sm:$0xff] }
 0x211   : > { %v2049_v27 = vadd.f32 %v2011_v11, %v1692_v37 }
 0x212   : > { %v2141_v12 = vpop.f32.mrf.mxu3 }
 0x213   : > { %v1696_v44 = vpop.f32.mrf.mxu1  ;;  %v2181_v36 = vadd.f32 %v2141_v12, %v2048_v5 }
 0x214   : > { %v1697_v7 = vadd.f32 %v1696_v44, %v5045_v14 }
 0x215   : > { %v2296_v30 = vpop.f32.mrf.mxu0 }
 0x216   : > { %3411 = vmatmul.msk.bf16.gmra.mxu1 %vm1339_vm12, %v5041_v18  ;;  %v4642_v47 = vadd.f32 %v2296_v30, %v2181_v36 }
 0x217   : > { %3446 = vmatmul.msk.bf16.gmra.mxu3 %vm1339_vm12, %v5043_v49 }
 0x218   : > { %v2013_v3 = vpop.f32.mrf.mxu2 }
 0x219   : > { %v2050_v0 = vadd.f32 %v2013_v3, %v1694_v62 }
 0x21a   : > { %v2144_v28 = vpop.f32.mrf.mxu3 }
 0x21b   : > { %v1698_v55 = vpop.f32.mrf.mxu1  ;;  %v2182_v6 = vadd.f32 %v2144_v28, %v2049_v27 }
 0x21c   : > { %v1699_v62 = vadd.f32 %v1698_v55, %v5046_v43 }
 0x21d   : > { %3431 = vmatmul.msk.bf16.gmra.mxu2 %vm1339_vm12, %v5044_v50  ;;  %v2299_v5 = vpop.f32.mrf.mxu0 }
 0x21e   : > { %v4647_v11 = vadd.f32 %v2299_v5, %v2182_v6 }
 0x220   : > { %v2016_v37 = vpop.f32.mrf.mxu2  ;;  %3463 = vmatmul.msk.bf16.gmra.mxu0 %vm1339_vm12, %v5041_v18 }
 0x221   : > { %v2051_v21 = vadd.f32 %v2016_v37, %v1697_v7 }
 0x222   : > { %v2146_v36 = vpop.f32.mrf.mxu3 }
 0x223   : > { %v2368_v12 = vpop.f32.mrf.mxu1  ;;  %v2183_v30 = vadd.f32 %v2146_v36, %v2050_v0 }
 0x224   : > { %v2448_v7 = vadd.f32 %v2368_v12, %v4365_v25 }
 0x225   : > { %v2301_v27 = vpop.f32.mrf.mxu0 }
 0x226   : > { %3412 = vmatmul.msk.bf16.gmra.mxu1 %vm1339_vm12, %v4358_v45  ;;  %v4656_v49 = vadd.f32 %v2301_v27, %v2183_v30 }
 0x227   : > { %3447 = vmatmul.msk.bf16.gmra.mxu3 %vm1339_vm12, %v3830_v58 }
 0x228   : > { %v2018_v44 = vpop.f32.mrf.mxu2 }
 0x229   : > { %v2052_v3 = vadd.f32 %v2018_v44, %v1699_v62 }
 0x22a   : > { %v2149_v6 = vpop.f32.mrf.mxu3 }
 0x22b   : > { %v2370_v28 = vpop.f32.mrf.mxu1  ;;  %v2184_v50 = vadd.f32 %v2149_v6, %v2051_v21 }
 0x22d   : > { %3432 = vmatmul.msk.bf16.gmra.mxu2 %vm1339_vm12, %v4373_v15  ;;  %v2304_v18 = vpop.f32.mrf.mxu0 }
 0x22e   : > { %v4660_v5 = vadd.f32 %v2304_v18, %v2184_v50  ;;  %v5049_v18 = vld [vmem:[#allocation34_spill] sm:$0xff] }
 0x230   : > { %v2501_v0 = vpop.f32.mrf.mxu2  ;;  %3464 = vmatmul.msk.bf16.gmra.mxu0 %vm1339_vm12, %v4358_v45  ;;  %v5047_v45 = vld [vmem:[#allocation33_spill] sm:$0xff] }
 0x231   : > { %v2581_v15 = vadd.f32 %v2501_v0, %v2448_v7  ;;  %v2449_v62 = vadd.f32 %v2370_v28, %v5047_v45  ;;  %v5048_v28 = vld [vmem:[#allocation36_spill] sm:$0xff] }
 0x232   : > { %v2151_v58 = vpop.f32.mrf.mxu3 }
 0x233   : > { %v2373_v55 = vpop.f32.mrf.mxu1  ;;  %v2185_v14 = vadd.f32 %v2151_v58, %v2052_v3 }
 0x234   : > { %v2450_v0 = vadd.f32 %v2373_v55, %v5049_v18 }
 0x235   : > { %v2306_v37 = vpop.f32.mrf.mxu0 }
 0x236   : > { %3413 = vmatmul.msk.bf16.gmra.mxu1 %vm1339_vm12, %v4383_v40  ;;  %v4669_v36 = vadd.f32 %v2306_v37, %v2185_v14  ;;  %v5050_v37 = vld [vmem:[#allocation10_spill] sm:$0xff] }
 0x237   : > { %3448 = vmatmul.msk.bf16.gmra.mxu3 %vm1339_vm12, %v3950_v22 }
 0x238   : > { %v2503_v21 = vpop.f32.mrf.mxu2 }
 0x239   : > { %v2582_v25 = vadd.f32 %v2503_v21, %v2449_v62 }
 0x23a   : > { %v2656_v27 = vpop.f32.mrf.mxu3 }
 0x23b   : > { %v2375_v30 = vpop.f32.mrf.mxu1  ;;  %v2736_v43 = vadd.f32 %v2656_v27, %v2581_v15 }
 0x23d   : > { %3433 = vmatmul.msk.bf16.gmra.mxu2 %vm1339_vm12, %v4399_v38  ;;  %v2795_v44 = vpop.f32.mrf.mxu0 }
 0x23e   : > { %v2875_v3 = vadd.f32 %v2795_v44, %v2736_v43 }
 0x240   : > { %v2506_v12 = vpop.f32.mrf.mxu2  ;;  %3465 = vmatmul.msk.bf16.gmra.mxu0 %vm1339_vm12, %v4383_v40  ;;  %v2907_v22 = vpack.c.bf16 %v2875_v3, %v2875_v3  ;;  %v3041_v14 = vmul.f32 %v2875_v3, %v2875_v3  ;;  %v2971_v21 = vsel %vm1339_vm12, %v2875_v3, 0.0  ;;  %v5052_v3 = vld [vmem:[#allocation35_spill] sm:$0xff] }
 0x241   : > { %v2583_v15 = vadd.f32 %v2506_v12, %v2450_v0  ;;  %v5051_v12 = vld [vmem:[#allocation38_spill] sm:$0xff]  ;;  %v2451_v18 = vadd.f32 %v2375_v30, %v5052_v3  ;;  %v5055_v3 = vld [vmem:[#allocation5_spill] sm:$0xff] }
 0x242   : > { %v2658_v50 = vpop.f32.mrf.mxu3  ;;  %2939 = vst.msk [vmem:[%s4678_s1] sm:$0xf] %vm269_vm6, %v2907_v22  ;;  %v3073_v22 = vsel %vm1339_vm12, %v3041_v14, 0.0 }
 0x243   : > { %v2378_v6 = vpop.f32.mrf.mxu1  ;;  %v2737_v38 = vadd.f32 %v2658_v50, %v2582_v25 }
 0x245   : > { %v2797_v58 = vpop.f32.mrf.mxu0 }
 0x246   : > { %3414 = vmatmul.msk.bf16.gmra.mxu1 %vm1339_vm12, %v5048_v28  ;;  %v2876_v7 = vadd.f32 %v2797_v58, %v2737_v38 }
 0x247   : > { %3449 = vmatmul.msk.bf16.gmra.mxu3 %vm1339_vm12, %v5050_v37 }
 0x248   : > { %v2508_v40 = vpop.f32.mrf.mxu2  ;;  %v2908_v27 = vpack.c.bf16 %v2876_v7, %v2876_v7  ;;  %v2972_v43 = vsel %vm1339_vm12, %v2876_v7, 0.0  ;;  %v3042_v45 = vmul.f32 %v2876_v7, %v2876_v7 }
 0x249   : > { %v2973_v44 = vadd.f32 %v2972_v43, %v2971_v21  ;;  %v2584_v7 = vadd.f32 %v2508_v40, %v2451_v18  ;;  %v5054_v40 = vld [vmem:[#allocation37_spill] sm:$0xff] }
 0x24a   : > { %v2661_v25 = vpop.f32.mrf.mxu3  ;;  %2940 = vst.msk [vmem:[%s4678_s1 + $0x4] sm:$0xf] %vm269_vm6, %v2908_v27  ;;  %v3074_v55 = vsel %vm1339_vm12, %v3042_v45, 0.0 }
 0x24b   : > { %v2380_v62 = vpop.f32.mrf.mxu1  ;;  %v2738_v50 = vadd.f32 %v2661_v25, %v2583_v15  ;;  %v3075_v38 = vadd.f32 %v3074_v55, %v3073_v22  ;;  %v5053_v55 = vld [vmem:[#allocation40_spill] sm:$0xff] }
 0x24d   : > { %3434 = vmatmul.msk.bf16.gmra.mxu2 %vm1339_vm12, %v5051_v12  ;;  %v2800_v0 = vpop.f32.mrf.mxu0 }
 0x24e   : > { %v2877_v58 = vadd.f32 %v2800_v0, %v2738_v50  ;;  %v2452_v50 = vadd.f32 %v2378_v6, %v5054_v40 }
 0x250   : > { %v2511_v37 = vpop.f32.mrf.mxu2  ;;  %3466 = vmatmul.msk.bf16.gmra.mxu0 %vm1339_vm12, %v5048_v28  ;;  %v2909_v14 = vpack.c.bf16 %v2877_v58, %v2877_v58  ;;  %v2974_v21 = vsel %vm1339_vm12, %v2877_v58, 0.0  ;;  %v3043_v27 = vmul.f32 %v2877_v58, %v2877_v58 }
 0x251   : > { %v2975_v45 = vadd.f32 %v2974_v21, %v2973_v44  ;;  %v2585_v18 = vadd.f32 %v2511_v37, %v2452_v50 }
 0x252   : > { %v2663_v15 = vpop.f32.mrf.mxu3  ;;  %2941 = vst.msk [vmem:[%s4678_s1 + $0x8] sm:$0xf] %vm269_vm6, %v2909_v14  ;;  %v3076_v25 = vsel %vm1339_vm12, %v3043_v27, 0.0 }
 0x253   : > { %v2383_v43 = vpop.f32.mrf.mxu1  ;;  %v2739_v30 = vadd.f32 %v2663_v15, %v2584_v7  ;;  %v3077_v22 = vadd.f32 %v3076_v25, %v3075_v38  ;;  %v5056_v25 = vld [vmem:[#allocation42_spill] sm:$0xff] }
 0x255   : > { %v2802_v28 = vpop.f32.mrf.mxu0 }
 0x256   : > { %3415 = vmatmul.msk.bf16.gmra.mxu1 %vm1339_vm12, %v5053_v55  ;;  %v2878_v12 = vadd.f32 %v2802_v28, %v2739_v30  ;;  %v5057_v30 = vld [vmem:[#allocation39_spill] sm:$0xff] }
 0x257   : > { %3450 = vmatmul.msk.bf16.gmra.mxu3 %vm1339_vm12, %v5055_v3  ;;  %v2453_v37 = vadd.f32 %v2380_v62, %v5057_v30 }
 0x258   : > { %v2513_v44 = vpop.f32.mrf.mxu2  ;;  %v2910_v0 = vpack.c.bf16 %v2878_v12, %v2878_v12  ;;  %v2976_v58 = vsel %vm1339_vm12, %v2878_v12, 0.0  ;;  %v3044_v14 = vmul.f32 %v2878_v12, %v2878_v12 }
 0x259   : > { %v2977_v27 = vadd.f32 %v2976_v58, %v2975_v45  ;;  %v2586_v28 = vadd.f32 %v2513_v44, %v2453_v37  ;;  %v5058_v44 = vld [vmem:[#allocation41_spill] sm:$0xff] }
 0x25a   : > { %v2666_v7 = vpop.f32.mrf.mxu3  ;;  %2942 = vst.msk [vmem:[%s4678_s1 + $0xc] sm:$0xf] %vm269_vm6, %v2910_v0  ;;  %v3078_v38 = vsel %vm1339_vm12, %v3044_v14, 0.0 }
 0x25b   : > { %v2385_v21 = vpop.f32.mrf.mxu1  ;;  %v2740_v6 = vadd.f32 %v2666_v7, %v2585_v18  ;;  %v3079_v15 = vadd.f32 %v3078_v38, %v3077_v22  ;;  %v2454_v38 = vadd.f32 %v2383_v43, %v5058_v44 }
 0x25d   : > { %3435 = vmatmul.msk.bf16.gmra.mxu2 %vm1339_vm12, %v5056_v25  ;;  %v2805_v40 = vpop.f32.mrf.mxu0 }
 0x25e   : > { %v2879_v50 = vadd.f32 %v2805_v40, %v2740_v6 }
 0x260   : > { %v2516_v3 = vpop.f32.mrf.mxu2  ;;  %3467 = vmatmul.msk.bf16.gmra.mxu0 %vm1339_vm12, %v5053_v55  ;;  %v2911_v45 = vpack.c.bf16 %v2879_v50, %v2879_v50  ;;  %v2978_v12 = vsel %vm1339_vm12, %v2879_v50, 0.0  ;;  %v3045_v0 = vmul.f32 %v2879_v50, %v2879_v50 }
 0x261   : > { %v2979_v14 = vadd.f32 %v2978_v12, %v2977_v27  ;;  %v2587_v25 = vadd.f32 %v2516_v3, %v2454_v38 }
 0x262   : > { %v2668_v18 = vpop.f32.mrf.mxu3  ;;  %2943 = vst.msk [vmem:[%s4678_s1 + $0x10] sm:$0xf] %vm269_vm6, %v2911_v45  ;;  %v3080_v22 = vsel %vm1339_vm12, %v3045_v0, 0.0 }
 0x263   : > { %v2388_v58 = vpop.f32.mrf.mxu1  ;;  %v2741_v62 = vadd.f32 %v2668_v18, %v2586_v28  ;;  %v3081_v7 = vadd.f32 %v3080_v22, %v3079_v15 }
 0x265   : > { %v2807_v55 = vpop.f32.mrf.mxu0 }
 0x266   : > { %3416 = vmatmul.msk.bf16.gmra.mxu1 %vm1339_vm12, %v4455_v31  ;;  %v2880_v6 = vadd.f32 %v2807_v55, %v2741_v62 }
 0x267   : > { %3451 = vmatmul.msk.bf16.gmra.mxu3 %vm1339_vm12, %v3851_v24  ;;  %v2455_v24 = vadd.f32 %v2385_v21, %v4457_v54 }
 0x268   : > { %v2518_v27 = vpop.f32.mrf.mxu2  ;;  %v2912_v30 = vpack.c.bf16 %v2880_v6, %v2880_v6  ;;  %v2980_v37 = vsel %vm1339_vm12, %v2880_v6, 0.0  ;;  %v3046_v40 = vmul.f32 %v2880_v6, %v2880_v6 }
 0x269   : > { %v2981_v45 = vadd.f32 %v2980_v37, %v2979_v14  ;;  %v2588_v18 = vadd.f32 %v2518_v27, %v2455_v24 }
 0x26a   : > { %v2671_v28 = vpop.f32.mrf.mxu3  ;;  %2944 = vst.msk [vmem:[%s4678_s1 + $0x14] sm:$0xf] %vm269_vm6, %v2912_v30  ;;  %v3082_v15 = vsel %vm1339_vm12, %v3046_v40, 0.0 }
 0x26b   : > { %v2390_v50 = vpop.f32.mrf.mxu1  ;;  %v2742_v43 = vadd.f32 %v2671_v28, %v2587_v25  ;;  %v3083_v12 = vadd.f32 %v3082_v15, %v3081_v7  ;;  %v2456_v7 = vadd.f32 %v2388_v58, %v4469_v53 }
 0x26d   : > { %3436 = vmatmul.msk.bf16.gmra.mxu2 %vm1339_vm12, %v4477_v1  ;;  %v2810_v3 = vpop.f32.mrf.mxu0 }
 0x26e   : > { %v2881_v0 = vadd.f32 %v2810_v3, %v2742_v43 }
 0x270   : > { %v2521_v22 = vpop.f32.mrf.mxu2  ;;  %3468 = vmatmul.msk.bf16.gmra.mxu0 %vm1339_vm12, %v4455_v31  ;;  %v2913_v14 = vpack.c.bf16 %v2881_v0, %v2881_v0  ;;  %v2982_v62 = vsel %vm1339_vm12, %v2881_v0, 0.0  ;;  %v3047_v44 = vmul.f32 %v2881_v0, %v2881_v0 }
 0x271   : > { %v2983_v55 = vadd.f32 %v2982_v62, %v2981_v45  ;;  %v2589_v27 = vadd.f32 %v2521_v22, %v2456_v7 }
 0x272   : > { %v2673_v6 = vpop.f32.mrf.mxu3  ;;  %2945 = vst.msk [vmem:[%s4678_s1 + $0x18] sm:$0xf] %vm269_vm6, %v2913_v14  ;;  %v3084_v1 = vsel %vm1339_vm12, %v3047_v44, 0.0 }
 0x273   : > { %v2393_v38 = vpop.f32.mrf.mxu1  ;;  %v2743_v54 = vadd.f32 %v2673_v6, %v2588_v18  ;;  %v3085_v21 = vadd.f32 %v3084_v1, %v3083_v12 }
 0x275   : > { %v2812_v31 = vpop.f32.mrf.mxu0 }
 0x276   : > { %3417 = vmatmul.msk.bf16.gmra.mxu1 %vm1339_vm12, %v4486_v41  ;;  %v2882_v25 = vadd.f32 %v2812_v31, %v2743_v54 }
 0x277   : > { %3452 = vmatmul.msk.bf16.gmra.mxu3 %vm1339_vm12, %v5019_v52  ;;  %v2457_v52 = vadd.f32 %v2390_v50, %v4484_v51  ;;  %v2344_v50 = vrot.slane %v4504_v9, 5  ;;  %v4768_v9 = vld [vmem:[#allocation2 + $0xcc] sm:$0xf] }
 0x278   : > { %v2523_v30 = vpop.f32.mrf.mxu2  ;;  %v2914_v37 = vpack.c.bf16 %v2882_v25, %v2882_v25  ;;  %v2984_v40 = vsel %vm1339_vm12, %v2882_v25, 0.0  ;;  %v3048_v45 = vmul.f32 %v2882_v25, %v2882_v25  ;;  %v3456_v60 = vrot.slane %v4768_v9, 9 }
 0x279   : > { %v2985_v15 = vadd.f32 %v2984_v40, %v2983_v55  ;;  %v2590_v0 = vadd.f32 %v2523_v30, %v2457_v52  ;;  %v2347_v30 = vrot.slane %v4521_v2, 5  ;;  %v2617_v52 = vshll.u32 %v4768_v9, 16 }
 0x27a   : > { %v2676_v43 = vpop.f32.mrf.mxu3  ;;  %2946 = vst.msk [vmem:[%s4678_s1 + $0x1c] sm:$0xf] %vm269_vm6, %v2914_v37  ;;  %v3086_v12 = vsel %vm1339_vm12, %v3048_v45, 0.0 }
 0x27b   : > { %v2395_v28 = vpop.f32.mrf.mxu1  ;;  %v2744_v53 = vadd.f32 %v2676_v43, %v2589_v27  ;;  %v3087_v58 = vadd.f32 %v3086_v12, %v3085_v21  ;;  %v3403_v21 = vrot.slane %v4506_v39, 9  ;;  %v2346_v27 = vrot.slane %v2344_v50, 4 }
 0x27d   : > { %3437 = vmatmul.msk.bf16.gmra.mxu2 %vm1339_vm12, %v4502_v19  ;;  %v2815_v24 = vpop.f32.mrf.mxu0  ;;  %v2348_v12 = vsel %vm4093_vm2, %v2346_v27, %v2347_v30 }
 0x27e   : > { %v2883_v3 = vadd.f32 %v2815_v24, %v2744_v53  ;;  %v2614_v53 = vshrl.u32 %v4768_v9, 16 }
 0x280   : > { %v2526_v18 = vpop.f32.mrf.mxu2  ;;  %3469 = vmatmul.msk.bf16.gmra.mxu0 %vm1339_vm12, %v4486_v41  ;;  %v2915_v22 = vpack.c.bf16 %v2883_v3, %v2883_v3  ;;  %v2986_v14 = vsel %vm1339_vm12, %v2883_v3, 0.0  ;;  %v3049_v62 = vmul.f32 %v2883_v3, %v2883_v3  ;;  %v2458_v41 = vadd.f32 %v2393_v38, %v4494_v29  ;;  %v4773_v38 = vld [vmem:[#allocation2 + $0xd0] sm:$0xf] }
 0x281   : > { %v2987_v55 = vadd.f32 %v2986_v14, %v2985_v15  ;;  %v2623_v24 = vshll.u32 %v4773_v38, 16  ;;  %v2627_v3 = vshrl.u32 %v4773_v38, 16  ;;  %v2351_v14 = vunpack.c.l.b16 %v2348_v12 }
 0x282   : > { %v2678_v6 = vpop.f32.mrf.mxu3  ;;  %2947 = vst.msk [vmem:[%s4678_s1 + $0x20] sm:$0xf] %vm269_vm6, %v2915_v22  ;;  %v3088_v19 = vsel %vm1339_vm12, %v3049_v62, 0.0  ;;  %v2591_v31 = vadd.f32 %v2526_v18, %v2458_v41 }
 0x283   : > { %v4755_v44 = vpop.f32.mrf.mxu1  ;;  %v2745_v51 = vadd.f32 %v2678_v6, %v2590_v0  ;;  %v3089_v1 = vadd.f32 %v3088_v19, %v3087_v58  ;;  %v2459_v0 = vadd.f32 %v2395_v28, %v4517_v32  ;;  %v2616_v19 = vrot.slane %v2614_v53, 4  ;;  %v4792_v32 = vld [vmem:[#allocation2 + $0xd4] sm:$0x1] }
 0x285   : > { %v2817_v54 = vpop.f32.mrf.mxu0 }
 0x286   : > { %3418 = vmatmul.msk.bf16.gmra.mxu1 %vm1339_vm12, %v4519_v26  ;;  %v2884_v7 = vadd.f32 %v2817_v54, %v2745_v51  ;;  %v2619_v51 = vrot.slane %v2617_v52, 5 }
 0x287   : > { %3453 = vmatmul.msk.bf16.gmra.mxu3 %vm1339_vm12, %v4129_v59  ;;  %v2345_v59 = vsel %vm4093_vm2, %v3403_v21, %v2344_v50  ;;  %v2625_v50 = vrot.slane %v2623_v24, 5 }
 0x288   : > { %v2528_v25 = vpop.f32.mrf.mxu2  ;;  %v2916_v37 = vpack.c.bf16 %v2884_v7, %v2884_v7  ;;  %v2988_v40 = vsel %vm1339_vm12, %v2884_v7, 0.0  ;;  %v3050_v45 = vmul.f32 %v2884_v7, %v2884_v7  ;;  %v2350_v22 = vunpack.c.l.b16 %v2345_v59 }
 0x289   : > { %v2989_v39 = vadd.f32 %v2988_v40, %v2987_v55  ;;  %v2592_v55 = vadd.f32 %v2528_v25, %v2459_v0  ;;  %v2633_v40 = vshll.u32 %v4792_v32, 16 }
 0x28a   : > { %v2681_v15 = vpop.f32.mrf.mxu3  ;;  %2948 = vst.msk [vmem:[%s4678_s1 + $0x24] sm:$0xf] %vm269_vm6, %v2916_v37  ;;  %v3090_v43 = vsel %vm1339_vm12, %v3050_v45, 0.0  ;;  %v2620_v37 = vor.u32 %v2619_v51, %v2616_v19  ;;  %v2460_v45 = vadd.f32 %v4755_v44, %v4527_v48  ;;  %v2771_v19 = vrot.slane %v4773_v38, 5 }
 0x28b   : > { %v4771_v29 = vpop.f32.mrf.mxu1  ;;  %v2746_v2 = vadd.f32 %v2681_v15, %v2591_v31  ;;  %v3091_v58 = vadd.f32 %v3090_v43, %v3089_v1  ;;  %v2629_v1 = vrot.slane %v2627_v3, 4  ;;  %v2352_v31 = vpack.c.b16 %v2351_v14, %v2350_v22 }
 0x28c   : > { %v2621_v12 = vrot.slane %v2620_v37, 4  ;;  %v2774_v38 = vrot.slane %v4792_v32, 5 }
 0x28d   : > { %3438 = vmatmul.msk.bf16.gmra.mxu2 %vm1339_vm12, %v4531_v4  ;;  %v2820_v18 = vpop.f32.mrf.mxu0 }
 0x28e   : > { %v2885_v62 = vadd.f32 %v2820_v18, %v2746_v2  ;;  %v3494_v2 = vld [vmem:[#allocation2 + $0xcc] sm:$0xff] }
 0x290   : > { %v2531_v6 = vpop.f32.mrf.mxu2  ;;  %3470 = vmatmul.msk.bf16.gmra.mxu0 %vm1339_vm12, %v4519_v26  ;;  %v2917_v4 = vpack.c.bf16 %v2885_v62, %v2885_v62  ;;  %v2990_v41 = vsel %vm1339_vm12, %v2885_v62, 0.0  ;;  %v3051_v54 = vmul.f32 %v2885_v62, %v2885_v62  ;;  %v2630_v26 = vor.u32 %v2629_v1, %v2625_v50 }
 0x291   : > { %v2991_v28 = vadd.f32 %v2990_v41, %v2989_v39  ;;  %v2593_v59 = vadd.f32 %v2531_v6, %v2460_v45  ;;  %v2772_v45 = vsel %vm4093_vm2, %v3456_v60, %v2771_v19 }
 0x292   : > { %v2683_v7 = vpop.f32.mrf.mxu3  ;;  %2949 = vst.msk [vmem:[%s4678_s1 + $0x28] sm:$0xf] %vm269_vm6, %v2917_v4  ;;  %v3092_v25 = vsel %vm1339_vm12, %v3051_v54, 0.0  ;;  %v2631_v53 = vrot.slane %v2630_v26, 4 }
 0x293   : > { %v2403_v21 = vpop.f32.mrf.mxu1  ;;  %v2747_v27 = vadd.f32 %v2683_v7, %v2592_v55  ;;  %v3093_v30 = vadd.f32 %v3092_v25, %v3091_v58  ;;  %v2635_v58 = vrot.slane %v2633_v40, 5  ;;  %v2461_v55 = vadd.f32 %v4771_v29, %v4542_v13 }
 0x294   : > { %v2773_v29 = vrot.slane %v2771_v19, 4 }
 0x295   : > { %v2822_v15 = vpop.f32.mrf.mxu0  ;;  %v2636_v62 = vsel %vm3686_vm13, %v2631_v53, %v2635_v58 }
 0x296   : > { %3419 = vmatmul.msk.bf16.gmra.mxu1 %vm1339_vm12, %v2352_v31  ;;  %v2886_v39 = vadd.f32 %v2822_v15, %v2747_v27  ;;  %v2639_v41 = vunpack.c.l.b16 %v2636_v62  ;;  %v2775_v15 = vsel %vm4093_vm2, %v2773_v29, %v2774_v38 }
 0x297   : > { %3454 = vmatmul.msk.bf16.gmra.mxu3 %vm1339_vm12, %v4546_v61  ;;  %v2626_v61 = vsel %vm3686_vm13, %v2621_v12, %v2625_v50  ;;  %v2778_v58 = vunpack.c.l.b16 %v2775_v15 }
 0x298   : > { %v2533_v43 = vpop.f32.mrf.mxu2  ;;  %v2918_v52 = vpack.c.bf16 %v2886_v39, %v2886_v39  ;;  %v2992_v24 = vsel %vm1339_vm12, %v2886_v39, 0.0  ;;  %v3052_v3 = vmul.f32 %v2886_v39, %v2886_v39  ;;  %v2638_v4 = vunpack.c.l.b16 %v2626_v61 }
 0x299   : > { %v2993_v18 = vadd.f32 %v2992_v24, %v2991_v28  ;;  %v2594_v1 = vadd.f32 %v2533_v43, %v2461_v55  ;;  %v2777_v43 = vunpack.c.l.b16 %v2772_v45 }
 0x29a   : > { %v2686_v22 = vpop.f32.mrf.mxu3  ;;  %2950 = vst.msk [vmem:[%s4678_s1 + $0x2c] sm:$0xf] %vm269_vm6, %v2918_v52  ;;  %v3094_v48 = vsel %vm1339_vm12, %v3052_v3, 0.0  ;;  %v2640_v26 = vpack.c.b16 %v2639_v41, %v2638_v4 }
 0x29b   : > { %v2405_v0 = vpop.f32.mrf.mxu1  ;;  %v2748_v44 = vadd.f32 %v2686_v22, %v2593_v59  ;;  %v3095_v14 = vadd.f32 %v3094_v48, %v3093_v30 }
 0x29c   : > { %v2463_v22 = vadd.f32 %v2405_v0, %v4558_v35 }
 0x29d   : > { %3439 = vmatmul.msk.bf16.gmra.mxu2 %vm1339_vm12, %v3494_v2  ;;  %v2825_v6 = vpop.f32.mrf.mxu0 }
 0x29e   : > { %v2887_v51 = vadd.f32 %v2825_v6, %v2748_v44 }
 0x2a0   : > { %v2536_v54 = vpop.f32.mrf.mxu2  ;;  %3471 = vmatmul.msk.bf16.gmra.mxu0 %vm1339_vm12, %v2352_v31  ;;  %v2919_v28 = vpack.c.bf16 %v2887_v51, %v2887_v51  ;;  %v2994_v50 = vsel %vm1339_vm12, %v2887_v51, 0.0  ;;  %v3053_v7 = vmul.f32 %v2887_v51, %v2887_v51  ;;  %v2462_v31 = vadd.f32 %v2403_v21, %v4549_v16 }
 0x2a1   : > { %v2995_v27 = vadd.f32 %v2994_v50, %v2993_v18  ;;  %v2779_v18 = vpack.c.b16 %v2778_v58, %v2777_v43 }
 0x2a2   : > { %v2688_v13 = vpop.f32.mrf.mxu3  ;;  %2951 = vst.msk [vmem:[%s4678_s1 + $0x30] sm:$0xf] %vm269_vm6, %v2919_v28  ;;  %v3096_v30 = vsel %vm1339_vm12, %v3053_v7, 0.0  ;;  %v2595_v32 = vadd.f32 %v2536_v54, %v2462_v31 }
 0x2a3   : > { %v2408_v25 = vpop.f32.mrf.mxu1  ;;  %v2749_v37 = vadd.f32 %v2688_v13, %v2594_v1  ;;  %v3097_v40 = vadd.f32 %v3096_v30, %v3095_v14 }
 0x2a4   : > { %v2464_v0 = vadd.f32 %v2408_v25, %v4563_v23 }
 0x2a5   : > { %v2827_v9 = vpop.f32.mrf.mxu0 }
 0x2a6   : > { %v2888_v39 = vadd.f32 %v2827_v9, %v2749_v37 }
 0x2a7   : > { %3455 = vmatmul.msk.bf16.gmra.mxu3 %vm1339_vm12, %v2640_v26 }
 0x2a8   : > { %v2538_v59 = vpop.f32.mrf.mxu2  ;;  %v2920_v2 = vpack.c.bf16 %v2888_v39, %v2888_v39  ;;  %v2996_v12 = vsel %vm1339_vm12, %v2888_v39, 0.0  ;;  %v3054_v53 = vmul.f32 %v2888_v39, %v2888_v39 }
 0x2a9   : > { %v2997_v21 = vadd.f32 %v2996_v12, %v2995_v27  ;;  %v2596_v14 = vadd.f32 %v2538_v59, %v2463_v22 }
 0x2aa   : > { %v2691_v52 = vpop.f32.mrf.mxu3  ;;  %2952 = vst.msk [vmem:[%s4678_s1 + $0x34] sm:$0xf] %vm269_vm6, %v2920_v2  ;;  %v3098_v24 = vsel %vm1339_vm12, %v3054_v53, 0.0 }
 0x2ab   : > { %v2410_v16 = vpop.f32.mrf.mxu1  ;;  %v2750_v46 = vadd.f32 %v2691_v52, %v2595_v32  ;;  %v3099_v3 = vadd.f32 %v3098_v24, %v3097_v40 }
 0x2ac   : > { %v2465_v23 = vadd.f32 %v2410_v16, %v4572_v63 }
 0x2ad   : > { %v2830_v48 = vpop.f32.mrf.mxu0 }
 0x2ae   : > { %v2889_v44 = vadd.f32 %v2830_v48, %v2750_v46 }
 0x2b0   : > { %v2541_v61 = vpop.f32.mrf.mxu2  ;;  %3472 = vmatmul.msk.bf16.gmra.mxu0 %vm1339_vm12, %v2779_v18  ;;  %v2921_v62 = vpack.c.bf16 %v2889_v44, %v2889_v44  ;;  %v2998_v55 = vsel %vm1339_vm12, %v2889_v44, 0.0  ;;  %v3055_v6 = vmul.f32 %v2889_v44, %v2889_v44 }
 0x2b1   : > { %v2999_v51 = vadd.f32 %v2998_v55, %v2997_v21  ;;  %v2597_v50 = vadd.f32 %v2541_v61, %v2464_v0 }
 0x2b2   : > { %v2693_v1 = vpop.f32.mrf.mxu3  ;;  %2953 = vst.msk [vmem:[%s4678_s1 + $0x38] sm:$0xf] %vm269_vm6, %v2921_v62  ;;  %v3100_v4 = vsel %vm1339_vm12, %v3055_v6, 0.0 }
 0x2b3   : > { %v2413_v19 = vpop.f32.mrf.mxu1  ;;  %v2751_v41 = vadd.f32 %v2693_v1, %v2596_v14  ;;  %v3101_v35 = vadd.f32 %v3100_v4, %v3099_v3 }
 0x2b4   : > { %v2466_v63 = vadd.f32 %v2413_v19, %v4577_v56 }
 0x2b5   : > { %v2832_v54 = vpop.f32.mrf.mxu0 }
 0x2b6   : > { %v2890_v28 = vadd.f32 %v2832_v54, %v2751_v41 }
 0x2b8   : > { %v2543_v7 = vpop.f32.mrf.mxu2  ;;  %v2922_v60 = vpack.c.bf16 %v2890_v28, %v2890_v28  ;;  %v3000_v27 = vsel %vm1339_vm12, %v2890_v28, 0.0  ;;  %v3056_v13 = vmul.f32 %v2890_v28, %v2890_v28 }
 0x2b9   : > { %v3001_v38 = vadd.f32 %v3000_v27, %v2999_v51  ;;  %v2598_v45 = vadd.f32 %v2543_v7, %v2465_v23 }
 0x2ba   : > { %v2696_v30 = vpop.f32.mrf.mxu3  ;;  %2954 = vst.msk [vmem:[%s4678_s1 + $0x3c] sm:$0xf] %vm269_vm6, %v2922_v60  ;;  %v3102_v37 = vsel %vm1339_vm12, %v3056_v13, 0.0 }
 0x2bb   : > { %v2415_v29 = vpop.f32.mrf.mxu1  ;;  %v2752_v26 = vadd.f32 %v2696_v30, %v2597_v50  ;;  %v3103_v40 = vadd.f32 %v3102_v37, %v3101_v35 }
 0x2bc   : > { %v2467_v56 = vadd.f32 %v2415_v29, %v4586_v10 }
 0x2bd   : > { %v2835_v25 = vpop.f32.mrf.mxu0 }
 0x2be   : > { %v2891_v31 = vadd.f32 %v2835_v25, %v2752_v26 }
 0x2c0   : > { %v2546_v9 = vpop.f32.mrf.mxu2  ;;  %v2923_v15 = vpack.c.bf16 %v2891_v31, %v2891_v31  ;;  %v3002_v39 = vsel %vm1339_vm12, %v2891_v31, 0.0  ;;  %v3057_v32 = vmul.f32 %v2891_v31, %v2891_v31 }
 0x2c1   : > { %v3003_v43 = vadd.f32 %v3002_v39, %v3001_v38  ;;  %v2599_v52 = vadd.f32 %v2546_v9, %v2466_v63 }
 0x2c2   : > { %v2698_v2 = vpop.f32.mrf.mxu3  ;;  %2955 = vst.msk [vmem:[%s4678_s1 + $0x40] sm:$0xf] %vm269_vm6, %v2923_v15  ;;  %v3104_v12 = vsel %vm1339_vm12, %v3057_v32, 0.0 }
 0x2c3   : > { %v2418_v59 = vpop.f32.mrf.mxu1  ;;  %v2753_v53 = vadd.f32 %v2698_v2, %v2598_v45  ;;  %v3105_v58 = vadd.f32 %v3104_v12, %v3103_v40 }
 0x2c4   : > { %v2468_v10 = vadd.f32 %v2418_v59, %v4591_v8 }
 0x2c5   : > { %v2837_v16 = vpop.f32.mrf.mxu0 }
 0x2c6   : > { %v2892_v21 = vadd.f32 %v2837_v16, %v2753_v53 }
 0x2c8   : > { %v2548_v24 = vpop.f32.mrf.mxu2  ;;  %v2924_v46 = vpack.c.bf16 %v2892_v21, %v2892_v21  ;;  %v3004_v3 = vsel %vm1339_vm12, %v2892_v21, 0.0  ;;  %v3058_v18 = vmul.f32 %v2892_v21, %v2892_v21 }
 0x2c9   : > { %v3005_v48 = vadd.f32 %v3004_v3, %v3003_v43  ;;  %v2600_v19 = vadd.f32 %v2548_v24, %v2467_v56 }
 0x2ca   : > { %v2701_v44 = vpop.f32.mrf.mxu3  ;;  %2956 = vst.msk [vmem:[%s4678_s1 + $0x44] sm:$0xf] %vm269_vm6, %v2924_v46  ;;  %v3106_v14 = vsel %vm1339_vm12, %v3058_v18, 0.0 }
 0x2cb   : > { %v2420_v22 = vpop.f32.mrf.mxu1  ;;  %v2754_v61 = vadd.f32 %v2701_v44, %v2599_v52  ;;  %v3107_v62 = vadd.f32 %v3106_v14, %v3105_v58 }
 0x2cc   : > { %v2469_v8 = vadd.f32 %v2420_v22, %v4600_v57 }
 0x2cd   : > { %v2840_v55 = vpop.f32.mrf.mxu0 }
 0x2ce   : > { %v2893_v6 = vadd.f32 %v2840_v55, %v2754_v61 }
 0x2d0   : > { %v2551_v51 = vpop.f32.mrf.mxu2  ;;  %v2925_v1 = vpack.c.bf16 %v2893_v6, %v2893_v6  ;;  %v3006_v4 = vsel %vm1339_vm12, %v2893_v6, 0.0  ;;  %v3059_v41 = vmul.f32 %v2893_v6, %v2893_v6 }
 0x2d1   : > { %v3007_v0 = vadd.f32 %v3006_v4, %v3005_v48  ;;  %v2601_v13 = vadd.f32 %v2551_v51, %v2468_v10 }
 0x2d2   : > { %v2703_v54 = vpop.f32.mrf.mxu3  ;;  %2957 = vst.msk [vmem:[%s4678_s1 + $0x48] sm:$0xf] %vm269_vm6, %v2925_v1  ;;  %v3108_v28 = vsel %vm1339_vm12, %v3059_v41, 0.0 }
 0x2d3   : > { %v2423_v35 = vpop.f32.mrf.mxu1  ;;  %v2755_v50 = vadd.f32 %v2703_v54, %v2600_v19  ;;  %v3109_v7 = vadd.f32 %v3108_v28, %v3107_v62 }
 0x2d4   : > { %v2470_v57 = vadd.f32 %v2423_v35, %v4605_v20 }
 0x2d5   : > { %v2842_v60 = vpop.f32.mrf.mxu0 }
 0x2d6   : > { %v2894_v27 = vadd.f32 %v2842_v60, %v2755_v50 }
 0x2d8   : > { %v2553_v29 = vpop.f32.mrf.mxu2  ;;  %v2926_v38 = vpack.c.bf16 %v2894_v27, %v2894_v27  ;;  %v3008_v30 = vsel %vm1339_vm12, %v2894_v27, 0.0  ;;  %v3060_v37 = vmul.f32 %v2894_v27, %v2894_v27 }
 0x2d9   : > { %v3009_v26 = vadd.f32 %v3008_v30, %v3007_v0  ;;  %v2602_v39 = vadd.f32 %v2553_v29, %v2469_v8 }
 0x2da   : > { %v2706_v40 = vpop.f32.mrf.mxu3  ;;  %2958 = vst.msk [vmem:[%s4678_s1 + $0x4c] sm:$0xf] %vm269_vm6, %v2926_v38  ;;  %v3110_v25 = vsel %vm1339_vm12, %v3060_v37, 0.0 }
 0x2db   : > { %v2425_v23 = vpop.f32.mrf.mxu1  ;;  %v2756_v31 = vadd.f32 %v2706_v40, %v2601_v13  ;;  %v3111_v45 = vadd.f32 %v3110_v25, %v3109_v7 }
 0x2dc   : > { %v2471_v55 = vadd.f32 %v2425_v23, %v4614_v33 }
 0x2dd   : > { %v2845_v9 = vpop.f32.mrf.mxu0 }
 0x2de   : > { %v2895_v15 = vadd.f32 %v2845_v9, %v2756_v31 }
 0x2e0   : > { %v2556_v32 = vpop.f32.mrf.mxu2  ;;  %v2927_v59 = vpack.c.bf16 %v2895_v15, %v2895_v15  ;;  %v3010_v43 = vsel %vm1339_vm12, %v2895_v15, 0.0  ;;  %v3061_v2 = vmul.f32 %v2895_v15, %v2895_v15 }
 0x2e1   : > { %v3011_v12 = vadd.f32 %v3010_v43, %v3009_v26  ;;  %v2603_v46 = vadd.f32 %v2556_v32, %v2470_v57 }
 0x2e2   : > { %v2708_v53 = vpop.f32.mrf.mxu3  ;;  %2959 = vst.msk [vmem:[%s4678_s1 + $0x50] sm:$0xf] %vm269_vm6, %v2927_v59  ;;  %v3112_v58 = vsel %vm1339_vm12, %v3061_v2, 0.0 }
 0x2e3   : > { %v2757_v63 = vadd.f32 %v2708_v53, %v2602_v39  ;;  %v3113_v16 = vadd.f32 %v3112_v58, %v3111_v45  ;;  %v2428_v21 = vpop.f32.mrf.mxu1 }
 0x2e4   : > { %v2472_v33 = vadd.f32 %v2428_v21, %v4619_v34 }
 0x2e5   : > { %v2847_v52 = vpop.f32.mrf.mxu0 }
 0x2e6   : > { %v2896_v24 = vadd.f32 %v2847_v52, %v2757_v63 }
 0x2e8   : > { %v2558_v3 = vpop.f32.mrf.mxu2  ;;  %v2928_v18 = vpack.c.bf16 %v2896_v24, %v2896_v24  ;;  %v3012_v22 = vsel %vm1339_vm12, %v2896_v24, 0.0  ;;  %v3062_v48 = vmul.f32 %v2896_v24, %v2896_v24 }
 0x2e9   : > { %v3013_v44 = vadd.f32 %v3012_v22, %v3011_v12  ;;  %v2604_v51 = vadd.f32 %v2558_v3, %v2471_v55 }
 0x2ea   : > { %v2711_v14 = vpop.f32.mrf.mxu3  ;;  %2960 = vst.msk [vmem:[%s4678_s1 + $0x54] sm:$0xf] %vm269_vm6, %v2928_v18  ;;  %v3114_v61 = vsel %vm1339_vm12, %v3062_v48, 0.0 }
 0x2eb   : > { %v2758_v62 = vadd.f32 %v2711_v14, %v2603_v46  ;;  %v3115_v56 = vadd.f32 %v3114_v61, %v3113_v16  ;;  %v2430_v6 = vpop.f32.mrf.mxu1 }
 0x2ec   : > { %v2473_v34 = vadd.f32 %v2430_v6, %v4628_v17 }
 0x2ed   : > { %v2850_v20 = vpop.f32.mrf.mxu0 }
 0x2ee   : > { %v2897_v19 = vadd.f32 %v2850_v20, %v2758_v62 }
 0x2f0   : > { %v2561_v1 = vpop.f32.mrf.mxu2  ;;  %v2929_v4 = vpack.c.bf16 %v2897_v19, %v2897_v19  ;;  %v3014_v41 = vsel %vm1339_vm12, %v2897_v19, 0.0  ;;  %v3063_v35 = vmul.f32 %v2897_v19, %v2897_v19 }
 0x2f1   : > { %v3015_v0 = vadd.f32 %v3014_v41, %v3013_v44  ;;  %v2605_v27 = vadd.f32 %v2561_v1, %v2472_v33 }
 0x2f2   : > { %v2713_v54 = vpop.f32.mrf.mxu3  ;;  %2961 = vst.msk [vmem:[%s4678_s1 + $0x58] sm:$0xf] %vm269_vm6, %v2929_v4  ;;  %v3116_v28 = vsel %vm1339_vm12, %v3063_v35, 0.0 }
 0x2f3   : > { %v2759_v50 = vadd.f32 %v2713_v54, %v2604_v51  ;;  %v3117_v7 = vadd.f32 %v3116_v28, %v3115_v56  ;;  %v2433_v29 = vpop.f32.mrf.mxu1 }
 0x2f4   : > { %v2474_v17 = vadd.f32 %v2433_v29, %v4633_v42 }
 0x2f5   : > { %v2852_v10 = vpop.f32.mrf.mxu0 }
 0x2f6   : > { %v2898_v60 = vadd.f32 %v2852_v10, %v2759_v50 }
 0x2f8   : > { %v2563_v13 = vpop.f32.mrf.mxu2  ;;  %v2930_v38 = vpack.c.bf16 %v2898_v60, %v2898_v60  ;;  %v3016_v30 = vsel %vm1339_vm12, %v2898_v60, 0.0  ;;  %v3064_v37 = vmul.f32 %v2898_v60, %v2898_v60 }
 0x2f9   : > { %v3017_v26 = vadd.f32 %v3016_v30, %v3015_v0  ;;  %v2606_v9 = vadd.f32 %v2563_v13, %v2473_v34 }
 0x2fa   : > { %v2716_v40 = vpop.f32.mrf.mxu3  ;;  %2962 = vst.msk [vmem:[%s4678_s1 + $0x5c] sm:$0xf] %vm269_vm6, %v2930_v38  ;;  %v3118_v23 = vsel %vm1339_vm12, %v3064_v37, 0.0 }
 0x2fb   : > { %v2760_v25 = vadd.f32 %v2716_v40, %v2605_v27  ;;  %v3119_v31 = vadd.f32 %v3118_v23, %v3117_v7  ;;  %v2435_v12 = vpop.f32.mrf.mxu1 }
 0x2fc   : > { %v2475_v42 = vadd.f32 %v2435_v12, %v4642_v47 }
 0x2fd   : > { %v2855_v45 = vpop.f32.mrf.mxu0 }
 0x2fe   : > { %v2899_v8 = vadd.f32 %v2855_v45, %v2760_v25 }
 0x300   : > { %v2566_v15 = vpop.f32.mrf.mxu2  ;;  %v2931_v39 = vpack.c.bf16 %v2899_v8, %v2899_v8  ;;  %v3018_v32 = vsel %vm1339_vm12, %v2899_v8, 0.0  ;;  %v3065_v59 = vmul.f32 %v2899_v8, %v2899_v8 }
 0x301   : > { %v3019_v43 = vadd.f32 %v3018_v32, %v3017_v26  ;;  %v2607_v57 = vadd.f32 %v2566_v15, %v2474_v17 }
 0x302   : > { %v2718_v2 = vpop.f32.mrf.mxu3  ;;  %2963 = vst.msk [vmem:[%s4678_s1 + $0x60] sm:$0xf] %vm269_vm6, %v2931_v39  ;;  %v3120_v53 = vsel %vm1339_vm12, %v3065_v59, 0.0 }
 0x303   : > { %v2761_v58 = vadd.f32 %v2718_v2, %v2606_v9  ;;  %v3121_v63 = vadd.f32 %v3120_v53, %v3119_v31  ;;  %v2438_v61 = vpop.f32.mrf.mxu1 }
 0x304   : > { %v2476_v54 = vadd.f32 %v2438_v61, %v4647_v11 }
 0x305   : > { %v2857_v16 = vpop.f32.mrf.mxu0 }
 0x306   : > { %v2900_v21 = vadd.f32 %v2857_v16, %v2761_v58 }
 0x308   : > { %v2568_v52 = vpop.f32.mrf.mxu2  ;;  %v2932_v24 = vpack.c.bf16 %v2900_v21, %v2900_v21  ;;  %v3020_v46 = vsel %vm1339_vm12, %v2900_v21, 0.0  ;;  %v3066_v3 = vmul.f32 %v2900_v21, %v2900_v21 }
 0x309   : > { %v3021_v18 = vadd.f32 %v3020_v46, %v3019_v43  ;;  %v2608_v55 = vadd.f32 %v2568_v52, %v2475_v42 }
 0x30a   : > { %v2721_v22 = vpop.f32.mrf.mxu3  ;;  %2964 = vst.msk [vmem:[%s4678_s1 + $0x64] sm:$0xf] %vm269_vm6, %v2932_v24  ;;  %v3122_v48 = vsel %vm1339_vm12, %v3066_v3, 0.0 }
 0x30b   : > { %v2762_v44 = vadd.f32 %v2721_v22, %v2607_v57  ;;  %v3123_v14 = vadd.f32 %v3122_v48, %v3121_v63  ;;  %v2440_v28 = vpop.f32.mrf.mxu1 }
 0x30c   : > { %v2477_v11 = vadd.f32 %v2440_v28, %v4656_v49 }
 0x30d   : > { %v2860_v62 = vpop.f32.mrf.mxu0 }
 0x30e   : > { %v2901_v56 = vadd.f32 %v2860_v62, %v2762_v44 }
 0x310   : > { %v2571_v20 = vpop.f32.mrf.mxu2  ;;  %v2933_v6 = vpack.c.bf16 %v2901_v56, %v2901_v56  ;;  %v3022_v19 = vsel %vm1339_vm12, %v2901_v56, 0.0  ;;  %v3067_v51 = vmul.f32 %v2901_v56, %v2901_v56 }
 0x311   : > { %v3023_v1 = vadd.f32 %v3022_v19, %v3021_v18  ;;  %v2609_v7 = vadd.f32 %v2571_v20, %v2476_v54 }
 0x312   : > { %v2723_v4 = vpop.f32.mrf.mxu3  ;;  %2965 = vst.msk [vmem:[%s4678_s1 + $0x68] sm:$0xf] %vm269_vm6, %v2933_v6  ;;  %v3124_v41 = vsel %vm1339_vm12, %v3067_v51, 0.0 }
 0x313   : > { %v2763_v35 = vadd.f32 %v2723_v4, %v2608_v55  ;;  %v3125_v0 = vadd.f32 %v3124_v41, %v3123_v14  ;;  %v2443_v25 = vpop.f32.mrf.mxu1 }
 0x314   : > { %v2478_v49 = vadd.f32 %v2443_v25, %v4660_v5 }
 0x315   : > { %v2862_v47 = vpop.f32.mrf.mxu0 }
 0x316   : > { %v2902_v50 = vadd.f32 %v2862_v47, %v2763_v35 }
 0x318   : > { %v2573_v33 = vpop.f32.mrf.mxu2  ;;  %v2934_v10 = vpack.c.bf16 %v2902_v50, %v2902_v50  ;;  %v3024_v60 = vsel %vm1339_vm12, %v2902_v50, 0.0  ;;  %v3068_v27 = vmul.f32 %v2902_v50, %v2902_v50 }
 0x319   : > { %v3025_v13 = vadd.f32 %v3024_v60, %v3023_v1  ;;  %v2610_v23 = vadd.f32 %v2573_v33, %v2477_v11 }
 0x31a   : > { %v2726_v29 = vpop.f32.mrf.mxu3  ;;  %2966 = vst.msk [vmem:[%s4678_s1 + $0x6c] sm:$0xf] %vm269_vm6, %v2934_v10  ;;  %v3126_v38 = vsel %vm1339_vm12, %v3068_v27, 0.0 }
 0x31b   : > { %v2764_v30 = vadd.f32 %v2726_v29, %v2609_v7  ;;  %v3127_v37 = vadd.f32 %v3126_v38, %v3125_v0  ;;  %v2445_v21 = vpop.f32.mrf.mxu1 }
 0x31c   : > { %v2479_v5 = vadd.f32 %v2445_v21, %v4669_v36 }
 0x31d   : > { %v2865_v26 = vpop.f32.mrf.mxu0 }
 0x31e   : > { %v2903_v40 = vadd.f32 %v2865_v26, %v2764_v30 }
 0x320   : > { %v2935_v31 = vpack.c.bf16 %v2903_v40, %v2903_v40  ;;  %v3026_v34 = vsel %vm1339_vm12, %v2903_v40, 0.0  ;;  %v3069_v45 = vmul.f32 %v2903_v40, %v2903_v40  ;;  %v2576_v15 = vpop.f32.mrf.mxu2 }
 0x321   : > { %v3027_v8 = vadd.f32 %v3026_v34, %v3025_v13  ;;  %v2611_v12 = vadd.f32 %v2576_v15, %v2478_v49 }
 0x322   : > { %v2728_v9 = vpop.f32.mrf.mxu3  ;;  %2967 = vst.msk [vmem:[%s4678_s1 + $0x70] sm:$0xf] %vm269_vm6, %v2935_v31  ;;  %v3128_v39 = vsel %vm1339_vm12, %v3069_v45, 0.0 }
 0x323   : > { %v2765_v32 = vadd.f32 %v2728_v9, %v2610_v23  ;;  %v3129_v59 = vadd.f32 %v3128_v39, %v3127_v37 }
 0x325   : > { %v2867_v43 = vpop.f32.mrf.mxu0 }
 0x326   : > { %v2904_v2 = vadd.f32 %v2867_v43, %v2765_v32 }
 0x328   : > { %v2936_v53 = vpack.c.bf16 %v2904_v2, %v2904_v2  ;;  %v3028_v58 = vsel %vm1339_vm12, %v2904_v2, 0.0  ;;  %v3070_v63 = vmul.f32 %v2904_v2, %v2904_v2  ;;  %v2578_v46 = vpop.f32.mrf.mxu2 }
 0x329   : > { %v3029_v17 = vadd.f32 %v3028_v58, %v3027_v8  ;;  %v2612_v22 = vadd.f32 %v2578_v46, %v2479_v5 }
 0x32a   : > { %v2731_v16 = vpop.f32.mrf.mxu3  ;;  %2968 = vst.msk [vmem:[%s4678_s1 + $0x74] sm:$0xf] %vm269_vm6, %v2936_v53  ;;  %v3130_v57 = vsel %vm1339_vm12, %v3070_v63, 0.0 }
 0x32b   : > { %v2766_v52 = vadd.f32 %v2731_v16, %v2611_v12  ;;  %v3131_v24 = vadd.f32 %v3130_v57, %v3129_v59 }
 0x32d   : > { %v2870_v3 = vpop.f32.mrf.mxu0 }
 0x32e   : > { %v2905_v18 = vadd.f32 %v2870_v3, %v2766_v52 }
 0x330   : > { %v2937_v48 = vpack.c.bf16 %v2905_v18, %v2905_v18  ;;  %v3030_v44 = vsel %vm1339_vm12, %v2905_v18, 0.0  ;;  %v3071_v14 = vmul.f32 %v2905_v18, %v2905_v18 }
 0x331   : > { %v3031_v61 = vadd.f32 %v3030_v44, %v3029_v17 }
 0x332   : > { %v2733_v42 = vpop.f32.mrf.mxu3  ;;  %2969 = vst.msk [vmem:[%s4678_s1 + $0x78] sm:$0xf] %vm269_vm6, %v2937_v48  ;;  %v3132_v62 = vsel %vm1339_vm12, %v3071_v14, 0.0 }
 0x333   : > { %v2767_v56 = vadd.f32 %v2733_v42, %v2612_v22  ;;  %v3133_v55 = vadd.f32 %v3132_v62, %v3131_v24 }
 0x335   : > { %v2872_v20 = vpop.f32.mrf.mxu0 }
 0x336   : > { %v2906_v6 = vadd.f32 %v2872_v20, %v2767_v56 }
 0x338   : > { %v2938_v36 = vpack.c.bf16 %v2906_v6, %v2906_v6  ;;  %v3032_v19 = vsel %vm1339_vm12, %v2906_v6, 0.0  ;;  %v3072_v51 = vmul.f32 %v2906_v6, %v2906_v6 }
 0x339   : > { %v3033_v1 = vadd.f32 %v3032_v19, %v3031_v61 }
 0x33a   : > { %2970 = vst.msk [vmem:[%s4678_s1 + $0x7c] sm:$0xf] %vm269_vm6, %v2938_v36  ;;  %v3134_v4 = vsel %vm1339_vm12, %v3072_v51, 0.0 }
 0x33b   : > { %v3034_v41 = vrot.slane %v3033_v1, 4  ;;  %v3135_v35 = vadd.f32 %v3134_v4, %v3133_v55 }
 0x33d   : > { %v3035_v0 = vadd.f32 %v3034_v41, %v3033_v1  ;;  %v3136_v54 = vrot.slane %v3135_v35, 4 }
 0x33f   : > { %v3036_v47 = vrot.slane %v3035_v0, 2  ;;  %v3137_v28 = vadd.f32 %v3136_v54, %v3135_v35 }
 0x341   : > { %v3037_v50 = vadd.f32 %v3036_v47, %v3035_v0  ;;  %v3138_v7 = vrot.slane %v3137_v28, 2 }
 0x343   : > { %v3038_v33 = vrot.slane %v3037_v50, 1  ;;  %v3139_v10 = vadd.f32 %v3138_v7, %v3137_v28 }
 0x345   : > { %v3039_v60 = vadd.f32 %v3038_v33, %v3037_v50  ;;  %v3140_v27 = vrot.slane %v3139_v10, 1 }
 0x347   : > { %3040 = vst.msk [vmem:[%s235_s22] sm:$0x1] %vm272_vm1, %v3039_v60  ;;  %v3141_v13 = vadd.f32 %v3140_v27, %v3139_v10 }
 0x349   : > { %3142 = vst.msk [vmem:[%s235_s22 + $0x1] sm:$0x1] %vm272_vm1, %v3141_v13 }
 0x34a PF: > { %s16_s18 = sadd.s32 1, %s3537_s18  }
 0x34b   : > { %p13_p4 = scmp.ge.s32.totalorder %s16_s18, 4  }
 0x34d   :  { %15 = sbr.rel (!%p13_p4) target bundleno = 1 (0x1), region = 80 }

// kernel: basic_block_forward.4
= control target key start
LH: loop header
LB: loop body
LE: loop exit
PB: predicated region body
PF: predicated region fallthrough
CT: control target
= control target key end

     0   :  { %s3794_s18 = smov 0   ;;  %s5192_s0 = inlined_call_operand.vmem [shape: f32[1,8], index: 0, kind: input, shape index: {}]   ;;  %s5193_s1 = inlined_call_operand.vmem [shape: f32[1,8], index: 1, kind: input, shape index: {}]   ;;  %s5194_s2 = inlined_call_operand.vmem [shape: bf16[2,16,16,8], index: 2, kind: input, shape index: {}]   ;;  %s5195_s3 = inlined_call_operand.vmem [shape: bf16[72,8], index: 3, kind: input, shape index: {}]   ;;  %s5196_s4 = inlined_call_operand.vmem [shape: bf16[2,16,16,8], index: 4, kind: output, shape index: {0}]   ;;  %s5197_s5 = inlined_call_operand.vmem [shape: f32[2,2,8], index: 5, kind: output, shape index: {1}]  }
   0x1 LB: > { %s3365_s19 = sadd.s32 4294967295, %s3761_s18   ;;  %p3369_p0 = scmp.ge.s32.totalorder %s3761_s18, 1  ;;  %s3761_s18 = sphi %s3794_s18, %s16_s18  }
   0x2   : > { %p190_p1 = scmp.lt.s32.totalorder %s3761_s18, 3 }
   0x4   : > { %p191_p2 = pnand %p3369_p0, %p190_p1 }
   0x6   : > { %194 = sbr.rel (%p191_p2) target bundleno = 874 (0x36a), region = 36 }
   0xb   : > { %v1426_v0 = vld [vmem:[%s5195_s3 + $0x4] sm:$0xf]  ;;  %vm1524_vm0 = vcmask 1043456   ;;  %p222_p3 = scmp.lt.s32.totalorder %s3365_s19, 1  ;;  %vm408_vm1 = vcmask 57344   ;;  %vm405_vm6 = vcmask 60416  }
   0xc   : > { %v1526_v1 = vsel %vm1524_vm0, %v1426_v0, 0  ;;  %vm416_vm2 = vsmask.f32 256  ;;  %v427_v3 = vld [vmem:[#allocation2 + $0x30] sm:$0x1]  ;;  %v3763_v18 = vmov 0  }
   0xd   : > { %3710 = vmatpush.bf16.msra.mxu1 %v1526_v1  ;;  %3711 = vmatpush.bf16.msra.mxu2 %v1526_v1  ;;  %s5328_s19 = smov (!%p222_p3, %s3365_s19), 1  ;;  %vm3810_vm3 = vmand %vm408_vm1, %vm416_vm2  ;;  %vm466_vm4 = vsmask.f32 7938  ;;  %v477_v4 = vld [vmem:[#allocation2 + $0x38] sm:$0x1]  ;;  %vm1475_vm13 = vcmask 64512  }
   0xe   : > { %3712 = vmatpush.bf16.msra.mxu3 %v1526_v1  ;;  %1535 = vmatpush.bf16.msra.mxu0 %v1526_v1  ;;  %s3611_s22 = sshll.u32 %s5328_s19, 7  ;;  %v3818_v5 = vld [vmem:[%s5192_s0] ss:$0 sm:$0xff]  ;;  %v428_v6 = vsel %vm3810_vm3, 0, %v427_v3  ;;  %vm3824_vm5 = vmand %vm408_vm1, %vm466_vm4  ;;  %v489_v17 = vld [vmem:[#allocation2 + $0x68] sm:$0x1] }
   0xf   : > { %s3833_s27 = scalar_lea.vmem %s5194_s2, %s3611_s22  ;;  %429 = vst [vmem:[#allocation2 + $0x30] sm:$0x1] %v428_v6  ;;  %v478_v8 = vsel %vm3824_vm5, 0, %v477_v4  ;;  %v3841_v10 = vld [vmem:[%s5193_s1] ss:$0 sm:$0xff]  ;;  %v490_v20 = vsel %vm3824_vm5, 0, %v489_v17  ;;  %vm3886_vm11 = vmand %vm405_vm6, %vm466_vm4  ;;  %s4929_s9 = scalar_lea.vmem %s5196_s4, %s3611_s22 }
  0x10   : > { %v3697_v9 = vld [vmem:[%s3833_s27 + $0x18] sm:$0xff]   ;;  %479 = vst [vmem:[#allocation2 + $0x38] sm:$0x1] %v478_v8  ;;  %v439_v16 = vld [vmem:[#allocation2 + $0x60] sm:$0x1]  ;;  %vm1853_vm14 = vcmask 1042432  }
  0x11   : > { %v3701_v11 = vld [vmem:[%s3833_s27 + $0x38] sm:$0xff]   ;;  %v3645_v12 = vunpack.c.l.bf16 %v3697_v9  ;;  %v3646_v13 = vunpack.c.h.bf16 %v3697_v9  ;;  %406 = vst.msk [vmem:[#allocation2] sm:$0xf] %vm405_vm6, %v3763_v18  ;;  %v440_v19 = vsel %vm3810_vm3, 0, %v439_v16  ;;  %v451_v22 = vld [vmem:[#allocation2 + $0x90] sm:$0x1] }
  0x12   : > { %v3661_v14 = vunpack.c.l.bf16 %v3701_v11  ;;  %v3662_v15 = vunpack.c.h.bf16 %v3701_v11  ;;  %v3705_v21 = vld [vmem:[%s3833_s27 + $0x58] sm:$0xff]   ;;  %441 = vst [vmem:[#allocation2 + $0x60] sm:$0x1] %v440_v19  ;;  %v452_v30 = vsel %vm3810_vm3, 0, %v451_v22  ;;  %v3864_v36 = vld [vmem:[%s3833_s27 + $0x20] sm:$0xff]   ;;  %vm1854_vm15 = vcmask 1046532  }
  0x13   : > { %v311_v23 = vmul.f32 %v3818_v5, %v3645_v12  ;;  %v312_v24 = vmul.f32 %v3818_v5, %v3646_v13  ;;  %v501_v27 = vld [vmem:[#allocation2 + $0x98] sm:$0x1]  ;;  %491 = vst [vmem:[#allocation2 + $0x68] sm:$0x1] %v490_v20  ;;  %v3677_v28 = vunpack.c.l.bf16 %v3705_v21  ;;  %v3678_v29 = vunpack.c.h.bf16 %v3705_v21  ;;  %s3374_s22 = sshll.u32 %s5328_s19, 1 }
  0x14   : > { %v319_v25 = vmul.f32 %v3818_v5, %v3661_v14  ;;  %v320_v26 = vmul.f32 %v3818_v5, %v3662_v15  ;;  %v502_v31 = vsel %vm3824_vm5, 0, %v501_v27  ;;  %453 = vst [vmem:[#allocation2 + $0x90] sm:$0x1] %v452_v30  ;;  %vm548_vm7 = vsmask.f32 4368  ;;  %s235_s12 = scalar_lea.vmem %s5197_s5, %s3374_s22 }
  0x15   : > { %v347_v32 = vadd.f32 %v3841_v10, %v311_v23  ;;  %v348_v33 = vadd.f32 %v3841_v10, %v312_v24  ;;  %v327_v37 = vmul.f32 %v3818_v5, %v3677_v28  ;;  %v328_v38 = vmul.f32 %v3818_v5, %v3678_v29  ;;  %503 = vst [vmem:[#allocation2 + $0x98] sm:$0x1] %v502_v31  ;;  %vm3878_vm10 = vmor %vm416_vm2, %vm548_vm7 }
  0x16   : > { %v355_v34 = vadd.f32 %v3841_v10, %v319_v25  ;;  %v356_v35 = vadd.f32 %v3841_v10, %v320_v26  ;;  %407 = vst.msk [vmem:[#allocation2 + $0x4] sm:$0xf] %vm405_vm6, %v3763_v18  ;;  %v3649_v46 = vunpack.c.l.bf16 %v3864_v36  ;;  %v3650_v47 = vunpack.c.h.bf16 %v3864_v36  ;;  %v893_v60 = vld [vmem:[#allocation2 + $0x30] sm:$0xf]  ;;  %vm4362_vm2 = vmor %vm1853_vm14, %vm1854_vm15 }
  0x17   : > { %v379_v39 = vmax.f32 %v347_v32, 0.0  ;;  %v380_v40 = vmax.f32 %v348_v33, 0.0  ;;  %v363_v43 = vadd.f32 %v3841_v10, %v327_v37  ;;  %v364_v44 = vadd.f32 %v3841_v10, %v328_v38  ;;  %409 = vst.msk [vmem:[#allocation2 + $0x8] sm:$0x1] %vm408_vm1, %v3763_v18  ;;  %v897_v61 = vld [vmem:[#allocation2 + $0x38] sm:$0x1] }
  0x18   : > { %v387_v41 = vmax.f32 %v355_v34, 0.0  ;;  %v388_v42 = vmax.f32 %v356_v35, 0.0  ;;  %v984_v45 = vld [vmem:[#allocation2] sm:$0xf]  ;;  %vm1039_vm8 = vsmask.f32 3328 }
  0x19   : > { %v522_v48 = vpack.c.bf16 %v379_v39, %v379_v39  ;;  %v523_v49 = vpack.c.bf16 %v380_v40, %v380_v40  ;;  %v395_v52 = vmax.f32 %v363_v43, 0.0  ;;  %v396_v53 = vmax.f32 %v364_v44, 0.0  ;;  %v921_v8 = vld [vmem:[#allocation2 + $0x60] sm:$0xf]  ;;  %411 = vst.msk [vmem:[#allocation2 + $0xcc] sm:$0xf] %vm405_vm6, %v3763_v18 }
  0x1a   : > { %v530_v50 = vpack.c.bf16 %v387_v41, %v387_v41  ;;  %v531_v51 = vpack.c.bf16 %v388_v42, %v388_v42  ;;  %v1043_v54 = vshrl.u32 %v984_v45, 16  ;;  %v1046_v55 = vshll.u32 %v984_v45, 16  ;;  %412 = vst.msk [vmem:[#allocation2 + $0xd0] sm:$0xf] %vm405_vm6, %v3763_v18  ;;  %v925_v22 = vld [vmem:[#allocation2 + $0x68] sm:$0x1] }
  0x1b   : > { %v602_v56 = vshrl.u32 %v522_v48, 16  ;;  %v605_v57 = vshll.u32 %v522_v48, 16  ;;  %v610_v58 = vshrl.u32 %v523_v49, 16  ;;  %v613_v59 = vshll.u32 %v523_v49, 16  ;;  %413 = vst.msk [vmem:[#allocation2 + $0xd4] sm:$0x1] %vm408_vm1, %v3763_v18 }
  0x1c   : > { %vm1040_vm9 = vsmask.f32 7440  ;;  %v670_v62 = vshrl.u32 %v530_v50, 16  ;;  %v673_v63 = vshll.u32 %v530_v50, 16  ;;  %v678_v0 = vshrl.u32 %v531_v51, 16 }
  0x1d   : > { %v681_v1 = vshll.u32 %v531_v51, 16  ;;  %v604_v4 = vrot.slane %v602_v56, 7  ;;  %v612_v6 = vrot.slane %v610_v58, 7  ;;  %v538_v9 = vpack.c.bf16 %v395_v52, %v395_v52  ;;  %v985_v31 = vld [vmem:[#allocation2 + $0x4] sm:$0xf]  ;;  %vm3917_vm12 = vmor %vm1039_vm8, %vm1040_vm9 }
  0x1e   : > { %v539_v11 = vpack.c.bf16 %v396_v53, %v396_v53  ;;  %v672_v13 = vrot.slane %v670_v62, 7  ;;  %v680_v14 = vrot.slane %v678_v0, 7  ;;  %v1045_v15 = vrot.slane %v1043_v54, 4  ;;  %v986_v32 = vld [vmem:[#allocation2 + $0x8] sm:$0x1]  ;;  %v3930_v62 = vld [vmem:[%s3833_s27 + $0x40] sm:$0xff]  }
  0x1f   : > { %v1048_v16 = vrot.slane %v1046_v55, 5  ;;  %v607_v17 = vor.u32 %v605_v57, %v604_v4  ;;  %v608_v19 = vrot.slane %v604_v4, 4  ;;  %v615_v20 = vor.u32 %v613_v59, %v612_v6  ;;  %v949_v37 = vld [vmem:[#allocation2 + $0x90] sm:$0xf]  ;;  %v1968_v38 = vld [vmem:[%s5195_s3 + $0x8] sm:$0xf] }
  0x20   : > { %v617_v21 = vrot.slane %v612_v6, 4  ;;  %v675_v23 = vor.u32 %v673_v63, %v672_v13  ;;  %v676_v24 = vrot.slane %v672_v13, 4  ;;  %v683_v25 = vor.u32 %v681_v1, %v680_v14  ;;  %v953_v52 = vld [vmem:[#allocation2 + $0x98] sm:$0x1]  ;;  %v1038_v4 = vld [vmem:[%s5195_s3] sm:$0xf] }
  0x21   : > { %v685_v26 = vrot.slane %v680_v14, 4  ;;  %v616_v27 = vsel %vm3878_vm10, %v608_v19, %v615_v20  ;;  %v894_v28 = vsel %vm3886_vm11, %v607_v17, %v893_v60  ;;  %v738_v30 = vshrl.u32 %v538_v9, 16 }
  0x22   : > { %v898_v29 = vsel %vm3810_vm3, %v617_v21, %v897_v61  ;;  %895 = vst [vmem:[#allocation2 + $0x30] sm:$0xf] %v894_v28  ;;  %v684_v18 = vsel %vm3878_vm10, %v676_v24, %v683_v25  ;;  %v922_v33 = vsel %vm3886_vm11, %v675_v23, %v921_v8  ;;  %v741_v35 = vshll.u32 %v538_v9, 16  ;;  %v2189_v61 = vld [vmem:[%s5195_s3 + $0xc] sm:$0xf] }
  0x23   : > { %v926_v34 = vsel %vm3810_vm3, %v685_v26, %v925_v22  ;;  %896 = vst.msk [vmem:[#allocation2 + $0x34] sm:$0xf] %vm405_vm6, %v616_v27  ;;  %v740_v39 = vrot.slane %v738_v30, 7  ;;  %v746_v40 = vshrl.u32 %v539_v11, 16  ;;  %v749_v41 = vshll.u32 %v539_v11, 16 }
  0x24   : > { %v2066_v42 = vsel %vm1524_vm0, %v1968_v38, 0  ;;  %899 = vst [vmem:[#allocation2 + $0x38] sm:$0x1] %v898_v29  ;;  %v1049_v43 = vor.u32 %v1048_v16, %v1045_v15  ;;  %v1052_v44 = vshll.u32 %v985_v31, 16  ;;  %v1056_v45 = vshrl.u32 %v985_v31, 16 }
  0x25   : > { %2075 = vmatpush.bf16.msrb.mxu2 %v2066_v42  ;;  %v1062_v48 = vshll.u32 %v986_v32, 16  ;;  %923 = vst [vmem:[#allocation2 + $0x60] sm:$0xf] %v922_v33  ;;  %v743_v49 = vor.u32 %v741_v35, %v740_v39  ;;  %v744_v50 = vrot.slane %v740_v39, 4  ;;  %v748_v51 = vrot.slane %v746_v40, 7 }
  0x26   : > { %924 = vst.msk [vmem:[#allocation2 + $0x64] sm:$0xf] %vm405_vm6, %v684_v18  ;;  %v1050_v53 = vrot.slane %v1049_v43, 4  ;;  %v1054_v54 = vrot.slane %v1052_v44, 5  ;;  %v1058_v55 = vrot.slane %v1056_v45, 4  ;;  %v313_v56 = vmul.f32 %v3818_v5, %v3649_v46 }
  0x27   : > { %927 = vst [vmem:[#allocation2 + $0x68] sm:$0x1] %v926_v34  ;;  %v751_v58 = vor.u32 %v749_v41, %v748_v51  ;;  %v753_v59 = vrot.slane %v748_v51, 4  ;;  %v950_v60 = vsel %vm3886_vm11, %v743_v49, %v949_v37  ;;  %v314_v46 = vmul.f32 %v3818_v5, %v3650_v47 }
  0x28   : > { %951 = vst [vmem:[#allocation2 + $0x90] sm:$0xf] %v950_v60  ;;  %v1055_v63 = vsel %vm3917_vm12, %v1050_v53, %v1054_v54  ;;  %v3934_v0 = vrot.slane %v1062_v48, 5  ;;  %v2199_v1 = vsel %vm1524_vm0, %v2189_v61, 0  ;;  %v1059_v8 = vor.u32 %v1058_v55, %v1054_v54  ;;  %v3957_v54 = vld [vmem:[%s3833_s27 + $0x60] sm:$0xff]  }
  0x29   : > { %v996_v6 = vld [vmem:[#allocation2 + $0x30] sm:$0xf]  ;;  %v752_v36 = vsel %vm3878_vm10, %v744_v50, %v751_v58  ;;  %v954_v47 = vsel %vm3810_vm3, %v753_v59, %v953_v52  ;;  %2208 = vmatpush.bf16.msrb.mxu3 %v2199_v1  ;;  %v1746_v9 = vsel %vm1524_vm0, %v1038_v4, 0  ;;  %v3946_v15 = vunpack.c.l.b16 %v1055_v63 }
  0x2a   : > { %v997_v11 = vld [vmem:[#allocation2 + $0x34] sm:$0xf]  ;;  %v1139_v13 = vshrl.u32 %v996_v6, 16  ;;  %v1142_v14 = vshll.u32 %v996_v6, 16  ;;  %952 = vst.msk [vmem:[#allocation2 + $0x94] sm:$0xf] %vm405_vm6, %v752_v36  ;;  %1755 = vmatpush.bf16.msrb.mxu1 %v1746_v9  ;;  %v3949_v16 = vadd.f32 %v3841_v10, %v313_v56  ;;  %v3952_v21 = vadd.f32 %v3841_v10, %v314_v46 }
  0x2b   : > { %v998_v17 = vld [vmem:[#allocation2 + $0x38] sm:$0x1]  ;;  %v1148_v19 = vshll.u32 %v997_v11, 16  ;;  %v1152_v20 = vshrl.u32 %v997_v11, 16  ;;  %955 = vst [vmem:[#allocation2 + $0x98] sm:$0x1] %v954_v47  ;;  %v3665_v22 = vunpack.c.l.bf16 %v3930_v62  ;;  %v3666_v27 = vunpack.c.h.bf16 %v3930_v62 }
  0x2c   : > { %v1141_v23 = vrot.slane %v1139_v13, 4  ;;  %v1144_v24 = vrot.slane %v1142_v14, 5  ;;  %v1158_v25 = vshll.u32 %v998_v17, 16  ;;  %v1008_v26 = vld [vmem:[#allocation2 + $0x60] sm:$0xf]  ;;  %v1060_v48 = vrot.slane %v1059_v8, 4 }
  0x2d   : > { %v1150_v28 = vrot.slane %v1148_v19, 5  ;;  %v1154_v29 = vrot.slane %v1152_v20, 4  ;;  %v1009_v30 = vld [vmem:[#allocation2 + $0x64] sm:$0xf]  ;;  %v1235_v31 = vshrl.u32 %v1008_v26, 16  ;;  %v1238_v32 = vshll.u32 %v1008_v26, 16 }
  0x2e   : > { %v1145_v18 = vor.u32 %v1144_v24, %v1141_v23  ;;  %v1160_v33 = vrot.slane %v1158_v25, 5  ;;  %v1010_v34 = vld [vmem:[#allocation2 + $0x68] sm:$0x1]  ;;  %v1244_v35 = vshll.u32 %v1009_v30, 16  ;;  %v1248_v37 = vshrl.u32 %v1009_v30, 16 }
  0x2f   : > { %v1155_v38 = vor.u32 %v1154_v29, %v1150_v28  ;;  %v1237_v39 = vrot.slane %v1235_v31, 4  ;;  %v1240_v40 = vrot.slane %v1238_v32, 5  ;;  %v1254_v41 = vshll.u32 %v1010_v34, 16  ;;  %v1020_v42 = vld [vmem:[#allocation2 + $0x90] sm:$0xf] }
  0x30   : > { %v1146_v43 = vrot.slane %v1145_v18, 4  ;;  %v1246_v44 = vrot.slane %v1244_v35, 5  ;;  %v1250_v45 = vrot.slane %v1248_v37, 4  ;;  %v1331_v53 = vshrl.u32 %v1020_v42, 16  ;;  %v2346_v14 = vld [vmem:[%s5195_s3 + $0x10] sm:$0xf] }
  0x31   : > { %v1156_v49 = vrot.slane %v1155_v38, 4  ;;  %v1241_v50 = vor.u32 %v1240_v40, %v1237_v39  ;;  %v1256_v51 = vrot.slane %v1254_v41, 5  ;;  %v1021_v52 = vld [vmem:[#allocation2 + $0x94] sm:$0xf]  ;;  %v1334_v59 = vshll.u32 %v1020_v42, 16 }
  0x32   : > { %v1151_v55 = vsel %vm3917_vm12, %v1146_v43, %v1150_v28  ;;  %v1251_v56 = vor.u32 %v1250_v45, %v1246_v44  ;;  %v1022_v58 = vld [vmem:[#allocation2 + $0x98] sm:$0x1]  ;;  %v1340_v60 = vshll.u32 %v1021_v52, 16  ;;  %v1333_v1 = vrot.slane %v1331_v53, 4  ;;  %v430_v24 = vld [vmem:[#allocation2 + $0x3c] sm:$0x1] }
  0x33   : > { %v1161_v61 = vsel %vm3917_vm12, %v1156_v49, %v1160_v33  ;;  %v1435_v46 = vunpack.c.l.b16 %v1151_v55  ;;  %v1242_v63 = vrot.slane %v1241_v50, 4  ;;  %v1336_v36 = vrot.slane %v1334_v59, 5  ;;  %v480_v30 = vld [vmem:[#allocation2 + $0x44] sm:$0x1]  ;;  %v492_v45 = vld [vmem:[#allocation2 + $0x74] sm:$0x1] }
  0x34   : > { %v1436_v4 = vunpack.c.l.b16 %v1161_v61  ;;  %v1252_v6 = vrot.slane %v1251_v56, 4  ;;  %v3681_v47 = vunpack.c.l.bf16 %v3957_v54  ;;  %v1342_v9 = vrot.slane %v1340_v60, 5 }
  0x35   : > { %v1247_v8 = vsel %vm3917_vm12, %v1242_v63, %v1246_v44  ;;  %v1344_v11 = vshrl.u32 %v1021_v52, 16  ;;  %v1350_v13 = vshll.u32 %v1022_v58, 16  ;;  %v1337_v23 = vor.u32 %v1336_v36, %v1333_v1 }
  0x36   : > { %v3969_v17 = vpack.c.b16 %v1436_v4, %v1435_v46  ;;  %v1257_v19 = vsel %vm3917_vm12, %v1252_v6, %v1256_v51  ;;  %v1443_v20 = vunpack.c.l.b16 %v1247_v8  ;;  %v1065_v29 = vsel %vm3917_vm12, %v1060_v48, %v3934_v0  ;;  %v442_v0 = vld [vmem:[#allocation2 + $0x6c] sm:$0x1]  ;;  %v454_v46 = vld [vmem:[#allocation2 + $0x9c] sm:$0x1] }
  0x37   : > { %v1444_v25 = vunpack.c.l.b16 %v1257_v19  ;;  %v1346_v26 = vrot.slane %v1344_v11, 4  ;;  %v1352_v28 = vrot.slane %v1350_v13, 5  ;;  %v1338_v31 = vrot.slane %v1337_v23, 4 }
  0x38   : > { %5239 = vst [vmem:[#allocation3_spill] sm:$0xff] %v3969_v17  ;;  %3379 = vmatmul.msk.bf16.vlgmr.msra.gmra.mxu1 %vm1475_vm13, %v3969_v17  ;;  %v1428_v32 = vunpack.c.l.b16 %v1065_v29  ;;  %v2354_v18 = vsel %vm1524_vm0, %v2346_v14, 0  ;;  %v381_v33 = vmax.f32 %v3949_v16, 0.0  ;;  %v382_v37 = vmax.f32 %v3952_v21, 0.0  ;;  %v3632_v14 = vld [vmem:[%s3833_s27] sm:$0xff]  }
  0x39   : > { %v3980_v34 = vpack.c.b16 %v1444_v25, %v1443_v20  ;;  %v1347_v35 = vor.u32 %v1346_v26, %v1342_v9  ;;  %2363 = vmatpush.bf16.msrb.mxu0 %v2354_v18  ;;  %v431_v38 = vsel %vm3810_vm3, 0, %v430_v24  ;;  %v1343_v39 = vsel %vm3917_vm12, %v1338_v31, %v1342_v9  ;;  %v504_v24 = vld [vmem:[#allocation2 + $0xa4] sm:$0x1] }
  0x3a   : > { %v1459_v40 = vpack.c.b16 %v1428_v32, %v3946_v15  ;;  %432 = vst [vmem:[#allocation2 + $0x3c] sm:$0x1] %v431_v38  ;;  %v481_v41 = vsel %vm3824_vm5, 0, %v480_v30  ;;  %v524_v16 = vpack.c.bf16 %v381_v33, %v381_v33  ;;  %v1451_v43 = vunpack.c.l.b16 %v1343_v39 }
  0x3b   : > { %5240 = vst [vmem:[#allocation4_spill] sm:$0xff] %v3980_v34  ;;  %3383 = vmatmul.msk.bf16.vlgmr.msra.gmra.mxu2 %vm1475_vm13, %v3980_v34  ;;  %v1348_v42 = vrot.slane %v1347_v35, 4  ;;  %v525_v21 = vpack.c.bf16 %v382_v37, %v382_v37  ;;  %v321_v44 = vmul.f32 %v3818_v5, %v3665_v22  ;;  %v322_v49 = vmul.f32 %v3818_v5, %v3666_v27 }
  0x3c   : > { %482 = vst [vmem:[#allocation2 + $0x44] sm:$0x1] %v481_v41  ;;  %3375 = vmatmul.msk.bf16.vlgmr.msra.gmra.mxu0 %vm1475_vm13, %v1459_v40  ;;  %v619_v15 = vshrl.u32 %v524_v16, 16  ;;  %v622_v48 = vshll.u32 %v524_v16, 16  ;;  %v443_v50 = vsel %vm3810_vm3, 0, %v442_v0  ;;  %v493_v62 = vsel %vm3824_vm5, 0, %v492_v45 }
  0x3d   : > { %v1353_v51 = vsel %vm3917_vm12, %v1348_v42, %v1352_v28  ;;  %v627_v52 = vshrl.u32 %v525_v21, 16  ;;  %v630_v53 = vshll.u32 %v525_v21, 16  ;;  %v357_v55 = vadd.f32 %v3841_v10, %v321_v44  ;;  %444 = vst [vmem:[#allocation2 + $0x6c] sm:$0x1] %v443_v50  ;;  %v4029_v0 = vld [vmem:[%s3833_s27 + $0x28] sm:$0xff]  }
  0x3e   : > { %v1452_v22 = vunpack.c.l.b16 %v1353_v51  ;;  %v621_v56 = vrot.slane %v619_v15, 7  ;;  %v358_v58 = vadd.f32 %v3841_v10, %v322_v49  ;;  %494 = vst [vmem:[#allocation2 + $0x74] sm:$0x1] %v493_v62  ;;  %v3682_v60 = vunpack.c.h.bf16 %v3957_v54 }
  0x3f   : > { %v629_v27 = vrot.slane %v627_v52, 7  ;;  %v389_v59 = vmax.f32 %v357_v55, 0.0  ;;  %v329_v61 = vmul.f32 %v3818_v5, %v3681_v47  ;;  %v455_v23 = vsel %vm3810_vm3, 0, %v454_v46 }
  0x40   : > { %v4009_v63 = vpack.c.b16 %v1452_v22, %v1451_v43  ;;  %v624_v1 = vor.u32 %v622_v48, %v621_v56  ;;  %v625_v4 = vrot.slane %v621_v56, 4  ;;  %v390_v6 = vmax.f32 %v358_v58, 0.0  ;;  %456 = vst [vmem:[#allocation2 + $0x9c] sm:$0x1] %v455_v23 }
  0x41   : > { %v632_v36 = vor.u32 %v630_v53, %v629_v27  ;;  %v634_v8 = vrot.slane %v629_v27, 4  ;;  %v900_v9 = vld [vmem:[#allocation2 + $0x3c] sm:$0xf]  ;;  %v532_v11 = vpack.c.bf16 %v389_v59, %v389_v59  ;;  %v330_v13 = vmul.f32 %v3818_v5, %v3682_v60 }
  0x42   : > { %5241 = vst [vmem:[#allocation5_spill] sm:$0xff] %v4009_v63  ;;  %3387 = vmatmul.msk.bf16.vlgmr.msra.gmra.mxu3 %vm1475_vm13, %v4009_v63  ;;  %v901_v54 = vsel %vm3886_vm11, %v624_v1, %v900_v9  ;;  %v533_v19 = vpack.c.bf16 %v390_v6, %v390_v6  ;;  %v365_v20 = vadd.f32 %v3841_v10, %v329_v61  ;;  %v3633_v18 = vunpack.c.l.bf16 %v3632_v14 }
  0x43   : > { %v904_v47 = vld [vmem:[#allocation2 + $0x44] sm:$0x1]  ;;  %v633_v25 = vsel %vm3878_vm10, %v625_v4, %v632_v36  ;;  %902 = vst [vmem:[#allocation2 + $0x3c] sm:$0xf] %v901_v54  ;;  %v687_v28 = vshrl.u32 %v532_v11, 16  ;;  %v690_v29 = vshll.u32 %v532_v11, 16  ;;  %v366_v32 = vadd.f32 %v3841_v10, %v330_v13 }
  0x44   : > { %v905_v26 = vsel %vm3810_vm3, %v634_v8, %v904_v47  ;;  %903 = vst.msk [vmem:[#allocation2 + $0x40] sm:$0xf] %vm405_vm6, %v633_v25  ;;  %v695_v30 = vshrl.u32 %v533_v19, 16  ;;  %v698_v31 = vshll.u32 %v533_v19, 16  ;;  %v397_v35 = vmax.f32 %v365_v20, 0.0 }
  0x45   : > { %906 = vst [vmem:[#allocation2 + $0x44] sm:$0x1] %v905_v26  ;;  %v689_v33 = vrot.slane %v687_v28, 7  ;;  %v505_v37 = vsel %vm3824_vm5, 0, %v504_v24  ;;  %v3634_v38 = vunpack.c.h.bf16 %v3632_v14  ;;  %v928_v40 = vld [vmem:[#allocation2 + $0x6c] sm:$0xf]  ;;  %v305_v16 = vmul.f32 %v3818_v5, %v3633_v18 }
  0x46   : > { %v697_v39 = vrot.slane %v695_v30, 7  ;;  %v398_v41 = vmax.f32 %v366_v32, 0.0  ;;  %v932_v21 = vld [vmem:[#allocation2 + $0x74] sm:$0x1]  ;;  %506 = vst [vmem:[#allocation2 + $0xa4] sm:$0x1] %v505_v37  ;;  %v540_v44 = vpack.c.bf16 %v397_v35, %v397_v35  ;;  %v3653_v50 = vunpack.c.l.bf16 %v4029_v0 }
  0x47   : > { %v692_v42 = vor.u32 %v690_v29, %v689_v33  ;;  %v693_v43 = vrot.slane %v689_v33, 4  ;;  %v306_v45 = vmul.f32 %v3818_v5, %v3634_v38  ;;  %v4037_v55 = vadd.f32 %v3841_v10, %v305_v16  ;;  %v418_v36 = vld [vmem:[#allocation2 + $0xc] sm:$0x1]  ;;  %v468_v47 = vld [vmem:[#allocation2 + $0x14] sm:$0x1] }
  0x48   : > { %v700_v15 = vor.u32 %v698_v31, %v697_v39  ;;  %v702_v48 = vrot.slane %v697_v39, 4  ;;  %v541_v49 = vpack.c.bf16 %v398_v41, %v398_v41  ;;  %v755_v52 = vshrl.u32 %v540_v44, 16  ;;  %v956_v24 = vld [vmem:[#allocation2 + $0x9c] sm:$0xf] }
  0x49   : > { %v929_v51 = vsel %vm3886_vm11, %v692_v42, %v928_v40  ;;  %v758_v53 = vshll.u32 %v540_v44, 16  ;;  %v342_v46 = vadd.f32 %v3841_v10, %v306_v45  ;;  %v3654_v8 = vunpack.c.h.bf16 %v4029_v0  ;;  %v4059_v44 = vld [vmem:[%s3833_s27 + $0x48] sm:$0xff]  }
  0x4a   : > { %v999_v22 = vld [vmem:[#allocation2 + $0x3c] sm:$0xf]  ;;  %v701_v56 = vsel %vm3878_vm10, %v693_v43, %v700_v15  ;;  %930 = vst [vmem:[#allocation2 + $0x6c] sm:$0xf] %v929_v51  ;;  %v933_v58 = vsel %vm3810_vm3, %v702_v48, %v932_v21  ;;  %v763_v62 = vshrl.u32 %v541_v49, 16  ;;  %v766_v27 = vshll.u32 %v541_v49, 16 }
  0x4b   : > { %v1000_v59 = vld [vmem:[#allocation2 + $0x40] sm:$0xf]  ;;  %v1163_v60 = vshrl.u32 %v999_v22, 16  ;;  %v1166_v61 = vshll.u32 %v999_v22, 16  ;;  %931 = vst.msk [vmem:[#allocation2 + $0x70] sm:$0xf] %vm405_vm6, %v701_v56  ;;  %v4047_v9 = vmul.f32 %v3818_v5, %v3653_v50 }
  0x4c   : > { %v1001_v1 = vld [vmem:[#allocation2 + $0x44] sm:$0x1]  ;;  %v1172_v4 = vshll.u32 %v1000_v59, 16  ;;  %v1176_v6 = vshrl.u32 %v1000_v59, 16  ;;  %934 = vst [vmem:[#allocation2 + $0x74] sm:$0x1] %v933_v58 }
  0x4d   : > { %v1165_v11 = vrot.slane %v1163_v60, 4  ;;  %v1168_v13 = vrot.slane %v1166_v61, 5  ;;  %v1182_v14 = vshll.u32 %v1001_v1, 16  ;;  %v757_v54 = vrot.slane %v755_v52, 7  ;;  %v960_v33 = vld [vmem:[#allocation2 + $0xa4] sm:$0x1] }
  0x4e   : > { %v1174_v19 = vrot.slane %v1172_v4, 5  ;;  %v1178_v20 = vrot.slane %v1176_v6, 4  ;;  %v765_v23 = vrot.slane %v763_v62, 7  ;;  %v373_v25 = vmax.f32 %v4037_v55, 0.0 }
  0x4f   : > { %v1169_v26 = vor.u32 %v1168_v13, %v1165_v11  ;;  %v1184_v28 = vrot.slane %v1182_v14, 5  ;;  %v760_v29 = vor.u32 %v758_v53, %v757_v54  ;;  %v761_v30 = vrot.slane %v757_v54, 4 }
  0x50   : > { %v1179_v31 = vor.u32 %v1178_v20, %v1174_v19  ;;  %v768_v32 = vor.u32 %v766_v27, %v765_v23  ;;  %v770_v18 = vrot.slane %v765_v23, 4  ;;  %v374_v35 = vmax.f32 %v342_v46, 0.0 }
  0x51   : > { %v1170_v37 = vrot.slane %v1169_v26, 4  ;;  %v1011_v38 = vld [vmem:[#allocation2 + $0x6c] sm:$0xf]  ;;  %v957_v0 = vsel %vm3886_vm11, %v760_v29, %v956_v24  ;;  %v419_v39 = vsel %vm3810_vm3, 0, %v418_v36  ;;  %v469_v40 = vsel %vm3824_vm5, 0, %v468_v47 }
  0x52   : > { %v1180_v41 = vrot.slane %v1179_v31, 4  ;;  %v1012_v16 = vld [vmem:[#allocation2 + $0x70] sm:$0xf]  ;;  %v1259_v42 = vshrl.u32 %v1011_v38, 16  ;;  %v1262_v43 = vshll.u32 %v1011_v38, 16  ;;  %v769_v21 = vsel %vm3878_vm10, %v761_v30, %v768_v32 }
  0x53   : > { %v1175_v45 = vsel %vm3917_vm12, %v1170_v37, %v1174_v19  ;;  %v1013_v15 = vld [vmem:[#allocation2 + $0x74] sm:$0x1]  ;;  %v1268_v48 = vshll.u32 %v1012_v16, 16  ;;  %v1272_v49 = vshrl.u32 %v1012_v16, 16  ;;  %958 = vst [vmem:[#allocation2 + $0x9c] sm:$0xf] %v957_v0  ;;  %v961_v50 = vsel %vm3810_vm3, %v770_v18, %v960_v33 }
  0x54   : > { %v1185_v51 = vsel %vm3917_vm12, %v1180_v41, %v1184_v28  ;;  %v1437_v52 = vunpack.c.l.b16 %v1175_v45  ;;  %v1261_v53 = vrot.slane %v1259_v42, 4  ;;  %v1264_v55 = vrot.slane %v1262_v43, 5  ;;  %959 = vst.msk [vmem:[#allocation2 + $0xa0] sm:$0xf] %vm405_vm6, %v769_v21  ;;  %v433_v36 = vld [vmem:[#allocation2 + $0x48] sm:$0x1] }
  0x55   : > { %v1438_v22 = vunpack.c.l.b16 %v1185_v51  ;;  %v1270_v56 = vrot.slane %v1268_v48, 5  ;;  %v1274_v58 = vrot.slane %v1272_v49, 4  ;;  %v1278_v62 = vshll.u32 %v1013_v15, 16  ;;  %962 = vst [vmem:[#allocation2 + $0xa4] sm:$0x1] %v961_v50 }
  0x56   : > { %v1265_v27 = vor.u32 %v1264_v55, %v1261_v53  ;;  %420 = vst [vmem:[#allocation2 + $0xc] sm:$0x1] %v419_v39  ;;  %v516_v59 = vpack.c.bf16 %v373_v25, %v373_v25  ;;  %v517_v60 = vpack.c.bf16 %v374_v35, %v374_v35  ;;  %v3669_v61 = vunpack.c.l.bf16 %v4059_v44  ;;  %v483_v0 = vld [vmem:[#allocation2 + $0x50] sm:$0x1] }
  0x57   : > { %v4069_v46 = vpack.c.b16 %v1438_v22, %v1437_v52  ;;  %v1275_v1 = vor.u32 %v1274_v58, %v1270_v56  ;;  %v1280_v4 = vrot.slane %v1278_v62, 5  ;;  %470 = vst [vmem:[#allocation2 + $0x14] sm:$0x1] %v469_v40  ;;  %v316_v6 = vmul.f32 %v3818_v5, %v3654_v8  ;;  %v445_v58 = vld [vmem:[#allocation2 + $0x78] sm:$0x1] }
  0x58   : > { %v1266_v11 = vrot.slane %v1265_v27, 4  ;;  %v551_v13 = vshrl.u32 %v516_v59, 16  ;;  %v554_v14 = vshll.u32 %v516_v59, 16  ;;  %v559_v54 = vshrl.u32 %v517_v60, 16  ;;  %v495_v62 = vld [vmem:[#allocation2 + $0x80] sm:$0x1] }
  0x59   : > { %5242 = vst [vmem:[#allocation6_spill] sm:$0xff] %v4069_v46  ;;  %3380 = vmatmul.msk.bf16.gmra.mxu1 %vm1475_vm13, %v4069_v46  ;;  %v1276_v47 = vrot.slane %v1275_v1, 4  ;;  %v562_v19 = vshll.u32 %v517_v60, 16  ;;  %v351_v20 = vadd.f32 %v3841_v10, %v4047_v9  ;;  %v352_v23 = vadd.f32 %v3841_v10, %v316_v6 }
  0x5a   : > { %v1271_v24 = vsel %vm3917_vm12, %v1266_v11, %v1270_v56  ;;  %v1023_v25 = vld [vmem:[#allocation2 + $0x9c] sm:$0xf]  ;;  %v553_v8 = vrot.slane %v551_v13, 7  ;;  %v561_v26 = vrot.slane %v559_v54, 7  ;;  %v434_v28 = vsel %vm3810_vm3, 0, %v433_v36 }
  0x5b   : > { %v1281_v29 = vsel %vm3917_vm12, %v1276_v47, %v1280_v4  ;;  %v1445_v30 = vunpack.c.l.b16 %v1271_v24  ;;  %v1024_v31 = vld [vmem:[#allocation2 + $0xa0] sm:$0xf]  ;;  %v1355_v32 = vshrl.u32 %v1023_v25, 16  ;;  %v1358_v18 = vshll.u32 %v1023_v25, 16  ;;  %435 = vst [vmem:[#allocation2 + $0x48] sm:$0x1] %v434_v28 }
  0x5c   : > { %v1446_v9 = vunpack.c.l.b16 %v1281_v29  ;;  %v1025_v33 = vld [vmem:[#allocation2 + $0xa4] sm:$0x1]  ;;  %v1364_v35 = vshll.u32 %v1024_v31, 16  ;;  %v1368_v37 = vshrl.u32 %v1024_v31, 16  ;;  %v556_v38 = vor.u32 %v554_v14, %v553_v8  ;;  %v457_v24 = vld [vmem:[#allocation2 + $0xa8] sm:$0x1] }
  0x5d   : > { %v1357_v39 = vrot.slane %v1355_v32, 4  ;;  %v1360_v40 = vrot.slane %v1358_v18, 5  ;;  %v1374_v41 = vshll.u32 %v1025_v33, 16  ;;  %v872_v16 = vld [vmem:[#allocation2 + $0xc] sm:$0xf]  ;;  %v3670_v42 = vunpack.c.h.bf16 %v4059_v44 }
  0x5e   : > { %v4084_v43 = vpack.c.b16 %v1446_v9, %v1445_v30  ;;  %v1366_v21 = vrot.slane %v1364_v35, 5  ;;  %v1370_v45 = vrot.slane %v1368_v37, 4  ;;  %v557_v15 = vrot.slane %v553_v8, 4  ;;  %v876_v48 = vld [vmem:[#allocation2 + $0x14] sm:$0x1] }
  0x5f   : > { %v1361_v49 = vor.u32 %v1360_v40, %v1357_v39  ;;  %v1376_v50 = vrot.slane %v1374_v41, 5  ;;  %v564_v51 = vor.u32 %v562_v19, %v561_v26  ;;  %v566_v52 = vrot.slane %v561_v26, 4  ;;  %v3707_v19 = vld [vmem:[%s3833_s27 + $0x68] sm:$0xff]  }
  0x60   : > { %3384 = vmatmul.msk.bf16.gmra.mxu2 %vm1475_vm13, %v4084_v43  ;;  %v1371_v53 = vor.u32 %v1370_v45, %v1366_v21  ;;  %v873_v55 = vsel %vm3886_vm11, %v556_v38, %v872_v16  ;;  %v383_v22 = vmax.f32 %v351_v20, 0.0  ;;  %v384_v56 = vmax.f32 %v352_v23, 0.0 }
  0x61   : > { %v1362_v27 = vrot.slane %v1361_v49, 4  ;;  %v565_v59 = vsel %vm3878_vm10, %v557_v15, %v564_v51  ;;  %874 = vst [vmem:[#allocation2 + $0xc] sm:$0xf] %v873_v55  ;;  %v877_v60 = vsel %vm3810_vm3, %v566_v52, %v876_v48  ;;  %v484_v1 = vsel %vm3824_vm5, 0, %v483_v0 }
  0x62   : > { %v1372_v4 = vrot.slane %v1371_v53, 4  ;;  %875 = vst.msk [vmem:[#allocation2 + $0x10] sm:$0xf] %vm405_vm6, %v565_v59  ;;  %v526_v6 = vpack.c.bf16 %v383_v22, %v383_v22  ;;  %v527_v36 = vpack.c.bf16 %v384_v56, %v384_v56  ;;  %v323_v11 = vmul.f32 %v3818_v5, %v3669_v61  ;;  %v907_v33 = vld [vmem:[#allocation2 + $0x48] sm:$0xf] }
  0x63   : > { %v1367_v13 = vsel %vm3917_vm12, %v1362_v27, %v1366_v21  ;;  %878 = vst [vmem:[#allocation2 + $0x14] sm:$0x1] %v877_v60  ;;  %v324_v14 = vmul.f32 %v3818_v5, %v3670_v42  ;;  %v446_v54 = vsel %vm3810_vm3, 0, %v445_v58  ;;  %v496_v47 = vsel %vm3824_vm5, 0, %v495_v62 }
  0x64   : > { %v1377_v20 = vsel %vm3917_vm12, %v1372_v4, %v1376_v50  ;;  %v1453_v23 = vunpack.c.l.b16 %v1367_v13  ;;  %485 = vst [vmem:[#allocation2 + $0x50] sm:$0x1] %v484_v1  ;;  %v636_v44 = vshrl.u32 %v526_v6, 16  ;;  %v639_v61 = vshll.u32 %v526_v6, 16  ;;  %v3695_v13 = vld [vmem:[%s3833_s27 + $0x8] sm:$0xff]  }
  0x65   : > { %v1454_v25 = vunpack.c.l.b16 %v1377_v20  ;;  %v644_v8 = vshrl.u32 %v527_v36, 16  ;;  %v647_v26 = vshll.u32 %v527_v36, 16  ;;  %v359_v28 = vadd.f32 %v3841_v10, %v323_v11  ;;  %447 = vst [vmem:[#allocation2 + $0x78] sm:$0x1] %v446_v54  ;;  %v507_v11 = vld [vmem:[#allocation2 + $0xb0] sm:$0x1] }
  0x66   : > { %v638_v29 = vrot.slane %v636_v44, 7  ;;  %v360_v30 = vadd.f32 %v3841_v10, %v324_v14  ;;  %497 = vst [vmem:[#allocation2 + $0x80] sm:$0x1] %v496_v47  ;;  %v3685_v31 = vunpack.c.l.bf16 %v3707_v19  ;;  %v3686_v32 = vunpack.c.h.bf16 %v3707_v19 }
  0x67   : > { %v4112_v18 = vpack.c.b16 %v1454_v25, %v1453_v23  ;;  %v646_v9 = vrot.slane %v644_v8, 7  ;;  %v391_v35 = vmax.f32 %v359_v28, 0.0  ;;  %v458_v37 = vsel %vm3810_vm3, 0, %v457_v24 }
  0x68   : > { %v4116_v38 = vld [vmem:[#allocation2 + $0xc] sm:$0xf]  ;;  %v641_v0 = vor.u32 %v639_v61, %v638_v29  ;;  %v642_v39 = vrot.slane %v638_v29, 4  ;;  %v392_v40 = vmax.f32 %v360_v30, 0.0  ;;  %v331_v41 = vmul.f32 %v3818_v5, %v3685_v31  ;;  %459 = vst [vmem:[#allocation2 + $0xa8] sm:$0x1] %v458_v37 }
  0x69   : > { %3388 = vmatmul.msk.bf16.gmra.mxu3 %vm1475_vm13, %v4112_v18  ;;  %v4121_v16 = vld [vmem:[#allocation2 + $0x10] sm:$0xf]  ;;  %v1067_v42 = vshrl.u32 %v4116_v38, 16  ;;  %v1070_v21 = vshll.u32 %v4116_v38, 16  ;;  %v649_v45 = vor.u32 %v647_v26, %v646_v9  ;;  %v651_v15 = vrot.slane %v646_v9, 4 }
  0x6a   : > { %v4125_v48 = vld [vmem:[#allocation2 + $0x14] sm:$0x1]  ;;  %v1076_v49 = vshll.u32 %v4121_v16, 16  ;;  %v1080_v50 = vshrl.u32 %v4121_v16, 16  ;;  %v908_v51 = vsel %vm3886_vm11, %v641_v0, %v907_v33  ;;  %v534_v52 = vpack.c.bf16 %v391_v35, %v391_v35 }
  0x6b   : > { %v1069_v53 = vrot.slane %v1067_v42, 4  ;;  %v1072_v55 = vrot.slane %v1070_v21, 5  ;;  %v1086_v22 = vshll.u32 %v4125_v48, 16  ;;  %v650_v56 = vsel %vm3878_vm10, %v642_v39, %v649_v45  ;;  %909 = vst [vmem:[#allocation2 + $0x48] sm:$0xf] %v908_v51 }
  0x6c   : > { %v1078_v58 = vrot.slane %v1076_v49, 5  ;;  %v1082_v62 = vrot.slane %v1080_v50, 4  ;;  %910 = vst.msk [vmem:[#allocation2 + $0x4c] sm:$0xf] %vm405_vm6, %v650_v56  ;;  %v911_v27 = vld [vmem:[#allocation2 + $0x50] sm:$0x1]  ;;  %v535_v59 = vpack.c.bf16 %v392_v40, %v392_v40  ;;  %v332_v60 = vmul.f32 %v3818_v5, %v3686_v32 }
  0x6d   : > { %v1073_v1 = vor.u32 %v1072_v55, %v1069_v53  ;;  %v1088_v4 = vrot.slane %v1086_v22, 5  ;;  %v912_v6 = vsel %vm3810_vm3, %v651_v15, %v911_v27  ;;  %v704_v36 = vshrl.u32 %v534_v52, 16  ;;  %v935_v25 = vld [vmem:[#allocation2 + $0x78] sm:$0xf]  ;;  %v939_v31 = vld [vmem:[#allocation2 + $0x80] sm:$0x1] }
  0x6e   : > { %v1083_v14 = vor.u32 %v1082_v62, %v1078_v58  ;;  %913 = vst [vmem:[#allocation2 + $0x50] sm:$0x1] %v912_v6  ;;  %v707_v54 = vshll.u32 %v534_v52, 16  ;;  %v712_v47 = vshrl.u32 %v535_v59, 16  ;;  %v715_v19 = vshll.u32 %v535_v59, 16 }
  0x6f   : > { %v1074_v20 = vrot.slane %v1073_v1, 4  ;;  %v706_v23 = vrot.slane %v704_v36, 7  ;;  %v367_v44 = vadd.f32 %v3841_v10, %v331_v41  ;;  %v368_v61 = vadd.f32 %v3841_v10, %v332_v60  ;;  %v421_v50 = vld [vmem:[#allocation2 + $0x18] sm:$0x1] }
  0x70   : > { %v1084_v5 = vrot.slane %v1083_v14, 4  ;;  %v714_v24 = vrot.slane %v712_v47, 7  ;;  %v508_v8 = vsel %vm3824_vm5, 0, %v507_v11  ;;  %v3637_v26 = vunpack.c.l.bf16 %v3695_v13  ;;  %v4172_v14 = vld [vmem:[%s5192_s0] ss:$0 sm:$0xff] }
  0x71   : > { %v1079_v28 = vsel %vm3917_vm12, %v1074_v20, %v1078_v58  ;;  %v709_v29 = vor.u32 %v707_v54, %v706_v23  ;;  %v710_v30 = vrot.slane %v706_v23, 4  ;;  %v399_v32 = vmax.f32 %v367_v44, 0.0  ;;  %509 = vst [vmem:[#allocation2 + $0xb0] sm:$0x1] %v508_v8 }
  0x72   : > { %v1089_v9 = vsel %vm3917_vm12, %v1084_v5, %v1088_v4  ;;  %v1429_v33 = vunpack.c.l.b16 %v1079_v28  ;;  %v4147_v10 = vld [vmem:[#allocation2 + $0x48] sm:$0xf]  ;;  %v717_v35 = vor.u32 %v715_v19, %v714_v24  ;;  %v719_v37 = vrot.slane %v714_v24, 4  ;;  %v4181_v5 = vld [vmem:[%s5193_s1] ss:$0 sm:$0xff] }
  0x73   : > { %v1430_v0 = vunpack.c.l.b16 %v1089_v9  ;;  %v4149_v39 = vld [vmem:[#allocation2 + $0x4c] sm:$0xf]  ;;  %v1187_v40 = vshrl.u32 %v4147_v10, 16  ;;  %v1190_v41 = vshll.u32 %v4147_v10, 16  ;;  %v936_v42 = vsel %vm3886_vm11, %v709_v29, %v935_v25 }
  0x74   : > { %v1196_v21 = vshll.u32 %v4149_v39, 16  ;;  %v1200_v45 = vshrl.u32 %v4149_v39, 16  ;;  %v718_v15 = vsel %vm3878_vm10, %v710_v30, %v717_v35  ;;  %937 = vst [vmem:[#allocation2 + $0x78] sm:$0xf] %v936_v42  ;;  %v940_v49 = vsel %vm3810_vm3, %v719_v37, %v939_v31  ;;  %v963_v35 = vld [vmem:[#allocation2 + $0xa8] sm:$0xf] }
  0x75   : > { %v4161_v51 = vpack.c.b16 %v1430_v0, %v1429_v33  ;;  %v4163_v52 = vld [vmem:[#allocation2 + $0x50] sm:$0x1]  ;;  %v1189_v53 = vrot.slane %v1187_v40, 4  ;;  %v1192_v55 = vrot.slane %v1190_v41, 5  ;;  %938 = vst.msk [vmem:[#allocation2 + $0x7c] sm:$0xf] %vm405_vm6, %v718_v15  ;;  %v542_v22 = vpack.c.bf16 %v399_v32, %v399_v32 }
  0x76   : > { %v1198_v56 = vrot.slane %v1196_v21, 5  ;;  %v1202_v58 = vrot.slane %v1200_v45, 4  ;;  %v1206_v62 = vshll.u32 %v4163_v52, 16  ;;  %941 = vst [vmem:[#allocation2 + $0x80] sm:$0x1] %v940_v49  ;;  %v400_v27 = vmax.f32 %v368_v61, 0.0 }
  0x77   : > { %3376 = vmatmul.msk.bf16.gmra.mxu0 %vm1475_vm13, %v4161_v51  ;;  %v1193_v59 = vor.u32 %v1192_v55, %v1189_v53  ;;  %v772_v60 = vshrl.u32 %v542_v22, 16  ;;  %v775_v1 = vshll.u32 %v542_v22, 16  ;;  %v3638_v4 = vunpack.c.h.bf16 %v3695_v13  ;;  %v471_v49 = vld [vmem:[#allocation2 + $0x20] sm:$0x1] }
  0x78   : > { %v1203_v6 = vor.u32 %v1202_v58, %v1198_v56  ;;  %v1208_v36 = vrot.slane %v1206_v62, 5  ;;  %v543_v11 = vpack.c.bf16 %v400_v27, %v400_v27  ;;  %v307_v54 = vmul.f32 %v4172_v14, %v3637_v26  ;;  %v3700_v58 = vld [vmem:[%s3833_s27 + $0x30] sm:$0xff]  }
  0x79   : > { %v1194_v47 = vrot.slane %v1193_v59, 4  ;;  %v774_v19 = vrot.slane %v772_v60, 7  ;;  %v308_v20 = vmul.f32 %v4172_v14, %v3638_v4  ;;  %v422_v23 = vsel %vm3810_vm3, 0, %v421_v50 }
  0x7a   : > { %v1204_v44 = vrot.slane %v1203_v6, 4  ;;  %v780_v61 = vshrl.u32 %v543_v11, 16  ;;  %v783_v13 = vshll.u32 %v543_v11, 16  ;;  %v343_v24 = vadd.f32 %v4181_v5, %v307_v54  ;;  %423 = vst [vmem:[#allocation2 + $0x18] sm:$0x1] %v422_v23 }
  0x7b   : > { %v1199_v25 = vsel %vm3917_vm12, %v1194_v47, %v1198_v56  ;;  %v1014_v8 = vld [vmem:[#allocation2 + $0x78] sm:$0xf]  ;;  %v777_v26 = vor.u32 %v775_v1, %v774_v19  ;;  %v778_v28 = vrot.slane %v774_v19, 4  ;;  %v344_v29 = vadd.f32 %v4181_v5, %v308_v20  ;;  %v967_v56 = vld [vmem:[#allocation2 + $0xb0] sm:$0x1] }
  0x7c   : > { %v1209_v30 = vsel %vm3917_vm12, %v1204_v44, %v1208_v36  ;;  %v1439_v31 = vunpack.c.l.b16 %v1199_v25  ;;  %v1015_v32 = vld [vmem:[#allocation2 + $0x7c] sm:$0xf]  ;;  %v1283_v9 = vshrl.u32 %v1014_v8, 16  ;;  %v1286_v33 = vshll.u32 %v1014_v8, 16  ;;  %v436_v1 = vld [vmem:[#allocation2 + $0x54] sm:$0x1] }
  0x7d   : > { %v1440_v37 = vunpack.c.l.b16 %v1209_v30  ;;  %v1016_v0 = vld [vmem:[#allocation2 + $0x80] sm:$0x1]  ;;  %v1292_v40 = vshll.u32 %v1015_v32, 16  ;;  %v1296_v41 = vshrl.u32 %v1015_v32, 16  ;;  %v782_v42 = vrot.slane %v780_v61, 7 }
  0x7e   : > { %v1285_v21 = vrot.slane %v1283_v9, 4  ;;  %v1288_v45 = vrot.slane %v1286_v33, 5  ;;  %v1302_v15 = vshll.u32 %v1016_v0, 16  ;;  %v964_v60 = vsel %vm3886_vm11, %v777_v26, %v963_v35  ;;  %v486_v54 = vld [vmem:[#allocation2 + $0x5c] sm:$0x1] }
  0x7f   : > { %v4189_v50 = vpack.c.b16 %v1440_v37, %v1439_v31  ;;  %v1294_v53 = vrot.slane %v1292_v40, 5  ;;  %v1298_v55 = vrot.slane %v1296_v41, 4  ;;  %v785_v22 = vor.u32 %v783_v13, %v782_v42  ;;  %965 = vst [vmem:[#allocation2 + $0xa8] sm:$0xf] %v964_v60  ;;  %v448_v33 = vld [vmem:[#allocation2 + $0x84] sm:$0x1] }
  0x80   : > { %v1289_v62 = vor.u32 %v1288_v45, %v1285_v21  ;;  %v1304_v27 = vrot.slane %v1302_v15, 5  ;;  %v787_v59 = vrot.slane %v782_v42, 4  ;;  %v375_v36 = vmax.f32 %v343_v24, 0.0 }
  0x81   : > { %5243 = vst [vmem:[#allocation7_spill] sm:$0xff] %v4189_v50  ;;  %3381 = vmatmul.msk.bf16.gmra.mxu1 %vm1475_vm13, %v4189_v50  ;;  %v1299_v4 = vor.u32 %v1298_v55, %v1294_v53  ;;  %v786_v6 = vsel %vm3878_vm10, %v778_v28, %v785_v22  ;;  %v376_v11 = vmax.f32 %v344_v29, 0.0  ;;  %v472_v20 = vsel %vm3824_vm5, 0, %v471_v49  ;;  %v3704_v29 = vld [vmem:[%s3833_s27 + $0x50] sm:$0xff]   ;;  %v879_v55 = vld [vmem:[#allocation2 + $0x18] sm:$0xf] }
  0x82   : > { %v1290_v47 = vrot.slane %v1289_v62, 4  ;;  %966 = vst.msk [vmem:[#allocation2 + $0xac] sm:$0xf] %vm405_vm6, %v786_v6  ;;  %v968_v19 = vsel %vm3810_vm3, %v787_v59, %v967_v56  ;;  %v3657_v23 = vunpack.c.l.bf16 %v3700_v58  ;;  %v518_v61 = vpack.c.bf16 %v375_v36, %v375_v36 }
  0x83   : > { %v1300_v44 = vrot.slane %v1299_v4, 4  ;;  %969 = vst [vmem:[#allocation2 + $0xb0] sm:$0x1] %v968_v19  ;;  %v519_v13 = vpack.c.bf16 %v376_v11, %v376_v11  ;;  %v3658_v25 = vunpack.c.h.bf16 %v3700_v58  ;;  %v437_v26 = vsel %vm3810_vm3, 0, %v436_v1 }
  0x84   : > { %v1295_v24 = vsel %vm3917_vm12, %v1290_v47, %v1294_v53  ;;  %473 = vst [vmem:[#allocation2 + $0x20] sm:$0x1] %v472_v20  ;;  %v317_v8 = vmul.f32 %v4172_v14, %v3657_v23  ;;  %v487_v28 = vsel %vm3824_vm5, 0, %v486_v54  ;;  %v568_v32 = vshrl.u32 %v518_v61, 16  ;;  %v3708_v23 = vld [vmem:[%s3833_s27 + $0x70] sm:$0xff]  }
  0x85   : > { %v1305_v30 = vsel %vm3917_vm12, %v1300_v44, %v1304_v27  ;;  %v1447_v31 = vunpack.c.l.b16 %v1295_v24  ;;  %v571_v9 = vshll.u32 %v518_v61, 16  ;;  %438 = vst [vmem:[#allocation2 + $0x54] sm:$0x1] %v437_v26  ;;  %v576_v37 = vshrl.u32 %v519_v13, 16  ;;  %v498_v24 = vld [vmem:[#allocation2 + $0x8c] sm:$0x1] }
  0x86   : > { %v1448_v35 = vunpack.c.l.b16 %v1305_v30  ;;  %v579_v0 = vshll.u32 %v519_v13, 16  ;;  %v318_v40 = vmul.f32 %v4172_v14, %v3658_v25  ;;  %488 = vst [vmem:[#allocation2 + $0x5c] sm:$0x1] %v487_v28  ;;  %v570_v41 = vrot.slane %v568_v32, 7  ;;  %v1026_v49 = vld [vmem:[#allocation2 + $0xa8] sm:$0xf] }
  0x87   : > { %v353_v42 = vadd.f32 %v4181_v5, %v317_v8  ;;  %v3673_v21 = vunpack.c.l.bf16 %v3704_v29  ;;  %v3674_v45 = vunpack.c.h.bf16 %v3704_v29  ;;  %v578_v53 = vrot.slane %v576_v37, 7 }
  0x88   : > { %v4215_v15 = vpack.c.b16 %v1448_v35, %v1447_v31  ;;  %v354_v22 = vadd.f32 %v4181_v5, %v318_v40  ;;  %v449_v56 = vsel %vm3810_vm3, 0, %v448_v33  ;;  %v1379_v62 = vshrl.u32 %v1026_v49, 16 }
  0x89   : > { %v1027_v58 = vld [vmem:[#allocation2 + $0xac] sm:$0xf]  ;;  %v1382_v27 = vshll.u32 %v1026_v49, 16  ;;  %v573_v59 = vor.u32 %v571_v9, %v570_v41  ;;  %v574_v60 = vrot.slane %v570_v41, 4  ;;  %v581_v36 = vor.u32 %v579_v0, %v578_v53  ;;  %450 = vst [vmem:[#allocation2 + $0x84] sm:$0x1] %v449_v56 }
  0x8a   : > { %3385 = vmatmul.msk.bf16.gmra.mxu2 %vm1475_vm13, %v4215_v15  ;;  %v1028_v1 = vld [vmem:[#allocation2 + $0xb0] sm:$0x1]  ;;  %v1388_v4 = vshll.u32 %v1027_v58, 16  ;;  %v1392_v6 = vshrl.u32 %v1027_v58, 16  ;;  %v583_v11 = vrot.slane %v578_v53, 4  ;;  %v1381_v54 = vrot.slane %v1379_v62, 4 }
  0x8b   : > { %v1384_v47 = vrot.slane %v1382_v27, 5  ;;  %v1398_v19 = vshll.u32 %v1028_v1, 16  ;;  %v883_v20 = vld [vmem:[#allocation2 + $0x20] sm:$0x1]  ;;  %v582_v13 = vsel %vm3878_vm10, %v574_v60, %v581_v36  ;;  %v880_v25 = vsel %vm3886_vm11, %v573_v59, %v879_v55 }
  0x8c   : > { %v1390_v44 = vrot.slane %v1388_v4, 5  ;;  %v1394_v61 = vrot.slane %v1392_v6, 4  ;;  %881 = vst [vmem:[#allocation2 + $0x18] sm:$0xf] %v880_v25  ;;  %v884_v28 = vsel %vm3810_vm3, %v583_v11, %v883_v20  ;;  %v385_v29 = vmax.f32 %v353_v42, 0.0 }
  0x8d   : > { %v1385_v8 = vor.u32 %v1384_v47, %v1381_v54  ;;  %v1400_v26 = vrot.slane %v1398_v19, 5  ;;  %882 = vst.msk [vmem:[#allocation2 + $0x1c] sm:$0xf] %vm405_vm6, %v582_v13  ;;  %v386_v31 = vmax.f32 %v354_v22, 0.0  ;;  %v325_v32 = vmul.f32 %v4172_v14, %v3673_v21  ;;  %v460_v22 = vld [vmem:[#allocation2 + $0xb4] sm:$0x1] }
  0x8e   : > { %v1395_v30 = vor.u32 %v1394_v61, %v1390_v44  ;;  %v326_v9 = vmul.f32 %v4172_v14, %v3674_v45  ;;  %885 = vst [vmem:[#allocation2 + $0x20] sm:$0x1] %v884_v28  ;;  %v528_v35 = vpack.c.bf16 %v385_v29, %v385_v29  ;;  %v499_v37 = vsel %vm3824_vm5, 0, %v498_v24  ;;  %v914_v1 = vld [vmem:[#allocation2 + $0x54] sm:$0xf] }
  0x8f   : > { %v1386_v33 = vrot.slane %v1385_v8, 4  ;;  %v3689_v0 = vunpack.c.l.bf16 %v3708_v23  ;;  %v529_v41 = vpack.c.bf16 %v386_v31, %v386_v31  ;;  %v361_v49 = vadd.f32 %v4181_v5, %v325_v32  ;;  %500 = vst [vmem:[#allocation2 + $0x8c] sm:$0x1] %v499_v37  ;;  %v918_v54 = vld [vmem:[#allocation2 + $0x5c] sm:$0x1] }
  0x90   : > { %v1396_v40 = vrot.slane %v1395_v30, 4  ;;  %v362_v42 = vadd.f32 %v4181_v5, %v326_v9  ;;  %v653_v21 = vshrl.u32 %v528_v35, 16  ;;  %v656_v55 = vshll.u32 %v528_v35, 16 }
  0x91   : > { %v1391_v53 = vsel %vm3917_vm12, %v1386_v33, %v1390_v44  ;;  %v3690_v45 = vunpack.c.h.bf16 %v3708_v23  ;;  %v661_v62 = vshrl.u32 %v529_v41, 16  ;;  %v664_v27 = vshll.u32 %v529_v41, 16 }
  0x92   : > { %v1401_v56 = vsel %vm3917_vm12, %v1396_v40, %v1400_v26  ;;  %v1455_v58 = vunpack.c.l.b16 %v1391_v53  ;;  %v655_v60 = vrot.slane %v653_v21, 7  ;;  %v393_v4 = vmax.f32 %v361_v49, 0.0  ;;  %v510_v40 = vld [vmem:[#allocation2 + $0xbc] sm:$0x1] }
  0x93   : > { %v1456_v59 = vunpack.c.l.b16 %v1401_v56  ;;  %v394_v6 = vmax.f32 %v362_v42, 0.0  ;;  %v4240_v36 = vld [vmem:[#allocation2 + $0x18] sm:$0xf]  ;;  %v663_v11 = vrot.slane %v661_v62, 7  ;;  %v333_v47 = vmul.f32 %v4172_v14, %v3689_v0  ;;  %v4269_v56 = vld [vmem:[%s3833_s27 + $0x10] sm:$0xff]  }
  0x94   : > { %v334_v19 = vmul.f32 %v4172_v14, %v3690_v45  ;;  %v461_v20 = vsel %vm3810_vm3, 0, %v460_v22  ;;  %v4248_v44 = vld [vmem:[#allocation2 + $0x1c] sm:$0xf]  ;;  %v1091_v61 = vshrl.u32 %v4240_v36, 16  ;;  %v1094_v13 = vshll.u32 %v4240_v36, 16 }
  0x95   : > { %v4246_v23 = vpack.c.b16 %v1456_v59, %v1455_v58  ;;  %v658_v25 = vor.u32 %v656_v55, %v655_v60  ;;  %462 = vst [vmem:[#allocation2 + $0xb4] sm:$0x1] %v461_v20  ;;  %v4252_v24 = vld [vmem:[#allocation2 + $0x20] sm:$0x1]  ;;  %v1100_v8 = vshll.u32 %v4248_v44, 16  ;;  %v1104_v26 = vshrl.u32 %v4248_v44, 16 }
  0x96   : > { %v659_v28 = vrot.slane %v655_v60, 4  ;;  %v666_v29 = vor.u32 %v664_v27, %v663_v11  ;;  %v1093_v30 = vrot.slane %v1091_v61, 4  ;;  %v1096_v31 = vrot.slane %v1094_v13, 5 }
  0x97   : > { %3389 = vmatmul.msk.bf16.gmra.mxu3 %vm1475_vm13, %v4246_v23  ;;  %v1110_v32 = vshll.u32 %v4252_v24, 16  ;;  %v668_v9 = vrot.slane %v663_v11, 4  ;;  %v1102_v33 = vrot.slane %v1100_v8, 5  ;;  %v1106_v35 = vrot.slane %v1104_v26, 4 }
  0x98   : > { %v667_v37 = vsel %vm3878_vm10, %v659_v28, %v666_v29  ;;  %v915_v0 = vsel %vm3886_vm11, %v658_v25, %v914_v1  ;;  %v1097_v41 = vor.u32 %v1096_v31, %v1093_v30  ;;  %v536_v53 = vpack.c.bf16 %v393_v4, %v393_v4  ;;  %v942_v25 = vld [vmem:[#allocation2 + $0x84] sm:$0xf]  ;;  %v946_v30 = vld [vmem:[#allocation2 + $0x8c] sm:$0x1] }
  0x99   : > { %v1112_v49 = vrot.slane %v1110_v32, 5  ;;  %916 = vst [vmem:[#allocation2 + $0x54] sm:$0xf] %v915_v0  ;;  %v919_v42 = vsel %vm3810_vm3, %v668_v9, %v918_v54  ;;  %v1107_v21 = vor.u32 %v1106_v35, %v1102_v33  ;;  %v537_v55 = vpack.c.bf16 %v394_v6, %v394_v6 }
  0x9a   : > { %917 = vst.msk [vmem:[#allocation2 + $0x58] sm:$0xf] %vm405_vm6, %v667_v37  ;;  %v369_v45 = vadd.f32 %v4181_v5, %v333_v47  ;;  %v370_v22 = vadd.f32 %v4181_v5, %v334_v19  ;;  %v1098_v58 = vrot.slane %v1097_v41, 4  ;;  %v721_v62 = vshrl.u32 %v536_v53, 16 }
  0x9b   : > { %920 = vst [vmem:[#allocation2 + $0x5c] sm:$0x1] %v919_v42  ;;  %v724_v27 = vshll.u32 %v536_v53, 16  ;;  %v511_v59 = vsel %vm3824_vm5, 0, %v510_v40  ;;  %v1108_v60 = vrot.slane %v1107_v21, 4  ;;  %v729_v1 = vshrl.u32 %v537_v55, 16 }
  0x9c   : > { %v732_v4 = vshll.u32 %v537_v55, 16  ;;  %v401_v11 = vmax.f32 %v369_v45, 0.0  ;;  %512 = vst [vmem:[#allocation2 + $0xbc] sm:$0x1] %v511_v59  ;;  %v1103_v6 = vsel %vm3917_vm12, %v1098_v58, %v1102_v33  ;;  %v723_v54 = vrot.slane %v721_v62, 7 }
  0x9d   : > { %v402_v47 = vmax.f32 %v370_v22, 0.0  ;;  %v3641_v19 = vunpack.c.l.bf16 %v4269_v56  ;;  %v1113_v20 = vsel %vm3917_vm12, %v1108_v60, %v1112_v49  ;;  %v1431_v61 = vunpack.c.l.b16 %v1103_v6  ;;  %v970_v58 = vld [vmem:[#allocation2 + $0xb4] sm:$0xf]  ;;  %v424_v62 = vld [vmem:[#allocation2 + $0x24] sm:$0x1] }
  0x9e   : > { %v731_v13 = vrot.slane %v729_v1, 7  ;;  %v544_v8 = vpack.c.bf16 %v401_v11, %v401_v11  ;;  %v1432_v26 = vunpack.c.l.b16 %v1113_v20  ;;  %v726_v28 = vor.u32 %v724_v27, %v723_v54  ;;  %v474_v27 = vld [vmem:[#allocation2 + $0x2c] sm:$0x1] }
  0x9f   : > { %v727_v29 = vrot.slane %v723_v54, 4  ;;  %v545_v31 = vpack.c.bf16 %v402_v47, %v402_v47 }
  0xa0   : > { %v4278_v32 = vld [vmem:[#allocation2 + $0x54] sm:$0xf]  ;;  %v734_v9 = vor.u32 %v732_v4, %v731_v13  ;;  %v736_v33 = vrot.slane %v731_v13, 4  ;;  %v789_v35 = vshrl.u32 %v544_v8, 16  ;;  %v792_v37 = vshll.u32 %v544_v8, 16 }
  0xa1   : > { %v4280_v0 = vpack.c.b16 %v1432_v26, %v1431_v61  ;;  %v4282_v40 = vld [vmem:[#allocation2 + $0x58] sm:$0xf]  ;;  %v1211_v41 = vshrl.u32 %v4278_v32, 16  ;;  %v1214_v49 = vshll.u32 %v4278_v32, 16  ;;  %v943_v42 = vsel %vm3886_vm11, %v726_v28, %v942_v25 }
  0xa2   : > { %v4288_v53 = vld [vmem:[#allocation2 + $0x5c] sm:$0x1]  ;;  %v1220_v21 = vshll.u32 %v4282_v40, 16  ;;  %v1224_v55 = vshrl.u32 %v4282_v40, 16  ;;  %v735_v45 = vsel %vm3878_vm10, %v727_v29, %v734_v9  ;;  %944 = vst [vmem:[#allocation2 + $0x84] sm:$0xf] %v943_v42  ;;  %v947_v22 = vsel %vm3810_vm3, %v736_v33, %v946_v30 }
  0xa3   : > { %3377 = vmatmul.msk.bf16.gmra.mxu0 %vm1475_vm13, %v4280_v0  ;;  %v1213_v59 = vrot.slane %v1211_v41, 4  ;;  %v1216_v60 = vrot.slane %v1214_v49, 5  ;;  %v1230_v1 = vshll.u32 %v4288_v53, 16  ;;  %945 = vst.msk [vmem:[#allocation2 + $0x88] sm:$0xf] %vm405_vm6, %v735_v45  ;;  %v791_v4 = vrot.slane %v789_v35, 7 }
  0xa4   : > { %v1222_v11 = vrot.slane %v1220_v21, 5  ;;  %v1226_v6 = vrot.slane %v1224_v55, 4  ;;  %948 = vst [vmem:[#allocation2 + $0x8c] sm:$0x1] %v947_v22  ;;  %v797_v54 = vshrl.u32 %v545_v31, 16  ;;  %v800_v47 = vshll.u32 %v545_v31, 16 }
  0xa5   : > { %v1217_v20 = vor.u32 %v1216_v60, %v1213_v59  ;;  %v1232_v61 = vrot.slane %v1230_v1, 5  ;;  %v794_v13 = vor.u32 %v792_v37, %v791_v4  ;;  %v795_v25 = vrot.slane %v791_v4, 4  ;;  %v974_v37 = vld [vmem:[#allocation2 + $0xbc] sm:$0x1] }
  0xa6   : > { %v1227_v8 = vor.u32 %v1226_v6, %v1222_v11  ;;  %v799_v26 = vrot.slane %v797_v54, 7  ;;  %v3642_v28 = vunpack.c.h.bf16 %v4269_v56  ;;  %v309_v29 = vmul.f32 %v4172_v14, %v3641_v19 }
  0xa7   : > { %v1218_v30 = vrot.slane %v1217_v20, 4  ;;  %v971_v9 = vsel %vm3886_vm11, %v794_v13, %v970_v58  ;;  %v425_v33 = vsel %vm3810_vm3, 0, %v424_v62  ;;  %v475_v31 = vsel %vm3824_vm5, 0, %v474_v27 }
  0xa8   : > { %v1228_v35 = vrot.slane %v1227_v8, 4  ;;  %v802_v41 = vor.u32 %v800_v47, %v799_v26  ;;  %972 = vst [vmem:[#allocation2 + $0xb4] sm:$0xf] %v971_v9  ;;  %v804_v19 = vrot.slane %v799_v26, 4  ;;  %v310_v42 = vmul.f32 %v4172_v14, %v3642_v28 }
  0xa9   : > { %v1223_v49 = vsel %vm3917_vm12, %v1218_v30, %v1222_v11  ;;  %v4310_v56 = vld [vmem:[#allocation2 + $0x84] sm:$0xf]  ;;  %v345_v21 = vadd.f32 %v4181_v5, %v309_v29  ;;  %426 = vst [vmem:[#allocation2 + $0x24] sm:$0x1] %v425_v33 }
  0xaa   : > { %v1233_v55 = vsel %vm3917_vm12, %v1228_v35, %v1232_v61  ;;  %v1441_v45 = vunpack.c.l.b16 %v1223_v49  ;;  %v4316_v22 = vld [vmem:[#allocation2 + $0x88] sm:$0xf]  ;;  %v1307_v58 = vshrl.u32 %v4310_v56, 16  ;;  %v1310_v62 = vshll.u32 %v4310_v56, 16  ;;  %476 = vst [vmem:[#allocation2 + $0x2c] sm:$0x1] %v475_v31 }
  0xab   : > { %v1442_v27 = vunpack.c.l.b16 %v1233_v55  ;;  %v4320_v59 = vld [vmem:[#allocation2 + $0x8c] sm:$0x1]  ;;  %v1316_v60 = vshll.u32 %v4316_v22, 16  ;;  %v1320_v14 = vshrl.u32 %v4316_v22, 16  ;;  %v803_v1 = vsel %vm3878_vm10, %v795_v25, %v802_v41 }
  0xac   : > { %v1309_v4 = vrot.slane %v1307_v58, 4  ;;  %v1312_v11 = vrot.slane %v1310_v62, 5  ;;  %v1326_v6 = vshll.u32 %v4320_v59, 16  ;;  %973 = vst.msk [vmem:[#allocation2 + $0xb8] sm:$0xf] %vm405_vm6, %v803_v1  ;;  %v975_v61 = vsel %vm3810_vm3, %v804_v19, %v974_v37 }
  0xad   : > { %v4328_v54 = vpack.c.b16 %v1442_v27, %v1441_v45  ;;  %v1318_v47 = vrot.slane %v1316_v60, 5  ;;  %v1322_v20 = vrot.slane %v1320_v14, 4  ;;  %976 = vst [vmem:[#allocation2 + $0xbc] sm:$0x1] %v975_v61  ;;  %v346_v8 = vadd.f32 %v4181_v5, %v310_v42 }
  0xae   : > { %v1313_v13 = vor.u32 %v1312_v11, %v1309_v4  ;;  %v377_v26 = vmax.f32 %v345_v21, 0.0  ;;  %v1328_v28 = vrot.slane %v1326_v6, 5 }
  0xaf   : > { %5244 = vst [vmem:[#allocation8_spill] sm:$0xff] %v4328_v54  ;;  %3382 = vmatmul.msk.bf16.gmra.mxu1 %vm1475_vm13, %v4328_v54  ;;  %v1323_v25 = vor.u32 %v1322_v20, %v1318_v47  ;;  %v4335_v29 = vld [vmem:[#allocation2 + $0xb4] sm:$0xf]  ;;  %v378_v31 = vmax.f32 %v346_v8, 0.0 }
  0xb0   : > { %v1314_v30 = vrot.slane %v1313_v13, 4  ;;  %v1403_v9 = vshrl.u32 %v4335_v29, 16  ;;  %v1406_v33 = vshll.u32 %v4335_v29, 16  ;;  %v520_v41 = vpack.c.bf16 %v377_v26, %v377_v26  ;;  %v886_v8 = vld [vmem:[#allocation2 + $0x24] sm:$0xf] }
  0xb1   : > { %v1324_v35 = vrot.slane %v1323_v25, 4  ;;  %v521_v19 = vpack.c.bf16 %v378_v31, %v378_v31  ;;  %v2616_v31 = vld [vmem:[%s5195_s3 + $0x18] sm:$0xf] }
  0xb2   : > { %v1319_v37 = vsel %vm3917_vm12, %v1314_v30, %v1318_v47  ;;  %v1405_v5 = vrot.slane %v1403_v9, 4  ;;  %v1408_v49 = vrot.slane %v1406_v33, 5  ;;  %v585_v45 = vshrl.u32 %v520_v41, 16 }
  0xb3   : > { %v1329_v42 = vsel %vm3917_vm12, %v1324_v35, %v1328_v28  ;;  %v1449_v21 = vunpack.c.l.b16 %v1319_v37  ;;  %v4343_v55 = vld [vmem:[#allocation2 + $0xb8] sm:$0xf]  ;;  %v588_v58 = vshll.u32 %v520_v41, 16  ;;  %v593_v11 = vshrl.u32 %v521_v19, 16  ;;  %v890_v37 = vld [vmem:[#allocation2 + $0x2c] sm:$0x1] }
  0xb4   : > { %v1450_v62 = vunpack.c.l.b16 %v1329_v42  ;;  %v1409_v27 = vor.u32 %v1408_v49, %v1405_v5  ;;  %v1412_v60 = vshll.u32 %v4343_v55, 16  ;;  %v1416_v14 = vshrl.u32 %v4343_v55, 16  ;;  %v4347_v1 = vld [vmem:[#allocation2 + $0xbc] sm:$0x1]  ;;  %v3726_v5 = vld [vmem:[#allocation2] sm:$0xf] }
  0xb5   : > { %v587_v4 = vrot.slane %v585_v45, 7  ;;  %v596_v6 = vshll.u32 %v521_v19, 16  ;;  %v1422_v26 = vshll.u32 %v4347_v1, 16  ;;  %v595_v33 = vrot.slane %v593_v11, 7 }
  0xb6   : > { %v4349_v47 = vpack.c.b16 %v1450_v62, %v1449_v21  ;;  %v1410_v20 = vrot.slane %v1409_v27, 4  ;;  %v1414_v61 = vrot.slane %v1412_v60, 5  ;;  %v1418_v13 = vrot.slane %v1416_v14, 4  ;;  %v3728_v27 = vld [vmem:[#allocation2 + $0x8] sm:$0x1] }
  0xb7   : > { %v590_v25 = vor.u32 %v588_v58, %v587_v4  ;;  %v591_v28 = vrot.slane %v587_v4, 4  ;;  %v1424_v35 = vrot.slane %v1422_v26, 5  ;;  %v3471_v49 = vrot.slane %v3726_v5, 9  ;;  %v3727_v58 = vld [vmem:[#allocation2 + $0x4] sm:$0xf] }
  0xb8   : > { %5245 = vst [vmem:[#allocation9_spill] sm:$0xff] %v4349_v47  ;;  %3386 = vmatmul.msk.bf16.gmra.mxu2 %vm1475_vm13, %v4349_v47  ;;  %v1415_v30 = vsel %vm3917_vm12, %v1410_v20, %v1414_v61  ;;  %v1419_v9 = vor.u32 %v1418_v13, %v1414_v61  ;;  %v598_v42 = vor.u32 %v596_v6, %v595_v33  ;;  %v600_v21 = vrot.slane %v595_v33, 4  ;;  %v3613_v4 = vld [vmem:[#allocation2] sm:$0xff] }
  0xb9   : > { %v887_v41 = vsel %vm3886_vm11, %v590_v25, %v886_v8  ;;  %v1858_v62 = vrot.slane %v3727_v58, 5  ;;  %v1861_v60 = vrot.slane %v3728_v27, 5  ;;  %v1457_v14 = vunpack.c.l.b16 %v1415_v30 }
  0xba   : > { %v1420_v19 = vrot.slane %v1419_v9, 4  ;;  %888 = vst [vmem:[#allocation2 + $0x24] sm:$0xf] %v887_v41  ;;  %v2626_v11 = vsel %vm1524_vm0, %v2616_v31, 0  ;;  %v599_v6 = vsel %vm3878_vm10, %v591_v28, %v598_v42  ;;  %v891_v61 = vsel %vm3810_vm3, %v600_v21, %v890_v37  ;;  %v2773_v41 = vld [vmem:[%s5195_s3 + $0x1c] sm:$0xf] }
  0xbb   : > { %2635 = vmatpush.bf16.msra.mxu2 %v2626_v11  ;;  %889 = vst.msk [vmem:[#allocation2 + $0x28] sm:$0xf] %vm405_vm6, %v599_v6  ;;  %v1859_v8 = vsel %vm4362_vm2, %v3471_v49, %v1858_v62  ;;  %v1860_v26 = vrot.slane %v1858_v62, 4  ;;  %v2485_v37 = vld [vmem:[%s5195_s3 + $0x14] sm:$0xf]  ;;  %v2781_v5 = vsel %vm1524_vm0, %v2773_v41, 0 }
  0xbc   : > { %v1425_v20 = vsel %vm3917_vm12, %v1420_v19, %v1424_v35  ;;  %892 = vst [vmem:[#allocation2 + $0x2c] sm:$0x1] %v891_v61  ;;  %v1969_v28 = vunpack.c.l.b16 %v1859_v8  ;;  %v2493_v49 = vsel %vm1524_vm0, %v2485_v37, 0  ;;  %v2912_v19 = vld [vmem:[%s5195_s3 + $0x20] sm:$0xf]  ;;  %2790 = vmatpush.bf16.msra.mxu3 %v2781_v5  ;;  %v1865_v11 = vrot.slane %v4121_v16, 5 }
  0xbd   : > { %v1458_v13 = vunpack.c.l.b16 %v1425_v20  ;;  %v1862_v30 = vsel %vm4362_vm2, %v1860_v26, %v1861_v60  ;;  %2502 = vmatpush.bf16.msra.mxu1 %v2493_v49  ;;  %v2920_v27 = vsel %vm1524_vm0, %v2912_v19, 0  ;;  %v3472_v26 = vrot.slane %v4116_v38, 9  ;;  %v3614_v5 = vld [vmem:[#allocation2 + $0xc] sm:$0xff] }
  0xbe   : > { %v1970_v9 = vunpack.c.l.b16 %v1862_v30  ;;  %2929 = vmatpush.bf16.msra.mxu0 %v2920_v27  ;;  %v1872_v27 = vrot.slane %v4248_v44, 5 }
  0xbf   : > { %v4376_v25 = vpack.c.b16 %v1458_v13, %v1457_v14  ;;  %3455 = vmatmul.msk.bf16.vlgmr.msrb.gmra.mxu1 %vm1475_vm13, %v3613_v4  ;;  %v1866_v49 = vsel %vm4362_vm2, %v3472_v26, %v1865_v11 }
  0xc0   : > { %v2001_v62 = vpack.c.b16 %v1970_v9, %v1969_v28  ;;  %v1867_v9 = vrot.slane %v1865_v11, 4 }
  0xc1   : > { %3390 = vmatmul.msk.bf16.gmra.mxu3 %vm1475_vm13, %v4376_v25  ;;  %v4383_v33 = vld [vmem:[#allocation2 + $0x24] sm:$0xf] }
  0xc2   : > { %v1115_v31 = vshrl.u32 %v4383_v33, 16  ;;  %v1118_v35 = vshll.u32 %v4383_v33, 16  ;;  %v994_v42 = vld [vmem:[#allocation2 + $0x28] sm:$0xf] }
  0xc3   : > { %v995_v60 = vld [vmem:[#allocation2 + $0x2c] sm:$0x1]  ;;  %v1124_v14 = vshll.u32 %v994_v42, 16  ;;  %v1128_v4 = vshrl.u32 %v994_v42, 16  ;;  %v1879_v44 = vrot.slane %v994_v42, 5 }
  0xc4   : > { %v1117_v21 = vrot.slane %v1115_v31, 4  ;;  %v1120_v58 = vrot.slane %v1118_v35, 5  ;;  %v1134_v6 = vshll.u32 %v995_v60, 16  ;;  %v1868_v31 = vrot.slane %v4125_v48, 5 }
  0xc5   : > { %v1126_v61 = vrot.slane %v1124_v14, 5  ;;  %v1130_v13 = vrot.slane %v1128_v4, 4  ;;  %v1971_v48 = vunpack.c.l.b16 %v1866_v49  ;;  %v1875_v14 = vrot.slane %v4252_v24, 5  ;;  %v3731_v49 = vld [vmem:[#allocation2 + $0x38] sm:$0x1] }
  0xc6   : > { %v1121_v20 = vor.u32 %v1120_v58, %v1117_v21  ;;  %v1136_v28 = vrot.slane %v1134_v6, 5  ;;  %v1869_v38 = vsel %vm4362_vm2, %v1867_v9, %v1868_v31  ;;  %v3474_v24 = vrot.slane %v4383_v33, 9 }
  0xc7   : > { %v1131_v30 = vor.u32 %v1130_v13, %v1126_v61  ;;  %v1972_v58 = vunpack.c.l.b16 %v1869_v38  ;;  %v1881_v26 = vrot.slane %v1879_v44, 4  ;;  %v1889_v38 = vrot.slane %v3731_v49, 5 }
  0xc8   : > { %v1122_v8 = vrot.slane %v1121_v20, 4  ;;  %3487 = vmatmul.msk.bf16.vlgmr.msrb.gmra.mxu2 %vm1475_vm13, %v2001_v62  ;;  %v3473_v62 = vrot.slane %v4240_v36, 9  ;;  %v1874_v20 = vrot.slane %v1872_v27, 4  ;;  %v4430_v36 = vld [vmem:[#allocation2 + $0x18] sm:$0xff]  ;;  %v1880_v9 = vsel %vm4362_vm2, %v3474_v24, %v1879_v44 }
  0xc9   : > { %v1132_v41 = vrot.slane %v1131_v30, 4  ;;  %v4420_v4 = vpack.c.b16 %v1972_v58, %v1971_v48  ;;  %v1882_v30 = vrot.slane %v995_v60, 5  ;;  %v3729_v60 = vld [vmem:[#allocation2 + $0x34] sm:$0xf]  ;;  %v3733_v44 = vld [vmem:[#allocation2 + $0x3c] sm:$0xf] }
  0xca   : > { %v1127_v35 = vsel %vm3917_vm12, %v1122_v8, %v1126_v61  ;;  %v1873_v11 = vsel %vm4362_vm2, %v3473_v62, %v1872_v27  ;;  %v1876_v61 = vsel %vm4362_vm2, %v1874_v20, %v1875_v14  ;;  %v4471_v14 = vpop.f32.mrf.mxu2  ;;  %v3476_v24 = vrot.slane %v3733_v44, 9 }
  0xcb   : > { %v1433_v37 = vunpack.c.l.b16 %v1127_v35  ;;  %v1137_v16 = vsel %vm3917_vm12, %v1132_v41, %v1136_v28  ;;  %v1973_v6 = vunpack.c.l.b16 %v1873_v11  ;;  %v1974_v13 = vunpack.c.l.b16 %v1876_v61  ;;  %v4441_v28 = vld [vmem:[#allocation2 + $0x24] sm:$0xff]  ;;  %v4457_v41 = vpop.f32.mrf.mxu1 }
  0xcc   : > { %v1434_v19 = vunpack.c.l.b16 %v1137_v16  ;;  %v1883_v31 = vsel %vm4362_vm2, %v1881_v26, %v1882_v30  ;;  %v1886_v35 = vrot.slane %v3729_v60, 5  ;;  %v3734_v30 = vld [vmem:[#allocation2 + $0x44] sm:$0x1] }
  0xcd   : > { %v4428_v8 = vpack.c.b16 %v1974_v13, %v1973_v6  ;;  %v1976_v42 = vunpack.c.l.b16 %v1883_v31  ;;  %v3732_v6 = vld [vmem:[#allocation2 + $0x40] sm:$0xf]  ;;  %v4479_v13 = vpop.f32.mrf.mxu3 }
  0xce   : > { %v4412_v21 = vpack.c.b16 %v1434_v19, %v1433_v37  ;;  %v3730_v37 = vld [vmem:[#allocation2 + $0x30] sm:$0xf]  ;;  %v1893_v61 = vrot.slane %v3732_v6, 5  ;;  %5250 = vst [vmem:[#allocation12_spill] sm:$0xff] %v4479_v13 }
  0xcf   : > { %3456 = vmatmul.msk.bf16.gmra.mxu1 %vm1475_vm13, %v3614_v5  ;;  %v3475_v16 = vrot.slane %v3730_v37, 9  ;;  %v4459_v19 = vld [vmem:[#allocation2 + $0x30] sm:$0xff] }
  0xd0   : > { %3378 = vmatmul.msk.bf16.gmra.mxu0 %vm1475_vm13, %v4412_v21  ;;  %5248 = vst [vmem:[#allocation10_spill] sm:$0xff] %v4459_v19  ;;  %v1895_v26 = vrot.slane %v1893_v61, 4  ;;  %v1894_v60 = vsel %vm4362_vm2, %v3476_v24, %v1893_v61  ;;  %v1903_v61 = vrot.slane %v4163_v52, 5 }
  0xd1   : > { %3507 = vmatmul.msk.bf16.vlgmr.msrb.gmra.mxu3 %vm1475_vm13, %v3614_v5  ;;  %v1888_v5 = vrot.slane %v1886_v35, 4  ;;  %v1887_v48 = vsel %vm4362_vm2, %v3475_v16, %v1886_v35  ;;  %v1979_v37 = vunpack.c.l.b16 %v1894_v60 }
  0xd2   : > { %v1977_v62 = vunpack.c.l.b16 %v1887_v48  ;;  %v4481_v31 = vpop.f32.mrf.mxu2 }
  0xd3   : > { %v1890_v58 = vsel %vm4362_vm2, %v1888_v5, %v1889_v38  ;;  %v4473_v11 = vpop.f32.mrf.mxu1  ;;  %v1537_v5 = vpop.f32.mrf.mxu0 }
  0xd4   : > { %v1978_v27 = vunpack.c.l.b16 %v1890_v58 }
  0xd5   : > { %v4497_v49 = vpop.f32.mrf.mxu3 }
  0xd6   : > { %v4475_v20 = vpack.c.b16 %v1978_v27, %v1977_v62  ;;  %5252 = vst [vmem:[#allocation14_spill] sm:$0xff] %v4497_v49  ;;  %v1900_v62 = vrot.slane %v4149_v39, 5  ;;  %v3477_v27 = vrot.slane %v4147_v10, 9  ;;  %v4545_v49 = vld [vmem:[#allocation2 + $0x54] sm:$0xff] }
  0xd7   : > { %5260 = vst [vmem:[#allocation22_spill] sm:$0xff] %v4545_v49 }
  0xd8   : > { %3488 = vmatmul.msk.bf16.gmra.mxu2 %vm1475_vm13, %v4420_v4  ;;  %5249 = vst [vmem:[#allocation11_spill] sm:$0xff] %v4475_v20  ;;  %v1902_v6 = vrot.slane %v1900_v62, 4  ;;  %v1901_v39 = vsel %vm4362_vm2, %v3477_v27, %v1900_v62 }
  0xd9   : > { %v1981_v10 = vunpack.c.l.b16 %v1901_v39 }
  0xda   : > { %v1904_v60 = vsel %vm4362_vm2, %v1902_v6, %v1903_v61  ;;  %v1907_v6 = vrot.slane %v4282_v40, 5  ;;  %v3478_v61 = vrot.slane %v4278_v32, 9 }
  0xdb   : > { %v1982_v52 = vunpack.c.l.b16 %v1904_v60  ;;  %v1910_v60 = vrot.slane %v4288_v53, 5 }
  0xdc   : > { %v1909_v39 = vrot.slane %v1907_v6, 4 }
  0xdf   : > { %3457 = vmatmul.msk.bf16.gmra.mxu1 %vm1475_vm13, %v4430_v36 }
  0xe0   : > { %3523 = vmatmul.msk.bf16.vlgmr.msrb.gmra.mxu0 %vm1475_vm13, %v4161_v51  ;;  %v1975_v51 = vunpack.c.l.b16 %v1880_v9  ;;  %v1896_v9 = vrot.slane %v3734_v30, 5  ;;  %v4516_v30 = vld [vmem:[#allocation2 + $0x48] sm:$0xff] }
  0xe1   : > { %3508 = vmatmul.msk.bf16.gmra.mxu3 %vm1475_vm13, %v4430_v36  ;;  %5255 = vst [vmem:[#allocation17_spill] sm:$0xff] %v4516_v30 }
  0xe2   : > { %v4453_v33 = vpack.c.b16 %v1976_v42, %v1975_v51  ;;  %v4483_v51 = vpop.f32.mrf.mxu1  ;;  %v4485_v42 = vld [vmem:[#allocation2 + $0x3c] sm:$0xff]  ;;  %v1897_v35 = vsel %vm4362_vm2, %v1895_v26, %v1896_v9  ;;  %v4514_v26 = vpop.f32.mrf.mxu0 }
  0xe3   : > { %5251 = vst [vmem:[#allocation13_spill] sm:$0xff] %v4485_v42  ;;  %v1980_v16 = vunpack.c.l.b16 %v1897_v35  ;;  %v4499_v38 = vpop.f32.mrf.mxu2 }
  0xe5   : > { %v4503_v58 = vpack.c.b16 %v1980_v16, %v1979_v37  ;;  %v4532_v37 = vpack.c.b16 %v1982_v52, %v1981_v10  ;;  %v1908_v10 = vsel %vm4362_vm2, %v3478_v61, %v1907_v6  ;;  %v1911_v52 = vsel %vm4362_vm2, %v1909_v39, %v1910_v60  ;;  %v3735_v39 = vld [vmem:[#allocation2 + $0x64] sm:$0xf] }
  0xe6   : > { %v1984_v32 = vunpack.c.l.b16 %v1911_v52  ;;  %v1914_v60 = vrot.slane %v3735_v39, 5 }
  0xe7   : > { %5253 = vst [vmem:[#allocation15_spill] sm:$0xff] %v4503_v58 }
  0xe8   : > { %3489 = vmatmul.msk.bf16.gmra.mxu2 %vm1475_vm13, %v4428_v8  ;;  %5257 = vst [vmem:[#allocation19_spill] sm:$0xff] %v4532_v37 }
  0xea   : > { %v4501_v48 = vpop.f32.mrf.mxu1 }
  0xeb   : > { %v4518_v9 = vpop.f32.mrf.mxu2 }
  0xec   : > { %v4512_v24 = vpop.f32.mrf.mxu3  ;;  %5256 = vst [vmem:[#allocation18_spill] sm:$0xff] %v4518_v9 }
  0xed   : > { %5254 = vst [vmem:[#allocation16_spill] sm:$0xff] %v4512_v24 }
  0xef   : > { %3458 = vmatmul.msk.bf16.gmra.mxu1 %vm1475_vm13, %v4441_v28 }
  0xf0   : > { %3524 = vmatmul.msk.bf16.gmra.mxu0 %vm1475_vm13, %v4280_v0 }
  0xf1   : > { %3509 = vmatmul.msk.bf16.gmra.mxu3 %vm1475_vm13, %v4441_v28 }
  0xf4   : > { %v4534_v16 = vpop.f32.mrf.mxu3  ;;  %v1542_v62 = vpop.f32.mrf.mxu0 }
  0xf5   : > { %5258 = vst [vmem:[#allocation20_spill] sm:$0xff] %v4534_v16  ;;  %v1983_v16 = vunpack.c.l.b16 %v1908_v10  ;;  %v3736_v10 = vld [vmem:[#allocation2 + $0x68] sm:$0x1] }
  0xf6   : > { %v1917_v52 = vrot.slane %v3736_v10, 5 }
  0xf7   : > { %v4563_v6 = vpack.c.b16 %v1984_v32, %v1983_v16  ;;  %v4573_v16 = vld [vmem:[#allocation2 + $0x60] sm:$0xff] }
  0xf8   : > { %3490 = vmatmul.msk.bf16.gmra.mxu2 %vm1475_vm13, %v4453_v33  ;;  %5266 = vst [vmem:[#allocation28_spill] sm:$0xff] %v4573_v16 }
  0xf9   : > { %5263 = vst [vmem:[#allocation25_spill] sm:$0xff] %v4563_v6 }
  0xfe   : > { %v4510_v44 = vpop.f32.mrf.mxu1 }
  0xff   : > { %3459 = vmatmul.msk.bf16.gmra.mxu1 %vm1475_vm13, %v4459_v19 }
 0x100   : > { %3525 = vmatmul.msk.bf16.gmra.mxu0 %vm1475_vm13, %v4412_v21 }
 0x101   : > { %3510 = vmatmul.msk.bf16.gmra.mxu3 %vm1475_vm13, %v4459_v19 }
 0x106   : > { %v4530_v35 = vpop.f32.mrf.mxu1 }
 0x108   : > { %3491 = vmatmul.msk.bf16.gmra.mxu2 %vm1475_vm13, %v4475_v20 }
 0x10d   : > { %v4536_v27 = vpop.f32.mrf.mxu2 }
 0x10e   : > { %5259 = vst [vmem:[#allocation21_spill] sm:$0xff] %v4536_v27 }
 0x10f   : > { %3460 = vmatmul.msk.bf16.gmra.mxu1 %vm1475_vm13, %v4485_v42 }
 0x110   : > { %3526 = vmatmul.msk.bf16.gmra.mxu0 %vm1475_vm13, %v3969_v17 }
 0x111   : > { %3511 = vmatmul.msk.bf16.gmra.mxu3 %vm1475_vm13, %v4485_v42 }
 0x115   : > { %v4559_v53 = vpop.f32.mrf.mxu2 }
 0x116   : > { %5262 = vst [vmem:[#allocation24_spill] sm:$0xff] %v4559_v53 }
 0x118   : > { %3492 = vmatmul.msk.bf16.gmra.mxu2 %vm1475_vm13, %v4503_v58 }
 0x11a   : > { %v4553_v40 = vpop.f32.mrf.mxu3 }
 0x11b   : > { %5261 = vst [vmem:[#allocation23_spill] sm:$0xff] %v4553_v40  ;;  %v3737_v40 = vld [vmem:[#allocation2 + $0x60] sm:$0xf] }
 0x11c   : > { %v3479_v13 = vrot.slane %v3737_v40, 9 }
 0x11e   : > { %v1915_v39 = vsel %vm4362_vm2, %v3479_v13, %v1914_v60 }
 0x11f   : > { %3461 = vmatmul.msk.bf16.gmra.mxu1 %vm1475_vm13, %v4516_v30  ;;  %v1985_v40 = vunpack.c.l.b16 %v1915_v39 }
 0x120   : > { %3527 = vmatmul.msk.bf16.gmra.mxu0 %vm1475_vm13, %v4069_v46 }
 0x121   : > { %3512 = vmatmul.msk.bf16.gmra.mxu3 %vm1475_vm13, %v4516_v30  ;;  %v1916_v30 = vrot.slane %v1914_v60, 4 }
 0x128   : > { %3493 = vmatmul.msk.bf16.gmra.mxu2 %vm1475_vm13, %v4532_v37  ;;  %v4555_v37 = vpop.f32.mrf.mxu0 }
 0x12c   : > { %v4543_v24 = vpop.f32.mrf.mxu1 }
 0x12f   : > { %3462 = vmatmul.msk.bf16.gmra.mxu1 %vm1475_vm13, %v4545_v49 }
 0x130   : > { %3528 = vmatmul.msk.bf16.gmra.mxu0 %vm1475_vm13, %v4189_v50  ;;  %v1547_v46 = vpop.f32.mrf.mxu0 }
 0x131   : > { %3513 = vmatmul.msk.bf16.gmra.mxu3 %vm1475_vm13, %v4545_v49  ;;  %v4569_v49 = vpop.f32.mrf.mxu3 }
 0x132   : > { %5264 = vst [vmem:[#allocation26_spill] sm:$0xff] %v4569_v49 }
 0x134   : > { %v4565_v61 = vpop.f32.mrf.mxu1 }
 0x138   : > { %3494 = vmatmul.msk.bf16.gmra.mxu2 %vm1475_vm13, %v4563_v6  ;;  %v1918_v6 = vsel %vm4362_vm2, %v1916_v30, %v1917_v52  ;;  %v1549_v60 = vpop.f32.mrf.mxu0  ;;  %v3738_v30 = vld [vmem:[#allocation2 + $0x70] sm:$0xf] }
 0x139   : > { %v1986_v10 = vunpack.c.l.b16 %v1918_v6  ;;  %v1921_v52 = vrot.slane %v3738_v30, 5  ;;  %v3739_v6 = vld [vmem:[#allocation2 + $0x74] sm:$0x1] }
 0x13a   : > { %v1924_v39 = vrot.slane %v3739_v6, 5 }
 0x13b   : > { %v4571_v58 = vpop.f32.mrf.mxu2  ;;  %v1923_v42 = vrot.slane %v1921_v52, 4 }
 0x13c   : > { %5265 = vst [vmem:[#allocation27_spill] sm:$0xff] %v4571_v58  ;;  %v1757_v50 = vpop.f32.mrf.mxu1  ;;  %v3740_v58 = vld [vmem:[#allocation2 + $0x6c] sm:$0xf] }
 0x13d   : > { %v1758_v32 = vadd.f32 %v1757_v50, %v1537_v5  ;;  %v4589_v5 = vpack.c.b16 %v1986_v10, %v1985_v40  ;;  %v1925_v30 = vsel %vm4362_vm2, %v1923_v42, %v1924_v39 }
 0x13e   : > { %v1988_v6 = vunpack.c.l.b16 %v1925_v30 }
 0x13f   : > { %3463 = vmatmul.msk.bf16.gmra.mxu1 %vm1475_vm13, %v4573_v16  ;;  %5269 = vst [vmem:[#allocation31_spill] sm:$0xff] %v4589_v5 }
 0x140   : > { %3529 = vmatmul.msk.bf16.gmra.mxu0 %vm1475_vm13, %v4328_v54 }
 0x141   : > { %3514 = vmatmul.msk.bf16.gmra.mxu3 %vm1475_vm13, %v4573_v16  ;;  %v3480_v16 = vrot.slane %v3740_v58, 9 }
 0x143   : > { %v4585_v49 = vpop.f32.mrf.mxu2  ;;  %v1922_v10 = vsel %vm4362_vm2, %v3480_v16, %v1921_v52 }
 0x144   : > { %5267 = vst [vmem:[#allocation29_spill] sm:$0xff] %v4585_v49  ;;  %v4587_v50 = vpop.f32.mrf.mxu3  ;;  %v1759_v13 = vpop.f32.mrf.mxu1  ;;  %v1987_v58 = vunpack.c.l.b16 %v1922_v10  ;;  %v3742_v10 = vld [vmem:[#allocation2 + $0x80] sm:$0x1] }
 0x145   : > { %5268 = vst [vmem:[#allocation30_spill] sm:$0xff] %v4587_v50  ;;  %v4595_v50 = vld [vmem:[#allocation2 + $0x6c] sm:$0xff]  ;;  %v1931_v30 = vrot.slane %v3742_v10, 5 }
 0x146   : > { %5271 = vst [vmem:[#allocation33_spill] sm:$0xff] %v4595_v50 }
 0x148   : > { %3495 = vmatmul.msk.bf16.gmra.mxu2 %vm1475_vm13, %v4589_v5 }
 0x14b   : > { %v2077_v53 = vpop.f32.mrf.mxu2 }
 0x14c   : > { %v4593_v54 = vpop.f32.mrf.mxu3  ;;  %v2157_v49 = vadd.f32 %v2077_v53, %v1758_v32  ;;  %v1762_v17 = vpop.f32.mrf.mxu1  ;;  %v4608_v32 = vpack.c.b16 %v1988_v6, %v1987_v58  ;;  %v4612_v58 = vld [vmem:[#allocation2 + $0x78] sm:$0xff] }
 0x14d   : > { %5270 = vst [vmem:[#allocation32_spill] sm:$0xff] %v4593_v54  ;;  %v1763_v40 = vadd.f32 %v1762_v17, %v1542_v62  ;;  %v1552_v5 = vpop.f32.mrf.mxu0  ;;  %v1760_v17 = vadd.f32 %v1759_v13, %v4514_v26  ;;  %v3741_v54 = vld [vmem:[#allocation2 + $0x7c] sm:$0xf] }
 0x14e   : > { %v1928_v20 = vrot.slane %v3741_v54, 5 }
 0x14f   : > { %3464 = vmatmul.msk.bf16.gmra.mxu1 %vm1475_vm13, %v4595_v50 }
 0x150   : > { %3530 = vmatmul.msk.bf16.gmra.mxu0 %vm1475_vm13, %v3980_v34  ;;  %v1930_v34 = vrot.slane %v1928_v20, 4 }
 0x151   : > { %3515 = vmatmul.msk.bf16.gmra.mxu3 %vm1475_vm13, %v4595_v50  ;;  %v3743_v50 = vld [vmem:[#allocation2 + $0x78] sm:$0xf] }
 0x152   : > { %v3481_v27 = vrot.slane %v3743_v50, 9  ;;  %v1932_v54 = vsel %vm4362_vm2, %v1930_v34, %v1931_v30 }
 0x153   : > { %v2079_v62 = vpop.f32.mrf.mxu2 }
 0x154   : > { %v2210_v53 = vpop.f32.mrf.mxu3  ;;  %v2158_v16 = vadd.f32 %v2079_v62, %v1760_v17  ;;  %v1764_v42 = vpop.f32.mrf.mxu1 }
 0x155   : > { %v2290_v52 = vadd.f32 %v2210_v53, %v2157_v49  ;;  %v1554_v39 = vpop.f32.mrf.mxu0  ;;  %v1929_v49 = vsel %vm4362_vm2, %v3481_v27, %v1928_v20  ;;  %v1990_v53 = vunpack.c.l.b16 %v1932_v54 }
 0x156   : > { %v1989_v50 = vunpack.c.l.b16 %v1929_v49  ;;  %v1938_v49 = vrot.slane %v4320_v59, 5 }
 0x158   : > { %3496 = vmatmul.msk.bf16.gmra.mxu2 %vm1475_vm13, %v4608_v32  ;;  %v4627_v34 = vpack.c.b16 %v1990_v53, %v1989_v50 }
 0x15b   : > { %v2082_v19 = vpop.f32.mrf.mxu2 }
 0x15c   : > { %v2212_v26 = vpop.f32.mrf.mxu3  ;;  %v2159_v13 = vadd.f32 %v2082_v19, %v1763_v40  ;;  %v1767_v9 = vpop.f32.mrf.mxu1 }
 0x15d   : > { %v2291_v17 = vadd.f32 %v2212_v26, %v2158_v16  ;;  %v1768_v6 = vadd.f32 %v1767_v9, %v1547_v46  ;;  %v2365_v62 = vpop.f32.mrf.mxu0  ;;  %v1765_v46 = vadd.f32 %v1764_v42, %v4555_v37  ;;  %v3482_v37 = vrot.slane %v4310_v56, 9 }
 0x15e   : > { %v4620_v10 = vadd.f32 %v2365_v62, %v2290_v52  ;;  %v1935_v52 = vrot.slane %v4316_v22, 5 }
 0x15f   : > { %3465 = vmatmul.msk.bf16.gmra.mxu1 %vm1475_vm13, %v4612_v58 }
 0x160   : > { %3531 = vmatmul.msk.bf16.gmra.mxu0 %vm1475_vm13, %v4084_v43  ;;  %v1937_v42 = vrot.slane %v1935_v52, 4  ;;  %v1936_v22 = vsel %vm4362_vm2, %v3482_v37, %v1935_v52 }
 0x161   : > { %3516 = vmatmul.msk.bf16.gmra.mxu3 %vm1475_vm13, %v4612_v58  ;;  %v1991_v56 = vunpack.c.l.b16 %v1936_v22  ;;  %v3746_v22 = vld [vmem:[#allocation2 + $0x90] sm:$0xf] }
 0x163   : > { %v2084_v19 = vpop.f32.mrf.mxu2 }
 0x164   : > { %v2215_v20 = vpop.f32.mrf.mxu3  ;;  %v2160_v9 = vadd.f32 %v2084_v19, %v1765_v46  ;;  %v1769_v27 = vpop.f32.mrf.mxu1 }
 0x165   : > { %v2292_v40 = vadd.f32 %v2215_v20, %v2159_v13  ;;  %v1770_v16 = vadd.f32 %v1769_v27, %v1549_v60  ;;  %v2367_v30 = vpop.f32.mrf.mxu0  ;;  %v4636_v13 = vld [vmem:[#allocation2 + $0x84] sm:$0xff] }
 0x166   : > { %v4632_v26 = vadd.f32 %v2367_v30, %v2291_v17  ;;  %v1939_v17 = vsel %vm4362_vm2, %v1937_v42, %v1938_v49  ;;  %v3744_v42 = vld [vmem:[#allocation2 + $0x94] sm:$0xf] }
 0x167   : > { %v1992_v59 = vunpack.c.l.b16 %v1939_v17  ;;  %v3483_v17 = vrot.slane %v3746_v22, 9 }
 0x168   : > { %3497 = vmatmul.msk.bf16.gmra.mxu2 %vm1475_vm13, %v4627_v34 }
 0x169   : > { %v4650_v27 = vpack.c.b16 %v1992_v59, %v1991_v56 }
 0x16b   : > { %v2087_v54 = vpop.f32.mrf.mxu2  ;;  %5273 = vst [vmem:[#allocation35_spill] sm:$0xff] %v4650_v27 }
 0x16c   : > { %v2217_v62 = vpop.f32.mrf.mxu3  ;;  %v2161_v50 = vadd.f32 %v2087_v54, %v1768_v6  ;;  %v1772_v53 = vpop.f32.mrf.mxu1  ;;  %v1942_v54 = vrot.slane %v3744_v42, 5 }
 0x16d   : > { %v2293_v46 = vadd.f32 %v2217_v62, %v2160_v9  ;;  %v1773_v60 = vadd.f32 %v1772_v53, %v1552_v5  ;;  %v2370_v19 = vpop.f32.mrf.mxu0  ;;  %v3745_v62 = vld [vmem:[#allocation2 + $0x98] sm:$0x1] }
 0x16e   : > { %v4644_v20 = vadd.f32 %v2370_v19, %v2292_v40  ;;  %v1945_v53 = vrot.slane %v3745_v62, 5  ;;  %v1944_v19 = vrot.slane %v1942_v54, 4 }
 0x16f   : > { %3466 = vmatmul.msk.bf16.gmra.mxu1 %vm1475_vm13, %v4636_v13 }
 0x170   : > { %5272 = vst [vmem:[#allocation34_spill] sm:$0xff] %v4644_v20  ;;  %3532 = vmatmul.msk.bf16.gmra.mxu0 %vm1475_vm13, %v4215_v15 }
 0x171   : > { %3517 = vmatmul.msk.bf16.gmra.mxu3 %vm1475_vm13, %v4636_v13 }
 0x173   : > { %v2089_v5 = vpop.f32.mrf.mxu2 }
 0x174   : > { %v2220_v6 = vpop.f32.mrf.mxu3  ;;  %v2162_v9 = vadd.f32 %v2089_v5, %v1770_v16  ;;  %v1774_v30 = vpop.f32.mrf.mxu1 }
 0x175   : > { %v2294_v52 = vadd.f32 %v2220_v6, %v2161_v50  ;;  %v1775_v49 = vadd.f32 %v1774_v30, %v1554_v39  ;;  %v2372_v37 = vpop.f32.mrf.mxu0  ;;  %v4656_v50 = vld [vmem:[#allocation2 + $0x90] sm:$0xff]  ;;  %v1943_v39 = vsel %vm4362_vm2, %v3483_v17, %v1942_v54  ;;  %v1946_v6 = vsel %vm4362_vm2, %v1944_v19, %v1945_v53  ;;  %v3747_v17 = vld [vmem:[#allocation2 + $0xa0] sm:$0xf] }
 0x176   : > { %v4654_v40 = vadd.f32 %v2372_v37, %v2293_v46  ;;  %5275 = vst [vmem:[#allocation37_spill] sm:$0xff] %v4656_v50  ;;  %v1993_v30 = vunpack.c.l.b16 %v1943_v39  ;;  %v1994_v37 = vunpack.c.l.b16 %v1946_v6  ;;  %v1949_v19 = vrot.slane %v3747_v17, 5  ;;  %v3749_v6 = vld [vmem:[#allocation2 + $0x9c] sm:$0xf] }
 0x177   : > { %v4678_v17 = vld [vmem:[#allocation2 + $0x9c] sm:$0xff] }
 0x178   : > { %3498 = vmatmul.msk.bf16.gmra.mxu2 %vm1475_vm13, %v4650_v27  ;;  %5274 = vst [vmem:[#allocation36_spill] sm:$0xff] %v4654_v40  ;;  %v4670_v54 = vpack.c.b16 %v1994_v37, %v1993_v30  ;;  %v3709_v30 = vld [vmem:[%s3833_s27 + $0x78] sm:$0xff]  }
 0x179   : > { %5279 = vst [vmem:[#allocation41_spill] sm:$0xff] %v4678_v17 }
 0x17a   : > { %5277 = vst [vmem:[#allocation39_spill] sm:$0xff] %v4670_v54 }
 0x17b   : > { %v2092_v20 = vpop.f32.mrf.mxu2 }
 0x17c   : > { %v2222_v16 = vpop.f32.mrf.mxu3  ;;  %v2163_v56 = vadd.f32 %v2092_v20, %v1773_v60  ;;  %v1777_v59 = vpop.f32.mrf.mxu1 }
 0x17d   : > { %v2295_v5 = vadd.f32 %v2222_v16, %v2162_v9  ;;  %v2375_v46 = vpop.f32.mrf.mxu0  ;;  %v3748_v16 = vld [vmem:[#allocation2 + $0xa4] sm:$0x1] }
 0x17e   : > { %v4664_v42 = vadd.f32 %v2375_v46, %v2294_v52  ;;  %v1952_v39 = vrot.slane %v3748_v16, 5  ;;  %v3484_v46 = vrot.slane %v3749_v6, 9  ;;  %v3694_v16 = vunpack.c.h.bf16 %v3709_v30 }
 0x17f   : > { %3467 = vmatmul.msk.bf16.gmra.mxu1 %vm1475_vm13, %v4656_v50 }
 0x180   : > { %5276 = vst [vmem:[#allocation38_spill] sm:$0xff] %v4664_v42  ;;  %3533 = vmatmul.msk.bf16.gmra.mxu0 %vm1475_vm13, %v4349_v47  ;;  %v1951_v42 = vrot.slane %v1949_v19, 4 }
 0x181   : > { %3518 = vmatmul.msk.bf16.gmra.mxu3 %vm1475_vm13, %v4656_v50 }
 0x183   : > { %v2094_v60 = vpop.f32.mrf.mxu2 }
 0x184   : > { %v2225_v20 = vpop.f32.mrf.mxu3  ;;  %v2164_v9 = vadd.f32 %v2094_v60, %v1775_v49  ;;  %v1779_v62 = vpop.f32.mrf.mxu1  ;;  %v1778_v49 = vadd.f32 %v1777_v59, %v4457_v41  ;;  %v3750_v41 = vld [vmem:[%s5192_s0] ss:$0 sm:$0xff] }
 0x185   : > { %v2296_v53 = vadd.f32 %v2225_v20, %v2163_v56  ;;  %v2377_v22 = vpop.f32.mrf.mxu0  ;;  %v3693_v20 = vunpack.c.l.bf16 %v3709_v30 }
 0x186   : > { %v4674_v52 = vadd.f32 %v2377_v22, %v2295_v5  ;;  %v1950_v5 = vsel %vm4362_vm2, %v3484_v46, %v1949_v19  ;;  %v1953_v22 = vsel %vm4362_vm2, %v1951_v42, %v1952_v39  ;;  %v3751_v19 = vld [vmem:[%s5193_s1] ss:$0 sm:$0xff]  ;;  %v1780_v39 = vadd.f32 %v1779_v62, %v4473_v11  ;;  %v3752_v11 = vld [vmem:[#allocation2 + $0xac] sm:$0xf] }
 0x187   : > { %v335_v59 = vmul.f32 %v3750_v41, %v3693_v20  ;;  %v463_v20 = vld [vmem:[#allocation2 + $0xc0] sm:$0x1]  ;;  %v1956_v62 = vrot.slane %v3752_v11, 5 }
 0x188   : > { %3499 = vmatmul.msk.bf16.gmra.mxu2 %vm1475_vm13, %v4670_v54  ;;  %5278 = vst [vmem:[#allocation40_spill] sm:$0xff] %v4674_v52 }
 0x189   : > { %v371_v46 = vadd.f32 %v3751_v19, %v335_v59 }
 0x18b   : > { %v2097_v60 = vpop.f32.mrf.mxu2  ;;  %v403_v30 = vmax.f32 %v371_v46, 0.0 }
 0x18c   : > { %v2227_v37 = vpop.f32.mrf.mxu3  ;;  %v2165_v40 = vadd.f32 %v2097_v60, %v1778_v49  ;;  %v1782_v56 = vpop.f32.mrf.mxu1  ;;  %v336_v49 = vmul.f32 %v3750_v41, %v3694_v16  ;;  %v1996_v60 = vunpack.c.l.b16 %v1953_v22  ;;  %v464_v16 = vsel %vm3810_vm3, 0, %v463_v20 }
 0x18d   : > { %v2297_v50 = vadd.f32 %v2227_v37, %v2164_v9  ;;  %v2380_v6 = vpop.f32.mrf.mxu0  ;;  %v1995_v9 = vunpack.c.l.b16 %v1950_v5  ;;  %465 = vst [vmem:[#allocation2 + $0xc0] sm:$0x1] %v464_v16  ;;  %v1958_v16 = vrot.slane %v1956_v62, 4  ;;  %v1783_v11 = vadd.f32 %v1782_v56, %v4483_v51 }
 0x18e   : > { %v4692_v37 = vadd.f32 %v2380_v6, %v2296_v53  ;;  %v372_v42 = vadd.f32 %v3751_v19, %v336_v49 }
 0x18f   : > { %3468 = vmatmul.msk.bf16.gmra.mxu1 %vm1475_vm13, %v4678_v17  ;;  %v4701_v53 = vpack.c.b16 %v1996_v60, %v1995_v9 }
 0x190   : > { %5280 = vst [vmem:[#allocation42_spill] sm:$0xff] %v4692_v37  ;;  %3534 = vmatmul.msk.bf16.gmra.mxu0 %vm1475_vm13, %v4009_v63  ;;  %v404_v22 = vmax.f32 %v372_v42, 0.0  ;;  %v546_v37 = vpack.c.bf16 %v403_v30, %v403_v30 }
 0x191   : > { %3519 = vmatmul.msk.bf16.gmra.mxu3 %vm1475_vm13, %v4678_v17  ;;  %5281 = vst [vmem:[#allocation43_spill] sm:$0xff] %v4701_v53  ;;  %v513_v17 = vld [vmem:[#allocation2 + $0xc8] sm:$0x1] }
 0x192   : > { %v547_v19 = vpack.c.bf16 %v404_v22, %v404_v22  ;;  %v806_v52 = vshrl.u32 %v546_v37, 16  ;;  %v514_v42 = vsel %vm3824_vm5, 0, %v513_v17  ;;  %v809_v9 = vshll.u32 %v546_v37, 16 }
 0x193   : > { %v2099_v5 = vpop.f32.mrf.mxu2  ;;  %515 = vst [vmem:[#allocation2 + $0xc8] sm:$0x1] %v514_v42 }
 0x194   : > { %v2230_v41 = vpop.f32.mrf.mxu3  ;;  %v2166_v59 = vadd.f32 %v2099_v5, %v1780_v39  ;;  %v1784_v6 = vpop.f32.mrf.mxu1  ;;  %v814_v46 = vshrl.u32 %v547_v19, 16  ;;  %v808_v39 = vrot.slane %v806_v52, 7  ;;  %v817_v60 = vshll.u32 %v547_v19, 16  ;;  %v3754_v5 = vld [vmem:[#allocation2 + $0xa8] sm:$0xf] }
 0x195   : > { %v2298_v49 = vadd.f32 %v2230_v41, %v2165_v40  ;;  %v2382_v63 = vpop.f32.mrf.mxu0  ;;  %v3753_v40 = vld [vmem:[#allocation2 + $0xb0] sm:$0x1]  ;;  %v3485_v22 = vrot.slane %v3754_v5, 9  ;;  %v977_v27 = vld [vmem:[#allocation2 + $0xc0] sm:$0xf]  ;;  %v4712_v19 = vld [vmem:[#allocation2 + $0xa8] sm:$0xff]  ;;  %v1785_v3 = vadd.f32 %v1784_v6, %v4501_v48 }
 0x196   : > { %v4707_v20 = vadd.f32 %v2382_v63, %v2297_v50  ;;  %v1959_v30 = vrot.slane %v3753_v40, 5  ;;  %v816_v41 = vrot.slane %v814_v46, 7  ;;  %v811_v54 = vor.u32 %v809_v9, %v808_v39 }
 0x197   : > { %v812_v7 = vrot.slane %v808_v39, 4  ;;  %v1957_v42 = vsel %vm4362_vm2, %v3485_v22, %v1956_v62  ;;  %v1966_v22 = vrot.slane %v4347_v1, 5 }
 0x198   : > { %3500 = vmatmul.msk.bf16.gmra.mxu2 %vm1475_vm13, %v4701_v53  ;;  %v819_v47 = vor.u32 %v817_v60, %v816_v41  ;;  %v978_v63 = vsel %vm3886_vm11, %v811_v54, %v977_v27  ;;  %v1960_v51 = vsel %vm4362_vm2, %v1958_v16, %v1959_v30  ;;  %v821_v46 = vrot.slane %v816_v41, 4 }
 0x199   : > { %979 = vst [vmem:[#allocation2 + $0xc0] sm:$0xf] %v978_v63  ;;  %v1997_v27 = vunpack.c.l.b16 %v1957_v42  ;;  %v1998_v54 = vunpack.c.l.b16 %v1960_v51  ;;  %v3486_v16 = vrot.slane %v4335_v29, 9  ;;  %v4742_v63 = vld [vmem:[#allocation2 + $0xb4] sm:$0xff] }
 0x19a   : > { %v820_v56 = vsel %vm3878_vm10, %v812_v7, %v819_v47  ;;  %v981_v12 = vld [vmem:[#allocation2 + $0xc8] sm:$0x1] }
 0x19b   : > { %v2102_v17 = vpop.f32.mrf.mxu2  ;;  %980 = vst.msk [vmem:[#allocation2 + $0xc4] sm:$0xf] %vm405_vm6, %v820_v56  ;;  %v4732_v60 = vpack.c.b16 %v1998_v54, %v1997_v27 }
 0x19c   : > { %v2232_v53 = vpop.f32.mrf.mxu3  ;;  %v2167_v52 = vadd.f32 %v2102_v17, %v1783_v11  ;;  %v1787_v37 = vpop.f32.mrf.mxu1 }
 0x19d   : > { %v2299_v50 = vadd.f32 %v2232_v53, %v2166_v59  ;;  %v2385_v39 = vpop.f32.mrf.mxu0  ;;  %v982_v59 = vsel %vm3810_vm3, %v821_v46, %v981_v12  ;;  %v1788_v6 = vadd.f32 %v1787_v37, %v4510_v44 }
 0x19e   : > { %v4725_v53 = vadd.f32 %v2385_v39, %v2298_v49  ;;  %983 = vst [vmem:[#allocation2 + $0xc8] sm:$0x1] %v982_v59  ;;  %v1963_v49 = vrot.slane %v4343_v55, 5 }
 0x19f   : > { %3469 = vmatmul.msk.bf16.gmra.mxu1 %vm1475_vm13, %v4712_v19 }
 0x1a0   : > { %3535 = vmatmul.msk.bf16.gmra.mxu0 %vm1475_vm13, %v4112_v18  ;;  %v1965_v48 = vrot.slane %v1963_v49, 4  ;;  %v1964_v55 = vsel %vm4362_vm2, %v3486_v16, %v1963_v49  ;;  %v4759_v12 = vld [vmem:[#allocation2 + $0xc0] sm:$0xf] }
 0x1a1   : > { %3520 = vmatmul.msk.bf16.gmra.mxu3 %vm1475_vm13, %v4712_v19  ;;  %v1999_v29 = vunpack.c.l.b16 %v1964_v55 }
 0x1a2   : > { %v4761_v27 = vld [vmem:[#allocation2 + $0xc4] sm:$0xf] }
 0x1a3   : > { %v2104_v47 = vpop.f32.mrf.mxu2 }
 0x1a4   : > { %v2235_v62 = vpop.f32.mrf.mxu3  ;;  %v2168_v9 = vadd.f32 %v2104_v47, %v1785_v3  ;;  %v1789_v40 = vpop.f32.mrf.mxu1  ;;  %v2323_v47 = vshrl.u32 %v4759_v12, 16 }
 0x1a5   : > { %v2300_v30 = vadd.f32 %v2235_v62, %v2167_v52  ;;  %v2387_v2 = vpop.f32.mrf.mxu0  ;;  %v1790_v37 = vadd.f32 %v1789_v40, %v4530_v35  ;;  %v2326_v62 = vshll.u32 %v4759_v12, 16  ;;  %v2336_v35 = vshrl.u32 %v4761_v27, 16 }
 0x1a6   : > { %v4737_v5 = vadd.f32 %v2387_v2, %v2299_v50  ;;  %v1967_v50 = vsel %vm4362_vm2, %v1965_v48, %v1966_v22  ;;  %v2325_v2 = vrot.slane %v2323_v47, 4 }
 0x1a7   : > { %v2000_v1 = vunpack.c.l.b16 %v1967_v50  ;;  %v2328_v49 = vrot.slane %v2326_v62, 5  ;;  %v2338_v16 = vrot.slane %v2336_v35, 4  ;;  %v4774_v50 = vld [vmem:[#allocation2 + $0xc0] sm:$0xff] }
 0x1a8   : > { %3501 = vmatmul.msk.bf16.gmra.mxu2 %vm1475_vm13, %v4732_v60 }
 0x1a9   : > { %v4757_v39 = vpack.c.b16 %v2000_v1, %v1999_v29  ;;  %v2329_v29 = vor.u32 %v2328_v49, %v2325_v2 }
 0x1ab   : > { %v2107_v41 = vpop.f32.mrf.mxu2 }
 0x1ac   : > { %v2237_v11 = vpop.f32.mrf.mxu3  ;;  %v2169_v7 = vadd.f32 %v2107_v41, %v1788_v6  ;;  %v1792_v17 = vpop.f32.mrf.mxu1  ;;  %v4772_v41 = vld [vmem:[#allocation2 + $0xc8] sm:$0x1] }
 0x1ad   : > { %v2301_v52 = vadd.f32 %v2237_v11, %v2168_v9  ;;  %v2390_v42 = vpop.f32.mrf.mxu0  ;;  %v2332_v9 = vshll.u32 %v4761_v27, 16 }
 0x1ae   : > { %v4750_v44 = vadd.f32 %v2390_v42, %v2300_v30  ;;  %v1793_v30 = vadd.f32 %v1792_v17, %v4543_v24 }
 0x1af   : > { %3470 = vmatmul.msk.bf16.gmra.mxu1 %vm1475_vm13, %v4742_v63  ;;  %v2334_v22 = vrot.slane %v2332_v9, 5 }
 0x1b0   : > { %3536 = vmatmul.msk.bf16.gmra.mxu0 %vm1475_vm13, %v4246_v23 }
 0x1b1   : > { %3521 = vmatmul.msk.bf16.gmra.mxu3 %vm1475_vm13, %v4742_v63  ;;  %v2339_v1 = vor.u32 %v2338_v16, %v2334_v22 }
 0x1b3   : > { %v2109_v51 = vpop.f32.mrf.mxu2 }
 0x1b4   : > { %v2240_v56 = vpop.f32.mrf.mxu3  ;;  %v2170_v46 = vadd.f32 %v2109_v51, %v1790_v37  ;;  %v1794_v54 = vpop.f32.mrf.mxu1  ;;  %v2330_v37 = vrot.slane %v2329_v29, 4  ;;  %v2340_v51 = vrot.slane %v2339_v1, 4 }
 0x1b5   : > { %v2302_v59 = vadd.f32 %v2240_v56, %v2169_v7  ;;  %v2392_v3 = vpop.f32.mrf.mxu0  ;;  %v1795_v17 = vadd.f32 %v1794_v54, %v4565_v61 }
 0x1b6   : > { %v4769_v40 = vadd.f32 %v2392_v3, %v2301_v52  ;;  %v2342_v52 = vshll.u32 %v4772_v41, 16 }
 0x1b8   : > { %3502 = vmatmul.msk.bf16.gmra.mxu2 %vm1475_vm13, %v4757_v39  ;;  %v2344_v56 = vrot.slane %v2342_v52, 5 }
 0x1bb   : > { %v2112_v48 = vpop.f32.mrf.mxu2 }
 0x1bc   : > { %v2242_v6 = vpop.f32.mrf.mxu3  ;;  %v2171_v11 = vadd.f32 %v2112_v48, %v1793_v30  ;;  %v1797_v7 = vpop.f32.mrf.mxu1 }
 0x1bd   : > { %v2303_v55 = vadd.f32 %v2242_v6, %v2170_v46  ;;  %v2395_v42 = vpop.f32.mrf.mxu0  ;;  %v1798_v2 = vadd.f32 %v1797_v7, %v4471_v14 }
 0x1be   : > { %v4779_v24 = vadd.f32 %v2395_v42, %v2302_v59  ;;  %v2345_v59 = vsel %vm3917_vm12, %v2340_v51, %v2344_v56 }
 0x1bf   : > { %3540 = vmatmul.msk.bf16.vlgmr.msra.gmra.mxu1 %vm1475_vm13, %v4420_v4  ;;  %v2335_v4 = vsel %vm3917_vm12, %v2330_v37, %v2334_v22  ;;  %v2348_v54 = vunpack.c.l.b16 %v2345_v59 }
 0x1c0   : > { %3537 = vmatmul.msk.bf16.gmra.mxu0 %vm1475_vm13, %v4376_v25  ;;  %v2347_v61 = vunpack.c.l.b16 %v2335_v4 }
 0x1c1   : > { %3522 = vmatmul.msk.bf16.gmra.mxu3 %vm1475_vm13, %v4774_v50 }
 0x1c2   : > { %v4795_v42 = vpack.c.b16 %v2348_v54, %v2347_v61 }
 0x1c3   : > { %v2114_v46 = vpop.f32.mrf.mxu2 }
 0x1c4   : > { %v2245_v3 = vpop.f32.mrf.mxu3  ;;  %v2172_v47 = vadd.f32 %v2114_v46, %v1795_v17  ;;  %v1799_v62 = vpop.f32.mrf.mxu1 }
 0x1c5   : > { %v2304_v9 = vadd.f32 %v2245_v3, %v2171_v11  ;;  %v2397_v35 = vpop.f32.mrf.mxu0 }
 0x1c6   : > { %v4792_v30 = vadd.f32 %v2397_v35, %v2303_v55 }
 0x1c8   : > { %3560 = vmatmul.msk.bf16.vlgmr.msra.gmra.mxu2 %vm1475_vm13, %v4430_v36  ;;  %v1800_v36 = vadd.f32 %v1799_v62, %v4481_v31 }
 0x1cb   : > { %v2117_v49 = vpop.f32.mrf.mxu2 }
 0x1cc   : > { %v2247_v16 = vpop.f32.mrf.mxu3  ;;  %v2173_v48 = vadd.f32 %v2117_v49, %v1798_v2  ;;  %v1802_v6 = vpop.f32.mrf.mxu1  ;;  %v5283_v2 = vld [vmem:[#allocation10_spill] sm:$0xff] }
 0x1cd   : > { %v2305_v11 = vadd.f32 %v2247_v16, %v2172_v47  ;;  %v2400_v22 = vpop.f32.mrf.mxu0  ;;  %v1803_v51 = vadd.f32 %v1802_v6, %v4499_v38  ;;  %v5284_v16 = vld [vmem:[#allocation21_spill] sm:$0xff] }
 0x1ce   : > { %v4799_v29 = vadd.f32 %v2400_v22, %v2304_v9 }
 0x1cf   : > { %3541 = vmatmul.msk.bf16.gmra.mxu1 %vm1475_vm13, %v4428_v8 }
 0x1d0   : > { %3538 = vmatmul.msk.bf16.gmra.mxu0 %vm1475_vm13, %v4795_v42 }
 0x1d1   : > { %3576 = vmatmul.msk.bf16.vlgmr.msra.gmra.mxu3 %vm1475_vm13, %v4280_v0 }
 0x1d3   : > { %v2119_v14 = vpop.f32.mrf.mxu2 }
 0x1d4   : > { %v2250_v7 = vpop.f32.mrf.mxu3  ;;  %v2174_v55 = vadd.f32 %v2119_v14, %v1800_v36  ;;  %v1804_v1 = vpop.f32.mrf.mxu1  ;;  %v5285_v14 = vld [vmem:[#allocation11_spill] sm:$0xff] }
 0x1d5   : > { %v2306_v52 = vadd.f32 %v2250_v7, %v2173_v48  ;;  %v2402_v17 = vpop.f32.mrf.mxu0 }
 0x1d6   : > { %v4808_v37 = vadd.f32 %v2402_v17, %v2305_v11 }
 0x1d8   : > { %3561 = vmatmul.msk.bf16.gmra.mxu2 %vm1475_vm13, %v4441_v28  ;;  %v5282_v28 = vld [vmem:[#allocation18_spill] sm:$0xff] }
 0x1d9   : > { %v1805_v62 = vadd.f32 %v1804_v1, %v5282_v28  ;;  %v5287_v1 = vld [vmem:[#allocation24_spill] sm:$0xff]  ;;  %v5289_v28 = vld [vmem:[#allocation27_spill] sm:$0xff] }
 0x1db   : > { %v2122_v56 = vpop.f32.mrf.mxu2 }
 0x1dc   : > { %v2252_v0 = vpop.f32.mrf.mxu3  ;;  %v2175_v46 = vadd.f32 %v2122_v56, %v1803_v51  ;;  %v1807_v3 = vpop.f32.mrf.mxu1 }
 0x1dd   : > { %v2307_v47 = vadd.f32 %v2252_v0, %v2174_v55  ;;  %v2405_v9 = vpop.f32.mrf.mxu0  ;;  %v1808_v48 = vadd.f32 %v1807_v3, %v5284_v16  ;;  %v5286_v55 = vld [vmem:[#allocation3_spill] sm:$0xff]  ;;  %v5291_v16 = vld [vmem:[#allocation6_spill] sm:$0xff] }
 0x1de   : > { %v4813_v31 = vadd.f32 %v2405_v9, %v2306_v52 }
 0x1df   : > { %3542 = vmatmul.msk.bf16.gmra.mxu1 %vm1475_vm13, %v4453_v33 }
 0x1e0   : > { %3593 = vmatmul.msk.bf16.vlgmr.msra.gmra.mxu0 %vm1475_vm13, %v4428_v8 }
 0x1e1   : > { %3577 = vmatmul.msk.bf16.gmra.mxu3 %vm1475_vm13, %v4412_v21 }
 0x1e3   : > { %v2124_v38 = vpop.f32.mrf.mxu2 }
 0x1e4   : > { %v2255_v35 = vpop.f32.mrf.mxu3  ;;  %v2176_v4 = vadd.f32 %v2124_v38, %v1805_v62  ;;  %v1809_v59 = vpop.f32.mrf.mxu1 }
 0x1e5   : > { %v2308_v61 = vadd.f32 %v2255_v35, %v2175_v46  ;;  %v2407_v54 = vpop.f32.mrf.mxu0  ;;  %v1810_v52 = vadd.f32 %v1809_v59, %v5287_v1  ;;  %v5290_v59 = vld [vmem:[#allocation15_spill] sm:$0xff]  ;;  %v5293_v1 = vld [vmem:[#allocation17_spill] sm:$0xff] }
 0x1e6   : > { %v4822_v49 = vadd.f32 %v2407_v54, %v2307_v47  ;;  %v5288_v47 = vld [vmem:[#allocation13_spill] sm:$0xff] }
 0x1e8   : > { %3562 = vmatmul.msk.bf16.gmra.mxu2 %vm1475_vm13, %v5283_v2 }
 0x1eb   : > { %v2127_v6 = vpop.f32.mrf.mxu2 }
 0x1ec   : > { %v2257_v21 = vpop.f32.mrf.mxu3  ;;  %v2177_v11 = vadd.f32 %v2127_v6, %v1808_v48  ;;  %v1812_v22 = vpop.f32.mrf.mxu1  ;;  %v5292_v48 = vld [vmem:[#allocation29_spill] sm:$0xff] }
 0x1ed   : > { %v2309_v8 = vadd.f32 %v2257_v21, %v2176_v4  ;;  %v2410_v36 = vpop.f32.mrf.mxu0  ;;  %v1813_v62 = vadd.f32 %v1812_v22, %v5289_v28 }
 0x1ee   : > { %v4827_v7 = vadd.f32 %v2410_v36, %v2308_v61 }
 0x1ef   : > { %3543 = vmatmul.msk.bf16.gmra.mxu1 %vm1475_vm13, %v5285_v14 }
 0x1f0   : > { %3594 = vmatmul.msk.bf16.gmra.mxu0 %vm1475_vm13, %v4453_v33 }
 0x1f1   : > { %3578 = vmatmul.msk.bf16.gmra.mxu3 %vm1475_vm13, %v5286_v55 }
 0x1f3   : > { %v2129_v17 = vpop.f32.mrf.mxu2 }
 0x1f4   : > { %v2260_v51 = vpop.f32.mrf.mxu3  ;;  %v2178_v56 = vadd.f32 %v2129_v17, %v1810_v52  ;;  %v1814_v0 = vpop.f32.mrf.mxu1  ;;  %v5294_v17 = vld [vmem:[#allocation12_spill] sm:$0xff] }
 0x1f5   : > { %v2310_v46 = vadd.f32 %v2260_v51, %v2177_v11  ;;  %v2412_v3 = vpop.f32.mrf.mxu0  ;;  %v1815_v6 = vadd.f32 %v1814_v0, %v5292_v48  ;;  %v5295_v0 = vld [vmem:[#allocation19_spill] sm:$0xff] }
 0x1f6   : > { %v4836_v9 = vadd.f32 %v2412_v3, %v2309_v8 }
 0x1f8   : > { %3563 = vmatmul.msk.bf16.gmra.mxu2 %vm1475_vm13, %v5288_v47 }
 0x1fb   : > { %v2132_v38 = vpop.f32.mrf.mxu2 }
 0x1fc   : > { %v2262_v35 = vpop.f32.mrf.mxu3  ;;  %v2179_v4 = vadd.f32 %v2132_v38, %v1813_v62  ;;  %v1817_v61 = vpop.f32.mrf.mxu1  ;;  %v5296_v38 = vld [vmem:[#allocation7_spill] sm:$0xff] }
 0x1fd   : > { %v2311_v33 = vadd.f32 %v2262_v35, %v2178_v56  ;;  %v2415_v54 = vpop.f32.mrf.mxu0  ;;  %v1818_v51 = vadd.f32 %v1817_v61, %v5294_v17  ;;  %v5297_v35 = vld [vmem:[#allocation14_spill] sm:$0xff] }
 0x1fe   : > { %v4841_v2 = vadd.f32 %v2415_v54, %v2310_v46 }
 0x1ff   : > { %3544 = vmatmul.msk.bf16.gmra.mxu1 %vm1475_vm13, %v5290_v59 }
 0x200   : > { %3595 = vmatmul.msk.bf16.gmra.mxu0 %vm1475_vm13, %v5285_v14 }
 0x201   : > { %3579 = vmatmul.msk.bf16.gmra.mxu3 %vm1475_vm13, %v5291_v16 }
 0x203   : > { %v2134_v21 = vpop.f32.mrf.mxu2 }
 0x204   : > { %v2265_v11 = vpop.f32.mrf.mxu3  ;;  %v2180_v22 = vadd.f32 %v2134_v21, %v1815_v6  ;;  %v1819_v8 = vpop.f32.mrf.mxu1  ;;  %v5298_v21 = vld [vmem:[#allocation22_spill] sm:$0xff] }
 0x205   : > { %v2312_v36 = vadd.f32 %v2265_v11, %v2179_v4  ;;  %v2417_v55 = vpop.f32.mrf.mxu0  ;;  %v1820_v4 = vadd.f32 %v1819_v8, %v5297_v35  ;;  %v5300_v8 = vld [vmem:[#allocation25_spill] sm:$0xff] }
 0x206   : > { %v4850_v52 = vadd.f32 %v2417_v55, %v2311_v33 }
 0x208   : > { %3564 = vmatmul.msk.bf16.gmra.mxu2 %vm1475_vm13, %v5293_v1 }
 0x20b   : > { %v2137_v56 = vpop.f32.mrf.mxu2 }
 0x20c   : > { %v2267_v46 = vpop.f32.mrf.mxu3  ;;  %v2181_v3 = vadd.f32 %v2137_v56, %v1818_v51  ;;  %v1822_v47 = vpop.f32.mrf.mxu1 }
 0x20d   : > { %v2313_v14 = vadd.f32 %v2267_v46, %v2180_v22  ;;  %v2420_v28 = vpop.f32.mrf.mxu0  ;;  %v5299_v22 = vld [vmem:[#allocation16_spill] sm:$0xff] }
 0x20e   : > { %v4855_v62 = vadd.f32 %v2420_v28, %v2312_v36  ;;  %v1823_v36 = vadd.f32 %v1822_v47, %v5299_v22 }
 0x20f   : > { %3545 = vmatmul.msk.bf16.gmra.mxu1 %vm1475_vm13, %v5295_v0 }
 0x210   : > { %3596 = vmatmul.msk.bf16.gmra.mxu0 %vm1475_vm13, %v5290_v59 }
 0x211   : > { %3580 = vmatmul.msk.bf16.gmra.mxu3 %vm1475_vm13, %v5296_v38 }
 0x213   : > { %v2139_v61 = vpop.f32.mrf.mxu2 }
 0x214   : > { %v2270_v33 = vpop.f32.mrf.mxu3  ;;  %v2182_v54 = vadd.f32 %v2139_v61, %v1820_v4  ;;  %v1824_v16 = vpop.f32.mrf.mxu1 }
 0x215   : > { %v2314_v48 = vadd.f32 %v2270_v33, %v2181_v3  ;;  %v2422_v6 = vpop.f32.mrf.mxu0  ;;  %v5301_v3 = vld [vmem:[#allocation8_spill] sm:$0xff] }
 0x216   : > { %v4864_v11 = vadd.f32 %v2422_v6, %v2313_v14  ;;  %v5302_v14 = vld [vmem:[#allocation20_spill] sm:$0xff] }
 0x217   : > { %v1825_v28 = vadd.f32 %v1824_v16, %v5302_v14  ;;  %v5305_v16 = vld [vmem:[#allocation31_spill] sm:$0xff] }
 0x218   : > { %3565 = vmatmul.msk.bf16.gmra.mxu2 %vm1475_vm13, %v5298_v21 }
 0x21b   : > { %v2142_v55 = vpop.f32.mrf.mxu2 }
 0x21c   : > { %v2272_v1 = vpop.f32.mrf.mxu3  ;;  %v2183_v17 = vadd.f32 %v2142_v55, %v1823_v36  ;;  %v1827_v51 = vpop.f32.mrf.mxu1 }
 0x21d   : > { %v2315_v59 = vadd.f32 %v2272_v1, %v2182_v54  ;;  %v2425_v56 = vpop.f32.mrf.mxu0  ;;  %v5303_v54 = vld [vmem:[#allocation28_spill] sm:$0xff] }
 0x21e   : > { %v4869_v46 = vadd.f32 %v2425_v56, %v2314_v48  ;;  %v5304_v48 = vld [vmem:[#allocation23_spill] sm:$0xff] }
 0x21f   : > { %3546 = vmatmul.msk.bf16.gmra.mxu1 %vm1475_vm13, %v5300_v8  ;;  %v1828_v21 = vadd.f32 %v1827_v51, %v5304_v48 }
 0x220   : > { %3597 = vmatmul.msk.bf16.gmra.mxu0 %vm1475_vm13, %v5295_v0 }
 0x221   : > { %3581 = vmatmul.msk.bf16.gmra.mxu3 %vm1475_vm13, %v5301_v3 }
 0x223   : > { %v2144_v47 = vpop.f32.mrf.mxu2 }
 0x224   : > { %v2275_v38 = vpop.f32.mrf.mxu3  ;;  %v2184_v35 = vadd.f32 %v2144_v47, %v1825_v28  ;;  %v1829_v4 = vpop.f32.mrf.mxu1 }
 0x225   : > { %v2316_v61 = vadd.f32 %v2275_v38, %v2183_v17  ;;  %v2427_v33 = vpop.f32.mrf.mxu0  ;;  %v5307_v17 = vld [vmem:[#allocation4_spill] sm:$0xff] }
 0x226   : > { %v4878_v6 = vadd.f32 %v2427_v33, %v2315_v59  ;;  %v5308_v59 = vld [vmem:[#allocation26_spill] sm:$0xff] }
 0x227   : > { %v1830_v14 = vadd.f32 %v1829_v4, %v5308_v59 }
 0x228   : > { %3566 = vmatmul.msk.bf16.gmra.mxu2 %vm1475_vm13, %v5303_v54  ;;  %v5309_v54 = vld [vmem:[#allocation33_spill] sm:$0xff] }
 0x22b   : > { %v2147_v22 = vpop.f32.mrf.mxu2 }
 0x22c   : > { %v2277_v36 = vpop.f32.mrf.mxu3  ;;  %v2185_v55 = vadd.f32 %v2147_v22, %v1828_v21  ;;  %v1832_v1 = vpop.f32.mrf.mxu1 }
 0x22d   : > { %v2317_v0 = vadd.f32 %v2277_v36, %v2184_v35  ;;  %v2430_v56 = vpop.f32.mrf.mxu0 }
 0x22e   : > { %v4883_v3 = vadd.f32 %v2430_v56, %v2316_v61  ;;  %v5310_v61 = vld [vmem:[#allocation30_spill] sm:$0xff] }
 0x22f   : > { %3547 = vmatmul.msk.bf16.gmra.mxu1 %vm1475_vm13, %v5305_v16  ;;  %v1833_v21 = vadd.f32 %v1832_v1, %v5310_v61 }
 0x230   : > { %5306 = vst [vmem:[#allocation18_spill] sm:$0xff] %v4883_v3  ;;  %3598 = vmatmul.msk.bf16.gmra.mxu0 %vm1475_vm13, %v5300_v8 }
 0x231   : > { %3582 = vmatmul.msk.bf16.gmra.mxu3 %vm1475_vm13, %v5307_v17 }
 0x233   : > { %v2149_v51 = vpop.f32.mrf.mxu2 }
 0x234   : > { %v2280_v28 = vpop.f32.mrf.mxu3  ;;  %v2186_v47 = vadd.f32 %v2149_v51, %v1830_v14  ;;  %v1834_v38 = vpop.f32.mrf.mxu1 }
 0x235   : > { %v2318_v33 = vadd.f32 %v2280_v28, %v2185_v55  ;;  %v2432_v35 = vpop.f32.mrf.mxu0  ;;  %v5311_v55 = vld [vmem:[#allocation32_spill] sm:$0xff] }
 0x236   : > { %v4892_v48 = vadd.f32 %v2432_v35, %v2317_v0  ;;  %v1835_v0 = vadd.f32 %v1834_v38, %v5311_v55 }
 0x238   : > { %3567 = vmatmul.msk.bf16.gmra.mxu2 %vm1475_vm13, %v5309_v54 }
 0x23b   : > { %v2152_v22 = vpop.f32.mrf.mxu2 }
 0x23c   : > { %v2282_v36 = vpop.f32.mrf.mxu3  ;;  %v2187_v56 = vadd.f32 %v2152_v22, %v1833_v21  ;;  %v2504_v17 = vpop.f32.mrf.mxu1 }
 0x23d   : > { %v2319_v8 = vadd.f32 %v2282_v36, %v2186_v47  ;;  %v2435_v3 = vpop.f32.mrf.mxu0  ;;  %v2584_v22 = vadd.f32 %v2504_v17, %v4620_v10  ;;  %v5314_v10 = vld [vmem:[#allocation9_spill] sm:$0xff] }
 0x23e   : > { %v4897_v4 = vadd.f32 %v2435_v3, %v2318_v33 }
 0x23f   : > { %3548 = vmatmul.msk.bf16.gmra.mxu1 %vm1475_vm13, %v4608_v32 }
 0x240   : > { %3599 = vmatmul.msk.bf16.gmra.mxu0 %vm1475_vm13, %v5305_v16 }
 0x241   : > { %3583 = vmatmul.msk.bf16.gmra.mxu3 %vm1475_vm13, %v4084_v43 }
 0x243   : > { %v2154_v1 = vpop.f32.mrf.mxu2 }
 0x244   : > { %v2285_v59 = vpop.f32.mrf.mxu3  ;;  %v2188_v14 = vadd.f32 %v2154_v1, %v1835_v0  ;;  %v2506_v51 = vpop.f32.mrf.mxu1 }
 0x245   : > { %v2320_v28 = vadd.f32 %v2285_v59, %v2187_v56  ;;  %v2437_v47 = vpop.f32.mrf.mxu0  ;;  %v2585_v59 = vadd.f32 %v2506_v51, %v4632_v26 }
 0x246   : > { %v4906_v35 = vadd.f32 %v2437_v47, %v2319_v8 }
 0x248   : > { %3568 = vmatmul.msk.bf16.gmra.mxu2 %vm1475_vm13, %v4612_v58 }
 0x24b   : > { %v2637_v3 = vpop.f32.mrf.mxu2 }
 0x24c   : > { %v2287_v33 = vpop.f32.mrf.mxu3  ;;  %v2509_v43 = vpop.f32.mrf.mxu1  ;;  %v2717_v56 = vadd.f32 %v2637_v3, %v2584_v22 }
 0x24d   : > { %v2321_v54 = vadd.f32 %v2287_v33, %v2188_v14  ;;  %v2440_v61 = vpop.f32.mrf.mxu0  ;;  %v5313_v14 = vld [vmem:[#allocation35_spill] sm:$0xff]  ;;  %v5315_v33 = vld [vmem:[#allocation34_spill] sm:$0xff] }
 0x24e   : > { %v4910_v16 = vadd.f32 %v2440_v61, %v2320_v28 }
 0x24f   : > { %3549 = vmatmul.msk.bf16.gmra.mxu1 %vm1475_vm13, %v4627_v34 }
 0x250   : > { %3600 = vmatmul.msk.bf16.gmra.mxu0 %vm1475_vm13, %v4608_v32 }
 0x251   : > { %3584 = vmatmul.msk.bf16.gmra.mxu3 %vm1475_vm13, %v4215_v15 }
 0x253   : > { %v2639_v38 = vpop.f32.mrf.mxu2 }
 0x254   : > { %v2792_v58 = vpop.f32.mrf.mxu3  ;;  %v2511_v21 = vpop.f32.mrf.mxu1  ;;  %v2718_v47 = vadd.f32 %v2639_v38, %v2585_v59 }
 0x255   : > { %v2442_v36 = vpop.f32.mrf.mxu0  ;;  %v2872_v0 = vadd.f32 %v2792_v58, %v2717_v56 }
 0x256   : > { %v4919_v8 = vadd.f32 %v2442_v36, %v2321_v54  ;;  %v2586_v54 = vadd.f32 %v2509_v43, %v5315_v33  ;;  %v5316_v36 = vld [vmem:[#allocation37_spill] sm:$0xff]  ;;  %v5317_v33 = vld [vmem:[#allocation36_spill] sm:$0xff] }
 0x258   : > { %3569 = vmatmul.msk.bf16.gmra.mxu2 %vm1475_vm13, %v4636_v13  ;;  %5312 = vst [vmem:[#allocation10_spill] sm:$0xff] %v4919_v8 }
 0x25b   : > { %v2642_v55 = vpop.f32.mrf.mxu2 }
 0x25c   : > { %v2794_v1 = vpop.f32.mrf.mxu3  ;;  %v2514_v15 = vpop.f32.mrf.mxu1  ;;  %v2719_v22 = vadd.f32 %v2642_v55, %v2586_v54  ;;  %v2587_v54 = vadd.f32 %v2511_v21, %v5317_v33 }
 0x25d   : > { %v2931_v32 = vpop.f32.mrf.mxu0  ;;  %v2873_v17 = vadd.f32 %v2794_v1, %v2718_v47 }
 0x25e   : > { %v3011_v28 = vadd.f32 %v2931_v32, %v2872_v0 }
 0x25f   : > { %3550 = vmatmul.msk.bf16.gmra.mxu1 %vm1475_vm13, %v5313_v14 }
 0x260   : > { %3601 = vmatmul.msk.bf16.gmra.mxu0 %vm1475_vm13, %v4627_v34  ;;  %v3043_v26 = vpack.c.bf16 %v3011_v28, %v3011_v28  ;;  %v3177_v38 = vmul.f32 %v3011_v28, %v3011_v28  ;;  %v3107_v56 = vsel %vm1475_vm13, %v3011_v28, 0.0 }
 0x261   : > { %3585 = vmatmul.msk.bf16.gmra.mxu3 %vm1475_vm13, %v5314_v10 }
 0x262   : > { %3075 = vst.msk [vmem:[%s4929_s9] sm:$0xf] %vm405_vm6, %v3043_v26  ;;  %v3209_v47 = vsel %vm1475_vm13, %v3177_v38, 0.0 }
 0x263   : > { %v2644_v13 = vpop.f32.mrf.mxu2 }
 0x264   : > { %v2797_v51 = vpop.f32.mrf.mxu3  ;;  %v2516_v3 = vpop.f32.mrf.mxu1 }
 0x265   : > { %v2933_v61 = vpop.f32.mrf.mxu0  ;;  %v2874_v10 = vadd.f32 %v2797_v51, %v2719_v22 }
 0x266   : > { %v3012_v58 = vadd.f32 %v2933_v61, %v2873_v17  ;;  %v5318_v61 = vld [vmem:[#allocation39_spill] sm:$0xff] }
 0x268   : > { %3570 = vmatmul.msk.bf16.gmra.mxu2 %vm1475_vm13, %v5316_v36  ;;  %v3044_v34 = vpack.c.bf16 %v3012_v58, %v3012_v58  ;;  %v3108_v0 = vsel %vm1475_vm13, %v3012_v58, 0.0  ;;  %v3178_v59 = vmul.f32 %v3012_v58, %v3012_v58  ;;  %v2720_v36 = vadd.f32 %v2644_v13, %v2587_v54 }
 0x269   : > { %v3109_v32 = vadd.f32 %v3108_v0, %v3107_v56  ;;  %v5319_v56 = vld [vmem:[#allocation5_spill] sm:$0xff] }
 0x26a   : > { %3076 = vst.msk [vmem:[%s4929_s9 + $0x4] sm:$0xf] %vm405_vm6, %v3044_v34  ;;  %v3210_v43 = vsel %vm1475_vm13, %v3178_v59, 0.0 }
 0x26b   : > { %v2647_v1 = vpop.f32.mrf.mxu2  ;;  %v3211_v26 = vadd.f32 %v3210_v43, %v3209_v47 }
 0x26c   : > { %v2799_v55 = vpop.f32.mrf.mxu3  ;;  %v2519_v17 = vpop.f32.mrf.mxu1 }
 0x26d   : > { %v2936_v28 = vpop.f32.mrf.mxu0  ;;  %v2875_v59 = vadd.f32 %v2799_v55, %v2720_v36 }
 0x26e   : > { %v3013_v58 = vadd.f32 %v2936_v28, %v2874_v10  ;;  %v5320_v10 = vld [vmem:[#allocation38_spill] sm:$0xff] }
 0x26f   : > { %3551 = vmatmul.msk.bf16.gmra.mxu1 %vm1475_vm13, %v5318_v61  ;;  %v2588_v33 = vadd.f32 %v2514_v15, %v5320_v10  ;;  %v5323_v10 = vld [vmem:[#allocation43_spill] sm:$0xff] }
 0x270   : > { %3602 = vmatmul.msk.bf16.gmra.mxu0 %vm1475_vm13, %v5313_v14  ;;  %v3045_v38 = vpack.c.bf16 %v3013_v58, %v3013_v58  ;;  %v3110_v51 = vsel %vm1475_vm13, %v3013_v58, 0.0  ;;  %v3179_v22 = vmul.f32 %v3013_v58, %v3013_v58 }
 0x271   : > { %3586 = vmatmul.msk.bf16.gmra.mxu3 %vm1475_vm13, %v5319_v56  ;;  %v3111_v34 = vadd.f32 %v3110_v51, %v3109_v32  ;;  %v2721_v14 = vadd.f32 %v2647_v1, %v2588_v33  ;;  %v5321_v56 = vld [vmem:[#allocation41_spill] sm:$0xff] }
 0x272   : > { %3077 = vst.msk [vmem:[%s4929_s9 + $0x8] sm:$0xf] %vm405_vm6, %v3045_v38  ;;  %v3212_v21 = vsel %vm1475_vm13, %v3179_v22, 0.0 }
 0x273   : > { %v2649_v0 = vpop.f32.mrf.mxu2  ;;  %v3213_v13 = vadd.f32 %v3212_v21, %v3211_v26  ;;  %v5322_v21 = vld [vmem:[#allocation40_spill] sm:$0xff] }
 0x274   : > { %v2802_v47 = vpop.f32.mrf.mxu3  ;;  %v2521_v43 = vpop.f32.mrf.mxu1  ;;  %v2589_v1 = vadd.f32 %v2516_v3, %v5322_v21 }
 0x275   : > { %v2938_v54 = vpop.f32.mrf.mxu0  ;;  %v2876_v26 = vadd.f32 %v2802_v47, %v2721_v14 }
 0x276   : > { %v3014_v28 = vadd.f32 %v2938_v54, %v2875_v59  ;;  %v2722_v54 = vadd.f32 %v2649_v0, %v2589_v1 }
 0x278   : > { %3571 = vmatmul.msk.bf16.gmra.mxu2 %vm1475_vm13, %v5321_v56  ;;  %v3046_v58 = vpack.c.bf16 %v3014_v28, %v3014_v28  ;;  %v3112_v32 = vsel %vm1475_vm13, %v3014_v28, 0.0  ;;  %v3180_v51 = vmul.f32 %v3014_v28, %v3014_v28 }
 0x279   : > { %v3113_v38 = vadd.f32 %v3112_v32, %v3111_v34 }
 0x27a   : > { %3078 = vst.msk [vmem:[%s4929_s9 + $0xc] sm:$0xf] %vm405_vm6, %v3046_v58  ;;  %v3214_v55 = vsel %vm1475_vm13, %v3180_v51, 0.0  ;;  %v5324_v51 = vld [vmem:[#allocation42_spill] sm:$0xff] }
 0x27b   : > { %v2652_v8 = vpop.f32.mrf.mxu2  ;;  %v3215_v15 = vadd.f32 %v3214_v55, %v3213_v13 }
 0x27c   : > { %v2804_v36 = vpop.f32.mrf.mxu3  ;;  %v2524_v22 = vpop.f32.mrf.mxu1 }
 0x27d   : > { %v2941_v59 = vpop.f32.mrf.mxu0  ;;  %v2877_v56 = vadd.f32 %v2804_v36, %v2722_v54 }
 0x27e   : > { %v3015_v33 = vadd.f32 %v2941_v59, %v2876_v26 }
 0x27f   : > { %3552 = vmatmul.msk.bf16.gmra.mxu1 %vm1475_vm13, %v5323_v10 }
 0x280   : > { %3603 = vmatmul.msk.bf16.gmra.mxu0 %vm1475_vm13, %v5318_v61  ;;  %v3047_v34 = vpack.c.bf16 %v3015_v33, %v3015_v33  ;;  %v3114_v47 = vsel %vm1475_vm13, %v3015_v33, 0.0  ;;  %v3181_v28 = vmul.f32 %v3015_v33, %v3015_v33 }
 0x281   : > { %3587 = vmatmul.msk.bf16.gmra.mxu3 %vm1475_vm13, %v4112_v18  ;;  %v3115_v13 = vadd.f32 %v3114_v47, %v3113_v38  ;;  %v2590_v18 = vadd.f32 %v2519_v17, %v5324_v51 }
 0x282   : > { %3079 = vst.msk [vmem:[%s4929_s9 + $0x10] sm:$0xf] %vm405_vm6, %v3047_v34  ;;  %v3216_v3 = vsel %vm1475_vm13, %v3181_v28, 0.0 }
 0x283   : > { %v2654_v14 = vpop.f32.mrf.mxu2  ;;  %v3217_v0 = vadd.f32 %v3216_v3, %v3215_v15  ;;  %v2723_v61 = vadd.f32 %v2652_v8, %v2590_v18  ;;  %v2591_v8 = vadd.f32 %v2521_v43, %v4707_v20 }
 0x284   : > { %v2807_v58 = vpop.f32.mrf.mxu3  ;;  %v2526_v32 = vpop.f32.mrf.mxu1 }
 0x285   : > { %v2943_v55 = vpop.f32.mrf.mxu0  ;;  %v2878_v15 = vadd.f32 %v2807_v58, %v2723_v61  ;;  %v2724_v28 = vadd.f32 %v2654_v14, %v2591_v8 }
 0x286   : > { %v3016_v26 = vadd.f32 %v2943_v55, %v2877_v56 }
 0x288   : > { %3572 = vmatmul.msk.bf16.gmra.mxu2 %vm1475_vm13, %v4712_v19  ;;  %v3048_v21 = vpack.c.bf16 %v3016_v26, %v3016_v26  ;;  %v3116_v38 = vsel %vm1475_vm13, %v3016_v26, 0.0  ;;  %v3182_v1 = vmul.f32 %v3016_v26, %v3016_v26 }
 0x289   : > { %v3117_v59 = vadd.f32 %v3116_v38, %v3115_v13 }
 0x28a   : > { %3080 = vst.msk [vmem:[%s4929_s9 + $0x14] sm:$0xf] %vm405_vm6, %v3048_v21  ;;  %v3218_v36 = vsel %vm1475_vm13, %v3182_v1, 0.0 }
 0x28b   : > { %v2657_v33 = vpop.f32.mrf.mxu2  ;;  %v3219_v17 = vadd.f32 %v3218_v36, %v3217_v0 }
 0x28c   : > { %v2809_v54 = vpop.f32.mrf.mxu3  ;;  %v4982_v34 = vpop.f32.mrf.mxu1 }
 0x28d   : > { %v2946_v47 = vpop.f32.mrf.mxu0  ;;  %v2879_v43 = vadd.f32 %v2809_v54, %v2724_v28 }
 0x28e   : > { %v3017_v19 = vadd.f32 %v2946_v47, %v2878_v15 }
 0x28f   : > { %3553 = vmatmul.msk.bf16.gmra.mxu1 %vm1475_vm13, %v4732_v60 }
 0x290   : > { %3604 = vmatmul.msk.bf16.gmra.mxu0 %vm1475_vm13, %v5323_v10  ;;  %v3049_v13 = vpack.c.bf16 %v3017_v19, %v3017_v19  ;;  %v3118_v3 = vsel %vm1475_vm13, %v3017_v19, 0.0  ;;  %v3183_v56 = vmul.f32 %v3017_v19, %v3017_v19  ;;  %v3539_v19 = vrot.slane %v4759_v12, 9 }
 0x291   : > { %3588 = vmatmul.msk.bf16.gmra.mxu3 %vm1475_vm13, %v4246_v23  ;;  %v3119_v58 = vadd.f32 %v3118_v3, %v3117_v59  ;;  %v2592_v23 = vadd.f32 %v2524_v22, %v4725_v53  ;;  %v2480_v22 = vrot.slane %v4761_v27, 5  ;;  %v5017_v3 = vld [vmem:[#allocation2 + $0xcc] sm:$0xf] }
 0x292   : > { %3081 = vst.msk [vmem:[%s4929_s9 + $0x18] sm:$0xf] %vm405_vm6, %v3049_v13  ;;  %v3220_v20 = vsel %vm1475_vm13, %v3183_v56, 0.0  ;;  %v5019_v56 = vld [vmem:[#allocation2 + $0xd0] sm:$0xf] }
 0x293   : > { %v2659_v0 = vpop.f32.mrf.mxu2  ;;  %v3221_v14 = vadd.f32 %v3220_v20, %v3219_v17  ;;  %v2725_v26 = vadd.f32 %v2657_v33, %v2592_v23  ;;  %v2593_v33 = vadd.f32 %v2526_v32, %v4737_v5  ;;  %v2482_v28 = vrot.slane %v2480_v22, 4 }
 0x294   : > { %v2812_v51 = vpop.f32.mrf.mxu3  ;;  %v4995_v18 = vpop.f32.mrf.mxu1  ;;  %v2483_v32 = vrot.slane %v4772_v41, 5  ;;  %v2750_v41 = vshrl.u32 %v5017_v3, 16  ;;  %v2759_v23 = vshll.u32 %v5019_v56, 16 }
 0x295   : > { %v2948_v55 = vpop.f32.mrf.mxu0  ;;  %v2880_v15 = vadd.f32 %v2812_v51, %v2725_v26  ;;  %v2726_v47 = vadd.f32 %v2659_v0, %v2593_v33  ;;  %v2763_v26 = vshrl.u32 %v5019_v56, 16  ;;  %v5039_v33 = vld [vmem:[#allocation2 + $0xd4] sm:$0x1] }
 0x296   : > { %v3018_v10 = vadd.f32 %v2948_v55, %v2879_v43  ;;  %v2594_v55 = vadd.f32 %v4982_v34, %v4750_v44 }
 0x298   : > { %3573 = vmatmul.msk.bf16.gmra.mxu2 %vm1475_vm13, %v4742_v63  ;;  %v3050_v61 = vpack.c.bf16 %v3018_v10, %v3018_v10  ;;  %v3120_v21 = vsel %vm1475_vm13, %v3018_v10, 0.0  ;;  %v3184_v38 = vmul.f32 %v3018_v10, %v3018_v10  ;;  %v2484_v10 = vsel %vm4362_vm2, %v2482_v28, %v2483_v32 }
 0x299   : > { %v3121_v1 = vadd.f32 %v3120_v21, %v3119_v58  ;;  %v2769_v32 = vshll.u32 %v5039_v33, 16 }
 0x29a   : > { %3082 = vst.msk [vmem:[%s4929_s9 + $0x1c] sm:$0xf] %vm405_vm6, %v3050_v61  ;;  %v3222_v36 = vsel %vm1475_vm13, %v3184_v38, 0.0 }
 0x29b   : > { %v2662_v59 = vpop.f32.mrf.mxu2  ;;  %v3223_v17 = vadd.f32 %v3222_v36, %v3221_v14  ;;  %v2753_v14 = vshll.u32 %v5017_v3, 16  ;;  %v2487_v36 = vunpack.c.l.b16 %v2484_v10 }
 0x29c   : > { %v2814_v54 = vpop.f32.mrf.mxu3  ;;  %v5004_v53 = vpop.f32.mrf.mxu1  ;;  %v2727_v38 = vadd.f32 %v2662_v59, %v2594_v55 }
 0x29d   : > { %v2951_v63 = vpop.f32.mrf.mxu0  ;;  %v2881_v12 = vadd.f32 %v2814_v54, %v2726_v47  ;;  %v2755_v54 = vrot.slane %v2753_v14, 5 }
 0x29e   : > { %v3019_v8 = vadd.f32 %v2951_v63, %v2880_v15  ;;  %v2752_v15 = vrot.slane %v2750_v41, 4  ;;  %v2765_v63 = vrot.slane %v2763_v26, 4 }
 0x29f   : > { %3554 = vmatmul.msk.bf16.gmra.mxu1 %vm1475_vm13, %v4757_v39 }
 0x2a0   : > { %3605 = vmatmul.msk.bf16.gmra.mxu0 %vm1475_vm13, %v4732_v60  ;;  %v3051_v13 = vpack.c.bf16 %v3019_v8, %v3019_v8  ;;  %v3122_v27 = vsel %vm1475_vm13, %v3019_v8, 0.0  ;;  %v3185_v5 = vmul.f32 %v3019_v8, %v3019_v8  ;;  %v2481_v60 = vsel %vm4362_vm2, %v3539_v19, %v2480_v22 }
 0x2a1   : > { %3589 = vmatmul.msk.bf16.gmra.mxu3 %vm1475_vm13, %v4376_v25  ;;  %v3123_v58 = vadd.f32 %v3122_v27, %v3121_v1  ;;  %v2486_v1 = vunpack.c.l.b16 %v2481_v60 }
 0x2a2   : > { %3083 = vst.msk [vmem:[%s4929_s9 + $0x20] sm:$0xf] %vm405_vm6, %v3051_v13  ;;  %v3224_v25 = vsel %vm1475_vm13, %v3185_v5, 0.0  ;;  %v2756_v5 = vor.u32 %v2755_v54, %v2752_v15 }
 0x2a3   : > { %v2664_v0 = vpop.f32.mrf.mxu2  ;;  %v3225_v43 = vadd.f32 %v3224_v25, %v3223_v17  ;;  %v2761_v17 = vrot.slane %v2759_v23, 5  ;;  %v2488_v13 = vpack.c.b16 %v2487_v36, %v2486_v1  ;;  %v2595_v25 = vadd.f32 %v4995_v18, %v4769_v40 }
 0x2a4   : > { %v2817_v20 = vpop.f32.mrf.mxu3  ;;  %v5026_v51 = vpop.f32.mrf.mxu1 }
 0x2a5   : > { %v2953_v61 = vpop.f32.mrf.mxu0  ;;  %v2882_v19 = vadd.f32 %v2817_v20, %v2727_v38  ;;  %v2728_v41 = vadd.f32 %v2664_v0, %v2595_v25  ;;  %v2757_v20 = vrot.slane %v2756_v5, 4  ;;  %v2907_v25 = vrot.slane %v5019_v56, 5 }
 0x2a6   : > { %v3020_v21 = vadd.f32 %v2953_v61, %v2881_v12  ;;  %v2766_v12 = vor.u32 %v2765_v63, %v2761_v17 }
 0x2a7   : > { %v2762_v1 = vsel %vm3917_vm12, %v2757_v20, %v2761_v17 }
 0x2a8   : > { %3574 = vmatmul.msk.bf16.gmra.mxu2 %vm1475_vm13, %v4774_v50  ;;  %v3052_v22 = vpack.c.bf16 %v3020_v21, %v3020_v21  ;;  %v3124_v44 = vsel %vm1475_vm13, %v3020_v21, 0.0  ;;  %v3186_v34 = vmul.f32 %v3020_v21, %v3020_v21  ;;  %v2767_v40 = vrot.slane %v2766_v12, 4  ;;  %v3630_v21 = vld [vmem:[#allocation2 + $0xcc] sm:$0xff] }
 0x2a9   : > { %v3125_v8 = vadd.f32 %v3124_v44, %v3123_v58  ;;  %v2774_v44 = vunpack.c.l.b16 %v2762_v1 }
 0x2aa   : > { %3084 = vst.msk [vmem:[%s4929_s9 + $0x24] sm:$0xf] %vm405_vm6, %v3052_v22  ;;  %v3226_v59 = vsel %vm1475_vm13, %v3186_v34, 0.0 }
 0x2ab   : > { %v2667_v47 = vpop.f32.mrf.mxu2  ;;  %v3227_v28 = vadd.f32 %v3226_v59, %v3225_v43  ;;  %v2771_v43 = vrot.slane %v2769_v32, 5 }
 0x2ac   : > { %v2819_v50 = vpop.f32.mrf.mxu3  ;;  %v5044_v27 = vpop.f32.mrf.mxu1 }
 0x2ad   : > { %v2956_v58 = vpop.f32.mrf.mxu0  ;;  %v2883_v0 = vadd.f32 %v2819_v50, %v2728_v41  ;;  %v2772_v36 = vsel %vm3917_vm12, %v2767_v40, %v2771_v43  ;;  %v3592_v43 = vrot.slane %v5017_v3, 9 }
 0x2ae   : > { %v3021_v60 = vadd.f32 %v2956_v58, %v2882_v19  ;;  %v2775_v34 = vunpack.c.l.b16 %v2772_v36 }
 0x2af   : > { %3555 = vmatmul.msk.bf16.gmra.mxu1 %vm1475_vm13, %v2488_v13  ;;  %v2908_v3 = vsel %vm4362_vm2, %v3592_v43, %v2907_v25 }
 0x2b0   : > { %3606 = vmatmul.msk.bf16.gmra.mxu0 %vm1475_vm13, %v4757_v39  ;;  %v3053_v14 = vpack.c.bf16 %v3021_v60, %v3021_v60  ;;  %v3126_v23 = vsel %vm1475_vm13, %v3021_v60, 0.0  ;;  %v3187_v55 = vmul.f32 %v3021_v60, %v3021_v60  ;;  %v2596_v39 = vadd.f32 %v5004_v53, %v4779_v24 }
 0x2b1   : > { %3590 = vmatmul.msk.bf16.gmra.mxu3 %vm1475_vm13, %v4795_v42  ;;  %v3127_v18 = vadd.f32 %v3126_v23, %v3125_v8  ;;  %v2909_v23 = vrot.slane %v2907_v25, 4 }
 0x2b2   : > { %3085 = vst.msk [vmem:[%s4929_s9 + $0x28] sm:$0xf] %vm405_vm6, %v3053_v14  ;;  %v3228_v26 = vsel %vm1475_vm13, %v3187_v55, 0.0  ;;  %v2729_v22 = vadd.f32 %v2667_v47, %v2596_v39  ;;  %v2597_v47 = vadd.f32 %v5026_v51, %v4792_v30  ;;  %v2910_v55 = vrot.slane %v5039_v33, 5 }
 0x2b3   : > { %v2669_v10 = vpop.f32.mrf.mxu2  ;;  %v3229_v42 = vadd.f32 %v3228_v26, %v3227_v28  ;;  %v2776_v28 = vpack.c.b16 %v2775_v34, %v2774_v44 }
 0x2b4   : > { %v2822_v61 = vpop.f32.mrf.mxu3  ;;  %v5058_v38 = vpop.f32.mrf.mxu1  ;;  %v2730_v58 = vadd.f32 %v2669_v10, %v2597_v47  ;;  %v2598_v10 = vadd.f32 %v5044_v27, %v4799_v29  ;;  %v2911_v33 = vsel %vm4362_vm2, %v2909_v23, %v2910_v55 }
 0x2b5   : > { %v2958_v15 = vpop.f32.mrf.mxu0  ;;  %v2884_v53 = vadd.f32 %v2822_v61, %v2729_v22  ;;  %v2914_v36 = vunpack.c.l.b16 %v2911_v33 }
 0x2b6   : > { %v3022_v54 = vadd.f32 %v2958_v15, %v2883_v0 }
 0x2b8   : > { %3575 = vmatmul.msk.bf16.gmra.mxu2 %vm1475_vm13, %v3630_v21  ;;  %v3054_v63 = vpack.c.bf16 %v3022_v54, %v3022_v54  ;;  %v3128_v8 = vsel %vm1475_vm13, %v3022_v54, 0.0  ;;  %v3188_v59 = vmul.f32 %v3022_v54, %v3022_v54  ;;  %v2913_v21 = vunpack.c.l.b16 %v2908_v3 }
 0x2b9   : > { %v3129_v19 = vadd.f32 %v3128_v8, %v3127_v18 }
 0x2ba   : > { %3086 = vst.msk [vmem:[%s4929_s9 + $0x2c] sm:$0xf] %vm405_vm6, %v3054_v63  ;;  %v3230_v24 = vsel %vm1475_vm13, %v3188_v59, 0.0  ;;  %v2915_v34 = vpack.c.b16 %v2914_v36, %v2913_v21  ;;  %v2599_v63 = vadd.f32 %v5058_v38, %v4808_v37 }
 0x2bb   : > { %v2672_v50 = vpop.f32.mrf.mxu2  ;;  %v3231_v17 = vadd.f32 %v3230_v24, %v3229_v42 }
 0x2bc   : > { %v2824_v57 = vpop.f32.mrf.mxu3  ;;  %v2544_v5 = vpop.f32.mrf.mxu1  ;;  %v2731_v61 = vadd.f32 %v2672_v50, %v2598_v10 }
 0x2bd   : > { %v2961_v32 = vpop.f32.mrf.mxu0  ;;  %v2885_v51 = vadd.f32 %v2824_v57, %v2730_v58  ;;  %v2600_v38 = vadd.f32 %v2544_v5, %v4813_v31 }
 0x2be   : > { %v3023_v12 = vadd.f32 %v2961_v32, %v2884_v53 }
 0x2c0   : > { %3607 = vmatmul.msk.bf16.gmra.mxu0 %vm1475_vm13, %v2488_v13  ;;  %v3055_v60 = vpack.c.bf16 %v3023_v12, %v3023_v12  ;;  %v3130_v41 = vsel %vm1475_vm13, %v3023_v12, 0.0  ;;  %v3189_v20 = vmul.f32 %v3023_v12, %v3023_v12 }
 0x2c1   : > { %3591 = vmatmul.msk.bf16.gmra.mxu3 %vm1475_vm13, %v2776_v28  ;;  %v3131_v14 = vadd.f32 %v3130_v41, %v3129_v19 }
 0x2c2   : > { %3087 = vst.msk [vmem:[%s4929_s9 + $0x30] sm:$0xf] %vm405_vm6, %v3055_v60  ;;  %v3232_v56 = vsel %vm1475_vm13, %v3189_v20, 0.0 }
 0x2c3   : > { %v2674_v30 = vpop.f32.mrf.mxu2  ;;  %v3233_v18 = vadd.f32 %v3232_v56, %v3231_v17 }
 0x2c4   : > { %v2827_v40 = vpop.f32.mrf.mxu3  ;;  %v2546_v13 = vpop.f32.mrf.mxu1  ;;  %v2732_v19 = vadd.f32 %v2674_v30, %v2599_v63 }
 0x2c5   : > { %v2963_v26 = vpop.f32.mrf.mxu0  ;;  %v2886_v27 = vadd.f32 %v2827_v40, %v2731_v61  ;;  %v2601_v31 = vadd.f32 %v2546_v13, %v4822_v49 }
 0x2c6   : > { %v3024_v0 = vadd.f32 %v2963_v26, %v2885_v51 }
 0x2c8   : > { %v3056_v42 = vpack.c.bf16 %v3024_v0, %v3024_v0  ;;  %v3132_v39 = vsel %vm1475_vm13, %v3024_v0, 0.0  ;;  %v3190_v1 = vmul.f32 %v3024_v0, %v3024_v0 }
 0x2c9   : > { %v3133_v15 = vadd.f32 %v3132_v39, %v3131_v14 }
 0x2ca   : > { %3088 = vst.msk [vmem:[%s4929_s9 + $0x34] sm:$0xf] %vm405_vm6, %v3056_v42  ;;  %v3234_v29 = vsel %vm1475_vm13, %v3190_v1, 0.0 }
 0x2cb   : > { %v2677_v54 = vpop.f32.mrf.mxu2  ;;  %v3235_v44 = vadd.f32 %v3234_v29, %v3233_v18 }
 0x2cc   : > { %v2829_v22 = vpop.f32.mrf.mxu3  ;;  %v2549_v45 = vpop.f32.mrf.mxu1  ;;  %v2733_v60 = vadd.f32 %v2677_v54, %v2600_v38 }
 0x2cd   : > { %v2966_v8 = vpop.f32.mrf.mxu0  ;;  %v2887_v47 = vadd.f32 %v2829_v22, %v2732_v19  ;;  %v2602_v36 = vadd.f32 %v2549_v45, %v4827_v7 }
 0x2ce   : > { %v3025_v59 = vadd.f32 %v2966_v8, %v2886_v27 }
 0x2d0   : > { %3608 = vmatmul.msk.bf16.gmra.mxu0 %vm1475_vm13, %v2915_v34  ;;  %v3057_v50 = vpack.c.bf16 %v3025_v59, %v3025_v59  ;;  %v3134_v24 = vsel %vm1475_vm13, %v3025_v59, 0.0  ;;  %v3191_v53 = vmul.f32 %v3025_v59, %v3025_v59 }
 0x2d1   : > { %v3135_v57 = vadd.f32 %v3134_v24, %v3133_v15 }
 0x2d2   : > { %3089 = vst.msk [vmem:[%s4929_s9 + $0x38] sm:$0xf] %vm405_vm6, %v3057_v50  ;;  %v3236_v28 = vsel %vm1475_vm13, %v3191_v53, 0.0 }
 0x2d3   : > { %v2679_v17 = vpop.f32.mrf.mxu2  ;;  %v3237_v25 = vadd.f32 %v3236_v28, %v3235_v44 }
 0x2d4   : > { %v2832_v32 = vpop.f32.mrf.mxu3  ;;  %v2551_v37 = vpop.f32.mrf.mxu1  ;;  %v2734_v10 = vadd.f32 %v2679_v17, %v2601_v31 }
 0x2d5   : > { %v2968_v12 = vpop.f32.mrf.mxu0  ;;  %v2888_v30 = vadd.f32 %v2832_v32, %v2733_v60  ;;  %v2603_v7 = vadd.f32 %v2551_v37, %v4836_v9 }
 0x2d6   : > { %v3026_v58 = vadd.f32 %v2968_v12, %v2887_v47 }
 0x2d8   : > { %v3058_v41 = vpack.c.bf16 %v3026_v58, %v3026_v58  ;;  %v3136_v20 = vsel %vm1475_vm13, %v3026_v58, 0.0  ;;  %v3192_v43 = vmul.f32 %v3026_v58, %v3026_v58 }
 0x2d9   : > { %v3137_v14 = vadd.f32 %v3136_v20, %v3135_v57 }
 0x2da   : > { %3090 = vst.msk [vmem:[%s4929_s9 + $0x3c] sm:$0xf] %vm405_vm6, %v3058_v41  ;;  %v3238_v55 = vsel %vm1475_vm13, %v3192_v43, 0.0 }
 0x2db   : > { %v2682_v23 = vpop.f32.mrf.mxu2  ;;  %v3239_v51 = vadd.f32 %v3238_v55, %v3237_v25 }
 0x2dc   : > { %v2834_v56 = vpop.f32.mrf.mxu3  ;;  %v2554_v40 = vpop.f32.mrf.mxu1  ;;  %v2735_v54 = vadd.f32 %v2682_v23, %v2602_v36 }
 0x2dd   : > { %v2971_v5 = vpop.f32.mrf.mxu0  ;;  %v2889_v42 = vadd.f32 %v2834_v56, %v2734_v10  ;;  %v2604_v9 = vadd.f32 %v2554_v40, %v4841_v2 }
 0x2de   : > { %v3027_v18 = vadd.f32 %v2971_v5, %v2888_v30 }
 0x2e0   : > { %v3059_v3 = vpack.c.bf16 %v3027_v18, %v3027_v18  ;;  %v3138_v26 = vsel %vm1475_vm13, %v3027_v18, 0.0  ;;  %v3193_v33 = vmul.f32 %v3027_v18, %v3027_v18 }
 0x2e1   : > { %v3139_v0 = vadd.f32 %v3138_v26, %v3137_v14 }
 0x2e2   : > { %3091 = vst.msk [vmem:[%s4929_s9 + $0x40] sm:$0xf] %vm405_vm6, %v3059_v3  ;;  %v3240_v21 = vsel %vm1475_vm13, %v3193_v33, 0.0 }
 0x2e3   : > { %v2684_v61 = vpop.f32.mrf.mxu2  ;;  %v3241_v1 = vadd.f32 %v3240_v21, %v3239_v51 }
 0x2e4   : > { %v2837_v39 = vpop.f32.mrf.mxu3  ;;  %v2556_v13 = vpop.f32.mrf.mxu1  ;;  %v2736_v24 = vadd.f32 %v2684_v61, %v2603_v7 }
 0x2e5   : > { %v2973_v49 = vpop.f32.mrf.mxu0  ;;  %v2890_v8 = vadd.f32 %v2837_v39, %v2735_v54  ;;  %v2605_v2 = vadd.f32 %v2556_v13, %v4850_v52 }
 0x2e6   : > { %v3028_v15 = vadd.f32 %v2973_v49, %v2889_v42 }
 0x2e8   : > { %v3060_v29 = vpack.c.bf16 %v3028_v15, %v3028_v15  ;;  %v3140_v27 = vsel %vm1475_vm13, %v3028_v15, 0.0  ;;  %v3194_v22 = vmul.f32 %v3028_v15, %v3028_v15 }
 0x2e9   : > { %v3141_v44 = vadd.f32 %v3140_v27, %v3139_v0 }
 0x2ea   : > { %3092 = vst.msk [vmem:[%s4929_s9 + $0x44] sm:$0xf] %vm405_vm6, %v3060_v29  ;;  %v3242_v63 = vsel %vm1475_vm13, %v3194_v22, 0.0 }
 0x2eb   : > { %v2687_v34 = vpop.f32.mrf.mxu2  ;;  %v3243_v19 = vadd.f32 %v3242_v63, %v3241_v1 }
 0x2ec   : > { %v2839_v59 = vpop.f32.mrf.mxu3  ;;  %v2559_v53 = vpop.f32.mrf.mxu1  ;;  %v2737_v41 = vadd.f32 %v2687_v34, %v2604_v9 }
 0x2ed   : > { %v2976_v45 = vpop.f32.mrf.mxu0  ;;  %v2891_v38 = vadd.f32 %v2839_v59, %v2736_v24  ;;  %v2606_v52 = vadd.f32 %v2559_v53, %v4855_v62 }
 0x2ee   : > { %v3029_v50 = vadd.f32 %v2976_v45, %v2890_v8 }
 0x2f0   : > { %v3061_v57 = vpack.c.bf16 %v3029_v50, %v3029_v50  ;;  %v3142_v17 = vsel %vm1475_vm13, %v3029_v50, 0.0  ;;  %v3195_v28 = vmul.f32 %v3029_v50, %v3029_v50 }
 0x2f1   : > { %v3143_v47 = vadd.f32 %v3142_v17, %v3141_v44 }
 0x2f2   : > { %3093 = vst.msk [vmem:[%s4929_s9 + $0x48] sm:$0xf] %vm405_vm6, %v3061_v57  ;;  %v3244_v25 = vsel %vm1475_vm13, %v3195_v28, 0.0 }
 0x2f3   : > { %v2689_v32 = vpop.f32.mrf.mxu2  ;;  %v3245_v58 = vadd.f32 %v3244_v25, %v3243_v19 }
 0x2f4   : > { %v2842_v12 = vpop.f32.mrf.mxu3  ;;  %v2561_v30 = vpop.f32.mrf.mxu1  ;;  %v2738_v10 = vadd.f32 %v2689_v32, %v2605_v2 }
 0x2f5   : > { %v2978_v37 = vpop.f32.mrf.mxu0  ;;  %v2892_v51 = vadd.f32 %v2842_v12, %v2737_v41  ;;  %v2607_v19 = vadd.f32 %v2561_v30, %v4864_v11 }
 0x2f6   : > { %v3030_v60 = vadd.f32 %v2978_v37, %v2891_v38 }
 0x2f8   : > { %v3062_v20 = vpack.c.bf16 %v3030_v60, %v3030_v60  ;;  %v3144_v43 = vsel %vm1475_vm13, %v3030_v60, 0.0  ;;  %v3196_v14 = vmul.f32 %v3030_v60, %v3030_v60 }
 0x2f9   : > { %v3145_v23 = vadd.f32 %v3144_v43, %v3143_v47 }
 0x2fa   : > { %3094 = vst.msk [vmem:[%s4929_s9 + $0x4c] sm:$0xf] %vm405_vm6, %v3062_v20  ;;  %v3246_v56 = vsel %vm1475_vm13, %v3196_v14, 0.0 }
 0x2fb   : > { %v2692_v55 = vpop.f32.mrf.mxu2  ;;  %v3247_v5 = vadd.f32 %v3246_v56, %v3245_v58 }
 0x2fc   : > { %v2844_v31 = vpop.f32.mrf.mxu3  ;;  %v2564_v36 = vpop.f32.mrf.mxu1  ;;  %v2739_v15 = vadd.f32 %v2692_v55, %v2606_v52 }
 0x2fd   : > { %v2981_v40 = vpop.f32.mrf.mxu0  ;;  %v2893_v42 = vadd.f32 %v2844_v31, %v2738_v10  ;;  %v2608_v11 = vadd.f32 %v2564_v36, %v4869_v46 }
 0x2fe   : > { %v3031_v18 = vadd.f32 %v2981_v40, %v2892_v51 }
 0x300   : > { %v3063_v3 = vpack.c.bf16 %v3031_v18, %v3031_v18  ;;  %v3146_v26 = vsel %vm1475_vm13, %v3031_v18, 0.0  ;;  %v3197_v33 = vmul.f32 %v3031_v18, %v3031_v18 }
 0x301   : > { %v3147_v0 = vadd.f32 %v3146_v26, %v3145_v23 }
 0x302   : > { %3095 = vst.msk [vmem:[%s4929_s9 + $0x50] sm:$0xf] %vm405_vm6, %v3063_v3  ;;  %v3248_v21 = vsel %vm1475_vm13, %v3197_v33, 0.0 }
 0x303   : > { %v2694_v61 = vpop.f32.mrf.mxu2  ;;  %v3249_v1 = vadd.f32 %v3248_v21, %v3247_v5 }
 0x304   : > { %v2847_v39 = vpop.f32.mrf.mxu3  ;;  %v2566_v7 = vpop.f32.mrf.mxu1  ;;  %v2740_v50 = vadd.f32 %v2694_v61, %v2607_v19 }
 0x305   : > { %v2983_v49 = vpop.f32.mrf.mxu0  ;;  %v2894_v63 = vadd.f32 %v2847_v39, %v2739_v15  ;;  %v2609_v46 = vadd.f32 %v2566_v7, %v4878_v6 }
 0x306   : > { %v3032_v13 = vadd.f32 %v2983_v49, %v2893_v42  ;;  %v5325_v42 = vld [vmem:[#allocation18_spill] sm:$0xff] }
 0x308   : > { %v3064_v54 = vpack.c.bf16 %v3032_v13, %v3032_v13  ;;  %v3148_v29 = vsel %vm1475_vm13, %v3032_v13, 0.0  ;;  %v3198_v27 = vmul.f32 %v3032_v13, %v3032_v13 }
 0x309   : > { %v3149_v22 = vadd.f32 %v3148_v29, %v3147_v0 }
 0x30a   : > { %3096 = vst.msk [vmem:[%s4929_s9 + $0x54] sm:$0xf] %vm405_vm6, %v3064_v54  ;;  %v3250_v34 = vsel %vm1475_vm13, %v3198_v27, 0.0 }
 0x30b   : > { %v2697_v44 = vpop.f32.mrf.mxu2  ;;  %v3251_v59 = vadd.f32 %v3250_v34, %v3249_v1 }
 0x30c   : > { %v2849_v8 = vpop.f32.mrf.mxu3  ;;  %v2741_v9 = vadd.f32 %v2697_v44, %v2608_v11  ;;  %v2569_v37 = vpop.f32.mrf.mxu1 }
 0x30d   : > { %v2986_v62 = vpop.f32.mrf.mxu0  ;;  %v2895_v32 = vadd.f32 %v2849_v8, %v2740_v50  ;;  %v2610_v6 = vadd.f32 %v2569_v37, %v5325_v42 }
 0x30e   : > { %v3033_v45 = vadd.f32 %v2986_v62, %v2894_v63 }
 0x310   : > { %v3065_v24 = vpack.c.bf16 %v3033_v45, %v3033_v45  ;;  %v3150_v53 = vsel %vm1475_vm13, %v3033_v45, 0.0  ;;  %v3199_v57 = vmul.f32 %v3033_v45, %v3033_v45 }
 0x311   : > { %v3151_v17 = vadd.f32 %v3150_v53, %v3149_v22 }
 0x312   : > { %3097 = vst.msk [vmem:[%s4929_s9 + $0x58] sm:$0xf] %vm405_vm6, %v3065_v24  ;;  %v3252_v47 = vsel %vm1475_vm13, %v3199_v57, 0.0 }
 0x313   : > { %v2699_v28 = vpop.f32.mrf.mxu2  ;;  %v3253_v38 = vadd.f32 %v3252_v47, %v3251_v59 }
 0x314   : > { %v2852_v25 = vpop.f32.mrf.mxu3  ;;  %v2742_v5 = vadd.f32 %v2699_v28, %v2609_v46  ;;  %v2571_v3 = vpop.f32.mrf.mxu1 }
 0x315   : > { %v2988_v12 = vpop.f32.mrf.mxu0  ;;  %v2896_v55 = vadd.f32 %v2852_v25, %v2741_v9  ;;  %v2611_v34 = vadd.f32 %v2571_v3, %v4892_v48 }
 0x316   : > { %v3034_v58 = vadd.f32 %v2988_v12, %v2895_v32 }
 0x318   : > { %v3066_v60 = vpack.c.bf16 %v3034_v58, %v3034_v58  ;;  %v3152_v41 = vsel %vm1475_vm13, %v3034_v58, 0.0  ;;  %v3200_v20 = vmul.f32 %v3034_v58, %v3034_v58 }
 0x319   : > { %v3153_v43 = vadd.f32 %v3152_v41, %v3151_v17 }
 0x31a   : > { %3098 = vst.msk [vmem:[%s4929_s9 + $0x5c] sm:$0xf] %vm405_vm6, %v3066_v60  ;;  %v3254_v23 = vsel %vm1475_vm13, %v3200_v20, 0.0 }
 0x31b   : > { %v2702_v14 = vpop.f32.mrf.mxu2  ;;  %v3255_v56 = vadd.f32 %v3254_v23, %v3253_v38 }
 0x31c   : > { %v2854_v30 = vpop.f32.mrf.mxu3  ;;  %v2743_v36 = vadd.f32 %v2702_v14, %v2610_v6  ;;  %v2574_v44 = vpop.f32.mrf.mxu1 }
 0x31d   : > { %v2991_v51 = vpop.f32.mrf.mxu0  ;;  %v2897_v33 = vadd.f32 %v2854_v30, %v2742_v5  ;;  %v2612_v28 = vadd.f32 %v2574_v44, %v4897_v4 }
 0x31e   : > { %v3035_v31 = vadd.f32 %v2991_v51, %v2896_v55 }
 0x320   : > { %v3067_v2 = vpack.c.bf16 %v3035_v31, %v3035_v31  ;;  %v3154_v40 = vsel %vm1475_vm13, %v3035_v31, 0.0  ;;  %v3201_v18 = vmul.f32 %v3035_v31, %v3035_v31 }
 0x321   : > { %v3155_v10 = vadd.f32 %v3154_v40, %v3153_v43 }
 0x322   : > { %3099 = vst.msk [vmem:[%s4929_s9 + $0x60] sm:$0xf] %vm405_vm6, %v3067_v2  ;;  %v3256_v26 = vsel %vm1475_vm13, %v3201_v18, 0.0 }
 0x323   : > { %v3257_v61 = vadd.f32 %v3256_v26, %v3255_v56  ;;  %v2704_v21 = vpop.f32.mrf.mxu2 }
 0x324   : > { %v2857_v0 = vpop.f32.mrf.mxu3  ;;  %v2744_v19 = vadd.f32 %v2704_v21, %v2611_v34  ;;  %v2576_v47 = vpop.f32.mrf.mxu1 }
 0x325   : > { %v2993_v39 = vpop.f32.mrf.mxu0  ;;  %v2898_v29 = vadd.f32 %v2857_v0, %v2743_v36  ;;  %v2613_v20 = vadd.f32 %v2576_v47, %v4906_v35 }
 0x326   : > { %v3036_v1 = vadd.f32 %v2993_v39, %v2897_v33 }
 0x328   : > { %v3068_v52 = vpack.c.bf16 %v3036_v1, %v3036_v1  ;;  %v3156_v49 = vsel %vm1475_vm13, %v3036_v1, 0.0  ;;  %v3202_v13 = vmul.f32 %v3036_v1, %v3036_v1 }
 0x329   : > { %v3157_v15 = vadd.f32 %v3156_v49, %v3155_v10 }
 0x32a   : > { %3100 = vst.msk [vmem:[%s4929_s9 + $0x64] sm:$0xf] %vm405_vm6, %v3068_v52  ;;  %v3258_v54 = vsel %vm1475_vm13, %v3202_v13, 0.0  ;;  %v5326_v52 = vld [vmem:[#allocation10_spill] sm:$0xff] }
 0x32b   : > { %v3259_v22 = vadd.f32 %v3258_v54, %v3257_v61  ;;  %v2707_v8 = vpop.f32.mrf.mxu2 }
 0x32c   : > { %v2859_v27 = vpop.f32.mrf.mxu3  ;;  %v2745_v25 = vadd.f32 %v2707_v8, %v2612_v28  ;;  %v2579_v55 = vpop.f32.mrf.mxu1 }
 0x32d   : > { %v2996_v63 = vpop.f32.mrf.mxu0  ;;  %v2899_v53 = vadd.f32 %v2859_v27, %v2744_v19  ;;  %v2614_v35 = vadd.f32 %v2579_v55, %v4910_v16 }
 0x32e   : > { %v3037_v59 = vadd.f32 %v2996_v63, %v2898_v29 }
 0x330   : > { %v3069_v62 = vpack.c.bf16 %v3037_v59, %v3037_v59  ;;  %v3158_v7 = vsel %vm1475_vm13, %v3037_v59, 0.0  ;;  %v3203_v45 = vmul.f32 %v3037_v59, %v3037_v59 }
 0x331   : > { %v3159_v50 = vadd.f32 %v3158_v7, %v3157_v15 }
 0x332   : > { %3101 = vst.msk [vmem:[%s4929_s9 + $0x68] sm:$0xf] %vm405_vm6, %v3069_v62  ;;  %v3260_v24 = vsel %vm1475_vm13, %v3203_v45, 0.0 }
 0x333   : > { %v3261_v57 = vadd.f32 %v3260_v24, %v3259_v22  ;;  %v2709_v38 = vpop.f32.mrf.mxu2 }
 0x334   : > { %v2862_v17 = vpop.f32.mrf.mxu3  ;;  %v2746_v23 = vadd.f32 %v2709_v38, %v2613_v20  ;;  %v2581_v42 = vpop.f32.mrf.mxu1 }
 0x335   : > { %v2998_v48 = vpop.f32.mrf.mxu0  ;;  %v2900_v60 = vadd.f32 %v2862_v17, %v2745_v25  ;;  %v2615_v16 = vadd.f32 %v2581_v42, %v5326_v52 }
 0x336   : > { %v3038_v32 = vadd.f32 %v2998_v48, %v2899_v53 }
 0x338   : > { %v3070_v11 = vpack.c.bf16 %v3038_v32, %v3038_v32  ;;  %v3160_v12 = vsel %vm1475_vm13, %v3038_v32, 0.0  ;;  %v3204_v58 = vmul.f32 %v3038_v32, %v3038_v32 }
 0x339   : > { %v3161_v9 = vadd.f32 %v3160_v12, %v3159_v50 }
 0x33a   : > { %3102 = vst.msk [vmem:[%s4929_s9 + $0x6c] sm:$0xf] %vm405_vm6, %v3070_v11  ;;  %v3262_v37 = vsel %vm1475_vm13, %v3204_v58, 0.0 }
 0x33b   : > { %v3263_v41 = vadd.f32 %v3262_v37, %v3261_v57  ;;  %v2712_v31 = vpop.f32.mrf.mxu2 }
 0x33c   : > { %v2864_v43 = vpop.f32.mrf.mxu3  ;;  %v2747_v3 = vadd.f32 %v2712_v31, %v2614_v35 }
 0x33d   : > { %v3001_v4 = vpop.f32.mrf.mxu0  ;;  %v2901_v2 = vadd.f32 %v2864_v43, %v2746_v23 }
 0x33e   : > { %v3039_v14 = vadd.f32 %v3001_v4, %v2900_v60 }
 0x340   : > { %v3071_v30 = vpack.c.bf16 %v3039_v14, %v3039_v14  ;;  %v3162_v56 = vsel %vm1475_vm13, %v3039_v14, 0.0  ;;  %v3205_v46 = vmul.f32 %v3039_v14, %v3039_v14 }
 0x341   : > { %v3163_v51 = vadd.f32 %v3162_v56, %v3161_v9 }
 0x342   : > { %3103 = vst.msk [vmem:[%s4929_s9 + $0x70] sm:$0xf] %vm405_vm6, %v3071_v30  ;;  %v3264_v5 = vsel %vm1475_vm13, %v3205_v46, 0.0 }
 0x343   : > { %v3265_v40 = vadd.f32 %v3264_v5, %v3263_v41  ;;  %v2714_v36 = vpop.f32.mrf.mxu2 }
 0x344   : > { %v2867_v26 = vpop.f32.mrf.mxu3  ;;  %v2748_v15 = vadd.f32 %v2714_v36, %v2615_v16 }
 0x345   : > { %v3003_v18 = vpop.f32.mrf.mxu0  ;;  %v2902_v39 = vadd.f32 %v2867_v26, %v2747_v3 }
 0x346   : > { %v3040_v10 = vadd.f32 %v3003_v18, %v2901_v2 }
 0x348   : > { %v3072_v33 = vpack.c.bf16 %v3040_v10, %v3040_v10  ;;  %v3164_v0 = vsel %vm1475_vm13, %v3040_v10, 0.0  ;;  %v3206_v61 = vmul.f32 %v3040_v10, %v3040_v10 }
 0x349   : > { %v3165_v21 = vadd.f32 %v3164_v0, %v3163_v51 }
 0x34a   : > { %3104 = vst.msk [vmem:[%s4929_s9 + $0x74] sm:$0xf] %vm405_vm6, %v3072_v33  ;;  %v3266_v6 = vsel %vm1475_vm13, %v3206_v61, 0.0 }
 0x34b   : > { %v3267_v1 = vadd.f32 %v3266_v6, %v3265_v40 }
 0x34c   : > { %v2869_v44 = vpop.f32.mrf.mxu3 }
 0x34d   : > { %v3006_v49 = vpop.f32.mrf.mxu0  ;;  %v2903_v63 = vadd.f32 %v2869_v44, %v2748_v15 }
 0x34e   : > { %v3041_v13 = vadd.f32 %v3006_v49, %v2902_v39 }
 0x350   : > { %v3073_v54 = vpack.c.bf16 %v3041_v13, %v3041_v13  ;;  %v3166_v29 = vsel %vm1475_vm13, %v3041_v13, 0.0  ;;  %v3207_v27 = vmul.f32 %v3041_v13, %v3041_v13 }
 0x351   : > { %v3167_v22 = vadd.f32 %v3166_v29, %v3165_v21 }
 0x352   : > { %3105 = vst.msk [vmem:[%s4929_s9 + $0x78] sm:$0xf] %vm405_vm6, %v3073_v54  ;;  %v3268_v34 = vsel %vm1475_vm13, %v3207_v27, 0.0 }
 0x353   : > { %v3269_v8 = vadd.f32 %v3268_v34, %v3267_v1 }
 0x355   : > { %v3008_v59 = vpop.f32.mrf.mxu0 }
 0x356   : > { %v3042_v19 = vadd.f32 %v3008_v59, %v2903_v63 }
 0x358   : > { %v3074_v62 = vpack.c.bf16 %v3042_v19, %v3042_v19  ;;  %v3168_v7 = vsel %vm1475_vm13, %v3042_v19, 0.0  ;;  %v3208_v45 = vmul.f32 %v3042_v19, %v3042_v19 }
 0x359   : > { %v3169_v50 = vadd.f32 %v3168_v7, %v3167_v22 }
 0x35a   : > { %3106 = vst.msk [vmem:[%s4929_s9 + $0x7c] sm:$0xf] %vm405_vm6, %v3074_v62  ;;  %v3270_v24 = vsel %vm1475_vm13, %v3208_v45, 0.0 }
 0x35b   : > { %v3170_v53 = vrot.slane %v3169_v50, 4  ;;  %v3271_v57 = vadd.f32 %v3270_v24, %v3269_v8 }
 0x35d   : > { %v3171_v17 = vadd.f32 %v3170_v53, %v3169_v50  ;;  %v3272_v28 = vrot.slane %v3271_v57, 4 }
 0x35f   : > { %v3172_v48 = vrot.slane %v3171_v17, 2  ;;  %v3273_v47 = vadd.f32 %v3272_v28, %v3271_v57 }
 0x361   : > { %v3173_v32 = vadd.f32 %v3172_v48, %v3171_v17  ;;  %v3274_v25 = vrot.slane %v3273_v47, 2 }
 0x363   : > { %v3174_v38 = vrot.slane %v3173_v32, 1  ;;  %v3275_v11 = vadd.f32 %v3274_v25, %v3273_v47 }
 0x365   : > { %v3175_v12 = vadd.f32 %v3174_v38, %v3173_v32  ;;  %v3276_v58 = vrot.slane %v3275_v11, 1 }
 0x367   : > { %3176 = vst.msk [vmem:[%s235_s12] sm:$0x1] %vm408_vm1, %v3175_v12  ;;  %v3277_v9 = vadd.f32 %v3276_v58, %v3275_v11 }
 0x369   : > { %3278 = vst.msk [vmem:[%s235_s12 + $0x1] sm:$0x1] %vm408_vm1, %v3277_v9 }
 0x36a PF: > { %s16_s18 = sadd.s32 1, %s3761_s18  }
 0x36b   : > { %p13_p4 = scmp.ge.s32.totalorder %s16_s18, 4  }
 0x36d   :  { %15 = sbr.rel (!%p13_p4) target bundleno = 1 (0x1), region = 80 }

</bundles_post_ra>
